<compile_context>
chip_gen: v5e
topology: v5e:2x2
jax: 0.10.0
libtpu: 0.0.40
codegen_flags: <defaults>
</compile_context>

<pallas_src>
import functools
import math

import jax
import jax.numpy as jnp
from jax.experimental import pallas as pl
from jax.experimental.pallas import tpu as pltpu


VMEM_LIMIT = 32 * 1024 * 1024


# ---------------------------------------------------------------------------
# In-kernel helpers (f32 element-wise math, bf16 MXU operands)
# ---------------------------------------------------------------------------

def _gelu_tanh(x):
    # tanh-approx GELU (Mosaic-safe), f32 math.
    c = math.sqrt(2.0 / math.pi)
    return 0.5 * x * (1.0 + jnp.tanh(c * (x + 0.044715 * x * x * x)))


def _ln(x, g, b, eps):
    mu = jnp.mean(x, axis=-1, keepdims=True)
    var = jnp.mean(jnp.square(x - mu), axis=-1, keepdims=True)
    return (x - mu) * jax.lax.rsqrt(var + eps) * g + b


def _mm(a, w):
    # bf16 MXU operands, f32 accumulation.
    return jnp.dot(a.astype(jnp.bfloat16), w.astype(jnp.bfloat16),
                   preferred_element_type=jnp.float32)


def _attention(xq, xkv, wq, bq, wk, bk, wv, bv, wo, bo, ctx_ref, mask_add,
               n_heads, scale):
    """Multi-head attention with a single full-K output projection.

    xq: (Lq, Dq), xkv: (Lk, Dkv) f32.  wq/wk/wv: (H, D_in, d) head-major (no lane
    slicing of activations); per-head contexts go into ctx_ref (Lq, D) f32 scratch at
    their static lane offset, then ONE (Lq, D) x (D, D) matmul with wo.
    mask_add: additive mask broadcastable to (Lq, Lk), or None.
    """
    d = wq.shape[-1]
    for h in range(n_heads):
        q = _mm(xq, wq[h]) + bq[h]                                    # (Lq, d)
        k = _mm(xkv, wk[h]) + bk[h]                                   # (Lk, d)
        v = _mm(xkv, wv[h]) + bv[h]                                   # (Lk, d)
        s = jax.lax.dot_general(
            q.astype(jnp.bfloat16), k.astype(jnp.bfloat16),
            (((1,), (1,)), ((), ())), preferred_element_type=jnp.float32) * scale
        if mask_add is not None:
            s = s + mask_add
        s = s - jnp.max(s, axis=-1, keepdims=True)
        p = jnp.exp(s)
        p = p * pl.reciprocal(jnp.sum(p, axis=-1, keepdims=True), approx=True)
        ctx = jnp.dot(p.astype(jnp.bfloat16), v.astype(jnp.bfloat16),
                      preferred_element_type=jnp.float32)             # (Lq, d)
        ctx_ref[:, h * d:(h + 1) * d] = ctx
    return _mm(ctx_ref[...], wo) + bo                                 # (Lq, D)


def _wspec(arr):
    """Full-array BlockSpec (broadcast across the 1-D grid)."""
    nd = arr.ndim
    return pl.BlockSpec(arr.shape, lambda i: (0,) * nd)


# ---------------------------------------------------------------------------
# Fused Pallas kernels
# ---------------------------------------------------------------------------

_VIT_W_KEYS = ('patch_w', 'patch_b', 'cls', 'pos',
               'ln1_g', 'ln1_b', 'wq', 'bq', 'wk', 'bk', 'wv', 'bv', 'wo', 'bo',
               'ln2_g', 'ln2_b', 'fc1_w', 'fc1_b', 'fc2_w', 'fc2_b')


def _vit_encoder_kernel(p_ref, *refs, n_layers, n_heads, eps):
    (patch_w, patch_b, cls_w, pos, ln1g, ln1b, wq, bq, wk, bk, wv, bv, wo, bo,
     ln2g, ln2b, w1, b1, w2, b2, o_ref, xbuf, ctx) = refs
    Dv = pos.shape[-1]
    d = Dv // n_heads
    scale = 1.0 / math.sqrt(d)

    # patch projection + [CLS] + positional embedding, written straight into a VMEM
    # scratch (no jnp.concatenate).
    tok = _mm(p_ref[0], patch_w[...]) + patch_b[...]                  # (n_patch, Dv)
    posv = pos[...]
    xbuf[0:1, :] = cls_w[...] + posv[0:1, :]
    xbuf[1:, :] = tok + posv[1:, :]
    x = xbuf[...]                                                     # (L_img, Dv) f32

    for l in range(n_layers):                                         # pre-LN ViT block
        h = _ln(x, ln1g[l], ln1b[l], eps)
        x = x + _attention(h, h, wq[l], bq[l], wk[l], bk[l], wv[l], bv[l],
                           wo[l], bo[l], ctx, None, n_heads, scale)
        h = _ln(x, ln2g[l], ln2b[l], eps)
        h = _gelu_tanh(_mm(h, w1[l]) + b1[l])
        x = x + _mm(h, w2[l]) + b2[l]
    o_ref[0] = x.astype(o_ref.dtype)


def vit_encode(patches, p, cfg):
    """patches: (M, n_patch, C*ps*ps) -> (M, L_img, Dv) bf16; all ViT layers fused."""
    M, n_patch, Kp = patches.shape
    L_img, Dv = p['pos'].shape
    ws = [p[k] for k in _VIT_W_KEYS]
    return pl.pallas_call(
        functools.partial(_vit_encoder_kernel, n_layers=cfg['vit_layers'],
                          n_heads=cfg['vit_heads'], eps=1e-6),
        out_shape=jax.ShapeDtypeStruct((M, L_img, Dv), jnp.bfloat16),
        grid=(M,),
        in_specs=[pl.BlockSpec((1, n_patch, Kp), lambda i: (i, 0, 0))]
                 + [_wspec(w) for w in ws],
        out_specs=pl.BlockSpec((1, L_img, Dv), lambda i: (i, 0, 0)),
        scratch_shapes=[pltpu.VMEM((L_img, Dv), jnp.float32),
                        pltpu.VMEM((L_img, Dv), jnp.float32)],
        compiler_params=pltpu.CompilerParams(dimension_semantics=("parallel",),
                                             vmem_limit_bytes=VMEM_LIMIT),
    )(patches, *ws)


def _pool_kernel(x_ref, m_ref, g_ref, b_ref, o_ref, *, n_frames, eps_ln, eps_norm):
    # ViT final LN + (mask * embeds).mean over frames + L2-normalize over flat features.
    x = x_ref[0]                                                      # (N, L, Dv) bf16
    m = m_ref[0]                                                      # (1, N) f32
    g, b = g_ref[...], b_ref[...]
    acc = None
    for n in range(n_frames):
        xn = _ln(x[n].astype(jnp.float32), g, b, eps_ln)              # (L, Dv)
        xn = xn * m[:, n:n + 1]                                       # frame mask (1,1)
        acc = xn if acc is None else acc + xn
    pooled = acc * (1.0 / float(n_frames))                            # mean over N frames
    ss = jnp.sum(pooled * pooled, axis=-1, keepdims=True)             # (L, 1)
    ss = jnp.sum(ss, axis=0, keepdims=True)                           # (1, 1)
    norm = jnp.maximum(jnp.sqrt(ss), eps_norm)                        # F.normalize clamp
    o_ref[0] = (pooled / norm).astype(o_ref.dtype)


def image_pool(image_tokens, images_mask, ln_g, ln_b):
    """image_tokens: (B, N, L_img, Dv) bf16, images_mask: (B, N) -> (B, L_img, Dv) bf16."""
    B, N, L_img, Dv = image_tokens.shape
    m = images_mask.astype(jnp.float32).reshape(B, 1, N)
    return pl.pallas_call(
        functools.partial(_pool_kernel, n_frames=N, eps_ln=1e-6, eps_norm=1e-12),
        out_shape=jax.ShapeDtypeStruct((B, L_img, Dv), jnp.bfloat16),
        grid=(B,),
        in_specs=[pl.BlockSpec((1, N, L_img, Dv), lambda i: (i, 0, 0, 0)),
                  pl.BlockSpec((1, 1, N), lambda i: (i, 0, 0)),
                  _wspec(ln_g), _wspec(ln_b)],
        out_specs=pl.BlockSpec((1, L_img, Dv), lambda i: (i, 0, 0)),
        compiler_params=pltpu.CompilerParams(dimension_semantics=("parallel",),
                                             vmem_limit_bytes=VMEM_LIMIT),
    )(image_tokens, m, ln_g, ln_b)


_TXT_W_KEYS = ('emb_ln_g', 'emb_ln_b',
               'wq', 'bq', 'wk', 'bk', 'wv', 'bv', 'wo', 'bo',
               'ln_self_g', 'ln_self_b',
               'wq_c', 'bq_c', 'wk_c', 'bk_c', 'wv_c', 'bv_c', 'wo_c', 'bo_c',
               'ln_cross_g', 'ln_cross_b',
               'fc1_w', 'fc1_b', 'fc2_w', 'fc2_b', 'ln_ffn_g', 'ln_ffn_b')


def _text_stack_kernel(x_ref, att_ref, enc_ref, catt_ref, *refs,
                       n_layers, n_heads, eps, causal, use_cross_mask):
    (emb_lng, emb_lnb, wq, bq, wk, bk, wv, bv, wo, bo, lnsg, lnsb,
     wqc, bqc, wkc, bkc, wvc, bvc, woc, boc, lncg, lncb,
     w1, b1, w2, b2, lnfg, lnfb, o_ref, ctx) = refs
    L, D = x_ref.shape[1], x_ref.shape[2]
    d = D // n_heads
    scale = 1.0 / math.sqrt(d)

    # embedding LN fused into the stack
    x = _ln(x_ref[0].astype(jnp.float32), emb_lng[...], emb_lnb[...], eps)   # (L, D)

    # additive masks built in-kernel from the padding vectors (no O(L^2) HBM masks)
    att = att_ref[0].astype(jnp.float32)                                     # (1, L)
    self_mask = (1.0 - att) * -10000.0                                       # (1, L)
    if causal:
        rows = jax.lax.broadcasted_iota(jnp.int32, (L, L), 0)
        cols = jax.lax.broadcasted_iota(jnp.int32, (L, L), 1)
        self_mask = self_mask + jnp.where(cols <= rows, 0.0, -10000.0)       # (L, L)
    cross_mask = None
    if use_cross_mask:
        catt = catt_ref[0].astype(jnp.float32)                               # (1, L_enc)
        cross_mask = (1.0 - catt) * -10000.0

    enc = enc_ref[0].astype(jnp.float32)                                     # (L_enc, De)

    for l in range(n_layers):                                                # post-LN BERT
        h = _attention(x, x, wq[l], bq[l], wk[l], bk[l], wv[l], bv[l],
                       wo[l], bo[l], ctx, self_mask, n_heads, scale)
        x = _ln(x + h, lnsg[l], lnsb[l], eps)
        h = _attention(x, enc, wqc[l], bqc[l], wkc[l], bkc[l], wvc[l], bvc[l],
                       woc[l], boc[l], ctx, cross_mask, n_heads, scale)
        x = _ln(x + h, lncg[l], lncb[l], eps)
        h = _gelu_tanh(_mm(x, w1[l]) + b1[l])
        h = _mm(h, w2[l]) + b2[l]
        x = _ln(x + h, lnfg[l], lnfb[l], eps)
    o_ref[0] = x.astype(o_ref.dtype)


def text_stack(x_emb, self_att, enc_states, cross_att, p, cfg, *, causal):
    """x_emb: (B, L, D) pre-LN embeddings; whole BERT stack in one pallas_call."""
    B, L, D = x_emb.shape
    L_enc, De = enc_states.shape[1], enc_states.shape[2]
    use_cross_mask = cross_att is not None
    if cross_att is None:                                   # image atts == 1 -> no mask
        cross_att = jnp.ones((B, L_enc), jnp.float32)
    self_att3 = self_att.astype(jnp.float32).reshape(B, 1, L)
    cross_att3 = cross_att.astype(jnp.float32).reshape(B, 1, L_enc)
    ws = [p[k] for k in _TXT_W_KEYS]
    return pl.pallas_call(
        functools.partial(_text_stack_kernel, n_layers=cfg['txt_layers'],
                          n_heads=cfg['txt_heads'], eps=1e-12,
                          causal=causal, use_cross_mask=use_cross_mask),
        out_shape=jax.ShapeDtypeStruct((B, L, D), jnp.bfloat16),
        grid=(B,),
        in_specs=[pl.BlockSpec((1, L, D), lambda i: (i, 0, 0)),
                  pl.BlockSpec((1, 1, L), lambda i: (i, 0, 0)),
                  pl.BlockSpec((1, L_enc, De), lambda i: (i, 0, 0)),
                  pl.BlockSpec((1, 1, L_enc), lambda i: (i, 0, 0))]
                 + [_wspec(w) for w in ws],
        out_specs=pl.BlockSpec((1, L, D), lambda i: (i, 0, 0)),
        scratch_shapes=[pltpu.VMEM((L, D), jnp.float32)],
        compiler_params=pltpu.CompilerParams(dimension_semantics=("parallel",),
                                             vmem_limit_bytes=VMEM_LIMIT),
    )(x_emb, self_att3, enc_states, cross_att3, *ws)


def _head_ce_kernel(x_ref, lab_ref, tw, tb, lng, lnb, dw, db, loss_ref,
                    *, smoothing, eps, inv_batch):
    # BertLMPredictionHead (dense+gelu+LN+vocab proj) fused with shifted, label-smoothed
    # cross entropy (ignore_index=-100); logits never touch HBM.  The (1,1) output block
    # accumulates sum_b(sum_t loss_bt) / B across the batch grid (== BLIP reduction='none'
    # per-sample sums followed by .mean()).
    @pl.when(pl.program_id(0) == 0)
    def _():
        loss_ref[...] = jnp.zeros_like(loss_ref)

    x = x_ref[0].astype(jnp.float32)                                  # (L, D)
    h = _gelu_tanh(_mm(x, tw[...]) + tb[...])
    h = _ln(h, lng[...], lnb[...], eps)
    logits = _mm(h, dw[...]) + db[...]                                # (L, V)
    labels = lab_ref[0]                                               # (L, 1) pre-shifted
    m = jnp.max(logits, axis=-1, keepdims=True)
    lse = jnp.log(jnp.sum(jnp.exp(logits - m), axis=-1, keepdims=True)) + m
    logp = logits - lse
    ids = jax.lax.broadcasted_iota(jnp.int32, logits.shape, 1)
    onehot = (ids == labels).astype(jnp.float32)
    nll = -jnp.sum(onehot * logp, axis=-1, keepdims=True)
    smooth = -jnp.mean(logp, axis=-1, keepdims=True)
    valid = (labels != -100).astype(jnp.float32)
    per_tok = ((1.0 - smoothing) * nll + smoothing * smooth) * valid  # (L, 1)
    loss_ref[...] += jnp.sum(per_tok, axis=0, keepdims=True) * inv_batch


def head_ce(x, labels_shift, head):
    """x: (B, L, D) bf16, labels_shift: (B, L) int -> scalar loss."""
    # TODO(synk): for realistic vocab sizes the vocab projection should be tiled over V
    # with an online-logsumexp accumulator (flash-CE); V=64 here fits trivially in VMEM.
    B, L, D = x.shape
    ws = [head['trans_w'], head['trans_b'], head['ln_g'], head['ln_b'],
          head['dec_w'], head['dec_b']]
    lab = labels_shift.astype(jnp.int32).reshape(B, L, 1)
    out = pl.pallas_call(
        functools.partial(_head_ce_kernel, smoothing=0.1, eps=1e-12, inv_batch=1.0 / B),
        out_shape=jax.ShapeDtypeStruct((1, 1), jnp.float32),
        grid=(B,),
        in_specs=[pl.BlockSpec((1, L, D), lambda i: (i, 0, 0)),
                  pl.BlockSpec((1, L, 1), lambda i: (i, 0, 0))]
                 + [_wspec(w) for w in ws],
        out_specs=pl.BlockSpec((1, 1), lambda i: (0, 0)),
        compiler_params=pltpu.CompilerParams(dimension_semantics=("arbitrary",),
                                             vmem_limit_bytes=VMEM_LIMIT),
    )(x, lab, *ws)
    return out[0, 0]


# ---------------------------------------------------------------------------
# Model glue (layout ops only; all math is in the kernels)
# ---------------------------------------------------------------------------

def embed_tokens(ids, p):
    L = ids.shape[1]
    x = jnp.take(p['word'], ids, axis=0) + p['pos'][:L][None, :, :]
    return x.astype(jnp.bfloat16)


def blip_comet_forward(params, cfg, images, images_mask, predict_ids, predict_atts,
                       target_ids, target_atts):
    B, N, C, H, W = images.shape
    # tokenizer-side special-token overwrites (forward sets column 0 explicitly)
    predict_ids = predict_ids.at[:, 0].set(cfg['enc_token_id'])
    target_ids = target_ids.at[:, 0].set(cfg['bos_token_id'])
    targets = jnp.where(target_ids == cfg['pad_token_id'], -100, target_ids)

    # ---- vision ----
    ps = cfg['patch']
    nh, nw = H // ps, W // ps
    M = B * N
    patches = images.reshape(M, C, nh, ps, nw, ps).transpose(0, 2, 4, 1, 3, 5)
    patches = patches.reshape(M, nh * nw, C * ps * ps)            # torch Conv2d flattening
    image_tokens = vit_encode(patches, params['vit'], cfg)        # (M, L_img, Dv) bf16
    L_img, Dv = image_tokens.shape[1], image_tokens.shape[2]
    image_embeds = image_pool(image_tokens.reshape(B, N, L_img, Dv), images_mask,
                              params['vit']['ln_g'], params['vit']['ln_b'])

    # ---- text encoder (cross-attends to images; image_atts == 1 -> no cross mask) ----
    enc_x = embed_tokens(predict_ids, params['enc'])
    predict_states = text_stack(enc_x, predict_atts, image_embeds, None,
                                params['enc'], cfg, causal=False)

    # ---- text decoder (causal, cross-attends to predict_states) ----
    dec_x = embed_tokens(target_ids, params['dec'])
    dec_states = text_stack(dec_x, target_atts, predict_states, predict_atts,
                            params['dec'], cfg, causal=True)

    # shifted LM labels (position t predicts token t+1); last position ignored.
    labels_shift = jnp.concatenate(
        [targets[:, 1:], jnp.full((B, 1), -100, targets.dtype)], axis=1)
    loss = head_ce(dec_states, labels_shift, params['dec']['head'])
    # TODO(synk): the evaluate=True branch (beam-search text_decoder.generate + tokenizer
    # string decode) is host-side autoregressive decoding with no clean Pallas equivalent.
    return {'loss': loss}


# ---------------------------------------------------------------------------
# Deterministic parameter construction (head-major q/k/v weights, stacked over layers)
# ---------------------------------------------------------------------------

def _init(key, shape, scale=0.02):
    return scale * jax.random.normal(key, shape, dtype=jnp.float32)


def make_params(key, cfg):
    keys = iter(jax.random.split(key, 256))
    nk = lambda: next(keys)
    bf = jnp.bfloat16
    Dv, Dt, V = cfg['d_vis'], cfg['d_txt'], cfg['vocab']
    Hv, Ht = cfg['vit_heads'], cfg['txt_heads']
    dv, dt = Dv // Hv, Dt // Ht
    n_vit, n_txt = cfg['vit_layers'], cfg['txt_layers']
    l_img = (cfg['image_size'] // cfg['patch']) ** 2 + 1
    Kp = cfg['c'] * cfg['patch'] ** 2

    def head_proj(n_layers, n_heads, d_in, d_head):
        return (_init(nk(), (n_layers, n_heads, d_in, d_head)).astype(bf),
                jnp.zeros((n_layers, n_heads, 1, d_head), jnp.float32))

    wq, bq = head_proj(n_vit, Hv, Dv, dv)
    wk, bk = head_proj(n_vit, Hv, Dv, dv)
    wv, bv = head_proj(n_vit, Hv, Dv, dv)
    vit = dict(
        patch_w=_init(nk(), (Kp, Dv)).astype(bf), patch_b=jnp.zeros((1, Dv), jnp.float32),
        cls=_init(nk(), (1, Dv)), pos=_init(nk(), (l_img, Dv)),
        ln1_g=jnp.ones((n_vit, 1, Dv), jnp.float32), ln1_b=jnp.zeros((n_vit, 1, Dv), jnp.float32),
        wq=wq, bq=bq, wk=wk, bk=bk, wv=wv, bv=bv,
        wo=_init(nk(), (n_vit, Dv, Dv)).astype(bf), bo=jnp.zeros((n_vit, 1, Dv), jnp.float32),
        ln2_g=jnp.ones((n_vit, 1, Dv), jnp.float32), ln2_b=jnp.zeros((n_vit, 1, Dv), jnp.float32),
        fc1_w=_init(nk(), (n_vit, Dv, cfg['vit_mlp'])).astype(bf),
        fc1_b=jnp.zeros((n_vit, 1, cfg['vit_mlp']), jnp.float32),
        fc2_w=_init(nk(), (n_vit, cfg['vit_mlp'], Dv)).astype(bf),
        fc2_b=jnp.zeros((n_vit, 1, Dv), jnp.float32),
        ln_g=jnp.ones((1, Dv), jnp.float32), ln_b=jnp.zeros((1, Dv), jnp.float32),
    )

    def text_params(cross_width, with_head):
        wq_, bq_ = head_proj(n_txt, Ht, Dt, dt)
        wk_, bk_ = head_proj(n_txt, Ht, Dt, dt)
        wv_, bv_ = head_proj(n_txt, Ht, Dt, dt)
        wqc_, bqc_ = head_proj(n_txt, Ht, Dt, dt)
        wkc_, bkc_ = head_proj(n_txt, Ht, cross_width, dt)
        wvc_, bvc_ = head_proj(n_txt, Ht, cross_width, dt)
        p = dict(
            word=_init(nk(), (V, Dt)), pos=_init(nk(), (cfg['max_pos'], Dt)),
            emb_ln_g=jnp.ones((1, Dt), jnp.float32), emb_ln_b=jnp.zeros((1, Dt), jnp.float32),
            wq=wq_, bq=bq_, wk=wk_, bk=bk_, wv=wv_, bv=bv_,
            wo=_init(nk(), (n_txt, Dt, Dt)).astype(bf), bo=jnp.zeros((n_txt, 1, Dt), jnp.float32),
            ln_self_g=jnp.ones((n_txt, 1, Dt), jnp.float32),
            ln_self_b=jnp.zeros((n_txt, 1, Dt), jnp.float32),
            wq_c=wqc_, bq_c=bqc_, wk_c=wkc_, bk_c=bkc_, wv_c=wvc_, bv_c=bvc_,
            wo_c=_init(nk(), (n_txt, Dt, Dt)).astype(bf),
            bo_c=jnp.zeros((n_txt, 1, Dt), jnp.float32),
            ln_cross_g=jnp.ones((n_txt, 1, Dt), jnp.float32),
            ln_cross_b=jnp.zeros((n_txt, 1, Dt), jnp.float32),
            fc1_w=_init(nk(), (n_txt, Dt, cfg['txt_mlp'])).astype(bf),
            fc1_b=jnp.zeros((n_txt, 1, cfg['txt_mlp']), jnp.float32),
            fc2_w=_init(nk(), (n_txt, cfg['txt_mlp'], Dt)).astype(bf),
            fc2_b=jnp.zeros((n_txt, 1, Dt), jnp.float32),
            ln_ffn_g=jnp.ones((n_txt, 1, Dt), jnp.float32),
            ln_ffn_b=jnp.zeros((n_txt, 1, Dt), jnp.float32),
        )
        if with_head:
            p['head'] = dict(trans_w=_init(nk(), (Dt, Dt)).astype(bf),
                             trans_b=jnp.zeros((1, Dt), jnp.float32),
                             ln_g=jnp.ones((1, Dt), jnp.float32),
                             ln_b=jnp.zeros((1, Dt), jnp.float32),
                             dec_w=_init(nk(), (Dt, V)).astype(bf),
                             dec_b=jnp.zeros((1, V), jnp.float32))
        return p

    enc = text_params(Dv, with_head=False)
    dec = text_params(Dt, with_head=True)
    return dict(vit=vit, enc=enc, dec=dec)


CFG = dict(
    c=3, patch=8, image_size=16, d_vis=32, vit_heads=4, vit_mlp=64, vit_layers=1,
    d_txt=32, txt_heads=4, txt_mlp=64, txt_layers=1, vocab=64, max_pos=16,
    pad_token_id=0, bos_token_id=1, sep_token_id=2, enc_token_id=3,
)


if __name__ == "__main__":
    key = jax.random.PRNGKey(0)
    k_img, k_pid, k_tid = jax.random.split(key, 3)
    cfg = dict(CFG)
    B, N = 2, 2
    L_pred, L_tgt = 8, 8

    images = jax.random.normal(
        k_img, (B, N, cfg['c'], cfg['image_size'], cfg['image_size']), jnp.float32)
    images_mask = jnp.array([[1.0, 1.0], [1.0, 0.0]], jnp.float32)

    predict_ids = jax.random.randint(k_pid, (B, L_pred), 4, cfg['vocab'], jnp.int32)
    predict_atts = jnp.array([[1] * 8, [1] * 6 + [0] * 2], jnp.int32)
    target_ids = jax.random.randint(k_tid, (B, L_tgt), 4, cfg['vocab'], jnp.int32)
    target_ids = target_ids.at[1, 6:].set(cfg['pad_token_id'])   # 'longest' padding
    target_atts = jnp.array([[1] * 8, [1] * 6 + [0] * 2], jnp.int32)

    params = make_params(jax.random.PRNGKey(42), cfg)
    fwd = jax.jit(functools.partial(blip_comet_forward, params, cfg))
    out = fwd(images, images_mask, predict_ids, predict_atts, target_ids, target_atts)
    loss = jax.block_until_ready(out['loss'])
    assert bool(jnp.isfinite(loss))
    print("KERNEL_OK")
</pallas_src>

<mosaic_0001>
module attributes {stable_mosaic.version = 11 : i64} {
  func.func @_pool_kernel(%arg0: i32, %arg1: memref<1x2x5x32xbf16, #tpu.memory_space<vmem>>, %arg2: memref<1x1x2xf32, #tpu.memory_space<vmem>>, %arg3: memref<1x32xf32, #tpu.memory_space<vmem>>, %arg4: memref<1x32xf32, #tpu.memory_space<vmem>>, %arg5: memref<1x5x32xbf16, #tpu.memory_space<vmem>>) attributes {dimension_semantics = [#tpu.dimension_semantics<parallel>], iteration_bounds = array<i64: 2>, scalar_prefetch = 0 : i64, scratch_operands = 0 : i64, tpu.core_type = #tpu.core_type<tc>, window_params = [{transform_indices = @transform_0, window_bounds = array<i64: 1, 2, 5, 32>}, {transform_indices = @transform_1, window_bounds = array<i64: 1, 1, 2>}, {pipeline_mode = #tpu.pipeline_mode<synchronous>, transform_indices = @transform_2, window_bounds = array<i64: 1, 32>}, {pipeline_mode = #tpu.pipeline_mode<synchronous>, transform_indices = @transform_3, window_bounds = array<i64: 1, 32>}, {transform_indices = @transform_4, window_bounds = array<i64: 1, 5, 32>}]} {
    %c0 = arith.constant 0 : index
    %c0_0 = arith.constant 0 : index
    %c0_1 = arith.constant 0 : index
    %c0_2 = arith.constant 0 : index
    %0 = vector.load %arg1[%c0, %c0_0, %c0_1, %c0_2] : memref<1x2x5x32xbf16, #tpu.memory_space<vmem>>, vector<1x2x5x32xbf16>
    %1 = vector.shape_cast %0 : vector<1x2x5x32xbf16> to vector<2x5x32xbf16>
    %c0_3 = arith.constant 0 : index
    %c0_4 = arith.constant 0 : index
    %c0_5 = arith.constant 0 : index
    %2 = vector.load %arg2[%c0_3, %c0_4, %c0_5] : memref<1x1x2xf32, #tpu.memory_space<vmem>>, vector<1x1x2xf32>
    %3 = vector.shape_cast %2 : vector<1x1x2xf32> to vector<1x2xf32>
    %c0_6 = arith.constant 0 : index
    %c0_7 = arith.constant 0 : index
    %4 = vector.load %arg3[%c0_6, %c0_7] : memref<1x32xf32, #tpu.memory_space<vmem>>, vector<1x32xf32>
    %c0_8 = arith.constant 0 : index
    %c0_9 = arith.constant 0 : index
    %5 = vector.load %arg4[%c0_8, %c0_9] : memref<1x32xf32, #tpu.memory_space<vmem>>, vector<1x32xf32>
    %6 = vector.extract_strided_slice %1 {offsets = [0, 0, 0], sizes = [1, 5, 32], strides = [1, 1, 1]} : vector<2x5x32xbf16> to vector<1x5x32xbf16>
    %7 = vector.shape_cast %6 : vector<1x5x32xbf16> to vector<5x32xbf16>
    %8 = arith.extf %7 : vector<5x32xbf16> to vector<5x32xf32>
    %cst = arith.constant dense<0.000000e+00> : vector<5xf32>
    %9 = vector.multi_reduction <add>, %8, %cst [1] : vector<5x32xf32> to vector<5xf32>
    %10 = vector.shape_cast %9 : vector<5xf32> to vector<5x1xf32>
    %cst_10 = arith.constant 3.200000e+01 : f32
    %11 = vector.broadcast %cst_10 : f32 to vector<5x1xf32>
    %12 = arith.divf %10, %11 : vector<5x1xf32>
    %13 = vector.broadcast %12 : vector<5x1xf32> to vector<5x32xf32>
    %14 = arith.subf %8, %13 : vector<5x32xf32>
    %15 = arith.mulf %14, %14 : vector<5x32xf32>
    %cst_11 = arith.constant dense<0.000000e+00> : vector<5xf32>
    %16 = vector.multi_reduction <add>, %15, %cst_11 [1] : vector<5x32xf32> to vector<5xf32>
    %17 = vector.shape_cast %16 : vector<5xf32> to vector<5x1xf32>
    %cst_12 = arith.constant 3.200000e+01 : f32
    %18 = vector.broadcast %cst_12 : f32 to vector<5x1xf32>
    %19 = arith.divf %17, %18 : vector<5x1xf32>
    %20 = vector.broadcast %12 : vector<5x1xf32> to vector<5x32xf32>
    %21 = arith.subf %8, %20 : vector<5x32xf32>
    %cst_13 = arith.constant 9.99999997E-7 : f32
    %22 = vector.broadcast %cst_13 : f32 to vector<5x1xf32>
    %23 = arith.addf %19, %22 : vector<5x1xf32>
    %24 = math.rsqrt %23 : vector<5x1xf32>
    %25 = vector.broadcast %24 : vector<5x1xf32> to vector<5x32xf32>
    %26 = arith.mulf %21, %25 : vector<5x32xf32>
    %27 = vector.broadcast %4 : vector<1x32xf32> to vector<5x32xf32>
    %28 = arith.mulf %26, %27 : vector<5x32xf32>
    %29 = vector.broadcast %5 : vector<1x32xf32> to vector<5x32xf32>
    %30 = arith.addf %28, %29 : vector<5x32xf32>
    %31 = vector.extract_strided_slice %3 {offsets = [0, 0], sizes = [1, 1], strides = [1, 1]} : vector<1x2xf32> to vector<1x1xf32>
    %32 = vector.broadcast %31 : vector<1x1xf32> to vector<5x32xf32>
    %33 = arith.mulf %30, %32 : vector<5x32xf32>
    %34 = vector.extract_strided_slice %1 {offsets = [1, 0, 0], sizes = [1, 5, 32], strides = [1, 1, 1]} : vector<2x5x32xbf16> to vector<1x5x32xbf16>
    %35 = vector.shape_cast %34 : vector<1x5x32xbf16> to vector<5x32xbf16>
    %36 = arith.extf %35 : vector<5x32xbf16> to vector<5x32xf32>
    %cst_14 = arith.constant dense<0.000000e+00> : vector<5xf32>
    %37 = vector.multi_reduction <add>, %36, %cst_14 [1] : vector<5x32xf32> to vector<5xf32>
    %38 = vector.shape_cast %37 : vector<5xf32> to vector<5x1xf32>
    %cst_15 = arith.constant 3.200000e+01 : f32
    %39 = vector.broadcast %cst_15 : f32 to vector<5x1xf32>
    %40 = arith.divf %38, %39 : vector<5x1xf32>
    %41 = vector.broadcast %40 : vector<5x1xf32> to vector<5x32xf32>
    %42 = arith.subf %36, %41 : vector<5x32xf32>
    %43 = arith.mulf %42, %42 : vector<5x32xf32>
    %cst_16 = arith.constant dense<0.000000e+00> : vector<5xf32>
    %44 = vector.multi_reduction <add>, %43, %cst_16 [1] : vector<5x32xf32> to vector<5xf32>
    %45 = vector.shape_cast %44 : vector<5xf32> to vector<5x1xf32>
    %cst_17 = arith.constant 3.200000e+01 : f32
    %46 = vector.broadcast %cst_17 : f32 to vector<5x1xf32>
    %47 = arith.divf %45, %46 : vector<5x1xf32>
    %48 = vector.broadcast %40 : vector<5x1xf32> to vector<5x32xf32>
    %49 = arith.subf %36, %48 : vector<5x32xf32>
    %cst_18 = arith.constant 9.99999997E-7 : f32
    %50 = vector.broadcast %cst_18 : f32 to vector<5x1xf32>
    %51 = arith.addf %47, %50 : vector<5x1xf32>
    %52 = math.rsqrt %51 : vector<5x1xf32>
    %53 = vector.broadcast %52 : vector<5x1xf32> to vector<5x32xf32>
    %54 = arith.mulf %49, %53 : vector<5x32xf32>
    %55 = vector.broadcast %4 : vector<1x32xf32> to vector<5x32xf32>
    %56 = arith.mulf %54, %55 : vector<5x32xf32>
    %57 = vector.broadcast %5 : vector<1x32xf32> to vector<5x32xf32>
    %58 = arith.addf %56, %57 : vector<5x32xf32>
    %59 = vector.extract_strided_slice %3 {offsets = [0, 1], sizes = [1, 1], strides = [1, 1]} : vector<1x2xf32> to vector<1x1xf32>
    %60 = vector.broadcast %59 : vector<1x1xf32> to vector<5x32xf32>
    %61 = arith.mulf %58, %60 : vector<5x32xf32>
    %62 = arith.addf %33, %61 : vector<5x32xf32>
    %cst_19 = arith.constant 5.000000e-01 : f32
    %63 = vector.broadcast %cst_19 : f32 to vector<5x32xf32>
    %64 = arith.mulf %62, %63 : vector<5x32xf32>
    %65 = arith.mulf %64, %64 : vector<5x32xf32>
    %cst_20 = arith.constant dense<0.000000e+00> : vector<5xf32>
    %66 = vector.multi_reduction <add>, %65, %cst_20 [1] : vector<5x32xf32> to vector<5xf32>
    %67 = vector.shape_cast %66 : vector<5xf32> to vector<5x1xf32>
    %cst_21 = arith.constant dense<0.000000e+00> : vector<1xf32>
    %68 = vector.multi_reduction <add>, %67, %cst_21 [0] : vector<5x1xf32> to vector<1xf32>
    %69 = vector.shape_cast %68 : vector<1xf32> to vector<1x1xf32>
    %70 = math.sqrt %69 : vector<1x1xf32>
    %cst_22 = arith.constant 9.99999996E-13 : f32
    %71 = vector.broadcast %cst_22 : f32 to vector<1x1xf32>
    %72 = arith.maximumf %70, %71 : vector<1x1xf32>
    %73 = vector.broadcast %72 : vector<1x1xf32> to vector<5x32xf32>
    %74 = arith.divf %64, %73 : vector<5x32xf32>
    %75 = arith.truncf %74 : vector<5x32xf32> to vector<5x32xbf16>
    %c0_23 = arith.constant 0 : index
    %c0_24 = arith.constant 0 : index
    %c0_25 = arith.constant 0 : index
    %76 = vector.load %arg5[%c0_23, %c0_24, %c0_25] : memref<1x5x32xbf16, #tpu.memory_space<vmem>>, vector<1x5x32xbf16>
    %77 = vector.shape_cast %76 : vector<1x5x32xbf16> to vector<5x32xbf16>
    %78 = vector.shape_cast %75 : vector<5x32xbf16> to vector<1x5x32xbf16>
    tpu.vector_store %arg5[%c0_23, %c0_24, %c0_25], %78 {strides = array<i32>} : memref<1x5x32xbf16, #tpu.memory_space<vmem>>, vector<1x5x32xbf16>,
    return
  }
  func.func @transform_0(%arg0: i32) -> (i32, i32, i32, i32) {
    %c0_i32 = arith.constant 0 : i32
    %c0_i32_0 = arith.constant 0 : i32
    %c0_i32_1 = arith.constant 0 : i32
    %c0_i32_2 = arith.constant 0 : i32
    return %arg0, %c0_i32, %c0_i32_0, %c0_i32_1 : i32, i32, i32, i32
  }
  func.func @transform_1(%arg0: i32) -> (i32, i32, i32) {
    %c0_i32 = arith.constant 0 : i32
    %c0_i32_0 = arith.constant 0 : i32
    %c0_i32_1 = arith.constant 0 : i32
    return %arg0, %c0_i32, %c0_i32_0 : i32, i32, i32
  }
  func.func @transform_2(%arg0: i32) -> (i32, i32) {
    %c0_i32 = arith.constant 0 : i32
    %c0_i32_0 = arith.constant 0 : i32
    %c0_i32_1 = arith.constant 0 : i32
    return %c0_i32, %c0_i32_0 : i32, i32
  }
  func.func @transform_3(%arg0: i32) -> (i32, i32) {
    %c0_i32 = arith.constant 0 : i32
    %c0_i32_0 = arith.constant 0 : i32
    %c0_i32_1 = arith.constant 0 : i32
    return %c0_i32, %c0_i32_0 : i32, i32
  }
  func.func @transform_4(%arg0: i32) -> (i32, i32, i32) {
    %c0_i32 = arith.constant 0 : i32
    %c0_i32_0 = arith.constant 0 : i32
    %c0_i32_1 = arith.constant 0 : i32
    return %arg0, %c0_i32, %c0_i32_0 : i32, i32, i32
  }
}

module attributes {stable_mosaic.version = 11 : i64} {
  func.func @_vit_encoder_kernel(%arg0: i32, %arg1: memref<1x4x192xf32, #tpu.memory_space<vmem>>, %arg2: memref<192x32xbf16, #tpu.memory_space<vmem>>, %arg3: memref<1x32xf32, #tpu.memory_space<vmem>>, %arg4: memref<1x32xf32, #tpu.memory_space<vmem>>, %arg5: memref<5x32xf32, #tpu.memory_space<vmem>>, %arg6: memref<1x1x32xf32, #tpu.memory_space<vmem>>, %arg7: memref<1x1x32xf32, #tpu.memory_space<vmem>>, %arg8: memref<1x4x32x8xbf16, #tpu.memory_space<vmem>>, %arg9: memref<1x4x1x8xf32, #tpu.memory_space<vmem>>, %arg10: memref<1x4x32x8xbf16, #tpu.memory_space<vmem>>, %arg11: memref<1x4x1x8xf32, #tpu.memory_space<vmem>>, %arg12: memref<1x4x32x8xbf16, #tpu.memory_space<vmem>>, %arg13: memref<1x4x1x8xf32, #tpu.memory_space<vmem>>, %arg14: memref<1x32x32xbf16, #tpu.memory_space<vmem>>, %arg15: memref<1x1x32xf32, #tpu.memory_space<vmem>>, %arg16: memref<1x1x32xf32, #tpu.memory_space<vmem>>, %arg17: memref<1x1x32xf32, #tpu.memory_space<vmem>>, %arg18: memref<1x32x64xbf16, #tpu.memory_space<vmem>>, %arg19: memref<1x1x64xf32, #tpu.memory_space<vmem>>, %arg20: memref<1x64x32xbf16, #tpu.memory_space<vmem>>, %arg21: memref<1x1x32xf32, #tpu.memory_space<vmem>>, %arg22: memref<1x5x32xbf16, #tpu.memory_space<vmem>>, %arg23: memref<5x32xf32, #tpu.memory_space<vmem>>, %arg24: memref<5x32xf32, #tpu.memory_space<vmem>>) attributes {dimension_semantics = [#tpu.dimension_semantics<parallel>], iteration_bounds = array<i64: 4>, scalar_prefetch = 0 : i64, scratch_operands = 2 : i64, tpu.core_type = #tpu.core_type<tc>, window_params = [{transform_indices = @transform_0, window_bounds = array<i64: 1, 4, 192>}, {pipeline_mode = #tpu.pipeline_mode<synchronous>, transform_indices = @transform_1, window_bounds = array<i64: 192, 32>}, {pipeline_mode = #tpu.pipeline_mode<synchronous>, transform_indices = @transform_2, window_bounds = array<i64: 1, 32>}, {pipeline_mode = #tpu.pipeline_mode<synchronous>, transform_indices = @transform_3, window_bounds = array<i64: 1, 32>}, {pipeline_mode = #tpu.pipeline_mode<synchronous>, transform_indices = @transform_4, window_bounds = array<i64: 5, 32>}, {pipeline_mode = #tpu.pipeline_mode<synchronous>, transform_indices = @transform_5, window_bounds = array<i64: 1, 1, 32>}, {pipeline_mode = #tpu.pipeline_mode<synchronous>, transform_indices = @transform_6, window_bounds = array<i64: 1, 1, 32>}, {pipeline_mode = #tpu.pipeline_mode<synchronous>, transform_indices = @transform_7, window_bounds = array<i64: 1, 4, 32, 8>}, {pipeline_mode = #tpu.pipeline_mode<synchronous>, transform_indices = @transform_8, window_bounds = array<i64: 1, 4, 1, 8>}, {pipeline_mode = #tpu.pipeline_mode<synchronous>, transform_indices = @transform_9, window_bounds = array<i64: 1, 4, 32, 8>}, {pipeline_mode = #tpu.pipeline_mode<synchronous>, transform_indices = @transform_10, window_bounds = array<i64: 1, 4, 1, 8>}, {pipeline_mode = #tpu.pipeline_mode<synchronous>, transform_indices = @transform_11, window_bounds = array<i64: 1, 4, 32, 8>}, {pipeline_mode = #tpu.pipeline_mode<synchronous>, transform_indices = @transform_12, window_bounds = array<i64: 1, 4, 1, 8>}, {pipeline_mode = #tpu.pipeline_mode<synchronous>, transform_indices = @transform_13, window_bounds = array<i64: 1, 32, 32>}, {pipeline_mode = #tpu.pipeline_mode<synchronous>, transform_indices = @transform_14, window_bounds = array<i64: 1, 1, 32>}, {pipeline_mode = #tpu.pipeline_mode<synchronous>, transform_indices = @transform_15, window_bounds = array<i64: 1, 1, 32>}, {pipeline_mode = #tpu.pipeline_mode<synchronous>, transform_indices = @transform_16, window_bounds = array<i64: 1, 1, 32>}, {pipeline_mode = #tpu.pipeline_mode<synchronous>, transform_indices = @transform_17, window_bounds = array<i64: 1, 32, 64>}, {pipeline_mode = #tpu.pipeline_mode<synchronous>, transform_indices = @transform_18, window_bounds = array<i64: 1, 1, 64>}, {pipeline_mode = #tpu.pipeline_mode<synchronous>, transform_indices = @transform_19, window_bounds = array<i64: 1, 64, 32>}, {pipeline_mode = #tpu.pipeline_mode<synchronous>, transform_indices = @transform_20, window_bounds = array<i64: 1, 1, 32>}, {transform_indices = @transform_21, window_bounds = array<i64: 1, 5, 32>}]} {
    %c0 = arith.constant 0 : index
    %c0_0 = arith.constant 0 : index
    %c0_1 = arith.constant 0 : index
    %0 = vector.load %arg1[%c0, %c0_0, %c0_1] : memref<1x4x192xf32, #tpu.memory_space<vmem>>, vector<1x4x192xf32>
    %1 = vector.shape_cast %0 : vector<1x4x192xf32> to vector<4x192xf32>
    %c0_2 = arith.constant 0 : index
    %c0_3 = arith.constant 0 : index
    %2 = vector.load %arg2[%c0_2, %c0_3] : memref<192x32xbf16, #tpu.memory_space<vmem>>, vector<192x32xbf16>
    %3 = arith.truncf %1 : vector<4x192xf32> to vector<4x192xbf16>
    %cst = arith.constant dense<0.000000e+00> : vector<4x32xf32>
    %4 = tpu.matmul %3, %2, %cst {dimension_numbers = #tpu.dot_dimension_numbers<[1], [0], [0], [1], [0, 0, 1, 1], [], []>} : vector<4x192xbf16>, vector<192x32xbf16>, vector<4x32xf32> -> vector<4x32xf32>
    %c0_4 = arith.constant 0 : index
    %c0_5 = arith.constant 0 : index
    %5 = vector.load %arg3[%c0_4, %c0_5] : memref<1x32xf32, #tpu.memory_space<vmem>>, vector<1x32xf32>
    %6 = vector.broadcast %5 : vector<1x32xf32> to vector<4x32xf32>
    %7 = arith.addf %4, %6 : vector<4x32xf32>
    %c0_6 = arith.constant 0 : index
    %c0_7 = arith.constant 0 : index
    %8 = vector.load %arg5[%c0_6, %c0_7] : memref<5x32xf32, #tpu.memory_space<vmem>>, vector<5x32xf32>
    %c0_8 = arith.constant 0 : index
    %c0_9 = arith.constant 0 : index
    %9 = vector.load %arg4[%c0_8, %c0_9] : memref<1x32xf32, #tpu.memory_space<vmem>>, vector<1x32xf32>
    %10 = vector.extract_strided_slice %8 {offsets = [0, 0], sizes = [1, 32], strides = [1, 1]} : vector<5x32xf32> to vector<1x32xf32>
    %11 = arith.addf %9, %10 : vector<1x32xf32>
    %c0_10 = arith.constant 0 : index
    %c0_11 = arith.constant 0 : index
    %12 = vector.load %arg23[%c0_10, %c0_11] : memref<5x32xf32, #tpu.memory_space<vmem>>, vector<1x32xf32>
    tpu.vector_store %arg23[%c0_10, %c0_11], %11 {strides = array<i32>} : memref<5x32xf32, #tpu.memory_space<vmem>>, vector<1x32xf32>,
    %13 = vector.extract_strided_slice %8 {offsets = [1, 0], sizes = [4, 32], strides = [1, 1]} : vector<5x32xf32> to vector<4x32xf32>
    %14 = arith.addf %7, %13 : vector<4x32xf32>
    %c1 = arith.constant 1 : index
    %c0_12 = arith.constant 0 : index
    %15 = vector.load %arg23[%c1, %c0_12] : memref<5x32xf32, #tpu.memory_space<vmem>>, vector<4x32xf32>
    tpu.vector_store %arg23[%c1, %c0_12], %14 {strides = array<i32>} : memref<5x32xf32, #tpu.memory_space<vmem>>, vector<4x32xf32>,
    %c0_13 = arith.constant 0 : index
    %c0_14 = arith.constant 0 : index
    %16 = vector.load %arg23[%c0_13, %c0_14] : memref<5x32xf32, #tpu.memory_space<vmem>>, vector<5x32xf32>
    %c0_15 = arith.constant 0 : index
    %c0_16 = arith.constant 0 : index
    %c0_17 = arith.constant 0 : index
    %17 = vector.load %arg6[%c0_15, %c0_16, %c0_17] : memref<1x1x32xf32, #tpu.memory_space<vmem>>, vector<1x1x32xf32>
    %18 = vector.shape_cast %17 : vector<1x1x32xf32> to vector<1x32xf32>
    %c0_18 = arith.constant 0 : index
    %c0_19 = arith.constant 0 : index
    %c0_20 = arith.constant 0 : index
    %19 = vector.load %arg7[%c0_18, %c0_19, %c0_20] : memref<1x1x32xf32, #tpu.memory_space<vmem>>, vector<1x1x32xf32>
    %20 = vector.shape_cast %19 : vector<1x1x32xf32> to vector<1x32xf32>
    %cst_21 = arith.constant dense<0.000000e+00> : vector<5xf32>
    %21 = vector.multi_reduction <add>, %16, %cst_21 [1] : vector<5x32xf32> to vector<5xf32>
    %22 = vector.shape_cast %21 : vector<5xf32> to vector<5x1xf32>
    %cst_22 = arith.constant 3.200000e+01 : f32
    %23 = vector.broadcast %cst_22 : f32 to vector<5x1xf32>
    %24 = arith.divf %22, %23 : vector<5x1xf32>
    %25 = vector.broadcast %24 : vector<5x1xf32> to vector<5x32xf32>
    %26 = arith.subf %16, %25 : vector<5x32xf32>
    %27 = arith.mulf %26, %26 : vector<5x32xf32>
    %cst_23 = arith.constant dense<0.000000e+00> : vector<5xf32>
    %28 = vector.multi_reduction <add>, %27, %cst_23 [1] : vector<5x32xf32> to vector<5xf32>
    %29 = vector.shape_cast %28 : vector<5xf32> to vector<5x1xf32>
    %cst_24 = arith.constant 3.200000e+01 : f32
    %30 = vector.broadcast %cst_24 : f32 to vector<5x1xf32>
    %31 = arith.divf %29, %30 : vector<5x1xf32>
    %32 = vector.broadcast %24 : vector<5x1xf32> to vector<5x32xf32>
    %33 = arith.subf %16, %32 : vector<5x32xf32>
    %cst_25 = arith.constant 9.99999997E-7 : f32
    %34 = vector.broadcast %cst_25 : f32 to vector<5x1xf32>
    %35 = arith.addf %31, %34 : vector<5x1xf32>
    %36 = math.rsqrt %35 : vector<5x1xf32>
    %37 = vector.broadcast %36 : vector<5x1xf32> to vector<5x32xf32>
    %38 = arith.mulf %33, %37 : vector<5x32xf32>
    %39 = vector.broadcast %18 : vector<1x32xf32> to vector<5x32xf32>
    %40 = arith.mulf %38, %39 : vector<5x32xf32>
    %41 = vector.broadcast %20 : vector<1x32xf32> to vector<5x32xf32>
    %42 = arith.addf %40, %41 : vector<5x32xf32>
    %c0_26 = arith.constant 0 : index
    %c0_27 = arith.constant 0 : index
    %c0_28 = arith.constant 0 : index
    %c0_29 = arith.constant 0 : index
    %43 = vector.load %arg8[%c0_26, %c0_27, %c0_28, %c0_29] : memref<1x4x32x8xbf16, #tpu.memory_space<vmem>>, vector<1x4x32x8xbf16>
    %44 = vector.shape_cast %43 : vector<1x4x32x8xbf16> to vector<4x32x8xbf16>
    %c0_30 = arith.constant 0 : index
    %c0_31 = arith.constant 0 : index
    %c0_32 = arith.constant 0 : index
    %c0_33 = arith.constant 0 : index
    %45 = vector.load %arg9[%c0_30, %c0_31, %c0_32, %c0_33] : memref<1x4x1x8xf32, #tpu.memory_space<vmem>>, vector<1x4x1x8xf32>
    %46 = vector.shape_cast %45 : vector<1x4x1x8xf32> to vector<4x1x8xf32>
    %c0_34 = arith.constant 0 : index
    %c0_35 = arith.constant 0 : index
    %c0_36 = arith.constant 0 : index
    %c0_37 = arith.constant 0 : index
    %47 = vector.load %arg10[%c0_34, %c0_35, %c0_36, %c0_37] : memref<1x4x32x8xbf16, #tpu.memory_space<vmem>>, vector<1x4x32x8xbf16>
    %48 = vector.shape_cast %47 : vector<1x4x32x8xbf16> to vector<4x32x8xbf16>
    %c0_38 = arith.constant 0 : index
    %c0_39 = arith.constant 0 : index
    %c0_40 = arith.constant 0 : index
    %c0_41 = arith.constant 0 : index
    %49 = vector.load %arg11[%c0_38, %c0_39, %c0_40, %c0_41] : memref<1x4x1x8xf32, #tpu.memory_space<vmem>>, vector<1x4x1x8xf32>
    %50 = vector.shape_cast %49 : vector<1x4x1x8xf32> to vector<4x1x8xf32>
    %c0_42 = arith.constant 0 : index
    %c0_43 = arith.constant 0 : index
    %c0_44 = arith.constant 0 : index
    %c0_45 = arith.constant 0 : index
    %51 = vector.load %arg12[%c0_42, %c0_43, %c0_44, %c0_45] : memref<1x4x32x8xbf16, #tpu.memory_space<vmem>>, vector<1x4x32x8xbf16>
    %52 = vector.shape_cast %51 : vector<1x4x32x8xbf16> to vector<4x32x8xbf16>
    %c0_46 = arith.constant 0 : index
    %c0_47 = arith.constant 0 : index
    %c0_48 = arith.constant 0 : index
    %c0_49 = arith.constant 0 : index
    %53 = vector.load %arg13[%c0_46, %c0_47, %c0_48, %c0_49] : memref<1x4x1x8xf32, #tpu.memory_space<vmem>>, vector<1x4x1x8xf32>
    %54 = vector.shape_cast %53 : vector<1x4x1x8xf32> to vector<4x1x8xf32>
    %c0_50 = arith.constant 0 : index
    %c0_51 = arith.constant 0 : index
    %c0_52 = arith.constant 0 : index
    %55 = vector.load %arg14[%c0_50, %c0_51, %c0_52] : memref<1x32x32xbf16, #tpu.memory_space<vmem>>, vector<1x32x32xbf16>
    %56 = vector.shape_cast %55 : vector<1x32x32xbf16> to vector<32x32xbf16>
    %c0_53 = arith.constant 0 : index
    %c0_54 = arith.constant 0 : index
    %c0_55 = arith.constant 0 : index
    %57 = vector.load %arg15[%c0_53, %c0_54, %c0_55] : memref<1x1x32xf32, #tpu.memory_space<vmem>>, vector<1x1x32xf32>
    %58 = vector.shape_cast %57 : vector<1x1x32xf32> to vector<1x32xf32>
    %59 = vector.extract_strided_slice %44 {offsets = [0, 0, 0], sizes = [1, 32, 8], strides = [1, 1, 1]} : vector<4x32x8xbf16> to vector<1x32x8xbf16>
    %60 = vector.shape_cast %59 : vector<1x32x8xbf16> to vector<32x8xbf16>
    %61 = arith.truncf %42 : vector<5x32xf32> to vector<5x32xbf16>
    %cst_56 = arith.constant dense<0.000000e+00> : vector<5x8xf32>
    %62 = tpu.matmul %61, %60, %cst_56 {dimension_numbers = #tpu.dot_dimension_numbers<[1], [0], [0], [1], [0, 0, 1, 1], [], []>} : vector<5x32xbf16>, vector<32x8xbf16>, vector<5x8xf32> -> vector<5x8xf32>
    %63 = vector.extract_strided_slice %46 {offsets = [0, 0, 0], sizes = [1, 1, 8], strides = [1, 1, 1]} : vector<4x1x8xf32> to vector<1x1x8xf32>
    %64 = vector.shape_cast %63 : vector<1x1x8xf32> to vector<1x8xf32>
    %65 = vector.broadcast %64 : vector<1x8xf32> to vector<5x8xf32>
    %66 = arith.addf %62, %65 : vector<5x8xf32>
    %67 = vector.extract_strided_slice %48 {offsets = [0, 0, 0], sizes = [1, 32, 8], strides = [1, 1, 1]} : vector<4x32x8xbf16> to vector<1x32x8xbf16>
    %68 = vector.shape_cast %67 : vector<1x32x8xbf16> to vector<32x8xbf16>
    %69 = arith.truncf %42 : vector<5x32xf32> to vector<5x32xbf16>
    %cst_57 = arith.constant dense<0.000000e+00> : vector<5x8xf32>
    %70 = tpu.matmul %69, %68, %cst_57 {dimension_numbers = #tpu.dot_dimension_numbers<[1], [0], [0], [1], [0, 0, 1, 1], [], []>} : vector<5x32xbf16>, vector<32x8xbf16>, vector<5x8xf32> -> vector<5x8xf32>
    %71 = vector.extract_strided_slice %50 {offsets = [0, 0, 0], sizes = [1, 1, 8], strides = [1, 1, 1]} : vector<4x1x8xf32> to vector<1x1x8xf32>
    %72 = vector.shape_cast %71 : vector<1x1x8xf32> to vector<1x8xf32>
    %73 = vector.broadcast %72 : vector<1x8xf32> to vector<5x8xf32>
    %74 = arith.addf %70, %73 : vector<5x8xf32>
    %75 = vector.extract_strided_slice %52 {offsets = [0, 0, 0], sizes = [1, 32, 8], strides = [1, 1, 1]} : vector<4x32x8xbf16> to vector<1x32x8xbf16>
    %76 = vector.shape_cast %75 : vector<1x32x8xbf16> to vector<32x8xbf16>
    %77 = arith.truncf %42 : vector<5x32xf32> to vector<5x32xbf16>
    %cst_58 = arith.constant dense<0.000000e+00> : vector<5x8xf32>
    %78 = tpu.matmul %77, %76, %cst_58 {dimension_numbers = #tpu.dot_dimension_numbers<[1], [0], [0], [1], [0, 0, 1, 1], [], []>} : vector<5x32xbf16>, vector<32x8xbf16>, vector<5x8xf32> -> vector<5x8xf32>
    %79 = vector.extract_strided_slice %54 {offsets = [0, 0, 0], sizes = [1, 1, 8], strides = [1, 1, 1]} : vector<4x1x8xf32> to vector<1x1x8xf32>
    %80 = vector.shape_cast %79 : vector<1x1x8xf32> to vector<1x8xf32>
    %81 = vector.broadcast %80 : vector<1x8xf32> to vector<5x8xf32>
    %82 = arith.addf %78, %81 : vector<5x8xf32>
    %83 = arith.truncf %66 : vector<5x8xf32> to vector<5x8xbf16>
    %84 = arith.truncf %74 : vector<5x8xf32> to vector<5x8xbf16>
    %cst_59 = arith.constant dense<0.000000e+00> : vector<5x5xf32>
    %85 = tpu.matmul %83, %84, %cst_59 {dimension_numbers = #tpu.dot_dimension_numbers<[1], [1], [0], [0], [0, 0, 1, 0], [], []>} : vector<5x8xbf16>, vector<5x8xbf16>, vector<5x5xf32> -> vector<5x5xf32>
    %cst_60 = arith.constant 0.353553385 : f32
    %86 = vector.broadcast %cst_60 : f32 to vector<5x5xf32>
    %87 = arith.mulf %85, %86 : vector<5x5xf32>
    %cst_61 = arith.constant dense<0xFF800000> : vector<5xf32>
    %88 = vector.multi_reduction <maximumf>, %87, %cst_61 [1] : vector<5x5xf32> to vector<5xf32>
    %89 = vector.shape_cast %88 : vector<5xf32> to vector<5x1xf32>
    %90 = vector.broadcast %89 : vector<5x1xf32> to vector<5x5xf32>
    %91 = arith.subf %87, %90 : vector<5x5xf32>
    %92 = math.exp %91 : vector<5x5xf32>
    %cst_62 = arith.constant dense<0.000000e+00> : vector<5xf32>
    %93 = vector.multi_reduction <add>, %92, %cst_62 [1] : vector<5x5xf32> to vector<5xf32>
    %94 = vector.shape_cast %93 : vector<5xf32> to vector<5x1xf32>
    %95 = tpu.reciprocal %94 {approx = true} : vector<5x1xf32> -> vector<5x1xf32>
    %96 = vector.broadcast %95 : vector<5x1xf32> to vector<5x5xf32>
    %97 = arith.mulf %92, %96 : vector<5x5xf32>
    %98 = arith.truncf %97 : vector<5x5xf32> to vector<5x5xbf16>
    %99 = arith.truncf %82 : vector<5x8xf32> to vector<5x8xbf16>
    %cst_63 = arith.constant dense<0.000000e+00> : vector<5x8xf32>
    %100 = tpu.matmul %98, %99, %cst_63 {dimension_numbers = #tpu.dot_dimension_numbers<[1], [0], [0], [1], [0, 0, 1, 1], [], []>} : vector<5x5xbf16>, vector<5x8xbf16>, vector<5x8xf32> -> vector<5x8xf32>
    %c0_64 = arith.constant 0 : index
    %c0_65 = arith.constant 0 : index
    %101 = vector.load %arg24[%c0_64, %c0_65] : memref<5x32xf32, #tpu.memory_space<vmem>>, vector<5x8xf32>
    tpu.vector_store %arg24[%c0_64, %c0_65], %100 {strides = array<i32>} : memref<5x32xf32, #tpu.memory_space<vmem>>, vector<5x8xf32>,
    %102 = vector.extract_strided_slice %44 {offsets = [1, 0, 0], sizes = [1, 32, 8], strides = [1, 1, 1]} : vector<4x32x8xbf16> to vector<1x32x8xbf16>
    %103 = vector.shape_cast %102 : vector<1x32x8xbf16> to vector<32x8xbf16>
    %104 = arith.truncf %42 : vector<5x32xf32> to vector<5x32xbf16>
    %cst_66 = arith.constant dense<0.000000e+00> : vector<5x8xf32>
    %105 = tpu.matmul %104, %103, %cst_66 {dimension_numbers = #tpu.dot_dimension_numbers<[1], [0], [0], [1], [0, 0, 1, 1], [], []>} : vector<5x32xbf16>, vector<32x8xbf16>, vector<5x8xf32> -> vector<5x8xf32>
    %106 = vector.extract_strided_slice %46 {offsets = [1, 0, 0], sizes = [1, 1, 8], strides = [1, 1, 1]} : vector<4x1x8xf32> to vector<1x1x8xf32>
    %107 = vector.shape_cast %106 : vector<1x1x8xf32> to vector<1x8xf32>
    %108 = vector.broadcast %107 : vector<1x8xf32> to vector<5x8xf32>
    %109 = arith.addf %105, %108 : vector<5x8xf32>
    %110 = vector.extract_strided_slice %48 {offsets = [1, 0, 0], sizes = [1, 32, 8], strides = [1, 1, 1]} : vector<4x32x8xbf16> to vector<1x32x8xbf16>
    %111 = vector.shape_cast %110 : vector<1x32x8xbf16> to vector<32x8xbf16>
    %112 = arith.truncf %42 : vector<5x32xf32> to vector<5x32xbf16>
    %cst_67 = arith.constant dense<0.000000e+00> : vector<5x8xf32>
    %113 = tpu.matmul %112, %111, %cst_67 {dimension_numbers = #tpu.dot_dimension_numbers<[1], [0], [0], [1], [0, 0, 1, 1], [], []>} : vector<5x32xbf16>, vector<32x8xbf16>, vector<5x8xf32> -> vector<5x8xf32>
    %114 = vector.extract_strided_slice %50 {offsets = [1, 0, 0], sizes = [1, 1, 8], strides = [1, 1, 1]} : vector<4x1x8xf32> to vector<1x1x8xf32>
    %115 = vector.shape_cast %114 : vector<1x1x8xf32> to vector<1x8xf32>
    %116 = vector.broadcast %115 : vector<1x8xf32> to vector<5x8xf32>
    %117 = arith.addf %113, %116 : vector<5x8xf32>
    %118 = vector.extract_strided_slice %52 {offsets = [1, 0, 0], sizes = [1, 32, 8], strides = [1, 1, 1]} : vector<4x32x8xbf16> to vector<1x32x8xbf16>
    %119 = vector.shape_cast %118 : vector<1x32x8xbf16> to vector<32x8xbf16>
    %120 = arith.truncf %42 : vector<5x32xf32> to vector<5x32xbf16>
    %cst_68 = arith.constant dense<0.000000e+00> : vector<5x8xf32>
    %121 = tpu.matmul %120, %119, %cst_68 {dimension_numbers = #tpu.dot_dimension_numbers<[1], [0], [0], [1], [0, 0, 1, 1], [], []>} : vector<5x32xbf16>, vector<32x8xbf16>, vector<5x8xf32> -> vector<5x8xf32>
    %122 = vector.extract_strided_slice %54 {offsets = [1, 0, 0], sizes = [1, 1, 8], strides = [1, 1, 1]} : vector<4x1x8xf32> to vector<1x1x8xf32>
    %123 = vector.shape_cast %122 : vector<1x1x8xf32> to vector<1x8xf32>
    %124 = vector.broadcast %123 : vector<1x8xf32> to vector<5x8xf32>
    %125 = arith.addf %121, %124 : vector<5x8xf32>
    %126 = arith.truncf %109 : vector<5x8xf32> to vector<5x8xbf16>
    %127 = arith.truncf %117 : vector<5x8xf32> to vector<5x8xbf16>
    %cst_69 = arith.constant dense<0.000000e+00> : vector<5x5xf32>
    %128 = tpu.matmul %126, %127, %cst_69 {dimension_numbers = #tpu.dot_dimension_numbers<[1], [1], [0], [0], [0, 0, 1, 0], [], []>} : vector<5x8xbf16>, vector<5x8xbf16>, vector<5x5xf32> -> vector<5x5xf32>
    %cst_70 = arith.constant 0.353553385 : f32
    %129 = vector.broadcast %cst_70 : f32 to vector<5x5xf32>
    %130 = arith.mulf %128, %129 : vector<5x5xf32>
    %cst_71 = arith.constant dense<0xFF800000> : vector<5xf32>
    %131 = vector.multi_reduction <maximumf>, %130, %cst_71 [1] : vector<5x5xf32> to vector<5xf32>
    %132 = vector.shape_cast %131 : vector<5xf32> to vector<5x1xf32>
    %133 = vector.broadcast %132 : vector<5x1xf32> to vector<5x5xf32>
    %134 = arith.subf %130, %133 : vector<5x5xf32>
    %135 = math.exp %134 : vector<5x5xf32>
    %cst_72 = arith.constant dense<0.000000e+00> : vector<5xf32>
    %136 = vector.multi_reduction <add>, %135, %cst_72 [1] : vector<5x5xf32> to vector<5xf32>
    %137 = vector.shape_cast %136 : vector<5xf32> to vector<5x1xf32>
    %138 = tpu.reciprocal %137 {approx = true} : vector<5x1xf32> -> vector<5x1xf32>
    %139 = vector.broadcast %138 : vector<5x1xf32> to vector<5x5xf32>
    %140 = arith.mulf %135, %139 : vector<5x5xf32>
    %141 = arith.truncf %140 : vector<5x5xf32> to vector<5x5xbf16>
    %142 = arith.truncf %125 : vector<5x8xf32> to vector<5x8xbf16>
    %cst_73 = arith.constant dense<0.000000e+00> : vector<5x8xf32>
    %143 = tpu.matmul %141, %142, %cst_73 {dimension_numbers = #tpu.dot_dimension_numbers<[1], [0], [0], [1], [0, 0, 1, 1], [], []>} : vector<5x5xbf16>, vector<5x8xbf16>, vector<5x8xf32> -> vector<5x8xf32>
    %c0_74 = arith.constant 0 : index
    %c8 = arith.constant 8 : index
    %144 = vector.load %arg24[%c0_74, %c8] : memref<5x32xf32, #tpu.memory_space<vmem>>, vector<5x8xf32>
    tpu.vector_store %arg24[%c0_74, %c8], %143 {strides = array<i32>} : memref<5x32xf32, #tpu.memory_space<vmem>>, vector<5x8xf32>,
    %145 = vector.extract_strided_slice %44 {offsets = [2, 0, 0], sizes = [1, 32, 8], strides = [1, 1, 1]} : vector<4x32x8xbf16> to vector<1x32x8xbf16>
    %146 = vector.shape_cast %145 : vector<1x32x8xbf16> to vector<32x8xbf16>
    %147 = arith.truncf %42 : vector<5x32xf32> to vector<5x32xbf16>
    %cst_75 = arith.constant dense<0.000000e+00> : vector<5x8xf32>
    %148 = tpu.matmul %147, %146, %cst_75 {dimension_numbers = #tpu.dot_dimension_numbers<[1], [0], [0], [1], [0, 0, 1, 1], [], []>} : vector<5x32xbf16>, vector<32x8xbf16>, vector<5x8xf32> -> vector<5x8xf32>
    %149 = vector.extract_strided_slice %46 {offsets = [2, 0, 0], sizes = [1, 1, 8], strides = [1, 1, 1]} : vector<4x1x8xf32> to vector<1x1x8xf32>
    %150 = vector.shape_cast %149 : vector<1x1x8xf32> to vector<1x8xf32>
    %151 = vector.broadcast %150 : vector<1x8xf32> to vector<5x8xf32>
    %152 = arith.addf %148, %151 : vector<5x8xf32>
    %153 = vector.extract_strided_slice %48 {offsets = [2, 0, 0], sizes = [1, 32, 8], strides = [1, 1, 1]} : vector<4x32x8xbf16> to vector<1x32x8xbf16>
    %154 = vector.shape_cast %153 : vector<1x32x8xbf16> to vector<32x8xbf16>
    %155 = arith.truncf %42 : vector<5x32xf32> to vector<5x32xbf16>
    %cst_76 = arith.constant dense<0.000000e+00> : vector<5x8xf32>
    %156 = tpu.matmul %155, %154, %cst_76 {dimension_numbers = #tpu.dot_dimension_numbers<[1], [0], [0], [1], [0, 0, 1, 1], [], []>} : vector<5x32xbf16>, vector<32x8xbf16>, vector<5x8xf32> -> vector<5x8xf32>
    %157 = vector.extract_strided_slice %50 {offsets = [2, 0, 0], sizes = [1, 1, 8], strides = [1, 1, 1]} : vector<4x1x8xf32> to vector<1x1x8xf32>
    %158 = vector.shape_cast %157 : vector<1x1x8xf32> to vector<1x8xf32>
    %159 = vector.broadcast %158 : vector<1x8xf32> to vector<5x8xf32>
    %160 = arith.addf %156, %159 : vector<5x8xf32>
    %161 = vector.extract_strided_slice %52 {offsets = [2, 0, 0], sizes = [1, 32, 8], strides = [1, 1, 1]} : vector<4x32x8xbf16> to vector<1x32x8xbf16>
    %162 = vector.shape_cast %161 : vector<1x32x8xbf16> to vector<32x8xbf16>
    %163 = arith.truncf %42 : vector<5x32xf32> to vector<5x32xbf16>
    %cst_77 = arith.constant dense<0.000000e+00> : vector<5x8xf32>
    %164 = tpu.matmul %163, %162, %cst_77 {dimension_numbers = #tpu.dot_dimension_numbers<[1], [0], [0], [1], [0, 0, 1, 1], [], []>} : vector<5x32xbf16>, vector<32x8xbf16>, vector<5x8xf32> -> vector<5x8xf32>
    %165 = vector.extract_strided_slice %54 {offsets = [2, 0, 0], sizes = [1, 1, 8], strides = [1, 1, 1]} : vector<4x1x8xf32> to vector<1x1x8xf32>
    %166 = vector.shape_cast %165 : vector<1x1x8xf32> to vector<1x8xf32>
    %167 = vector.broadcast %166 : vector<1x8xf32> to vector<5x8xf32>
    %168 = arith.addf %164, %167 : vector<5x8xf32>
    %169 = arith.truncf %152 : vector<5x8xf32> to vector<5x8xbf16>
    %170 = arith.truncf %160 : vector<5x8xf32> to vector<5x8xbf16>
    %cst_78 = arith.constant dense<0.000000e+00> : vector<5x5xf32>
    %171 = tpu.matmul %169, %170, %cst_78 {dimension_numbers = #tpu.dot_dimension_numbers<[1], [1], [0], [0], [0, 0, 1, 0], [], []>} : vector<5x8xbf16>, vector<5x8xbf16>, vector<5x5xf32> -> vector<5x5xf32>
    %cst_79 = arith.constant 0.353553385 : f32
    %172 = vector.broadcast %cst_79 : f32 to vector<5x5xf32>
    %173 = arith.mulf %171, %172 : vector<5x5xf32>
    %cst_80 = arith.constant dense<0xFF800000> : vector<5xf32>
    %174 = vector.multi_reduction <maximumf>, %173, %cst_80 [1] : vector<5x5xf32> to vector<5xf32>
    %175 = vector.shape_cast %174 : vector<5xf32> to vector<5x1xf32>
    %176 = vector.broadcast %175 : vector<5x1xf32> to vector<5x5xf32>
    %177 = arith.subf %173, %176 : vector<5x5xf32>
    %178 = math.exp %177 : vector<5x5xf32>
    %cst_81 = arith.constant dense<0.000000e+00> : vector<5xf32>
    %179 = vector.multi_reduction <add>, %178, %cst_81 [1] : vector<5x5xf32> to vector<5xf32>
    %180 = vector.shape_cast %179 : vector<5xf32> to vector<5x1xf32>
    %181 = tpu.reciprocal %180 {approx = true} : vector<5x1xf32> -> vector<5x1xf32>
    %182 = vector.broadcast %181 : vector<5x1xf32> to vector<5x5xf32>
    %183 = arith.mulf %178, %182 : vector<5x5xf32>
    %184 = arith.truncf %183 : vector<5x5xf32> to vector<5x5xbf16>
    %185 = arith.truncf %168 : vector<5x8xf32> to vector<5x8xbf16>
    %cst_82 = arith.constant dense<0.000000e+00> : vector<5x8xf32>
    %186 = tpu.matmul %184, %185, %cst_82 {dimension_numbers = #tpu.dot_dimension_numbers<[1], [0], [0], [1], [0, 0, 1, 1], [], []>} : vector<5x5xbf16>, vector<5x8xbf16>, vector<5x8xf32> -> vector<5x8xf32>
    %c0_83 = arith.constant 0 : index
    %c16 = arith.constant 16 : index
    %187 = vector.load %arg24[%c0_83, %c16] : memref<5x32xf32, #tpu.memory_space<vmem>>, vector<5x8xf32>
    tpu.vector_store %arg24[%c0_83, %c16], %186 {strides = array<i32>} : memref<5x32xf32, #tpu.memory_space<vmem>>, vector<5x8xf32>,
    %188 = vector.extract_strided_slice %44 {offsets = [3, 0, 0], sizes = [1, 32, 8], strides = [1, 1, 1]} : vector<4x32x8xbf16> to vector<1x32x8xbf16>
    %189 = vector.shape_cast %188 : vector<1x32x8xbf16> to vector<32x8xbf16>
    %190 = arith.truncf %42 : vector<5x32xf32> to vector<5x32xbf16>
    %cst_84 = arith.constant dense<0.000000e+00> : vector<5x8xf32>
    %191 = tpu.matmul %190, %189, %cst_84 {dimension_numbers = #tpu.dot_dimension_numbers<[1], [0], [0], [1], [0, 0, 1, 1], [], []>} : vector<5x32xbf16>, vector<32x8xbf16>, vector<5x8xf32> -> vector<5x8xf32>
    %192 = vector.extract_strided_slice %46 {offsets = [3, 0, 0], sizes = [1, 1, 8], strides = [1, 1, 1]} : vector<4x1x8xf32> to vector<1x1x8xf32>
    %193 = vector.shape_cast %192 : vector<1x1x8xf32> to vector<1x8xf32>
    %194 = vector.broadcast %193 : vector<1x8xf32> to vector<5x8xf32>
    %195 = arith.addf %191, %194 : vector<5x8xf32>
    %196 = vector.extract_strided_slice %48 {offsets = [3, 0, 0], sizes = [1, 32, 8], strides = [1, 1, 1]} : vector<4x32x8xbf16> to vector<1x32x8xbf16>
    %197 = vector.shape_cast %196 : vector<1x32x8xbf16> to vector<32x8xbf16>
    %198 = arith.truncf %42 : vector<5x32xf32> to vector<5x32xbf16>
    %cst_85 = arith.constant dense<0.000000e+00> : vector<5x8xf32>
    %199 = tpu.matmul %198, %197, %cst_85 {dimension_numbers = #tpu.dot_dimension_numbers<[1], [0], [0], [1], [0, 0, 1, 1], [], []>} : vector<5x32xbf16>, vector<32x8xbf16>, vector<5x8xf32> -> vector<5x8xf32>
    %200 = vector.extract_strided_slice %50 {offsets = [3, 0, 0], sizes = [1, 1, 8], strides = [1, 1, 1]} : vector<4x1x8xf32> to vector<1x1x8xf32>
    %201 = vector.shape_cast %200 : vector<1x1x8xf32> to vector<1x8xf32>
    %202 = vector.broadcast %201 : vector<1x8xf32> to vector<5x8xf32>
    %203 = arith.addf %199, %202 : vector<5x8xf32>
    %204 = vector.extract_strided_slice %52 {offsets = [3, 0, 0], sizes = [1, 32, 8], strides = [1, 1, 1]} : vector<4x32x8xbf16> to vector<1x32x8xbf16>
    %205 = vector.shape_cast %204 : vector<1x32x8xbf16> to vector<32x8xbf16>
    %206 = arith.truncf %42 : vector<5x32xf32> to vector<5x32xbf16>
    %cst_86 = arith.constant dense<0.000000e+00> : vector<5x8xf32>
    %207 = tpu.matmul %206, %205, %cst_86 {dimension_numbers = #tpu.dot_dimension_numbers<[1], [0], [0], [1], [0, 0, 1, 1], [], []>} : vector<5x32xbf16>, vector<32x8xbf16>, vector<5x8xf32> -> vector<5x8xf32>
    %208 = vector.extract_strided_slice %54 {offsets = [3, 0, 0], sizes = [1, 1, 8], strides = [1, 1, 1]} : vector<4x1x8xf32> to vector<1x1x8xf32>
    %209 = vector.shape_cast %208 : vector<1x1x8xf32> to vector<1x8xf32>
    %210 = vector.broadcast %209 : vector<1x8xf32> to vector<5x8xf32>
    %211 = arith.addf %207, %210 : vector<5x8xf32>
    %212 = arith.truncf %195 : vector<5x8xf32> to vector<5x8xbf16>
    %213 = arith.truncf %203 : vector<5x8xf32> to vector<5x8xbf16>
    %cst_87 = arith.constant dense<0.000000e+00> : vector<5x5xf32>
    %214 = tpu.matmul %212, %213, %cst_87 {dimension_numbers = #tpu.dot_dimension_numbers<[1], [1], [0], [0], [0, 0, 1, 0], [], []>} : vector<5x8xbf16>, vector<5x8xbf16>, vector<5x5xf32> -> vector<5x5xf32>
    %cst_88 = arith.constant 0.353553385 : f32
    %215 = vector.broadcast %cst_88 : f32 to vector<5x5xf32>
    %216 = arith.mulf %214, %215 : vector<5x5xf32>
    %cst_89 = arith.constant dense<0xFF800000> : vector<5xf32>
    %217 = vector.multi_reduction <maximumf>, %216, %cst_89 [1] : vector<5x5xf32> to vector<5xf32>
    %218 = vector.shape_cast %217 : vector<5xf32> to vector<5x1xf32>
    %219 = vector.broadcast %218 : vector<5x1xf32> to vector<5x5xf32>
    %220 = arith.subf %216, %219 : vector<5x5xf32>
    %221 = math.exp %220 : vector<5x5xf32>
    %cst_90 = arith.constant dense<0.000000e+00> : vector<5xf32>
    %222 = vector.multi_reduction <add>, %221, %cst_90 [1] : vector<5x5xf32> to vector<5xf32>
    %223 = vector.shape_cast %222 : vector<5xf32> to vector<5x1xf32>
    %224 = tpu.reciprocal %223 {approx = true} : vector<5x1xf32> -> vector<5x1xf32>
    %225 = vector.broadcast %224 : vector<5x1xf32> to vector<5x5xf32>
    %226 = arith.mulf %221, %225 : vector<5x5xf32>
    %227 = arith.truncf %226 : vector<5x5xf32> to vector<5x5xbf16>
    %228 = arith.truncf %211 : vector<5x8xf32> to vector<5x8xbf16>
    %cst_91 = arith.constant dense<0.000000e+00> : vector<5x8xf32>
    %229 = tpu.matmul %227, %228, %cst_91 {dimension_numbers = #tpu.dot_dimension_numbers<[1], [0], [0], [1], [0, 0, 1, 1], [], []>} : vector<5x5xbf16>, vector<5x8xbf16>, vector<5x8xf32> -> vector<5x8xf32>
    %c0_92 = arith.constant 0 : index
    %c24 = arith.constant 24 : index
    %230 = vector.load %arg24[%c0_92, %c24] : memref<5x32xf32, #tpu.memory_space<vmem>>, vector<5x8xf32>
    tpu.vector_store %arg24[%c0_92, %c24], %229 {strides = array<i32>} : memref<5x32xf32, #tpu.memory_space<vmem>>, vector<5x8xf32>,
    %c0_93 = arith.constant 0 : index
    %c0_94 = arith.constant 0 : index
    %231 = vector.load %arg24[%c0_93, %c0_94] : memref<5x32xf32, #tpu.memory_space<vmem>>, vector<5x32xf32>
    %232 = arith.truncf %231 : vector<5x32xf32> to vector<5x32xbf16>
    %cst_95 = arith.constant dense<0.000000e+00> : vector<5x32xf32>
    %233 = tpu.matmul %232, %56, %cst_95 {dimension_numbers = #tpu.dot_dimension_numbers<[1], [0], [0], [1], [0, 0, 1, 1], [], []>} : vector<5x32xbf16>, vector<32x32xbf16>, vector<5x32xf32> -> vector<5x32xf32>
    %234 = vector.broadcast %58 : vector<1x32xf32> to vector<5x32xf32>
    %235 = arith.addf %233, %234 : vector<5x32xf32>
    %236 = arith.addf %16, %235 : vector<5x32xf32>
    %c0_96 = arith.constant 0 : index
    %c0_97 = arith.constant 0 : index
    %c0_98 = arith.constant 0 : index
    %237 = vector.load %arg16[%c0_96, %c0_97, %c0_98] : memref<1x1x32xf32, #tpu.memory_space<vmem>>, vector<1x1x32xf32>
    %238 = vector.shape_cast %237 : vector<1x1x32xf32> to vector<1x32xf32>
    %c0_99 = arith.constant 0 : index
    %c0_100 = arith.constant 0 : index
    %c0_101 = arith.constant 0 : index
    %239 = vector.load %arg17[%c0_99, %c0_100, %c0_101] : memref<1x1x32xf32, #tpu.memory_space<vmem>>, vector<1x1x32xf32>
    %240 = vector.shape_cast %239 : vector<1x1x32xf32> to vector<1x32xf32>
    %cst_102 = arith.constant dense<0.000000e+00> : vector<5xf32>
    %241 = vector.multi_reduction <add>, %236, %cst_102 [1] : vector<5x32xf32> to vector<5xf32>
    %242 = vector.shape_cast %241 : vector<5xf32> to vector<5x1xf32>
    %cst_103 = arith.constant 3.200000e+01 : f32
    %243 = vector.broadcast %cst_103 : f32 to vector<5x1xf32>
    %244 = arith.divf %242, %243 : vector<5x1xf32>
    %245 = vector.broadcast %244 : vector<5x1xf32> to vector<5x32xf32>
    %246 = arith.subf %236, %245 : vector<5x32xf32>
    %247 = arith.mulf %246, %246 : vector<5x32xf32>
    %cst_104 = arith.constant dense<0.000000e+00> : vector<5xf32>
    %248 = vector.multi_reduction <add>, %247, %cst_104 [1] : vector<5x32xf32> to vector<5xf32>
    %249 = vector.shape_cast %248 : vector<5xf32> to vector<5x1xf32>
    %cst_105 = arith.constant 3.200000e+01 : f32
    %250 = vector.broadcast %cst_105 : f32 to vector<5x1xf32>
    %251 = arith.divf %249, %250 : vector<5x1xf32>
    %252 = vector.broadcast %244 : vector<5x1xf32> to vector<5x32xf32>
    %253 = arith.subf %236, %252 : vector<5x32xf32>
    %cst_106 = arith.constant 9.99999997E-7 : f32
    %254 = vector.broadcast %cst_106 : f32 to vector<5x1xf32>
    %255 = arith.addf %251, %254 : vector<5x1xf32>
    %256 = math.rsqrt %255 : vector<5x1xf32>
    %257 = vector.broadcast %256 : vector<5x1xf32> to vector<5x32xf32>
    %258 = arith.mulf %253, %257 : vector<5x32xf32>
    %259 = vector.broadcast %238 : vector<1x32xf32> to vector<5x32xf32>
    %260 = arith.mulf %258, %259 : vector<5x32xf32>
    %261 = vector.broadcast %240 : vector<1x32xf32> to vector<5x32xf32>
    %262 = arith.addf %260, %261 : vector<5x32xf32>
    %c0_107 = arith.constant 0 : index
    %c0_108 = arith.constant 0 : index
    %c0_109 = arith.constant 0 : index
    %263 = vector.load %arg18[%c0_107, %c0_108, %c0_109] : memref<1x32x64xbf16, #tpu.memory_space<vmem>>, vector<1x32x64xbf16>
    %264 = vector.shape_cast %263 : vector<1x32x64xbf16> to vector<32x64xbf16>
    %265 = arith.truncf %262 : vector<5x32xf32> to vector<5x32xbf16>
    %cst_110 = arith.constant dense<0.000000e+00> : vector<5x64xf32>
    %266 = tpu.matmul %265, %264, %cst_110 {dimension_numbers = #tpu.dot_dimension_numbers<[1], [0], [0], [1], [0, 0, 1, 1], [], []>} : vector<5x32xbf16>, vector<32x64xbf16>, vector<5x64xf32> -> vector<5x64xf32>
    %c0_111 = arith.constant 0 : index
    %c0_112 = arith.constant 0 : index
    %c0_113 = arith.constant 0 : index
    %267 = vector.load %arg19[%c0_111, %c0_112, %c0_113] : memref<1x1x64xf32, #tpu.memory_space<vmem>>, vector<1x1x64xf32>
    %268 = vector.shape_cast %267 : vector<1x1x64xf32> to vector<1x64xf32>
    %269 = vector.broadcast %268 : vector<1x64xf32> to vector<5x64xf32>
    %270 = arith.addf %266, %269 : vector<5x64xf32>
    %cst_114 = arith.constant 5.000000e-01 : f32
    %271 = vector.broadcast %cst_114 : f32 to vector<5x64xf32>
    %272 = arith.mulf %271, %270 : vector<5x64xf32>
    %cst_115 = arith.constant 4.471500e-02 : f32
    %273 = vector.broadcast %cst_115 : f32 to vector<5x64xf32>
    %274 = arith.mulf %273, %270 : vector<5x64xf32>
    %275 = arith.mulf %274, %270 : vector<5x64xf32>
    %276 = arith.mulf %275, %270 : vector<5x64xf32>
    %277 = arith.addf %270, %276 : vector<5x64xf32>
    %cst_116 = arith.constant 0.797884583 : f32
    %278 = vector.broadcast %cst_116 : f32 to vector<5x64xf32>
    %279 = arith.mulf %278, %277 : vector<5x64xf32>
    %280 = math.tanh %279 : vector<5x64xf32>
    %cst_117 = arith.constant 1.000000e+00 : f32
    %281 = vector.broadcast %cst_117 : f32 to vector<5x64xf32>
    %282 = arith.addf %281, %280 : vector<5x64xf32>
    %283 = arith.mulf %272, %282 : vector<5x64xf32>
    %c0_118 = arith.constant 0 : index
    %c0_119 = arith.constant 0 : index
    %c0_120 = arith.constant 0 : index
    %284 = vector.load %arg20[%c0_118, %c0_119, %c0_120] : memref<1x64x32xbf16, #tpu.memory_space<vmem>>, vector<1x64x32xbf16>
    %285 = vector.shape_cast %284 : vector<1x64x32xbf16> to vector<64x32xbf16>
    %286 = arith.truncf %283 : vector<5x64xf32> to vector<5x64xbf16>
    %cst_121 = arith.constant dense<0.000000e+00> : vector<5x32xf32>
    %287 = tpu.matmul %286, %285, %cst_121 {dimension_numbers = #tpu.dot_dimension_numbers<[1], [0], [0], [1], [0, 0, 1, 1], [], []>} : vector<5x64xbf16>, vector<64x32xbf16>, vector<5x32xf32> -> vector<5x32xf32>
    %288 = arith.addf %236, %287 : vector<5x32xf32>
    %c0_122 = arith.constant 0 : index
    %c0_123 = arith.constant 0 : index
    %c0_124 = arith.constant 0 : index
    %289 = vector.load %arg21[%c0_122, %c0_123, %c0_124] : memref<1x1x32xf32, #tpu.memory_space<vmem>>, vector<1x1x32xf32>
    %290 = vector.shape_cast %289 : vector<1x1x32xf32> to vector<1x32xf32>
    %291 = vector.broadcast %290 : vector<1x32xf32> to vector<5x32xf32>
    %292 = arith.addf %288, %291 : vector<5x32xf32>
    %293 = arith.truncf %292 : vector<5x32xf32> to vector<5x32xbf16>
    %c0_125 = arith.constant 0 : index
    %c0_126 = arith.constant 0 : index
    %c0_127 = arith.constant 0 : index
    %294 = vector.load %arg22[%c0_125, %c0_126, %c0_127] : memref<1x5x32xbf16, #tpu.memory_space<vmem>>, vector<1x5x32xbf16>
    %295 = vector.shape_cast %294 : vector<1x5x32xbf16> to vector<5x32xbf16>
    %296 = vector.shape_cast %293 : vector<5x32xbf16> to vector<1x5x32xbf16>
    tpu.vector_store %arg22[%c0_125, %c0_126, %c0_127], %296 {strides = array<i32>} : memref<1x5x32xbf16, #tpu.memory_space<vmem>>, vector<1x5x32xbf16>,
    return
  }
  func.func @transform_0(%arg0: i32) -> (i32, i32, i32) {
    %c0_i32 = arith.constant 0 : i32
    %c0_i32_0 = arith.constant 0 : i32
    %c0_i32_1 = arith.constant 0 : i32
    return %arg0, %c0_i32, %c0_i32_0 : i32, i32, i32
  }
  func.func @transform_1(%arg0: i32) -> (i32, i32) {
    %c0_i32 = arith.constant 0 : i32
    %c0_i32_0 = arith.constant 0 : i32
    %c0_i32_1 = arith.constant 0 : i32
    return %c0_i32, %c0_i32_0 : i32, i32
  }
  func.func @transform_2(%arg0: i32) -> (i32, i32) {
    %c0_i32 = arith.constant 0 : i32
    %c0_i32_0 = arith.constant 0 : i32
    %c0_i32_1 = arith.constant 0 : i32
    return %c0_i32, %c0_i32_0 : i32, i32
  }
  func.func @transform_3(%arg0: i32) -> (i32, i32) {
    %c0_i32 = arith.constant 0 : i32
    %c0_i32_0 = arith.constant 0 : i32
    %c0_i32_1 = arith.constant 0 : i32
    return %c0_i32, %c0_i32_0 : i32, i32
  }
  func.func @transform_4(%arg0: i32) -> (i32, i32) {
    %c0_i32 = arith.constant 0 : i32
    %c0_i32_0 = arith.constant 0 : i32
    %c0_i32_1 = arith.constant 0 : i32
    return %c0_i32, %c0_i32_0 : i32, i32
  }
  func.func @transform_5(%arg0: i32) -> (i32, i32, i32) {
    %c0_i32 = arith.constant 0 : i32
    %c0_i32_0 = arith.constant 0 : i32
    %c0_i32_1 = arith.constant 0 : i32
    %c0_i32_2 = arith.constant 0 : i32
    return %c0_i32, %c0_i32_0, %c0_i32_1 : i32, i32, i32
  }
  func.func @transform_6(%arg0: i32) -> (i32, i32, i32) {
    %c0_i32 = arith.constant 0 : i32
    %c0_i32_0 = arith.constant 0 : i32
    %c0_i32_1 = arith.constant 0 : i32
    %c0_i32_2 = arith.constant 0 : i32
    return %c0_i32, %c0_i32_0, %c0_i32_1 : i32, i32, i32
  }
  func.func @transform_7(%arg0: i32) -> (i32, i32, i32, i32) {
    %c0_i32 = arith.constant 0 : i32
    %c0_i32_0 = arith.constant 0 : i32
    %c0_i32_1 = arith.constant 0 : i32
    %c0_i32_2 = arith.constant 0 : i32
    %c0_i32_3 = arith.constant 0 : i32
    return %c0_i32, %c0_i32_0, %c0_i32_1, %c0_i32_2 : i32, i32, i32, i32
  }
  func.func @transform_8(%arg0: i32) -> (i32, i32, i32, i32) {
    %c0_i32 = arith.constant 0 : i32
    %c0_i32_0 = arith.constant 0 : i32
    %c0_i32_1 = arith.constant 0 : i32
    %c0_i32_2 = arith.constant 0 : i32
    %c0_i32_3 = arith.constant 0 : i32
    return %c0_i32, %c0_i32_0, %c0_i32_1, %c0_i32_2 : i32, i32, i32, i32
  }
  func.func @transform_9(%arg0: i32) -> (i32, i32, i32, i32) {
    %c0_i32 = arith.constant 0 : i32
    %c0_i32_0 = arith.constant 0 : i32
    %c0_i32_1 = arith.constant 0 : i32
    %c0_i32_2 = arith.constant 0 : i32
    %c0_i32_3 = arith.constant 0 : i32
    return %c0_i32, %c0_i32_0, %c0_i32_1, %c0_i32_2 : i32, i32, i32, i32
  }
  func.func @transform_10(%arg0: i32) -> (i32, i32, i32, i32) {
    %c0_i32 = arith.constant 0 : i32
    %c0_i32_0 = arith.constant 0 : i32
    %c0_i32_1 = arith.constant 0 : i32
    %c0_i32_2 = arith.constant 0 : i32
    %c0_i32_3 = arith.constant 0 : i32
    return %c0_i32, %c0_i32_0, %c0_i32_1, %c0_i32_2 : i32, i32, i32, i32
  }
  func.func @transform_11(%arg0: i32) -> (i32, i32, i32, i32) {
    %c0_i32 = arith.constant 0 : i32
    %c0_i32_0 = arith.constant 0 : i32
    %c0_i32_1 = arith.constant 0 : i32
    %c0_i32_2 = arith.constant 0 : i32
    %c0_i32_3 = arith.constant 0 : i32
    return %c0_i32, %c0_i32_0, %c0_i32_1, %c0_i32_2 : i32, i32, i32, i32
  }
  func.func @transform_12(%arg0: i32) -> (i32, i32, i32, i32) {
    %c0_i32 = arith.constant 0 : i32
    %c0_i32_0 = arith.constant 0 : i32
    %c0_i32_1 = arith.constant 0 : i32
    %c0_i32_2 = arith.constant 0 : i32
    %c0_i32_3 = arith.constant 0 : i32
    return %c0_i32, %c0_i32_0, %c0_i32_1, %c0_i32_2 : i32, i32, i32, i32
  }
  func.func @transform_13(%arg0: i32) -> (i32, i32, i32) {
    %c0_i32 = arith.constant 0 : i32
    %c0_i32_0 = arith.constant 0 : i32
    %c0_i32_1 = arith.constant 0 : i32
    %c0_i32_2 = arith.constant 0 : i32
    return %c0_i32, %c0_i32_0, %c0_i32_1 : i32, i32, i32
  }
  func.func @transform_14(%arg0: i32) -> (i32, i32, i32) {
    %c0_i32 = arith.constant 0 : i32
    %c0_i32_0 = arith.constant 0 : i32
    %c0_i32_1 = arith.constant 0 : i32
    %c0_i32_2 = arith.constant 0 : i32
    return %c0_i32, %c0_i32_0, %c0_i32_1 : i32, i32, i32
  }
  func.func @transform_15(%arg0: i32) -> (i32, i32, i32) {
    %c0_i32 = arith.constant 0 : i32
    %c0_i32_0 = arith.constant 0 : i32
    %c0_i32_1 = arith.constant 0 : i32
    %c0_i32_2 = arith.constant 0 : i32
    return %c0_i32, %c0_i32_0, %c0_i32_1 : i32, i32, i32
  }
  func.func @transform_16(%arg0: i32) -> (i32, i32, i32) {
    %c0_i32 = arith.constant 0 : i32
    %c0_i32_0 = arith.constant 0 : i32
    %c0_i32_1 = arith.constant 0 : i32
    %c0_i32_2 = arith.constant 0 : i32
    return %c0_i32, %c0_i32_0, %c0_i32_1 : i32, i32, i32
  }
  func.func @transform_17(%arg0: i32) -> (i32, i32, i32) {
    %c0_i32 = arith.constant 0 : i32
    %c0_i32_0 = arith.constant 0 : i32
    %c0_i32_1 = arith.constant 0 : i32
    %c0_i32_2 = arith.constant 0 : i32
    return %c0_i32, %c0_i32_0, %c0_i32_1 : i32, i32, i32
  }
  func.func @transform_18(%arg0: i32) -> (i32, i32, i32) {
    %c0_i32 = arith.constant 0 : i32
    %c0_i32_0 = arith.constant 0 : i32
    %c0_i32_1 = arith.constant 0 : i32
    %c0_i32_2 = arith.constant 0 : i32
    return %c0_i32, %c0_i32_0, %c0_i32_1 : i32, i32, i32
  }
  func.func @transform_19(%arg0: i32) -> (i32, i32, i32) {
    %c0_i32 = arith.constant 0 : i32
    %c0_i32_0 = arith.constant 0 : i32
    %c0_i32_1 = arith.constant 0 : i32
    %c0_i32_2 = arith.constant 0 : i32
    return %c0_i32, %c0_i32_0, %c0_i32_1 : i32, i32, i32
  }
  func.func @transform_20(%arg0: i32) -> (i32, i32, i32) {
    %c0_i32 = arith.constant 0 : i32
    %c0_i32_0 = arith.constant 0 : i32
    %c0_i32_1 = arith.constant 0 : i32
    %c0_i32_2 = arith.constant 0 : i32
    return %c0_i32, %c0_i32_0, %c0_i32_1 : i32, i32, i32
  }
  func.func @transform_21(%arg0: i32) -> (i32, i32, i32) {
    %c0_i32 = arith.constant 0 : i32
    %c0_i32_0 = arith.constant 0 : i32
    %c0_i32_1 = arith.constant 0 : i32
    return %arg0, %c0_i32, %c0_i32_0 : i32, i32, i32
  }
}

module attributes {stable_mosaic.version = 11 : i64} {
  func.func @_text_stack_kernel(%arg0: i32, %arg1: memref<1x8x32xbf16, #tpu.memory_space<vmem>>, %arg2: memref<1x1x8xf32, #tpu.memory_space<vmem>>, %arg3: memref<1x5x32xbf16, #tpu.memory_space<vmem>>, %arg4: memref<1x1x5xf32, #tpu.memory_space<vmem>>, %arg5: memref<1x32xf32, #tpu.memory_space<vmem>>, %arg6: memref<1x32xf32, #tpu.memory_space<vmem>>, %arg7: memref<1x4x32x8xbf16, #tpu.memory_space<vmem>>, %arg8: memref<1x4x1x8xf32, #tpu.memory_space<vmem>>, %arg9: memref<1x4x32x8xbf16, #tpu.memory_space<vmem>>, %arg10: memref<1x4x1x8xf32, #tpu.memory_space<vmem>>, %arg11: memref<1x4x32x8xbf16, #tpu.memory_space<vmem>>, %arg12: memref<1x4x1x8xf32, #tpu.memory_space<vmem>>, %arg13: memref<1x32x32xbf16, #tpu.memory_space<vmem>>, %arg14: memref<1x1x32xf32, #tpu.memory_space<vmem>>, %arg15: memref<1x1x32xf32, #tpu.memory_space<vmem>>, %arg16: memref<1x1x32xf32, #tpu.memory_space<vmem>>, %arg17: memref<1x4x32x8xbf16, #tpu.memory_space<vmem>>, %arg18: memref<1x4x1x8xf32, #tpu.memory_space<vmem>>, %arg19: memref<1x4x32x8xbf16, #tpu.memory_space<vmem>>, %arg20: memref<1x4x1x8xf32, #tpu.memory_space<vmem>>, %arg21: memref<1x4x32x8xbf16, #tpu.memory_space<vmem>>, %arg22: memref<1x4x1x8xf32, #tpu.memory_space<vmem>>, %arg23: memref<1x32x32xbf16, #tpu.memory_space<vmem>>, %arg24: memref<1x1x32xf32, #tpu.memory_space<vmem>>, %arg25: memref<1x1x32xf32, #tpu.memory_space<vmem>>, %arg26: memref<1x1x32xf32, #tpu.memory_space<vmem>>, %arg27: memref<1x32x64xbf16, #tpu.memory_space<vmem>>, %arg28: memref<1x1x64xf32, #tpu.memory_space<vmem>>, %arg29: memref<1x64x32xbf16, #tpu.memory_space<vmem>>, %arg30: memref<1x1x32xf32, #tpu.memory_space<vmem>>, %arg31: memref<1x1x32xf32, #tpu.memory_space<vmem>>, %arg32: memref<1x1x32xf32, #tpu.memory_space<vmem>>, %arg33: memref<1x8x32xbf16, #tpu.memory_space<vmem>>, %arg34: memref<8x32xf32, #tpu.memory_space<vmem>>) attributes {dimension_semantics = [#tpu.dimension_semantics<parallel>], iteration_bounds = array<i64: 2>, scalar_prefetch = 0 : i64, scratch_operands = 1 : i64, tpu.core_type = #tpu.core_type<tc>, window_params = [{transform_indices = @transform_0, window_bounds = array<i64: 1, 8, 32>}, {transform_indices = @transform_1, window_bounds = array<i64: 1, 1, 8>}, {transform_indices = @transform_2, window_bounds = array<i64: 1, 5, 32>}, {transform_indices = @transform_3, window_bounds = array<i64: 1, 1, 5>}, {pipeline_mode = #tpu.pipeline_mode<synchronous>, transform_indices = @transform_4, window_bounds = array<i64: 1, 32>}, {pipeline_mode = #tpu.pipeline_mode<synchronous>, transform_indices = @transform_5, window_bounds = array<i64: 1, 32>}, {pipeline_mode = #tpu.pipeline_mode<synchronous>, transform_indices = @transform_6, window_bounds = array<i64: 1, 4, 32, 8>}, {pipeline_mode = #tpu.pipeline_mode<synchronous>, transform_indices = @transform_7, window_bounds = array<i64: 1, 4, 1, 8>}, {pipeline_mode = #tpu.pipeline_mode<synchronous>, transform_indices = @transform_8, window_bounds = array<i64: 1, 4, 32, 8>}, {pipeline_mode = #tpu.pipeline_mode<synchronous>, transform_indices = @transform_9, window_bounds = array<i64: 1, 4, 1, 8>}, {pipeline_mode = #tpu.pipeline_mode<synchronous>, transform_indices = @transform_10, window_bounds = array<i64: 1, 4, 32, 8>}, {pipeline_mode = #tpu.pipeline_mode<synchronous>, transform_indices = @transform_11, window_bounds = array<i64: 1, 4, 1, 8>}, {pipeline_mode = #tpu.pipeline_mode<synchronous>, transform_indices = @transform_12, window_bounds = array<i64: 1, 32, 32>}, {pipeline_mode = #tpu.pipeline_mode<synchronous>, transform_indices = @transform_13, window_bounds = array<i64: 1, 1, 32>}, {pipeline_mode = #tpu.pipeline_mode<synchronous>, transform_indices = @transform_14, window_bounds = array<i64: 1, 1, 32>}, {pipeline_mode = #tpu.pipeline_mode<synchronous>, transform_indices = @transform_15, window_bounds = array<i64: 1, 1, 32>}, {pipeline_mode = #tpu.pipeline_mode<synchronous>, transform_indices = @transform_16, window_bounds = array<i64: 1, 4, 32, 8>}, {pipeline_mode = #tpu.pipeline_mode<synchronous>, transform_indices = @transform_17, window_bounds = array<i64: 1, 4, 1, 8>}, {pipeline_mode = #tpu.pipeline_mode<synchronous>, transform_indices = @transform_18, window_bounds = array<i64: 1, 4, 32, 8>}, {pipeline_mode = #tpu.pipeline_mode<synchronous>, transform_indices = @transform_19, window_bounds = array<i64: 1, 4, 1, 8>}, {pipeline_mode = #tpu.pipeline_mode<synchronous>, transform_indices = @transform_20, window_bounds = array<i64: 1, 4, 32, 8>}, {pipeline_mode = #tpu.pipeline_mode<synchronous>, transform_indices = @transform_21, window_bounds = array<i64: 1, 4, 1, 8>}, {pipeline_mode = #tpu.pipeline_mode<synchronous>, transform_indices = @transform_22, window_bounds = array<i64: 1, 32, 32>}, {pipeline_mode = #tpu.pipeline_mode<synchronous>, transform_indices = @transform_23, window_bounds = array<i64: 1, 1, 32>}, {pipeline_mode = #tpu.pipeline_mode<synchronous>, transform_indices = @transform_24, window_bounds = array<i64: 1, 1, 32>}, {pipeline_mode = #tpu.pipeline_mode<synchronous>, transform_indices = @transform_25, window_bounds = array<i64: 1, 1, 32>}, {pipeline_mode = #tpu.pipeline_mode<synchronous>, transform_indices = @transform_26, window_bounds = array<i64: 1, 32, 64>}, {pipeline_mode = #tpu.pipeline_mode<synchronous>, transform_indices = @transform_27, window_bounds = array<i64: 1, 1, 64>}, {pipeline_mode = #tpu.pipeline_mode<synchronous>, transform_indices = @transform_28, window_bounds = array<i64: 1, 64, 32>}, {pipeline_mode = #tpu.pipeline_mode<synchronous>, transform_indices = @transform_29, window_bounds = array<i64: 1, 1, 32>}, {pipeline_mode = #tpu.pipeline_mode<synchronous>, transform_indices = @transform_30, window_bounds = array<i64: 1, 1, 32>}, {pipeline_mode = #tpu.pipeline_mode<synchronous>, transform_indices = @transform_31, window_bounds = array<i64: 1, 1, 32>}, {transform_indices = @transform_32, window_bounds = array<i64: 1, 8, 32>}]} {
    %c0 = arith.constant 0 : index
    %c0_0 = arith.constant 0 : index
    %c0_1 = arith.constant 0 : index
    %0 = vector.load %arg1[%c0, %c0_0, %c0_1] : memref<1x8x32xbf16, #tpu.memory_space<vmem>>, vector<1x8x32xbf16>
    %1 = vector.shape_cast %0 : vector<1x8x32xbf16> to vector<8x32xbf16>
    %2 = arith.extf %1 : vector<8x32xbf16> to vector<8x32xf32>
    %c0_2 = arith.constant 0 : index
    %c0_3 = arith.constant 0 : index
    %3 = vector.load %arg5[%c0_2, %c0_3] : memref<1x32xf32, #tpu.memory_space<vmem>>, vector<1x32xf32>
    %c0_4 = arith.constant 0 : index
    %c0_5 = arith.constant 0 : index
    %4 = vector.load %arg6[%c0_4, %c0_5] : memref<1x32xf32, #tpu.memory_space<vmem>>, vector<1x32xf32>
    %cst = arith.constant dense<0.000000e+00> : vector<8xf32>
    %5 = vector.multi_reduction <add>, %2, %cst [1] : vector<8x32xf32> to vector<8xf32>
    %6 = vector.shape_cast %5 : vector<8xf32> to vector<8x1xf32>
    %cst_6 = arith.constant 3.200000e+01 : f32
    %7 = vector.broadcast %cst_6 : f32 to vector<8x1xf32>
    %8 = arith.divf %6, %7 : vector<8x1xf32>
    %9 = vector.broadcast %8 : vector<8x1xf32> to vector<8x32xf32>
    %10 = arith.subf %2, %9 : vector<8x32xf32>
    %11 = arith.mulf %10, %10 : vector<8x32xf32>
    %cst_7 = arith.constant dense<0.000000e+00> : vector<8xf32>
    %12 = vector.multi_reduction <add>, %11, %cst_7 [1] : vector<8x32xf32> to vector<8xf32>
    %13 = vector.shape_cast %12 : vector<8xf32> to vector<8x1xf32>
    %cst_8 = arith.constant 3.200000e+01 : f32
    %14 = vector.broadcast %cst_8 : f32 to vector<8x1xf32>
    %15 = arith.divf %13, %14 : vector<8x1xf32>
    %16 = vector.broadcast %8 : vector<8x1xf32> to vector<8x32xf32>
    %17 = arith.subf %2, %16 : vector<8x32xf32>
    %cst_9 = arith.constant 9.99999996E-13 : f32
    %18 = vector.broadcast %cst_9 : f32 to vector<8x1xf32>
    %19 = arith.addf %15, %18 : vector<8x1xf32>
    %20 = math.rsqrt %19 : vector<8x1xf32>
    %21 = vector.broadcast %20 : vector<8x1xf32> to vector<8x32xf32>
    %22 = arith.mulf %17, %21 : vector<8x32xf32>
    %23 = vector.broadcast %3 : vector<1x32xf32> to vector<8x32xf32>
    %24 = arith.mulf %22, %23 : vector<8x32xf32>
    %25 = vector.broadcast %4 : vector<1x32xf32> to vector<8x32xf32>
    %26 = arith.addf %24, %25 : vector<8x32xf32>
    %c0_10 = arith.constant 0 : index
    %c0_11 = arith.constant 0 : index
    %c0_12 = arith.constant 0 : index
    %27 = vector.load %arg2[%c0_10, %c0_11, %c0_12] : memref<1x1x8xf32, #tpu.memory_space<vmem>>, vector<1x1x8xf32>
    %28 = vector.shape_cast %27 : vector<1x1x8xf32> to vector<1x8xf32>
    %cst_13 = arith.constant 1.000000e+00 : f32
    %29 = vector.broadcast %cst_13 : f32 to vector<1x8xf32>
    %30 = arith.subf %29, %28 : vector<1x8xf32>
    %cst_14 = arith.constant -1.000000e+04 : f32
    %31 = vector.broadcast %cst_14 : f32 to vector<1x8xf32>
    %32 = arith.mulf %30, %31 : vector<1x8xf32>
    %c0_15 = arith.constant 0 : index
    %c0_16 = arith.constant 0 : index
    %c0_17 = arith.constant 0 : index
    %33 = vector.load %arg3[%c0_15, %c0_16, %c0_17] : memref<1x5x32xbf16, #tpu.memory_space<vmem>>, vector<1x5x32xbf16>
    %34 = vector.shape_cast %33 : vector<1x5x32xbf16> to vector<5x32xbf16>
    %35 = arith.extf %34 : vector<5x32xbf16> to vector<5x32xf32>
    %c0_18 = arith.constant 0 : index
    %c0_19 = arith.constant 0 : index
    %c0_20 = arith.constant 0 : index
    %c0_21 = arith.constant 0 : index
    %36 = vector.load %arg7[%c0_18, %c0_19, %c0_20, %c0_21] : memref<1x4x32x8xbf16, #tpu.memory_space<vmem>>, vector<1x4x32x8xbf16>
    %37 = vector.shape_cast %36 : vector<1x4x32x8xbf16> to vector<4x32x8xbf16>
    %c0_22 = arith.constant 0 : index
    %c0_23 = arith.constant 0 : index
    %c0_24 = arith.constant 0 : index
    %c0_25 = arith.constant 0 : index
    %38 = vector.load %arg8[%c0_22, %c0_23, %c0_24, %c0_25] : memref<1x4x1x8xf32, #tpu.memory_space<vmem>>, vector<1x4x1x8xf32>
    %39 = vector.shape_cast %38 : vector<1x4x1x8xf32> to vector<4x1x8xf32>
    %c0_26 = arith.constant 0 : index
    %c0_27 = arith.constant 0 : index
    %c0_28 = arith.constant 0 : index
    %c0_29 = arith.constant 0 : index
    %40 = vector.load %arg9[%c0_26, %c0_27, %c0_28, %c0_29] : memref<1x4x32x8xbf16, #tpu.memory_space<vmem>>, vector<1x4x32x8xbf16>
    %41 = vector.shape_cast %40 : vector<1x4x32x8xbf16> to vector<4x32x8xbf16>
    %c0_30 = arith.constant 0 : index
    %c0_31 = arith.constant 0 : index
    %c0_32 = arith.constant 0 : index
    %c0_33 = arith.constant 0 : index
    %42 = vector.load %arg10[%c0_30, %c0_31, %c0_32, %c0_33] : memref<1x4x1x8xf32, #tpu.memory_space<vmem>>, vector<1x4x1x8xf32>
    %43 = vector.shape_cast %42 : vector<1x4x1x8xf32> to vector<4x1x8xf32>
    %c0_34 = arith.constant 0 : index
    %c0_35 = arith.constant 0 : index
    %c0_36 = arith.constant 0 : index
    %c0_37 = arith.constant 0 : index
    %44 = vector.load %arg11[%c0_34, %c0_35, %c0_36, %c0_37] : memref<1x4x32x8xbf16, #tpu.memory_space<vmem>>, vector<1x4x32x8xbf16>
    %45 = vector.shape_cast %44 : vector<1x4x32x8xbf16> to vector<4x32x8xbf16>
    %c0_38 = arith.constant 0 : index
    %c0_39 = arith.constant 0 : index
    %c0_40 = arith.constant 0 : index
    %c0_41 = arith.constant 0 : index
    %46 = vector.load %arg12[%c0_38, %c0_39, %c0_40, %c0_41] : memref<1x4x1x8xf32, #tpu.memory_space<vmem>>, vector<1x4x1x8xf32>
    %47 = vector.shape_cast %46 : vector<1x4x1x8xf32> to vector<4x1x8xf32>
    %c0_42 = arith.constant 0 : index
    %c0_43 = arith.constant 0 : index
    %c0_44 = arith.constant 0 : index
    %48 = vector.load %arg13[%c0_42, %c0_43, %c0_44] : memref<1x32x32xbf16, #tpu.memory_space<vmem>>, vector<1x32x32xbf16>
    %49 = vector.shape_cast %48 : vector<1x32x32xbf16> to vector<32x32xbf16>
    %c0_45 = arith.constant 0 : index
    %c0_46 = arith.constant 0 : index
    %c0_47 = arith.constant 0 : index
    %50 = vector.load %arg14[%c0_45, %c0_46, %c0_47] : memref<1x1x32xf32, #tpu.memory_space<vmem>>, vector<1x1x32xf32>
    %51 = vector.shape_cast %50 : vector<1x1x32xf32> to vector<1x32xf32>
    %52 = vector.extract_strided_slice %37 {offsets = [0, 0, 0], sizes = [1, 32, 8], strides = [1, 1, 1]} : vector<4x32x8xbf16> to vector<1x32x8xbf16>
    %53 = vector.shape_cast %52 : vector<1x32x8xbf16> to vector<32x8xbf16>
    %54 = arith.truncf %26 : vector<8x32xf32> to vector<8x32xbf16>
    %cst_48 = arith.constant dense<0.000000e+00> : vector<8x8xf32>
    %55 = tpu.matmul %54, %53, %cst_48 {dimension_numbers = #tpu.dot_dimension_numbers<[1], [0], [0], [1], [0, 0, 1, 1], [], []>} : vector<8x32xbf16>, vector<32x8xbf16>, vector<8x8xf32> -> vector<8x8xf32>
    %56 = vector.extract_strided_slice %39 {offsets = [0, 0, 0], sizes = [1, 1, 8], strides = [1, 1, 1]} : vector<4x1x8xf32> to vector<1x1x8xf32>
    %57 = vector.shape_cast %56 : vector<1x1x8xf32> to vector<1x8xf32>
    %58 = vector.broadcast %57 : vector<1x8xf32> to vector<8x8xf32>
    %59 = arith.addf %55, %58 : vector<8x8xf32>
    %60 = vector.extract_strided_slice %41 {offsets = [0, 0, 0], sizes = [1, 32, 8], strides = [1, 1, 1]} : vector<4x32x8xbf16> to vector<1x32x8xbf16>
    %61 = vector.shape_cast %60 : vector<1x32x8xbf16> to vector<32x8xbf16>
    %62 = arith.truncf %26 : vector<8x32xf32> to vector<8x32xbf16>
    %cst_49 = arith.constant dense<0.000000e+00> : vector<8x8xf32>
    %63 = tpu.matmul %62, %61, %cst_49 {dimension_numbers = #tpu.dot_dimension_numbers<[1], [0], [0], [1], [0, 0, 1, 1], [], []>} : vector<8x32xbf16>, vector<32x8xbf16>, vector<8x8xf32> -> vector<8x8xf32>
    %64 = vector.extract_strided_slice %43 {offsets = [0, 0, 0], sizes = [1, 1, 8], strides = [1, 1, 1]} : vector<4x1x8xf32> to vector<1x1x8xf32>
    %65 = vector.shape_cast %64 : vector<1x1x8xf32> to vector<1x8xf32>
    %66 = vector.broadcast %65 : vector<1x8xf32> to vector<8x8xf32>
    %67 = arith.addf %63, %66 : vector<8x8xf32>
    %68 = vector.extract_strided_slice %45 {offsets = [0, 0, 0], sizes = [1, 32, 8], strides = [1, 1, 1]} : vector<4x32x8xbf16> to vector<1x32x8xbf16>
    %69 = vector.shape_cast %68 : vector<1x32x8xbf16> to vector<32x8xbf16>
    %70 = arith.truncf %26 : vector<8x32xf32> to vector<8x32xbf16>
    %cst_50 = arith.constant dense<0.000000e+00> : vector<8x8xf32>
    %71 = tpu.matmul %70, %69, %cst_50 {dimension_numbers = #tpu.dot_dimension_numbers<[1], [0], [0], [1], [0, 0, 1, 1], [], []>} : vector<8x32xbf16>, vector<32x8xbf16>, vector<8x8xf32> -> vector<8x8xf32>
    %72 = vector.extract_strided_slice %47 {offsets = [0, 0, 0], sizes = [1, 1, 8], strides = [1, 1, 1]} : vector<4x1x8xf32> to vector<1x1x8xf32>
    %73 = vector.shape_cast %72 : vector<1x1x8xf32> to vector<1x8xf32>
    %74 = vector.broadcast %73 : vector<1x8xf32> to vector<8x8xf32>
    %75 = arith.addf %71, %74 : vector<8x8xf32>
    %76 = arith.truncf %59 : vector<8x8xf32> to vector<8x8xbf16>
    %77 = arith.truncf %67 : vector<8x8xf32> to vector<8x8xbf16>
    %cst_51 = arith.constant dense<0.000000e+00> : vector<8x8xf32>
    %78 = tpu.matmul %76, %77, %cst_51 {dimension_numbers = #tpu.dot_dimension_numbers<[1], [1], [0], [0], [0, 0, 1, 0], [], []>} : vector<8x8xbf16>, vector<8x8xbf16>, vector<8x8xf32> -> vector<8x8xf32>
    %cst_52 = arith.constant 0.353553385 : f32
    %79 = vector.broadcast %cst_52 : f32 to vector<8x8xf32>
    %80 = arith.mulf %78, %79 : vector<8x8xf32>
    %81 = vector.broadcast %32 : vector<1x8xf32> to vector<8x8xf32>
    %82 = arith.addf %80, %81 : vector<8x8xf32>
    %cst_53 = arith.constant dense<0xFF800000> : vector<8xf32>
    %83 = vector.multi_reduction <maximumf>, %82, %cst_53 [1] : vector<8x8xf32> to vector<8xf32>
    %84 = vector.shape_cast %83 : vector<8xf32> to vector<8x1xf32>
    %85 = vector.broadcast %84 : vector<8x1xf32> to vector<8x8xf32>
    %86 = arith.subf %82, %85 : vector<8x8xf32>
    %87 = math.exp %86 : vector<8x8xf32>
    %cst_54 = arith.constant dense<0.000000e+00> : vector<8xf32>
    %88 = vector.multi_reduction <add>, %87, %cst_54 [1] : vector<8x8xf32> to vector<8xf32>
    %89 = vector.shape_cast %88 : vector<8xf32> to vector<8x1xf32>
    %90 = tpu.reciprocal %89 {approx = true} : vector<8x1xf32> -> vector<8x1xf32>
    %91 = vector.broadcast %90 : vector<8x1xf32> to vector<8x8xf32>
    %92 = arith.mulf %87, %91 : vector<8x8xf32>
    %93 = arith.truncf %92 : vector<8x8xf32> to vector<8x8xbf16>
    %94 = arith.truncf %75 : vector<8x8xf32> to vector<8x8xbf16>
    %cst_55 = arith.constant dense<0.000000e+00> : vector<8x8xf32>
    %95 = tpu.matmul %93, %94, %cst_55 {dimension_numbers = #tpu.dot_dimension_numbers<[1], [0], [0], [1], [0, 0, 1, 1], [], []>} : vector<8x8xbf16>, vector<8x8xbf16>, vector<8x8xf32> -> vector<8x8xf32>
    %c0_56 = arith.constant 0 : index
    %c0_57 = arith.constant 0 : index
    %96 = vector.load %arg34[%c0_56, %c0_57] : memref<8x32xf32, #tpu.memory_space<vmem>>, vector<8x8xf32>
    tpu.vector_store %arg34[%c0_56, %c0_57], %95 {strides = array<i32>} : memref<8x32xf32, #tpu.memory_space<vmem>>, vector<8x8xf32>,
    %97 = vector.extract_strided_slice %37 {offsets = [1, 0, 0], sizes = [1, 32, 8], strides = [1, 1, 1]} : vector<4x32x8xbf16> to vector<1x32x8xbf16>
    %98 = vector.shape_cast %97 : vector<1x32x8xbf16> to vector<32x8xbf16>
    %99 = arith.truncf %26 : vector<8x32xf32> to vector<8x32xbf16>
    %cst_58 = arith.constant dense<0.000000e+00> : vector<8x8xf32>
    %100 = tpu.matmul %99, %98, %cst_58 {dimension_numbers = #tpu.dot_dimension_numbers<[1], [0], [0], [1], [0, 0, 1, 1], [], []>} : vector<8x32xbf16>, vector<32x8xbf16>, vector<8x8xf32> -> vector<8x8xf32>
    %101 = vector.extract_strided_slice %39 {offsets = [1, 0, 0], sizes = [1, 1, 8], strides = [1, 1, 1]} : vector<4x1x8xf32> to vector<1x1x8xf32>
    %102 = vector.shape_cast %101 : vector<1x1x8xf32> to vector<1x8xf32>
    %103 = vector.broadcast %102 : vector<1x8xf32> to vector<8x8xf32>
    %104 = arith.addf %100, %103 : vector<8x8xf32>
    %105 = vector.extract_strided_slice %41 {offsets = [1, 0, 0], sizes = [1, 32, 8], strides = [1, 1, 1]} : vector<4x32x8xbf16> to vector<1x32x8xbf16>
    %106 = vector.shape_cast %105 : vector<1x32x8xbf16> to vector<32x8xbf16>
    %107 = arith.truncf %26 : vector<8x32xf32> to vector<8x32xbf16>
    %cst_59 = arith.constant dense<0.000000e+00> : vector<8x8xf32>
    %108 = tpu.matmul %107, %106, %cst_59 {dimension_numbers = #tpu.dot_dimension_numbers<[1], [0], [0], [1], [0, 0, 1, 1], [], []>} : vector<8x32xbf16>, vector<32x8xbf16>, vector<8x8xf32> -> vector<8x8xf32>
    %109 = vector.extract_strided_slice %43 {offsets = [1, 0, 0], sizes = [1, 1, 8], strides = [1, 1, 1]} : vector<4x1x8xf32> to vector<1x1x8xf32>
    %110 = vector.shape_cast %109 : vector<1x1x8xf32> to vector<1x8xf32>
    %111 = vector.broadcast %110 : vector<1x8xf32> to vector<8x8xf32>
    %112 = arith.addf %108, %111 : vector<8x8xf32>
    %113 = vector.extract_strided_slice %45 {offsets = [1, 0, 0], sizes = [1, 32, 8], strides = [1, 1, 1]} : vector<4x32x8xbf16> to vector<1x32x8xbf16>
    %114 = vector.shape_cast %113 : vector<1x32x8xbf16> to vector<32x8xbf16>
    %115 = arith.truncf %26 : vector<8x32xf32> to vector<8x32xbf16>
    %cst_60 = arith.constant dense<0.000000e+00> : vector<8x8xf32>
    %116 = tpu.matmul %115, %114, %cst_60 {dimension_numbers = #tpu.dot_dimension_numbers<[1], [0], [0], [1], [0, 0, 1, 1], [], []>} : vector<8x32xbf16>, vector<32x8xbf16>, vector<8x8xf32> -> vector<8x8xf32>
    %117 = vector.extract_strided_slice %47 {offsets = [1, 0, 0], sizes = [1, 1, 8], strides = [1, 1, 1]} : vector<4x1x8xf32> to vector<1x1x8xf32>
    %118 = vector.shape_cast %117 : vector<1x1x8xf32> to vector<1x8xf32>
    %119 = vector.broadcast %118 : vector<1x8xf32> to vector<8x8xf32>
    %120 = arith.addf %116, %119 : vector<8x8xf32>
    %121 = arith.truncf %104 : vector<8x8xf32> to vector<8x8xbf16>
    %122 = arith.truncf %112 : vector<8x8xf32> to vector<8x8xbf16>
    %cst_61 = arith.constant dense<0.000000e+00> : vector<8x8xf32>
    %123 = tpu.matmul %121, %122, %cst_61 {dimension_numbers = #tpu.dot_dimension_numbers<[1], [1], [0], [0], [0, 0, 1, 0], [], []>} : vector<8x8xbf16>, vector<8x8xbf16>, vector<8x8xf32> -> vector<8x8xf32>
    %cst_62 = arith.constant 0.353553385 : f32
    %124 = vector.broadcast %cst_62 : f32 to vector<8x8xf32>
    %125 = arith.mulf %123, %124 : vector<8x8xf32>
    %126 = vector.broadcast %32 : vector<1x8xf32> to vector<8x8xf32>
    %127 = arith.addf %125, %126 : vector<8x8xf32>
    %cst_63 = arith.constant dense<0xFF800000> : vector<8xf32>
    %128 = vector.multi_reduction <maximumf>, %127, %cst_63 [1] : vector<8x8xf32> to vector<8xf32>
    %129 = vector.shape_cast %128 : vector<8xf32> to vector<8x1xf32>
    %130 = vector.broadcast %129 : vector<8x1xf32> to vector<8x8xf32>
    %131 = arith.subf %127, %130 : vector<8x8xf32>
    %132 = math.exp %131 : vector<8x8xf32>
    %cst_64 = arith.constant dense<0.000000e+00> : vector<8xf32>
    %133 = vector.multi_reduction <add>, %132, %cst_64 [1] : vector<8x8xf32> to vector<8xf32>
    %134 = vector.shape_cast %133 : vector<8xf32> to vector<8x1xf32>
    %135 = tpu.reciprocal %134 {approx = true} : vector<8x1xf32> -> vector<8x1xf32>
    %136 = vector.broadcast %135 : vector<8x1xf32> to vector<8x8xf32>
    %137 = arith.mulf %132, %136 : vector<8x8xf32>
    %138 = arith.truncf %137 : vector<8x8xf32> to vector<8x8xbf16>
    %139 = arith.truncf %120 : vector<8x8xf32> to vector<8x8xbf16>
    %cst_65 = arith.constant dense<0.000000e+00> : vector<8x8xf32>
    %140 = tpu.matmul %138, %139, %cst_65 {dimension_numbers = #tpu.dot_dimension_numbers<[1], [0], [0], [1], [0, 0, 1, 1], [], []>} : vector<8x8xbf16>, vector<8x8xbf16>, vector<8x8xf32> -> vector<8x8xf32>
    %c0_66 = arith.constant 0 : index
    %c8 = arith.constant 8 : index
    %141 = vector.load %arg34[%c0_66, %c8] : memref<8x32xf32, #tpu.memory_space<vmem>>, vector<8x8xf32>
    tpu.vector_store %arg34[%c0_66, %c8], %140 {strides = array<i32>} : memref<8x32xf32, #tpu.memory_space<vmem>>, vector<8x8xf32>,
    %142 = vector.extract_strided_slice %37 {offsets = [2, 0, 0], sizes = [1, 32, 8], strides = [1, 1, 1]} : vector<4x32x8xbf16> to vector<1x32x8xbf16>
    %143 = vector.shape_cast %142 : vector<1x32x8xbf16> to vector<32x8xbf16>
    %144 = arith.truncf %26 : vector<8x32xf32> to vector<8x32xbf16>
    %cst_67 = arith.constant dense<0.000000e+00> : vector<8x8xf32>
    %145 = tpu.matmul %144, %143, %cst_67 {dimension_numbers = #tpu.dot_dimension_numbers<[1], [0], [0], [1], [0, 0, 1, 1], [], []>} : vector<8x32xbf16>, vector<32x8xbf16>, vector<8x8xf32> -> vector<8x8xf32>
    %146 = vector.extract_strided_slice %39 {offsets = [2, 0, 0], sizes = [1, 1, 8], strides = [1, 1, 1]} : vector<4x1x8xf32> to vector<1x1x8xf32>
    %147 = vector.shape_cast %146 : vector<1x1x8xf32> to vector<1x8xf32>
    %148 = vector.broadcast %147 : vector<1x8xf32> to vector<8x8xf32>
    %149 = arith.addf %145, %148 : vector<8x8xf32>
    %150 = vector.extract_strided_slice %41 {offsets = [2, 0, 0], sizes = [1, 32, 8], strides = [1, 1, 1]} : vector<4x32x8xbf16> to vector<1x32x8xbf16>
    %151 = vector.shape_cast %150 : vector<1x32x8xbf16> to vector<32x8xbf16>
    %152 = arith.truncf %26 : vector<8x32xf32> to vector<8x32xbf16>
    %cst_68 = arith.constant dense<0.000000e+00> : vector<8x8xf32>
    %153 = tpu.matmul %152, %151, %cst_68 {dimension_numbers = #tpu.dot_dimension_numbers<[1], [0], [0], [1], [0, 0, 1, 1], [], []>} : vector<8x32xbf16>, vector<32x8xbf16>, vector<8x8xf32> -> vector<8x8xf32>
    %154 = vector.extract_strided_slice %43 {offsets = [2, 0, 0], sizes = [1, 1, 8], strides = [1, 1, 1]} : vector<4x1x8xf32> to vector<1x1x8xf32>
    %155 = vector.shape_cast %154 : vector<1x1x8xf32> to vector<1x8xf32>
    %156 = vector.broadcast %155 : vector<1x8xf32> to vector<8x8xf32>
    %157 = arith.addf %153, %156 : vector<8x8xf32>
    %158 = vector.extract_strided_slice %45 {offsets = [2, 0, 0], sizes = [1, 32, 8], strides = [1, 1, 1]} : vector<4x32x8xbf16> to vector<1x32x8xbf16>
    %159 = vector.shape_cast %158 : vector<1x32x8xbf16> to vector<32x8xbf16>
    %160 = arith.truncf %26 : vector<8x32xf32> to vector<8x32xbf16>
    %cst_69 = arith.constant dense<0.000000e+00> : vector<8x8xf32>
    %161 = tpu.matmul %160, %159, %cst_69 {dimension_numbers = #tpu.dot_dimension_numbers<[1], [0], [0], [1], [0, 0, 1, 1], [], []>} : vector<8x32xbf16>, vector<32x8xbf16>, vector<8x8xf32> -> vector<8x8xf32>
    %162 = vector.extract_strided_slice %47 {offsets = [2, 0, 0], sizes = [1, 1, 8], strides = [1, 1, 1]} : vector<4x1x8xf32> to vector<1x1x8xf32>
    %163 = vector.shape_cast %162 : vector<1x1x8xf32> to vector<1x8xf32>
    %164 = vector.broadcast %163 : vector<1x8xf32> to vector<8x8xf32>
    %165 = arith.addf %161, %164 : vector<8x8xf32>
    %166 = arith.truncf %149 : vector<8x8xf32> to vector<8x8xbf16>
    %167 = arith.truncf %157 : vector<8x8xf32> to vector<8x8xbf16>
    %cst_70 = arith.constant dense<0.000000e+00> : vector<8x8xf32>
    %168 = tpu.matmul %166, %167, %cst_70 {dimension_numbers = #tpu.dot_dimension_numbers<[1], [1], [0], [0], [0, 0, 1, 0], [], []>} : vector<8x8xbf16>, vector<8x8xbf16>, vector<8x8xf32> -> vector<8x8xf32>
    %cst_71 = arith.constant 0.353553385 : f32
    %169 = vector.broadcast %cst_71 : f32 to vector<8x8xf32>
    %170 = arith.mulf %168, %169 : vector<8x8xf32>
    %171 = vector.broadcast %32 : vector<1x8xf32> to vector<8x8xf32>
    %172 = arith.addf %170, %171 : vector<8x8xf32>
    %cst_72 = arith.constant dense<0xFF800000> : vector<8xf32>
    %173 = vector.multi_reduction <maximumf>, %172, %cst_72 [1] : vector<8x8xf32> to vector<8xf32>
    %174 = vector.shape_cast %173 : vector<8xf32> to vector<8x1xf32>
    %175 = vector.broadcast %174 : vector<8x1xf32> to vector<8x8xf32>
    %176 = arith.subf %172, %175 : vector<8x8xf32>
    %177 = math.exp %176 : vector<8x8xf32>
    %cst_73 = arith.constant dense<0.000000e+00> : vector<8xf32>
    %178 = vector.multi_reduction <add>, %177, %cst_73 [1] : vector<8x8xf32> to vector<8xf32>
    %179 = vector.shape_cast %178 : vector<8xf32> to vector<8x1xf32>
    %180 = tpu.reciprocal %179 {approx = true} : vector<8x1xf32> -> vector<8x1xf32>
    %181 = vector.broadcast %180 : vector<8x1xf32> to vector<8x8xf32>
    %182 = arith.mulf %177, %181 : vector<8x8xf32>
    %183 = arith.truncf %182 : vector<8x8xf32> to vector<8x8xbf16>
    %184 = arith.truncf %165 : vector<8x8xf32> to vector<8x8xbf16>
    %cst_74 = arith.constant dense<0.000000e+00> : vector<8x8xf32>
    %185 = tpu.matmul %183, %184, %cst_74 {dimension_numbers = #tpu.dot_dimension_numbers<[1], [0], [0], [1], [0, 0, 1, 1], [], []>} : vector<8x8xbf16>, vector<8x8xbf16>, vector<8x8xf32> -> vector<8x8xf32>
    %c0_75 = arith.constant 0 : index
    %c16 = arith.constant 16 : index
    %186 = vector.load %arg34[%c0_75, %c16] : memref<8x32xf32, #tpu.memory_space<vmem>>, vector<8x8xf32>
    tpu.vector_store %arg34[%c0_75, %c16], %185 {strides = array<i32>} : memref<8x32xf32, #tpu.memory_space<vmem>>, vector<8x8xf32>,
    %187 = vector.extract_strided_slice %37 {offsets = [3, 0, 0], sizes = [1, 32, 8], strides = [1, 1, 1]} : vector<4x32x8xbf16> to vector<1x32x8xbf16>
    %188 = vector.shape_cast %187 : vector<1x32x8xbf16> to vector<32x8xbf16>
    %189 = arith.truncf %26 : vector<8x32xf32> to vector<8x32xbf16>
    %cst_76 = arith.constant dense<0.000000e+00> : vector<8x8xf32>
    %190 = tpu.matmul %189, %188, %cst_76 {dimension_numbers = #tpu.dot_dimension_numbers<[1], [0], [0], [1], [0, 0, 1, 1], [], []>} : vector<8x32xbf16>, vector<32x8xbf16>, vector<8x8xf32> -> vector<8x8xf32>
    %191 = vector.extract_strided_slice %39 {offsets = [3, 0, 0], sizes = [1, 1, 8], strides = [1, 1, 1]} : vector<4x1x8xf32> to vector<1x1x8xf32>
    %192 = vector.shape_cast %191 : vector<1x1x8xf32> to vector<1x8xf32>
    %193 = vector.broadcast %192 : vector<1x8xf32> to vector<8x8xf32>
    %194 = arith.addf %190, %193 : vector<8x8xf32>
    %195 = vector.extract_strided_slice %41 {offsets = [3, 0, 0], sizes = [1, 32, 8], strides = [1, 1, 1]} : vector<4x32x8xbf16> to vector<1x32x8xbf16>
    %196 = vector.shape_cast %195 : vector<1x32x8xbf16> to vector<32x8xbf16>
    %197 = arith.truncf %26 : vector<8x32xf32> to vector<8x32xbf16>
    %cst_77 = arith.constant dense<0.000000e+00> : vector<8x8xf32>
    %198 = tpu.matmul %197, %196, %cst_77 {dimension_numbers = #tpu.dot_dimension_numbers<[1], [0], [0], [1], [0, 0, 1, 1], [], []>} : vector<8x32xbf16>, vector<32x8xbf16>, vector<8x8xf32> -> vector<8x8xf32>
    %199 = vector.extract_strided_slice %43 {offsets = [3, 0, 0], sizes = [1, 1, 8], strides = [1, 1, 1]} : vector<4x1x8xf32> to vector<1x1x8xf32>
    %200 = vector.shape_cast %199 : vector<1x1x8xf32> to vector<1x8xf32>
    %201 = vector.broadcast %200 : vector<1x8xf32> to vector<8x8xf32>
    %202 = arith.addf %198, %201 : vector<8x8xf32>
    %203 = vector.extract_strided_slice %45 {offsets = [3, 0, 0], sizes = [1, 32, 8], strides = [1, 1, 1]} : vector<4x32x8xbf16> to vector<1x32x8xbf16>
    %204 = vector.shape_cast %203 : vector<1x32x8xbf16> to vector<32x8xbf16>
    %205 = arith.truncf %26 : vector<8x32xf32> to vector<8x32xbf16>
    %cst_78 = arith.constant dense<0.000000e+00> : vector<8x8xf32>
    %206 = tpu.matmul %205, %204, %cst_78 {dimension_numbers = #tpu.dot_dimension_numbers<[1], [0], [0], [1], [0, 0, 1, 1], [], []>} : vector<8x32xbf16>, vector<32x8xbf16>, vector<8x8xf32> -> vector<8x8xf32>
    %207 = vector.extract_strided_slice %47 {offsets = [3, 0, 0], sizes = [1, 1, 8], strides = [1, 1, 1]} : vector<4x1x8xf32> to vector<1x1x8xf32>
    %208 = vector.shape_cast %207 : vector<1x1x8xf32> to vector<1x8xf32>
    %209 = vector.broadcast %208 : vector<1x8xf32> to vector<8x8xf32>
    %210 = arith.addf %206, %209 : vector<8x8xf32>
    %211 = arith.truncf %194 : vector<8x8xf32> to vector<8x8xbf16>
    %212 = arith.truncf %202 : vector<8x8xf32> to vector<8x8xbf16>
    %cst_79 = arith.constant dense<0.000000e+00> : vector<8x8xf32>
    %213 = tpu.matmul %211, %212, %cst_79 {dimension_numbers = #tpu.dot_dimension_numbers<[1], [1], [0], [0], [0, 0, 1, 0], [], []>} : vector<8x8xbf16>, vector<8x8xbf16>, vector<8x8xf32> -> vector<8x8xf32>
    %cst_80 = arith.constant 0.353553385 : f32
    %214 = vector.broadcast %cst_80 : f32 to vector<8x8xf32>
    %215 = arith.mulf %213, %214 : vector<8x8xf32>
    %216 = vector.broadcast %32 : vector<1x8xf32> to vector<8x8xf32>
    %217 = arith.addf %215, %216 : vector<8x8xf32>
    %cst_81 = arith.constant dense<0xFF800000> : vector<8xf32>
    %218 = vector.multi_reduction <maximumf>, %217, %cst_81 [1] : vector<8x8xf32> to vector<8xf32>
    %219 = vector.shape_cast %218 : vector<8xf32> to vector<8x1xf32>
    %220 = vector.broadcast %219 : vector<8x1xf32> to vector<8x8xf32>
    %221 = arith.subf %217, %220 : vector<8x8xf32>
    %222 = math.exp %221 : vector<8x8xf32>
    %cst_82 = arith.constant dense<0.000000e+00> : vector<8xf32>
    %223 = vector.multi_reduction <add>, %222, %cst_82 [1] : vector<8x8xf32> to vector<8xf32>
    %224 = vector.shape_cast %223 : vector<8xf32> to vector<8x1xf32>
    %225 = tpu.reciprocal %224 {approx = true} : vector<8x1xf32> -> vector<8x1xf32>
    %226 = vector.broadcast %225 : vector<8x1xf32> to vector<8x8xf32>
    %227 = arith.mulf %222, %226 : vector<8x8xf32>
    %228 = arith.truncf %227 : vector<8x8xf32> to vector<8x8xbf16>
    %229 = arith.truncf %210 : vector<8x8xf32> to vector<8x8xbf16>
    %cst_83 = arith.constant dense<0.000000e+00> : vector<8x8xf32>
    %230 = tpu.matmul %228, %229, %cst_83 {dimension_numbers = #tpu.dot_dimension_numbers<[1], [0], [0], [1], [0, 0, 1, 1], [], []>} : vector<8x8xbf16>, vector<8x8xbf16>, vector<8x8xf32> -> vector<8x8xf32>
    %c0_84 = arith.constant 0 : index
    %c24 = arith.constant 24 : index
    %231 = vector.load %arg34[%c0_84, %c24] : memref<8x32xf32, #tpu.memory_space<vmem>>, vector<8x8xf32>
    tpu.vector_store %arg34[%c0_84, %c24], %230 {strides = array<i32>} : memref<8x32xf32, #tpu.memory_space<vmem>>, vector<8x8xf32>,
    %c0_85 = arith.constant 0 : index
    %c0_86 = arith.constant 0 : index
    %232 = vector.load %arg34[%c0_85, %c0_86] : memref<8x32xf32, #tpu.memory_space<vmem>>, vector<8x32xf32>
    %233 = arith.truncf %232 : vector<8x32xf32> to vector<8x32xbf16>
    %cst_87 = arith.constant dense<0.000000e+00> : vector<8x32xf32>
    %234 = tpu.matmul %233, %49, %cst_87 {dimension_numbers = #tpu.dot_dimension_numbers<[1], [0], [0], [1], [0, 0, 1, 1], [], []>} : vector<8x32xbf16>, vector<32x32xbf16>, vector<8x32xf32> -> vector<8x32xf32>
    %235 = vector.broadcast %51 : vector<1x32xf32> to vector<8x32xf32>
    %236 = arith.addf %234, %235 : vector<8x32xf32>
    %237 = arith.addf %26, %236 : vector<8x32xf32>
    %c0_88 = arith.constant 0 : index
    %c0_89 = arith.constant 0 : index
    %c0_90 = arith.constant 0 : index
    %238 = vector.load %arg15[%c0_88, %c0_89, %c0_90] : memref<1x1x32xf32, #tpu.memory_space<vmem>>, vector<1x1x32xf32>
    %239 = vector.shape_cast %238 : vector<1x1x32xf32> to vector<1x32xf32>
    %c0_91 = arith.constant 0 : index
    %c0_92 = arith.constant 0 : index
    %c0_93 = arith.constant 0 : index
    %240 = vector.load %arg16[%c0_91, %c0_92, %c0_93] : memref<1x1x32xf32, #tpu.memory_space<vmem>>, vector<1x1x32xf32>
    %241 = vector.shape_cast %240 : vector<1x1x32xf32> to vector<1x32xf32>
    %cst_94 = arith.constant dense<0.000000e+00> : vector<8xf32>
    %242 = vector.multi_reduction <add>, %237, %cst_94 [1] : vector<8x32xf32> to vector<8xf32>
    %243 = vector.shape_cast %242 : vector<8xf32> to vector<8x1xf32>
    %cst_95 = arith.constant 3.200000e+01 : f32
    %244 = vector.broadcast %cst_95 : f32 to vector<8x1xf32>
    %245 = arith.divf %243, %244 : vector<8x1xf32>
    %246 = vector.broadcast %245 : vector<8x1xf32> to vector<8x32xf32>
    %247 = arith.subf %237, %246 : vector<8x32xf32>
    %248 = arith.mulf %247, %247 : vector<8x32xf32>
    %cst_96 = arith.constant dense<0.000000e+00> : vector<8xf32>
    %249 = vector.multi_reduction <add>, %248, %cst_96 [1] : vector<8x32xf32> to vector<8xf32>
    %250 = vector.shape_cast %249 : vector<8xf32> to vector<8x1xf32>
    %cst_97 = arith.constant 3.200000e+01 : f32
    %251 = vector.broadcast %cst_97 : f32 to vector<8x1xf32>
    %252 = arith.divf %250, %251 : vector<8x1xf32>
    %253 = vector.broadcast %245 : vector<8x1xf32> to vector<8x32xf32>
    %254 = arith.subf %237, %253 : vector<8x32xf32>
    %cst_98 = arith.constant 9.99999996E-13 : f32
    %255 = vector.broadcast %cst_98 : f32 to vector<8x1xf32>
    %256 = arith.addf %252, %255 : vector<8x1xf32>
    %257 = math.rsqrt %256 : vector<8x1xf32>
    %258 = vector.broadcast %257 : vector<8x1xf32> to vector<8x32xf32>
    %259 = arith.mulf %254, %258 : vector<8x32xf32>
    %260 = vector.broadcast %239 : vector<1x32xf32> to vector<8x32xf32>
    %261 = arith.mulf %259, %260 : vector<8x32xf32>
    %262 = vector.broadcast %241 : vector<1x32xf32> to vector<8x32xf32>
    %263 = arith.addf %261, %262 : vector<8x32xf32>
    %c0_99 = arith.constant 0 : index
    %c0_100 = arith.constant 0 : index
    %c0_101 = arith.constant 0 : index
    %c0_102 = arith.constant 0 : index
    %264 = vector.load %arg17[%c0_99, %c0_100, %c0_101, %c0_102] : memref<1x4x32x8xbf16, #tpu.memory_space<vmem>>, vector<1x4x32x8xbf16>
    %265 = vector.shape_cast %264 : vector<1x4x32x8xbf16> to vector<4x32x8xbf16>
    %c0_103 = arith.constant 0 : index
    %c0_104 = arith.constant 0 : index
    %c0_105 = arith.constant 0 : index
    %c0_106 = arith.constant 0 : index
    %266 = vector.load %arg18[%c0_103, %c0_104, %c0_105, %c0_106] : memref<1x4x1x8xf32, #tpu.memory_space<vmem>>, vector<1x4x1x8xf32>
    %267 = vector.shape_cast %266 : vector<1x4x1x8xf32> to vector<4x1x8xf32>
    %c0_107 = arith.constant 0 : index
    %c0_108 = arith.constant 0 : index
    %c0_109 = arith.constant 0 : index
    %c0_110 = arith.constant 0 : index
    %268 = vector.load %arg19[%c0_107, %c0_108, %c0_109, %c0_110] : memref<1x4x32x8xbf16, #tpu.memory_space<vmem>>, vector<1x4x32x8xbf16>
    %269 = vector.shape_cast %268 : vector<1x4x32x8xbf16> to vector<4x32x8xbf16>
    %c0_111 = arith.constant 0 : index
    %c0_112 = arith.constant 0 : index
    %c0_113 = arith.constant 0 : index
    %c0_114 = arith.constant 0 : index
    %270 = vector.load %arg20[%c0_111, %c0_112, %c0_113, %c0_114] : memref<1x4x1x8xf32, #tpu.memory_space<vmem>>, vector<1x4x1x8xf32>
    %271 = vector.shape_cast %270 : vector<1x4x1x8xf32> to vector<4x1x8xf32>
    %c0_115 = arith.constant 0 : index
    %c0_116 = arith.constant 0 : index
    %c0_117 = arith.constant 0 : index
    %c0_118 = arith.constant 0 : index
    %272 = vector.load %arg21[%c0_115, %c0_116, %c0_117, %c0_118] : memref<1x4x32x8xbf16, #tpu.memory_space<vmem>>, vector<1x4x32x8xbf16>
    %273 = vector.shape_cast %272 : vector<1x4x32x8xbf16> to vector<4x32x8xbf16>
    %c0_119 = arith.constant 0 : index
    %c0_120 = arith.constant 0 : index
    %c0_121 = arith.constant 0 : index
    %c0_122 = arith.constant 0 : index
    %274 = vector.load %arg22[%c0_119, %c0_120, %c0_121, %c0_122] : memref<1x4x1x8xf32, #tpu.memory_space<vmem>>, vector<1x4x1x8xf32>
    %275 = vector.shape_cast %274 : vector<1x4x1x8xf32> to vector<4x1x8xf32>
    %c0_123 = arith.constant 0 : index
    %c0_124 = arith.constant 0 : index
    %c0_125 = arith.constant 0 : index
    %276 = vector.load %arg23[%c0_123, %c0_124, %c0_125] : memref<1x32x32xbf16, #tpu.memory_space<vmem>>, vector<1x32x32xbf16>
    %277 = vector.shape_cast %276 : vector<1x32x32xbf16> to vector<32x32xbf16>
    %c0_126 = arith.constant 0 : index
    %c0_127 = arith.constant 0 : index
    %c0_128 = arith.constant 0 : index
    %278 = vector.load %arg24[%c0_126, %c0_127, %c0_128] : memref<1x1x32xf32, #tpu.memory_space<vmem>>, vector<1x1x32xf32>
    %279 = vector.shape_cast %278 : vector<1x1x32xf32> to vector<1x32xf32>
    %280 = vector.extract_strided_slice %265 {offsets = [0, 0, 0], sizes = [1, 32, 8], strides = [1, 1, 1]} : vector<4x32x8xbf16> to vector<1x32x8xbf16>
    %281 = vector.shape_cast %280 : vector<1x32x8xbf16> to vector<32x8xbf16>
    %282 = arith.truncf %263 : vector<8x32xf32> to vector<8x32xbf16>
    %cst_129 = arith.constant dense<0.000000e+00> : vector<8x8xf32>
    %283 = tpu.matmul %282, %281, %cst_129 {dimension_numbers = #tpu.dot_dimension_numbers<[1], [0], [0], [1], [0, 0, 1, 1], [], []>} : vector<8x32xbf16>, vector<32x8xbf16>, vector<8x8xf32> -> vector<8x8xf32>
    %284 = vector.extract_strided_slice %267 {offsets = [0, 0, 0], sizes = [1, 1, 8], strides = [1, 1, 1]} : vector<4x1x8xf32> to vector<1x1x8xf32>
    %285 = vector.shape_cast %284 : vector<1x1x8xf32> to vector<1x8xf32>
    %286 = vector.broadcast %285 : vector<1x8xf32> to vector<8x8xf32>
    %287 = arith.addf %283, %286 : vector<8x8xf32>
    %288 = vector.extract_strided_slice %269 {offsets = [0, 0, 0], sizes = [1, 32, 8], strides = [1, 1, 1]} : vector<4x32x8xbf16> to vector<1x32x8xbf16>
    %289 = vector.shape_cast %288 : vector<1x32x8xbf16> to vector<32x8xbf16>
    %290 = arith.truncf %35 : vector<5x32xf32> to vector<5x32xbf16>
    %cst_130 = arith.constant dense<0.000000e+00> : vector<5x8xf32>
    %291 = tpu.matmul %290, %289, %cst_130 {dimension_numbers = #tpu.dot_dimension_numbers<[1], [0], [0], [1], [0, 0, 1, 1], [], []>} : vector<5x32xbf16>, vector<32x8xbf16>, vector<5x8xf32> -> vector<5x8xf32>
    %292 = vector.extract_strided_slice %271 {offsets = [0, 0, 0], sizes = [1, 1, 8], strides = [1, 1, 1]} : vector<4x1x8xf32> to vector<1x1x8xf32>
    %293 = vector.shape_cast %292 : vector<1x1x8xf32> to vector<1x8xf32>
    %294 = vector.broadcast %293 : vector<1x8xf32> to vector<5x8xf32>
    %295 = arith.addf %291, %294 : vector<5x8xf32>
    %296 = vector.extract_strided_slice %273 {offsets = [0, 0, 0], sizes = [1, 32, 8], strides = [1, 1, 1]} : vector<4x32x8xbf16> to vector<1x32x8xbf16>
    %297 = vector.shape_cast %296 : vector<1x32x8xbf16> to vector<32x8xbf16>
    %298 = arith.truncf %35 : vector<5x32xf32> to vector<5x32xbf16>
    %cst_131 = arith.constant dense<0.000000e+00> : vector<5x8xf32>
    %299 = tpu.matmul %298, %297, %cst_131 {dimension_numbers = #tpu.dot_dimension_numbers<[1], [0], [0], [1], [0, 0, 1, 1], [], []>} : vector<5x32xbf16>, vector<32x8xbf16>, vector<5x8xf32> -> vector<5x8xf32>
    %300 = vector.extract_strided_slice %275 {offsets = [0, 0, 0], sizes = [1, 1, 8], strides = [1, 1, 1]} : vector<4x1x8xf32> to vector<1x1x8xf32>
    %301 = vector.shape_cast %300 : vector<1x1x8xf32> to vector<1x8xf32>
    %302 = vector.broadcast %301 : vector<1x8xf32> to vector<5x8xf32>
    %303 = arith.addf %299, %302 : vector<5x8xf32>
    %304 = arith.truncf %287 : vector<8x8xf32> to vector<8x8xbf16>
    %305 = arith.truncf %295 : vector<5x8xf32> to vector<5x8xbf16>
    %cst_132 = arith.constant dense<0.000000e+00> : vector<8x5xf32>
    %306 = tpu.matmul %304, %305, %cst_132 {dimension_numbers = #tpu.dot_dimension_numbers<[1], [1], [0], [0], [0, 0, 1, 0], [], []>} : vector<8x8xbf16>, vector<5x8xbf16>, vector<8x5xf32> -> vector<8x5xf32>
    %cst_133 = arith.constant 0.353553385 : f32
    %307 = vector.broadcast %cst_133 : f32 to vector<8x5xf32>
    %308 = arith.mulf %306, %307 : vector<8x5xf32>
    %cst_134 = arith.constant dense<0xFF800000> : vector<8xf32>
    %309 = vector.multi_reduction <maximumf>, %308, %cst_134 [1] : vector<8x5xf32> to vector<8xf32>
    %310 = vector.shape_cast %309 : vector<8xf32> to vector<8x1xf32>
    %311 = vector.broadcast %310 : vector<8x1xf32> to vector<8x5xf32>
    %312 = arith.subf %308, %311 : vector<8x5xf32>
    %313 = math.exp %312 : vector<8x5xf32>
    %cst_135 = arith.constant dense<0.000000e+00> : vector<8xf32>
    %314 = vector.multi_reduction <add>, %313, %cst_135 [1] : vector<8x5xf32> to vector<8xf32>
    %315 = vector.shape_cast %314 : vector<8xf32> to vector<8x1xf32>
    %316 = tpu.reciprocal %315 {approx = true} : vector<8x1xf32> -> vector<8x1xf32>
    %317 = vector.broadcast %316 : vector<8x1xf32> to vector<8x5xf32>
    %318 = arith.mulf %313, %317 : vector<8x5xf32>
    %319 = arith.truncf %318 : vector<8x5xf32> to vector<8x5xbf16>
    %320 = arith.truncf %303 : vector<5x8xf32> to vector<5x8xbf16>
    %cst_136 = arith.constant dense<0.000000e+00> : vector<8x8xf32>
    %321 = tpu.matmul %319, %320, %cst_136 {dimension_numbers = #tpu.dot_dimension_numbers<[1], [0], [0], [1], [0, 0, 1, 1], [], []>} : vector<8x5xbf16>, vector<5x8xbf16>, vector<8x8xf32> -> vector<8x8xf32>
    %c0_137 = arith.constant 0 : index
    %c0_138 = arith.constant 0 : index
    %322 = vector.load %arg34[%c0_137, %c0_138] : memref<8x32xf32, #tpu.memory_space<vmem>>, vector<8x8xf32>
    tpu.vector_store %arg34[%c0_137, %c0_138], %321 {strides = array<i32>} : memref<8x32xf32, #tpu.memory_space<vmem>>, vector<8x8xf32>,
    %323 = vector.extract_strided_slice %265 {offsets = [1, 0, 0], sizes = [1, 32, 8], strides = [1, 1, 1]} : vector<4x32x8xbf16> to vector<1x32x8xbf16>
    %324 = vector.shape_cast %323 : vector<1x32x8xbf16> to vector<32x8xbf16>
    %325 = arith.truncf %263 : vector<8x32xf32> to vector<8x32xbf16>
    %cst_139 = arith.constant dense<0.000000e+00> : vector<8x8xf32>
    %326 = tpu.matmul %325, %324, %cst_139 {dimension_numbers = #tpu.dot_dimension_numbers<[1], [0], [0], [1], [0, 0, 1, 1], [], []>} : vector<8x32xbf16>, vector<32x8xbf16>, vector<8x8xf32> -> vector<8x8xf32>
    %327 = vector.extract_strided_slice %267 {offsets = [1, 0, 0], sizes = [1, 1, 8], strides = [1, 1, 1]} : vector<4x1x8xf32> to vector<1x1x8xf32>
    %328 = vector.shape_cast %327 : vector<1x1x8xf32> to vector<1x8xf32>
    %329 = vector.broadcast %328 : vector<1x8xf32> to vector<8x8xf32>
    %330 = arith.addf %326, %329 : vector<8x8xf32>
    %331 = vector.extract_strided_slice %269 {offsets = [1, 0, 0], sizes = [1, 32, 8], strides = [1, 1, 1]} : vector<4x32x8xbf16> to vector<1x32x8xbf16>
    %332 = vector.shape_cast %331 : vector<1x32x8xbf16> to vector<32x8xbf16>
    %333 = arith.truncf %35 : vector<5x32xf32> to vector<5x32xbf16>
    %cst_140 = arith.constant dense<0.000000e+00> : vector<5x8xf32>
    %334 = tpu.matmul %333, %332, %cst_140 {dimension_numbers = #tpu.dot_dimension_numbers<[1], [0], [0], [1], [0, 0, 1, 1], [], []>} : vector<5x32xbf16>, vector<32x8xbf16>, vector<5x8xf32> -> vector<5x8xf32>
    %335 = vector.extract_strided_slice %271 {offsets = [1, 0, 0], sizes = [1, 1, 8], strides = [1, 1, 1]} : vector<4x1x8xf32> to vector<1x1x8xf32>
    %336 = vector.shape_cast %335 : vector<1x1x8xf32> to vector<1x8xf32>
    %337 = vector.broadcast %336 : vector<1x8xf32> to vector<5x8xf32>
    %338 = arith.addf %334, %337 : vector<5x8xf32>
    %339 = vector.extract_strided_slice %273 {offsets = [1, 0, 0], sizes = [1, 32, 8], strides = [1, 1, 1]} : vector<4x32x8xbf16> to vector<1x32x8xbf16>
    %340 = vector.shape_cast %339 : vector<1x32x8xbf16> to vector<32x8xbf16>
    %341 = arith.truncf %35 : vector<5x32xf32> to vector<5x32xbf16>
    %cst_141 = arith.constant dense<0.000000e+00> : vector<5x8xf32>
    %342 = tpu.matmul %341, %340, %cst_141 {dimension_numbers = #tpu.dot_dimension_numbers<[1], [0], [0], [1], [0, 0, 1, 1], [], []>} : vector<5x32xbf16>, vector<32x8xbf16>, vector<5x8xf32> -> vector<5x8xf32>
    %343 = vector.extract_strided_slice %275 {offsets = [1, 0, 0], sizes = [1, 1, 8], strides = [1, 1, 1]} : vector<4x1x8xf32> to vector<1x1x8xf32>
    %344 = vector.shape_cast %343 : vector<1x1x8xf32> to vector<1x8xf32>
    %345 = vector.broadcast %344 : vector<1x8xf32> to vector<5x8xf32>
    %346 = arith.addf %342, %345 : vector<5x8xf32>
    %347 = arith.truncf %330 : vector<8x8xf32> to vector<8x8xbf16>
    %348 = arith.truncf %338 : vector<5x8xf32> to vector<5x8xbf16>
    %cst_142 = arith.constant dense<0.000000e+00> : vector<8x5xf32>
    %349 = tpu.matmul %347, %348, %cst_142 {dimension_numbers = #tpu.dot_dimension_numbers<[1], [1], [0], [0], [0, 0, 1, 0], [], []>} : vector<8x8xbf16>, vector<5x8xbf16>, vector<8x5xf32> -> vector<8x5xf32>
    %cst_143 = arith.constant 0.353553385 : f32
    %350 = vector.broadcast %cst_143 : f32 to vector<8x5xf32>
    %351 = arith.mulf %349, %350 : vector<8x5xf32>
    %cst_144 = arith.constant dense<0xFF800000> : vector<8xf32>
    %352 = vector.multi_reduction <maximumf>, %351, %cst_144 [1] : vector<8x5xf32> to vector<8xf32>
    %353 = vector.shape_cast %352 : vector<8xf32> to vector<8x1xf32>
    %354 = vector.broadcast %353 : vector<8x1xf32> to vector<8x5xf32>
    %355 = arith.subf %351, %354 : vector<8x5xf32>
    %356 = math.exp %355 : vector<8x5xf32>
    %cst_145 = arith.constant dense<0.000000e+00> : vector<8xf32>
    %357 = vector.multi_reduction <add>, %356, %cst_145 [1] : vector<8x5xf32> to vector<8xf32>
    %358 = vector.shape_cast %357 : vector<8xf32> to vector<8x1xf32>
    %359 = tpu.reciprocal %358 {approx = true} : vector<8x1xf32> -> vector<8x1xf32>
    %360 = vector.broadcast %359 : vector<8x1xf32> to vector<8x5xf32>
    %361 = arith.mulf %356, %360 : vector<8x5xf32>
    %362 = arith.truncf %361 : vector<8x5xf32> to vector<8x5xbf16>
    %363 = arith.truncf %346 : vector<5x8xf32> to vector<5x8xbf16>
    %cst_146 = arith.constant dense<0.000000e+00> : vector<8x8xf32>
    %364 = tpu.matmul %362, %363, %cst_146 {dimension_numbers = #tpu.dot_dimension_numbers<[1], [0], [0], [1], [0, 0, 1, 1], [], []>} : vector<8x5xbf16>, vector<5x8xbf16>, vector<8x8xf32> -> vector<8x8xf32>
    %c0_147 = arith.constant 0 : index
    %c8_148 = arith.constant 8 : index
    %365 = vector.load %arg34[%c0_147, %c8_148] : memref<8x32xf32, #tpu.memory_space<vmem>>, vector<8x8xf32>
    tpu.vector_store %arg34[%c0_147, %c8_148], %364 {strides = array<i32>} : memref<8x32xf32, #tpu.memory_space<vmem>>, vector<8x8xf32>,
    %366 = vector.extract_strided_slice %265 {offsets = [2, 0, 0], sizes = [1, 32, 8], strides = [1, 1, 1]} : vector<4x32x8xbf16> to vector<1x32x8xbf16>
    %367 = vector.shape_cast %366 : vector<1x32x8xbf16> to vector<32x8xbf16>
    %368 = arith.truncf %263 : vector<8x32xf32> to vector<8x32xbf16>
    %cst_149 = arith.constant dense<0.000000e+00> : vector<8x8xf32>
    %369 = tpu.matmul %368, %367, %cst_149 {dimension_numbers = #tpu.dot_dimension_numbers<[1], [0], [0], [1], [0, 0, 1, 1], [], []>} : vector<8x32xbf16>, vector<32x8xbf16>, vector<8x8xf32> -> vector<8x8xf32>
    %370 = vector.extract_strided_slice %267 {offsets = [2, 0, 0], sizes = [1, 1, 8], strides = [1, 1, 1]} : vector<4x1x8xf32> to vector<1x1x8xf32>
    %371 = vector.shape_cast %370 : vector<1x1x8xf32> to vector<1x8xf32>
    %372 = vector.broadcast %371 : vector<1x8xf32> to vector<8x8xf32>
    %373 = arith.addf %369, %372 : vector<8x8xf32>
    %374 = vector.extract_strided_slice %269 {offsets = [2, 0, 0], sizes = [1, 32, 8], strides = [1, 1, 1]} : vector<4x32x8xbf16> to vector<1x32x8xbf16>
    %375 = vector.shape_cast %374 : vector<1x32x8xbf16> to vector<32x8xbf16>
    %376 = arith.truncf %35 : vector<5x32xf32> to vector<5x32xbf16>
    %cst_150 = arith.constant dense<0.000000e+00> : vector<5x8xf32>
    %377 = tpu.matmul %376, %375, %cst_150 {dimension_numbers = #tpu.dot_dimension_numbers<[1], [0], [0], [1], [0, 0, 1, 1], [], []>} : vector<5x32xbf16>, vector<32x8xbf16>, vector<5x8xf32> -> vector<5x8xf32>
    %378 = vector.extract_strided_slice %271 {offsets = [2, 0, 0], sizes = [1, 1, 8], strides = [1, 1, 1]} : vector<4x1x8xf32> to vector<1x1x8xf32>
    %379 = vector.shape_cast %378 : vector<1x1x8xf32> to vector<1x8xf32>
    %380 = vector.broadcast %379 : vector<1x8xf32> to vector<5x8xf32>
    %381 = arith.addf %377, %380 : vector<5x8xf32>
    %382 = vector.extract_strided_slice %273 {offsets = [2, 0, 0], sizes = [1, 32, 8], strides = [1, 1, 1]} : vector<4x32x8xbf16> to vector<1x32x8xbf16>
    %383 = vector.shape_cast %382 : vector<1x32x8xbf16> to vector<32x8xbf16>
    %384 = arith.truncf %35 : vector<5x32xf32> to vector<5x32xbf16>
    %cst_151 = arith.constant dense<0.000000e+00> : vector<5x8xf32>
    %385 = tpu.matmul %384, %383, %cst_151 {dimension_numbers = #tpu.dot_dimension_numbers<[1], [0], [0], [1], [0, 0, 1, 1], [], []>} : vector<5x32xbf16>, vector<32x8xbf16>, vector<5x8xf32> -> vector<5x8xf32>
    %386 = vector.extract_strided_slice %275 {offsets = [2, 0, 0], sizes = [1, 1, 8], strides = [1, 1, 1]} : vector<4x1x8xf32> to vector<1x1x8xf32>
    %387 = vector.shape_cast %386 : vector<1x1x8xf32> to vector<1x8xf32>
    %388 = vector.broadcast %387 : vector<1x8xf32> to vector<5x8xf32>
    %389 = arith.addf %385, %388 : vector<5x8xf32>
    %390 = arith.truncf %373 : vector<8x8xf32> to vector<8x8xbf16>
    %391 = arith.truncf %381 : vector<5x8xf32> to vector<5x8xbf16>
    %cst_152 = arith.constant dense<0.000000e+00> : vector<8x5xf32>
    %392 = tpu.matmul %390, %391, %cst_152 {dimension_numbers = #tpu.dot_dimension_numbers<[1], [1], [0], [0], [0, 0, 1, 0], [], []>} : vector<8x8xbf16>, vector<5x8xbf16>, vector<8x5xf32> -> vector<8x5xf32>
    %cst_153 = arith.constant 0.353553385 : f32
    %393 = vector.broadcast %cst_153 : f32 to vector<8x5xf32>
    %394 = arith.mulf %392, %393 : vector<8x5xf32>
    %cst_154 = arith.constant dense<0xFF800000> : vector<8xf32>
    %395 = vector.multi_reduction <maximumf>, %394, %cst_154 [1] : vector<8x5xf32> to vector<8xf32>
    %396 = vector.shape_cast %395 : vector<8xf32> to vector<8x1xf32>
    %397 = vector.broadcast %396 : vector<8x1xf32> to vector<8x5xf32>
    %398 = arith.subf %394, %397 : vector<8x5xf32>
    %399 = math.exp %398 : vector<8x5xf32>
    %cst_155 = arith.constant dense<0.000000e+00> : vector<8xf32>
    %400 = vector.multi_reduction <add>, %399, %cst_155 [1] : vector<8x5xf32> to vector<8xf32>
    %401 = vector.shape_cast %400 : vector<8xf32> to vector<8x1xf32>
    %402 = tpu.reciprocal %401 {approx = true} : vector<8x1xf32> -> vector<8x1xf32>
    %403 = vector.broadcast %402 : vector<8x1xf32> to vector<8x5xf32>
    %404 = arith.mulf %399, %403 : vector<8x5xf32>
    %405 = arith.truncf %404 : vector<8x5xf32> to vector<8x5xbf16>
    %406 = arith.truncf %389 : vector<5x8xf32> to vector<5x8xbf16>
    %cst_156 = arith.constant dense<0.000000e+00> : vector<8x8xf32>
    %407 = tpu.matmul %405, %406, %cst_156 {dimension_numbers = #tpu.dot_dimension_numbers<[1], [0], [0], [1], [0, 0, 1, 1], [], []>} : vector<8x5xbf16>, vector<5x8xbf16>, vector<8x8xf32> -> vector<8x8xf32>
    %c0_157 = arith.constant 0 : index
    %c16_158 = arith.constant 16 : index
    %408 = vector.load %arg34[%c0_157, %c16_158] : memref<8x32xf32, #tpu.memory_space<vmem>>, vector<8x8xf32>
    tpu.vector_store %arg34[%c0_157, %c16_158], %407 {strides = array<i32>} : memref<8x32xf32, #tpu.memory_space<vmem>>, vector<8x8xf32>,
    %409 = vector.extract_strided_slice %265 {offsets = [3, 0, 0], sizes = [1, 32, 8], strides = [1, 1, 1]} : vector<4x32x8xbf16> to vector<1x32x8xbf16>
    %410 = vector.shape_cast %409 : vector<1x32x8xbf16> to vector<32x8xbf16>
    %411 = arith.truncf %263 : vector<8x32xf32> to vector<8x32xbf16>
    %cst_159 = arith.constant dense<0.000000e+00> : vector<8x8xf32>
    %412 = tpu.matmul %411, %410, %cst_159 {dimension_numbers = #tpu.dot_dimension_numbers<[1], [0], [0], [1], [0, 0, 1, 1], [], []>} : vector<8x32xbf16>, vector<32x8xbf16>, vector<8x8xf32> -> vector<8x8xf32>
    %413 = vector.extract_strided_slice %267 {offsets = [3, 0, 0], sizes = [1, 1, 8], strides = [1, 1, 1]} : vector<4x1x8xf32> to vector<1x1x8xf32>
    %414 = vector.shape_cast %413 : vector<1x1x8xf32> to vector<1x8xf32>
    %415 = vector.broadcast %414 : vector<1x8xf32> to vector<8x8xf32>
    %416 = arith.addf %412, %415 : vector<8x8xf32>
    %417 = vector.extract_strided_slice %269 {offsets = [3, 0, 0], sizes = [1, 32, 8], strides = [1, 1, 1]} : vector<4x32x8xbf16> to vector<1x32x8xbf16>
    %418 = vector.shape_cast %417 : vector<1x32x8xbf16> to vector<32x8xbf16>
    %419 = arith.truncf %35 : vector<5x32xf32> to vector<5x32xbf16>
    %cst_160 = arith.constant dense<0.000000e+00> : vector<5x8xf32>
    %420 = tpu.matmul %419, %418, %cst_160 {dimension_numbers = #tpu.dot_dimension_numbers<[1], [0], [0], [1], [0, 0, 1, 1], [], []>} : vector<5x32xbf16>, vector<32x8xbf16>, vector<5x8xf32> -> vector<5x8xf32>
    %421 = vector.extract_strided_slice %271 {offsets = [3, 0, 0], sizes = [1, 1, 8], strides = [1, 1, 1]} : vector<4x1x8xf32> to vector<1x1x8xf32>
    %422 = vector.shape_cast %421 : vector<1x1x8xf32> to vector<1x8xf32>
    %423 = vector.broadcast %422 : vector<1x8xf32> to vector<5x8xf32>
    %424 = arith.addf %420, %423 : vector<5x8xf32>
    %425 = vector.extract_strided_slice %273 {offsets = [3, 0, 0], sizes = [1, 32, 8], strides = [1, 1, 1]} : vector<4x32x8xbf16> to vector<1x32x8xbf16>
    %426 = vector.shape_cast %425 : vector<1x32x8xbf16> to vector<32x8xbf16>
    %427 = arith.truncf %35 : vector<5x32xf32> to vector<5x32xbf16>
    %cst_161 = arith.constant dense<0.000000e+00> : vector<5x8xf32>
    %428 = tpu.matmul %427, %426, %cst_161 {dimension_numbers = #tpu.dot_dimension_numbers<[1], [0], [0], [1], [0, 0, 1, 1], [], []>} : vector<5x32xbf16>, vector<32x8xbf16>, vector<5x8xf32> -> vector<5x8xf32>
    %429 = vector.extract_strided_slice %275 {offsets = [3, 0, 0], sizes = [1, 1, 8], strides = [1, 1, 1]} : vector<4x1x8xf32> to vector<1x1x8xf32>
    %430 = vector.shape_cast %429 : vector<1x1x8xf32> to vector<1x8xf32>
    %431 = vector.broadcast %430 : vector<1x8xf32> to vector<5x8xf32>
    %432 = arith.addf %428, %431 : vector<5x8xf32>
    %433 = arith.truncf %416 : vector<8x8xf32> to vector<8x8xbf16>
    %434 = arith.truncf %424 : vector<5x8xf32> to vector<5x8xbf16>
    %cst_162 = arith.constant dense<0.000000e+00> : vector<8x5xf32>
    %435 = tpu.matmul %433, %434, %cst_162 {dimension_numbers = #tpu.dot_dimension_numbers<[1], [1], [0], [0], [0, 0, 1, 0], [], []>} : vector<8x8xbf16>, vector<5x8xbf16>, vector<8x5xf32> -> vector<8x5xf32>
    %cst_163 = arith.constant 0.353553385 : f32
    %436 = vector.broadcast %cst_163 : f32 to vector<8x5xf32>
    %437 = arith.mulf %435, %436 : vector<8x5xf32>
    %cst_164 = arith.constant dense<0xFF800000> : vector<8xf32>
    %438 = vector.multi_reduction <maximumf>, %437, %cst_164 [1] : vector<8x5xf32> to vector<8xf32>
    %439 = vector.shape_cast %438 : vector<8xf32> to vector<8x1xf32>
    %440 = vector.broadcast %439 : vector<8x1xf32> to vector<8x5xf32>
    %441 = arith.subf %437, %440 : vector<8x5xf32>
    %442 = math.exp %441 : vector<8x5xf32>
    %cst_165 = arith.constant dense<0.000000e+00> : vector<8xf32>
    %443 = vector.multi_reduction <add>, %442, %cst_165 [1] : vector<8x5xf32> to vector<8xf32>
    %444 = vector.shape_cast %443 : vector<8xf32> to vector<8x1xf32>
    %445 = tpu.reciprocal %444 {approx = true} : vector<8x1xf32> -> vector<8x1xf32>
    %446 = vector.broadcast %445 : vector<8x1xf32> to vector<8x5xf32>
    %447 = arith.mulf %442, %446 : vector<8x5xf32>
    %448 = arith.truncf %447 : vector<8x5xf32> to vector<8x5xbf16>
    %449 = arith.truncf %432 : vector<5x8xf32> to vector<5x8xbf16>
    %cst_166 = arith.constant dense<0.000000e+00> : vector<8x8xf32>
    %450 = tpu.matmul %448, %449, %cst_166 {dimension_numbers = #tpu.dot_dimension_numbers<[1], [0], [0], [1], [0, 0, 1, 1], [], []>} : vector<8x5xbf16>, vector<5x8xbf16>, vector<8x8xf32> -> vector<8x8xf32>
    %c0_167 = arith.constant 0 : index
    %c24_168 = arith.constant 24 : index
    %451 = vector.load %arg34[%c0_167, %c24_168] : memref<8x32xf32, #tpu.memory_space<vmem>>, vector<8x8xf32>
    tpu.vector_store %arg34[%c0_167, %c24_168], %450 {strides = array<i32>} : memref<8x32xf32, #tpu.memory_space<vmem>>, vector<8x8xf32>,
    %c0_169 = arith.constant 0 : index
    %c0_170 = arith.constant 0 : index
    %452 = vector.load %arg34[%c0_169, %c0_170] : memref<8x32xf32, #tpu.memory_space<vmem>>, vector<8x32xf32>
    %453 = arith.truncf %452 : vector<8x32xf32> to vector<8x32xbf16>
    %cst_171 = arith.constant dense<0.000000e+00> : vector<8x32xf32>
    %454 = tpu.matmul %453, %277, %cst_171 {dimension_numbers = #tpu.dot_dimension_numbers<[1], [0], [0], [1], [0, 0, 1, 1], [], []>} : vector<8x32xbf16>, vector<32x32xbf16>, vector<8x32xf32> -> vector<8x32xf32>
    %455 = vector.broadcast %279 : vector<1x32xf32> to vector<8x32xf32>
    %456 = arith.addf %454, %455 : vector<8x32xf32>
    %457 = arith.addf %263, %456 : vector<8x32xf32>
    %c0_172 = arith.constant 0 : index
    %c0_173 = arith.constant 0 : index
    %c0_174 = arith.constant 0 : index
    %458 = vector.load %arg25[%c0_172, %c0_173, %c0_174] : memref<1x1x32xf32, #tpu.memory_space<vmem>>, vector<1x1x32xf32>
    %459 = vector.shape_cast %458 : vector<1x1x32xf32> to vector<1x32xf32>
    %c0_175 = arith.constant 0 : index
    %c0_176 = arith.constant 0 : index
    %c0_177 = arith.constant 0 : index
    %460 = vector.load %arg26[%c0_175, %c0_176, %c0_177] : memref<1x1x32xf32, #tpu.memory_space<vmem>>, vector<1x1x32xf32>
    %461 = vector.shape_cast %460 : vector<1x1x32xf32> to vector<1x32xf32>
    %cst_178 = arith.constant dense<0.000000e+00> : vector<8xf32>
    %462 = vector.multi_reduction <add>, %457, %cst_178 [1] : vector<8x32xf32> to vector<8xf32>
    %463 = vector.shape_cast %462 : vector<8xf32> to vector<8x1xf32>
    %cst_179 = arith.constant 3.200000e+01 : f32
    %464 = vector.broadcast %cst_179 : f32 to vector<8x1xf32>
    %465 = arith.divf %463, %464 : vector<8x1xf32>
    %466 = vector.broadcast %465 : vector<8x1xf32> to vector<8x32xf32>
    %467 = arith.subf %457, %466 : vector<8x32xf32>
    %468 = arith.mulf %467, %467 : vector<8x32xf32>
    %cst_180 = arith.constant dense<0.000000e+00> : vector<8xf32>
    %469 = vector.multi_reduction <add>, %468, %cst_180 [1] : vector<8x32xf32> to vector<8xf32>
    %470 = vector.shape_cast %469 : vector<8xf32> to vector<8x1xf32>
    %cst_181 = arith.constant 3.200000e+01 : f32
    %471 = vector.broadcast %cst_181 : f32 to vector<8x1xf32>
    %472 = arith.divf %470, %471 : vector<8x1xf32>
    %473 = vector.broadcast %465 : vector<8x1xf32> to vector<8x32xf32>
    %474 = arith.subf %457, %473 : vector<8x32xf32>
    %cst_182 = arith.constant 9.99999996E-13 : f32
    %475 = vector.broadcast %cst_182 : f32 to vector<8x1xf32>
    %476 = arith.addf %472, %475 : vector<8x1xf32>
    %477 = math.rsqrt %476 : vector<8x1xf32>
    %478 = vector.broadcast %477 : vector<8x1xf32> to vector<8x32xf32>
    %479 = arith.mulf %474, %478 : vector<8x32xf32>
    %480 = vector.broadcast %459 : vector<1x32xf32> to vector<8x32xf32>
    %481 = arith.mulf %479, %480 : vector<8x32xf32>
    %482 = vector.broadcast %461 : vector<1x32xf32> to vector<8x32xf32>
    %483 = arith.addf %481, %482 : vector<8x32xf32>
    %c0_183 = arith.constant 0 : index
    %c0_184 = arith.constant 0 : index
    %c0_185 = arith.constant 0 : index
    %484 = vector.load %arg27[%c0_183, %c0_184, %c0_185] : memref<1x32x64xbf16, #tpu.memory_space<vmem>>, vector<1x32x64xbf16>
    %485 = vector.shape_cast %484 : vector<1x32x64xbf16> to vector<32x64xbf16>
    %486 = arith.truncf %483 : vector<8x32xf32> to vector<8x32xbf16>
    %cst_186 = arith.constant dense<0.000000e+00> : vector<8x64xf32>
    %487 = tpu.matmul %486, %485, %cst_186 {dimension_numbers = #tpu.dot_dimension_numbers<[1], [0], [0], [1], [0, 0, 1, 1], [], []>} : vector<8x32xbf16>, vector<32x64xbf16>, vector<8x64xf32> -> vector<8x64xf32>
    %c0_187 = arith.constant 0 : index
    %c0_188 = arith.constant 0 : index
    %c0_189 = arith.constant 0 : index
    %488 = vector.load %arg28[%c0_187, %c0_188, %c0_189] : memref<1x1x64xf32, #tpu.memory_space<vmem>>, vector<1x1x64xf32>
    %489 = vector.shape_cast %488 : vector<1x1x64xf32> to vector<1x64xf32>
    %490 = vector.broadcast %489 : vector<1x64xf32> to vector<8x64xf32>
    %491 = arith.addf %487, %490 : vector<8x64xf32>
    %cst_190 = arith.constant 5.000000e-01 : f32
    %492 = vector.broadcast %cst_190 : f32 to vector<8x64xf32>
    %493 = arith.mulf %492, %491 : vector<8x64xf32>
    %cst_191 = arith.constant 4.471500e-02 : f32
    %494 = vector.broadcast %cst_191 : f32 to vector<8x64xf32>
    %495 = arith.mulf %494, %491 : vector<8x64xf32>
    %496 = arith.mulf %495, %491 : vector<8x64xf32>
    %497 = arith.mulf %496, %491 : vector<8x64xf32>
    %498 = arith.addf %491, %497 : vector<8x64xf32>
    %cst_192 = arith.constant 0.797884583 : f32
    %499 = vector.broadcast %cst_192 : f32 to vector<8x64xf32>
    %500 = arith.mulf %499, %498 : vector<8x64xf32>
    %501 = math.tanh %500 : vector<8x64xf32>
    %cst_193 = arith.constant 1.000000e+00 : f32
    %502 = vector.broadcast %cst_193 : f32 to vector<8x64xf32>
    %503 = arith.addf %502, %501 : vector<8x64xf32>
    %504 = arith.mulf %493, %503 : vector<8x64xf32>
    %c0_194 = arith.constant 0 : index
    %c0_195 = arith.constant 0 : index
    %c0_196 = arith.constant 0 : index
    %505 = vector.load %arg29[%c0_194, %c0_195, %c0_196] : memref<1x64x32xbf16, #tpu.memory_space<vmem>>, vector<1x64x32xbf16>
    %506 = vector.shape_cast %505 : vector<1x64x32xbf16> to vector<64x32xbf16>
    %507 = arith.truncf %504 : vector<8x64xf32> to vector<8x64xbf16>
    %cst_197 = arith.constant dense<0.000000e+00> : vector<8x32xf32>
    %508 = tpu.matmul %507, %506, %cst_197 {dimension_numbers = #tpu.dot_dimension_numbers<[1], [0], [0], [1], [0, 0, 1, 1], [], []>} : vector<8x64xbf16>, vector<64x32xbf16>, vector<8x32xf32> -> vector<8x32xf32>
    %c0_198 = arith.constant 0 : index
    %c0_199 = arith.constant 0 : index
    %c0_200 = arith.constant 0 : index
    %509 = vector.load %arg30[%c0_198, %c0_199, %c0_200] : memref<1x1x32xf32, #tpu.memory_space<vmem>>, vector<1x1x32xf32>
    %510 = vector.shape_cast %509 : vector<1x1x32xf32> to vector<1x32xf32>
    %511 = vector.broadcast %510 : vector<1x32xf32> to vector<8x32xf32>
    %512 = arith.addf %508, %511 : vector<8x32xf32>
    %513 = arith.addf %483, %512 : vector<8x32xf32>
    %c0_201 = arith.constant 0 : index
    %c0_202 = arith.constant 0 : index
    %c0_203 = arith.constant 0 : index
    %514 = vector.load %arg31[%c0_201, %c0_202, %c0_203] : memref<1x1x32xf32, #tpu.memory_space<vmem>>, vector<1x1x32xf32>
    %515 = vector.shape_cast %514 : vector<1x1x32xf32> to vector<1x32xf32>
    %c0_204 = arith.constant 0 : index
    %c0_205 = arith.constant 0 : index
    %c0_206 = arith.constant 0 : index
    %516 = vector.load %arg32[%c0_204, %c0_205, %c0_206] : memref<1x1x32xf32, #tpu.memory_space<vmem>>, vector<1x1x32xf32>
    %517 = vector.shape_cast %516 : vector<1x1x32xf32> to vector<1x32xf32>
    %cst_207 = arith.constant dense<0.000000e+00> : vector<8xf32>
    %518 = vector.multi_reduction <add>, %513, %cst_207 [1] : vector<8x32xf32> to vector<8xf32>
    %519 = vector.shape_cast %518 : vector<8xf32> to vector<8x1xf32>
    %cst_208 = arith.constant 3.200000e+01 : f32
    %520 = vector.broadcast %cst_208 : f32 to vector<8x1xf32>
    %521 = arith.divf %519, %520 : vector<8x1xf32>
    %522 = vector.broadcast %521 : vector<8x1xf32> to vector<8x32xf32>
    %523 = arith.subf %513, %522 : vector<8x32xf32>
    %524 = arith.mulf %523, %523 : vector<8x32xf32>
    %cst_209 = arith.constant dense<0.000000e+00> : vector<8xf32>
    %525 = vector.multi_reduction <add>, %524, %cst_209 [1] : vector<8x32xf32> to vector<8xf32>
    %526 = vector.shape_cast %525 : vector<8xf32> to vector<8x1xf32>
    %cst_210 = arith.constant 3.200000e+01 : f32
    %527 = vector.broadcast %cst_210 : f32 to vector<8x1xf32>
    %528 = arith.divf %526, %527 : vector<8x1xf32>
    %529 = vector.broadcast %521 : vector<8x1xf32> to vector<8x32xf32>
    %530 = arith.subf %513, %529 : vector<8x32xf32>
    %cst_211 = arith.constant 9.99999996E-13 : f32
    %531 = vector.broadcast %cst_211 : f32 to vector<8x1xf32>
    %532 = arith.addf %528, %531 : vector<8x1xf32>
    %533 = math.rsqrt %532 : vector<8x1xf32>
    %534 = vector.broadcast %533 : vector<8x1xf32> to vector<8x32xf32>
    %535 = arith.mulf %530, %534 : vector<8x32xf32>
    %536 = vector.broadcast %515 : vector<1x32xf32> to vector<8x32xf32>
    %537 = arith.mulf %535, %536 : vector<8x32xf32>
    %538 = vector.broadcast %517 : vector<1x32xf32> to vector<8x32xf32>
    %539 = arith.addf %537, %538 : vector<8x32xf32>
    %540 = arith.truncf %539 : vector<8x32xf32> to vector<8x32xbf16>
    %c0_212 = arith.constant 0 : index
    %c0_213 = arith.constant 0 : index
    %c0_214 = arith.constant 0 : index
    %541 = vector.load %arg33[%c0_212, %c0_213, %c0_214] : memref<1x8x32xbf16, #tpu.memory_space<vmem>>, vector<1x8x32xbf16>
    %542 = vector.shape_cast %541 : vector<1x8x32xbf16> to vector<8x32xbf16>
    %543 = vector.shape_cast %540 : vector<8x32xbf16> to vector<1x8x32xbf16>
    tpu.vector_store %arg33[%c0_212, %c0_213, %c0_214], %543 {strides = array<i32>} : memref<1x8x32xbf16, #tpu.memory_space<vmem>>, vector<1x8x32xbf16>,
    return
  }
  func.func @transform_0(%arg0: i32) -> (i32, i32, i32) {
    %c0_i32 = arith.constant 0 : i32
    %c0_i32_0 = arith.constant 0 : i32
    %c0_i32_1 = arith.constant 0 : i32
    return %arg0, %c0_i32, %c0_i32_0 : i32, i32, i32
  }
  func.func @transform_1(%arg0: i32) -> (i32, i32, i32) {
    %c0_i32 = arith.constant 0 : i32
    %c0_i32_0 = arith.constant 0 : i32
    %c0_i32_1 = arith.constant 0 : i32
    return %arg0, %c0_i32, %c0_i32_0 : i32, i32, i32
  }
  func.func @transform_2(%arg0: i32) -> (i32, i32, i32) {
    %c0_i32 = arith.constant 0 : i32
    %c0_i32_0 = arith.constant 0 : i32
    %c0_i32_1 = arith.constant 0 : i32
    return %arg0, %c0_i32, %c0_i32_0 : i32, i32, i32
  }
  func.func @transform_3(%arg0: i32) -> (i32, i32, i32) {
    %c0_i32 = arith.constant 0 : i32
    %c0_i32_0 = arith.constant 0 : i32
    %c0_i32_1 = arith.constant 0 : i32
    return %arg0, %c0_i32, %c0_i32_0 : i32, i32, i32
  }
  func.func @transform_4(%arg0: i32) -> (i32, i32) {
    %c0_i32 = arith.constant 0 : i32
    %c0_i32_0 = arith.constant 0 : i32
    %c0_i32_1 = arith.constant 0 : i32
    return %c0_i32, %c0_i32_0 : i32, i32
  }
  func.func @transform_5(%arg0: i32) -> (i32, i32) {
    %c0_i32 = arith.constant 0 : i32
    %c0_i32_0 = arith.constant 0 : i32
    %c0_i32_1 = arith.constant 0 : i32
    return %c0_i32, %c0_i32_0 : i32, i32
  }
  func.func @transform_6(%arg0: i32) -> (i32, i32, i32, i32) {
    %c0_i32 = arith.constant 0 : i32
    %c0_i32_0 = arith.constant 0 : i32
    %c0_i32_1 = arith.constant 0 : i32
    %c0_i32_2 = arith.constant 0 : i32
    %c0_i32_3 = arith.constant 0 : i32
    return %c0_i32, %c0_i32_0, %c0_i32_1, %c0_i32_2 : i32, i32, i32, i32
  }
  func.func @transform_7(%arg0: i32) -> (i32, i32, i32, i32) {
    %c0_i32 = arith.constant 0 : i32
    %c0_i32_0 = arith.constant 0 : i32
    %c0_i32_1 = arith.constant 0 : i32
    %c0_i32_2 = arith.constant 0 : i32
    %c0_i32_3 = arith.constant 0 : i32
    return %c0_i32, %c0_i32_0, %c0_i32_1, %c0_i32_2 : i32, i32, i32, i32
  }
  func.func @transform_8(%arg0: i32) -> (i32, i32, i32, i32) {
    %c0_i32 = arith.constant 0 : i32
    %c0_i32_0 = arith.constant 0 : i32
    %c0_i32_1 = arith.constant 0 : i32
    %c0_i32_2 = arith.constant 0 : i32
    %c0_i32_3 = arith.constant 0 : i32
    return %c0_i32, %c0_i32_0, %c0_i32_1, %c0_i32_2 : i32, i32, i32, i32
  }
  func.func @transform_9(%arg0: i32) -> (i32, i32, i32, i32) {
    %c0_i32 = arith.constant 0 : i32
    %c0_i32_0 = arith.constant 0 : i32
    %c0_i32_1 = arith.constant 0 : i32
    %c0_i32_2 = arith.constant 0 : i32
    %c0_i32_3 = arith.constant 0 : i32
    return %c0_i32, %c0_i32_0, %c0_i32_1, %c0_i32_2 : i32, i32, i32, i32
  }
  func.func @transform_10(%arg0: i32) -> (i32, i32, i32, i32) {
    %c0_i32 = arith.constant 0 : i32
    %c0_i32_0 = arith.constant 0 : i32
    %c0_i32_1 = arith.constant 0 : i32
    %c0_i32_2 = arith.constant 0 : i32
    %c0_i32_3 = arith.constant 0 : i32
    return %c0_i32, %c0_i32_0, %c0_i32_1, %c0_i32_2 : i32, i32, i32, i32
  }
  func.func @transform_11(%arg0: i32) -> (i32, i32, i32, i32) {
    %c0_i32 = arith.constant 0 : i32
    %c0_i32_0 = arith.constant 0 : i32
    %c0_i32_1 = arith.constant 0 : i32
    %c0_i32_2 = arith.constant 0 : i32
    %c0_i32_3 = arith.constant 0 : i32
    return %c0_i32, %c0_i32_0, %c0_i32_1, %c0_i32_2 : i32, i32, i32, i32
  }
  func.func @transform_12(%arg0: i32) -> (i32, i32, i32) {
    %c0_i32 = arith.constant 0 : i32
    %c0_i32_0 = arith.constant 0 : i32
    %c0_i32_1 = arith.constant 0 : i32
    %c0_i32_2 = arith.constant 0 : i32
    return %c0_i32, %c0_i32_0, %c0_i32_1 : i32, i32, i32
  }
  func.func @transform_13(%arg0: i32) -> (i32, i32, i32) {
    %c0_i32 = arith.constant 0 : i32
    %c0_i32_0 = arith.constant 0 : i32
    %c0_i32_1 = arith.constant 0 : i32
    %c0_i32_2 = arith.constant 0 : i32
    return %c0_i32, %c0_i32_0, %c0_i32_1 : i32, i32, i32
  }
  func.func @transform_14(%arg0: i32) -> (i32, i32, i32) {
    %c0_i32 = arith.constant 0 : i32
    %c0_i32_0 = arith.constant 0 : i32
    %c0_i32_1 = arith.constant 0 : i32
    %c0_i32_2 = arith.constant 0 : i32
    return %c0_i32, %c0_i32_0, %c0_i32_1 : i32, i32, i32
  }
  func.func @transform_15(%arg0: i32) -> (i32, i32, i32) {
    %c0_i32 = arith.constant 0 : i32
    %c0_i32_0 = arith.constant 0 : i32
    %c0_i32_1 = arith.constant 0 : i32
    %c0_i32_2 = arith.constant 0 : i32
    return %c0_i32, %c0_i32_0, %c0_i32_1 : i32, i32, i32
  }
  func.func @transform_16(%arg0: i32) -> (i32, i32, i32, i32) {
    %c0_i32 = arith.constant 0 : i32
    %c0_i32_0 = arith.constant 0 : i32
    %c0_i32_1 = arith.constant 0 : i32
    %c0_i32_2 = arith.constant 0 : i32
    %c0_i32_3 = arith.constant 0 : i32
    return %c0_i32, %c0_i32_0, %c0_i32_1, %c0_i32_2 : i32, i32, i32, i32
  }
  func.func @transform_17(%arg0: i32) -> (i32, i32, i32, i32) {
    %c0_i32 = arith.constant 0 : i32
    %c0_i32_0 = arith.constant 0 : i32
    %c0_i32_1 = arith.constant 0 : i32
    %c0_i32_2 = arith.constant 0 : i32
    %c0_i32_3 = arith.constant 0 : i32
    return %c0_i32, %c0_i32_0, %c0_i32_1, %c0_i32_2 : i32, i32, i32, i32
  }
  func.func @transform_18(%arg0: i32) -> (i32, i32, i32, i32) {
    %c0_i32 = arith.constant 0 : i32
    %c0_i32_0 = arith.constant 0 : i32
    %c0_i32_1 = arith.constant 0 : i32
    %c0_i32_2 = arith.constant 0 : i32
    %c0_i32_3 = arith.constant 0 : i32
    return %c0_i32, %c0_i32_0, %c0_i32_1, %c0_i32_2 : i32, i32, i32, i32
  }
  func.func @transform_19(%arg0: i32) -> (i32, i32, i32, i32) {
    %c0_i32 = arith.constant 0 : i32
    %c0_i32_0 = arith.constant 0 : i32
    %c0_i32_1 = arith.constant 0 : i32
    %c0_i32_2 = arith.constant 0 : i32
    %c0_i32_3 = arith.constant 0 : i32
    return %c0_i32, %c0_i32_0, %c0_i32_1, %c0_i32_2 : i32, i32, i32, i32
  }
  func.func @transform_20(%arg0: i32) -> (i32, i32, i32, i32) {
    %c0_i32 = arith.constant 0 : i32
    %c0_i32_0 = arith.constant 0 : i32
    %c0_i32_1 = arith.constant 0 : i32
    %c0_i32_2 = arith.constant 0 : i32
    %c0_i32_3 = arith.constant 0 : i32
    return %c0_i32, %c0_i32_0, %c0_i32_1, %c0_i32_2 : i32, i32, i32, i32
  }
  func.func @transform_21(%arg0: i32) -> (i32, i32, i32, i32) {
    %c0_i32 = arith.constant 0 : i32
    %c0_i32_0 = arith.constant 0 : i32
    %c0_i32_1 = arith.constant 0 : i32
    %c0_i32_2 = arith.constant 0 : i32
    %c0_i32_3 = arith.constant 0 : i32
    return %c0_i32, %c0_i32_0, %c0_i32_1, %c0_i32_2 : i32, i32, i32, i32
  }
  func.func @transform_22(%arg0: i32) -> (i32, i32, i32) {
    %c0_i32 = arith.constant 0 : i32
    %c0_i32_0 = arith.constant 0 : i32
    %c0_i32_1 = arith.constant 0 : i32
    %c0_i32_2 = arith.constant 0 : i32
    return %c0_i32, %c0_i32_0, %c0_i32_1 : i32, i32, i32
  }
  func.func @transform_23(%arg0: i32) -> (i32, i32, i32) {
    %c0_i32 = arith.constant 0 : i32
    %c0_i32_0 = arith.constant 0 : i32
    %c0_i32_1 = arith.constant 0 : i32
    %c0_i32_2 = arith.constant 0 : i32
    return %c0_i32, %c0_i32_0, %c0_i32_1 : i32, i32, i32
  }
  func.func @transform_24(%arg0: i32) -> (i32, i32, i32) {
    %c0_i32 = arith.constant 0 : i32
    %c0_i32_0 = arith.constant 0 : i32
    %c0_i32_1 = arith.constant 0 : i32
    %c0_i32_2 = arith.constant 0 : i32
    return %c0_i32, %c0_i32_0, %c0_i32_1 : i32, i32, i32
  }
  func.func @transform_25(%arg0: i32) -> (i32, i32, i32) {
    %c0_i32 = arith.constant 0 : i32
    %c0_i32_0 = arith.constant 0 : i32
    %c0_i32_1 = arith.constant 0 : i32
    %c0_i32_2 = arith.constant 0 : i32
    return %c0_i32, %c0_i32_0, %c0_i32_1 : i32, i32, i32
  }
  func.func @transform_26(%arg0: i32) -> (i32, i32, i32) {
    %c0_i32 = arith.constant 0 : i32
    %c0_i32_0 = arith.constant 0 : i32
    %c0_i32_1 = arith.constant 0 : i32
    %c0_i32_2 = arith.constant 0 : i32
    return %c0_i32, %c0_i32_0, %c0_i32_1 : i32, i32, i32
  }
  func.func @transform_27(%arg0: i32) -> (i32, i32, i32) {
    %c0_i32 = arith.constant 0 : i32
    %c0_i32_0 = arith.constant 0 : i32
    %c0_i32_1 = arith.constant 0 : i32
    %c0_i32_2 = arith.constant 0 : i32
    return %c0_i32, %c0_i32_0, %c0_i32_1 : i32, i32, i32
  }
  func.func @transform_28(%arg0: i32) -> (i32, i32, i32) {
    %c0_i32 = arith.constant 0 : i32
    %c0_i32_0 = arith.constant 0 : i32
    %c0_i32_1 = arith.constant 0 : i32
    %c0_i32_2 = arith.constant 0 : i32
    return %c0_i32, %c0_i32_0, %c0_i32_1 : i32, i32, i32
  }
  func.func @transform_29(%arg0: i32) -> (i32, i32, i32) {
    %c0_i32 = arith.constant 0 : i32
    %c0_i32_0 = arith.constant 0 : i32
    %c0_i32_1 = arith.constant 0 : i32
    %c0_i32_2 = arith.constant 0 : i32
    return %c0_i32, %c0_i32_0, %c0_i32_1 : i32, i32, i32
  }
  func.func @transform_30(%arg0: i32) -> (i32, i32, i32) {
    %c0_i32 = arith.constant 0 : i32
    %c0_i32_0 = arith.constant 0 : i32
    %c0_i32_1 = arith.constant 0 : i32
    %c0_i32_2 = arith.constant 0 : i32
    return %c0_i32, %c0_i32_0, %c0_i32_1 : i32, i32, i32
  }
  func.func @transform_31(%arg0: i32) -> (i32, i32, i32) {
    %c0_i32 = arith.constant 0 : i32
    %c0_i32_0 = arith.constant 0 : i32
    %c0_i32_1 = arith.constant 0 : i32
    %c0_i32_2 = arith.constant 0 : i32
    return %c0_i32, %c0_i32_0, %c0_i32_1 : i32, i32, i32
  }
  func.func @transform_32(%arg0: i32) -> (i32, i32, i32) {
    %c0_i32 = arith.constant 0 : i32
    %c0_i32_0 = arith.constant 0 : i32
    %c0_i32_1 = arith.constant 0 : i32
    return %arg0, %c0_i32, %c0_i32_0 : i32, i32, i32
  }
}

module attributes {stable_mosaic.version = 11 : i64} {
  func.func @_text_stack_kernel(%arg0: i32, %arg1: memref<1x8x32xbf16, #tpu.memory_space<vmem>>, %arg2: memref<1x1x8xf32, #tpu.memory_space<vmem>>, %arg3: memref<1x8x32xbf16, #tpu.memory_space<vmem>>, %arg4: memref<1x1x8xf32, #tpu.memory_space<vmem>>, %arg5: memref<1x32xf32, #tpu.memory_space<vmem>>, %arg6: memref<1x32xf32, #tpu.memory_space<vmem>>, %arg7: memref<1x4x32x8xbf16, #tpu.memory_space<vmem>>, %arg8: memref<1x4x1x8xf32, #tpu.memory_space<vmem>>, %arg9: memref<1x4x32x8xbf16, #tpu.memory_space<vmem>>, %arg10: memref<1x4x1x8xf32, #tpu.memory_space<vmem>>, %arg11: memref<1x4x32x8xbf16, #tpu.memory_space<vmem>>, %arg12: memref<1x4x1x8xf32, #tpu.memory_space<vmem>>, %arg13: memref<1x32x32xbf16, #tpu.memory_space<vmem>>, %arg14: memref<1x1x32xf32, #tpu.memory_space<vmem>>, %arg15: memref<1x1x32xf32, #tpu.memory_space<vmem>>, %arg16: memref<1x1x32xf32, #tpu.memory_space<vmem>>, %arg17: memref<1x4x32x8xbf16, #tpu.memory_space<vmem>>, %arg18: memref<1x4x1x8xf32, #tpu.memory_space<vmem>>, %arg19: memref<1x4x32x8xbf16, #tpu.memory_space<vmem>>, %arg20: memref<1x4x1x8xf32, #tpu.memory_space<vmem>>, %arg21: memref<1x4x32x8xbf16, #tpu.memory_space<vmem>>, %arg22: memref<1x4x1x8xf32, #tpu.memory_space<vmem>>, %arg23: memref<1x32x32xbf16, #tpu.memory_space<vmem>>, %arg24: memref<1x1x32xf32, #tpu.memory_space<vmem>>, %arg25: memref<1x1x32xf32, #tpu.memory_space<vmem>>, %arg26: memref<1x1x32xf32, #tpu.memory_space<vmem>>, %arg27: memref<1x32x64xbf16, #tpu.memory_space<vmem>>, %arg28: memref<1x1x64xf32, #tpu.memory_space<vmem>>, %arg29: memref<1x64x32xbf16, #tpu.memory_space<vmem>>, %arg30: memref<1x1x32xf32, #tpu.memory_space<vmem>>, %arg31: memref<1x1x32xf32, #tpu.memory_space<vmem>>, %arg32: memref<1x1x32xf32, #tpu.memory_space<vmem>>, %arg33: memref<1x8x32xbf16, #tpu.memory_space<vmem>>, %arg34: memref<8x32xf32, #tpu.memory_space<vmem>>) attributes {dimension_semantics = [#tpu.dimension_semantics<parallel>], iteration_bounds = array<i64: 2>, scalar_prefetch = 0 : i64, scratch_operands = 1 : i64, tpu.core_type = #tpu.core_type<tc>, window_params = [{transform_indices = @transform_0, window_bounds = array<i64: 1, 8, 32>}, {transform_indices = @transform_1, window_bounds = array<i64: 1, 1, 8>}, {transform_indices = @transform_2, window_bounds = array<i64: 1, 8, 32>}, {transform_indices = @transform_3, window_bounds = array<i64: 1, 1, 8>}, {pipeline_mode = #tpu.pipeline_mode<synchronous>, transform_indices = @transform_4, window_bounds = array<i64: 1, 32>}, {pipeline_mode = #tpu.pipeline_mode<synchronous>, transform_indices = @transform_5, window_bounds = array<i64: 1, 32>}, {pipeline_mode = #tpu.pipeline_mode<synchronous>, transform_indices = @transform_6, window_bounds = array<i64: 1, 4, 32, 8>}, {pipeline_mode = #tpu.pipeline_mode<synchronous>, transform_indices = @transform_7, window_bounds = array<i64: 1, 4, 1, 8>}, {pipeline_mode = #tpu.pipeline_mode<synchronous>, transform_indices = @transform_8, window_bounds = array<i64: 1, 4, 32, 8>}, {pipeline_mode = #tpu.pipeline_mode<synchronous>, transform_indices = @transform_9, window_bounds = array<i64: 1, 4, 1, 8>}, {pipeline_mode = #tpu.pipeline_mode<synchronous>, transform_indices = @transform_10, window_bounds = array<i64: 1, 4, 32, 8>}, {pipeline_mode = #tpu.pipeline_mode<synchronous>, transform_indices = @transform_11, window_bounds = array<i64: 1, 4, 1, 8>}, {pipeline_mode = #tpu.pipeline_mode<synchronous>, transform_indices = @transform_12, window_bounds = array<i64: 1, 32, 32>}, {pipeline_mode = #tpu.pipeline_mode<synchronous>, transform_indices = @transform_13, window_bounds = array<i64: 1, 1, 32>}, {pipeline_mode = #tpu.pipeline_mode<synchronous>, transform_indices = @transform_14, window_bounds = array<i64: 1, 1, 32>}, {pipeline_mode = #tpu.pipeline_mode<synchronous>, transform_indices = @transform_15, window_bounds = array<i64: 1, 1, 32>}, {pipeline_mode = #tpu.pipeline_mode<synchronous>, transform_indices = @transform_16, window_bounds = array<i64: 1, 4, 32, 8>}, {pipeline_mode = #tpu.pipeline_mode<synchronous>, transform_indices = @transform_17, window_bounds = array<i64: 1, 4, 1, 8>}, {pipeline_mode = #tpu.pipeline_mode<synchronous>, transform_indices = @transform_18, window_bounds = array<i64: 1, 4, 32, 8>}, {pipeline_mode = #tpu.pipeline_mode<synchronous>, transform_indices = @transform_19, window_bounds = array<i64: 1, 4, 1, 8>}, {pipeline_mode = #tpu.pipeline_mode<synchronous>, transform_indices = @transform_20, window_bounds = array<i64: 1, 4, 32, 8>}, {pipeline_mode = #tpu.pipeline_mode<synchronous>, transform_indices = @transform_21, window_bounds = array<i64: 1, 4, 1, 8>}, {pipeline_mode = #tpu.pipeline_mode<synchronous>, transform_indices = @transform_22, window_bounds = array<i64: 1, 32, 32>}, {pipeline_mode = #tpu.pipeline_mode<synchronous>, transform_indices = @transform_23, window_bounds = array<i64: 1, 1, 32>}, {pipeline_mode = #tpu.pipeline_mode<synchronous>, transform_indices = @transform_24, window_bounds = array<i64: 1, 1, 32>}, {pipeline_mode = #tpu.pipeline_mode<synchronous>, transform_indices = @transform_25, window_bounds = array<i64: 1, 1, 32>}, {pipeline_mode = #tpu.pipeline_mode<synchronous>, transform_indices = @transform_26, window_bounds = array<i64: 1, 32, 64>}, {pipeline_mode = #tpu.pipeline_mode<synchronous>, transform_indices = @transform_27, window_bounds = array<i64: 1, 1, 64>}, {pipeline_mode = #tpu.pipeline_mode<synchronous>, transform_indices = @transform_28, window_bounds = array<i64: 1, 64, 32>}, {pipeline_mode = #tpu.pipeline_mode<synchronous>, transform_indices = @transform_29, window_bounds = array<i64: 1, 1, 32>}, {pipeline_mode = #tpu.pipeline_mode<synchronous>, transform_indices = @transform_30, window_bounds = array<i64: 1, 1, 32>}, {pipeline_mode = #tpu.pipeline_mode<synchronous>, transform_indices = @transform_31, window_bounds = array<i64: 1, 1, 32>}, {transform_indices = @transform_32, window_bounds = array<i64: 1, 8, 32>}]} {
    %c0 = arith.constant 0 : index
    %c0_0 = arith.constant 0 : index
    %c0_1 = arith.constant 0 : index
    %0 = vector.load %arg1[%c0, %c0_0, %c0_1] : memref<1x8x32xbf16, #tpu.memory_space<vmem>>, vector<1x8x32xbf16>
    %1 = vector.shape_cast %0 : vector<1x8x32xbf16> to vector<8x32xbf16>
    %2 = arith.extf %1 : vector<8x32xbf16> to vector<8x32xf32>
    %c0_2 = arith.constant 0 : index
    %c0_3 = arith.constant 0 : index
    %3 = vector.load %arg5[%c0_2, %c0_3] : memref<1x32xf32, #tpu.memory_space<vmem>>, vector<1x32xf32>
    %c0_4 = arith.constant 0 : index
    %c0_5 = arith.constant 0 : index
    %4 = vector.load %arg6[%c0_4, %c0_5] : memref<1x32xf32, #tpu.memory_space<vmem>>, vector<1x32xf32>
    %cst = arith.constant dense<0.000000e+00> : vector<8xf32>
    %5 = vector.multi_reduction <add>, %2, %cst [1] : vector<8x32xf32> to vector<8xf32>
    %6 = vector.shape_cast %5 : vector<8xf32> to vector<8x1xf32>
    %cst_6 = arith.constant 3.200000e+01 : f32
    %7 = vector.broadcast %cst_6 : f32 to vector<8x1xf32>
    %8 = arith.divf %6, %7 : vector<8x1xf32>
    %9 = vector.broadcast %8 : vector<8x1xf32> to vector<8x32xf32>
    %10 = arith.subf %2, %9 : vector<8x32xf32>
    %11 = arith.mulf %10, %10 : vector<8x32xf32>
    %cst_7 = arith.constant dense<0.000000e+00> : vector<8xf32>
    %12 = vector.multi_reduction <add>, %11, %cst_7 [1] : vector<8x32xf32> to vector<8xf32>
    %13 = vector.shape_cast %12 : vector<8xf32> to vector<8x1xf32>
    %cst_8 = arith.constant 3.200000e+01 : f32
    %14 = vector.broadcast %cst_8 : f32 to vector<8x1xf32>
    %15 = arith.divf %13, %14 : vector<8x1xf32>
    %16 = vector.broadcast %8 : vector<8x1xf32> to vector<8x32xf32>
    %17 = arith.subf %2, %16 : vector<8x32xf32>
    %cst_9 = arith.constant 9.99999996E-13 : f32
    %18 = vector.broadcast %cst_9 : f32 to vector<8x1xf32>
    %19 = arith.addf %15, %18 : vector<8x1xf32>
    %20 = math.rsqrt %19 : vector<8x1xf32>
    %21 = vector.broadcast %20 : vector<8x1xf32> to vector<8x32xf32>
    %22 = arith.mulf %17, %21 : vector<8x32xf32>
    %23 = vector.broadcast %3 : vector<1x32xf32> to vector<8x32xf32>
    %24 = arith.mulf %22, %23 : vector<8x32xf32>
    %25 = vector.broadcast %4 : vector<1x32xf32> to vector<8x32xf32>
    %26 = arith.addf %24, %25 : vector<8x32xf32>
    %c0_10 = arith.constant 0 : index
    %c0_11 = arith.constant 0 : index
    %c0_12 = arith.constant 0 : index
    %27 = vector.load %arg2[%c0_10, %c0_11, %c0_12] : memref<1x1x8xf32, #tpu.memory_space<vmem>>, vector<1x1x8xf32>
    %28 = vector.shape_cast %27 : vector<1x1x8xf32> to vector<1x8xf32>
    %cst_13 = arith.constant 1.000000e+00 : f32
    %29 = vector.broadcast %cst_13 : f32 to vector<1x8xf32>
    %30 = arith.subf %29, %28 : vector<1x8xf32>
    %cst_14 = arith.constant -1.000000e+04 : f32
    %31 = vector.broadcast %cst_14 : f32 to vector<1x8xf32>
    %32 = arith.mulf %30, %31 : vector<1x8xf32>
    %33 = tpu.iota {dimensions = array<i32: 0>} : vector<8x8xi32>
    %34 = tpu.iota {dimensions = array<i32: 1>} : vector<8x8xi32>
    %35 = arith.cmpi sle, %34, %33 : vector<8x8xi32>
    %cst_15 = arith.constant 0.000000e+00 : f32
    %cst_16 = arith.constant -1.000000e+04 : f32
    %36 = vector.broadcast %cst_15 : f32 to vector<8x8xf32>
    %37 = vector.broadcast %cst_16 : f32 to vector<8x8xf32>
    %38 = arith.select %35, %36, %37 : vector<8x8xi1>, vector<8x8xf32>
    %39 = vector.broadcast %32 : vector<1x8xf32> to vector<8x8xf32>
    %40 = arith.addf %39, %38 : vector<8x8xf32>
    %c0_17 = arith.constant 0 : index
    %c0_18 = arith.constant 0 : index
    %c0_19 = arith.constant 0 : index
    %41 = vector.load %arg4[%c0_17, %c0_18, %c0_19] : memref<1x1x8xf32, #tpu.memory_space<vmem>>, vector<1x1x8xf32>
    %42 = vector.shape_cast %41 : vector<1x1x8xf32> to vector<1x8xf32>
    %cst_20 = arith.constant 1.000000e+00 : f32
    %43 = vector.broadcast %cst_20 : f32 to vector<1x8xf32>
    %44 = arith.subf %43, %42 : vector<1x8xf32>
    %cst_21 = arith.constant -1.000000e+04 : f32
    %45 = vector.broadcast %cst_21 : f32 to vector<1x8xf32>
    %46 = arith.mulf %44, %45 : vector<1x8xf32>
    %c0_22 = arith.constant 0 : index
    %c0_23 = arith.constant 0 : index
    %c0_24 = arith.constant 0 : index
    %47 = vector.load %arg3[%c0_22, %c0_23, %c0_24] : memref<1x8x32xbf16, #tpu.memory_space<vmem>>, vector<1x8x32xbf16>
    %48 = vector.shape_cast %47 : vector<1x8x32xbf16> to vector<8x32xbf16>
    %49 = arith.extf %48 : vector<8x32xbf16> to vector<8x32xf32>
    %c0_25 = arith.constant 0 : index
    %c0_26 = arith.constant 0 : index
    %c0_27 = arith.constant 0 : index
    %c0_28 = arith.constant 0 : index
    %50 = vector.load %arg7[%c0_25, %c0_26, %c0_27, %c0_28] : memref<1x4x32x8xbf16, #tpu.memory_space<vmem>>, vector<1x4x32x8xbf16>
    %51 = vector.shape_cast %50 : vector<1x4x32x8xbf16> to vector<4x32x8xbf16>
    %c0_29 = arith.constant 0 : index
    %c0_30 = arith.constant 0 : index
    %c0_31 = arith.constant 0 : index
    %c0_32 = arith.constant 0 : index
    %52 = vector.load %arg8[%c0_29, %c0_30, %c0_31, %c0_32] : memref<1x4x1x8xf32, #tpu.memory_space<vmem>>, vector<1x4x1x8xf32>
    %53 = vector.shape_cast %52 : vector<1x4x1x8xf32> to vector<4x1x8xf32>
    %c0_33 = arith.constant 0 : index
    %c0_34 = arith.constant 0 : index
    %c0_35 = arith.constant 0 : index
    %c0_36 = arith.constant 0 : index
    %54 = vector.load %arg9[%c0_33, %c0_34, %c0_35, %c0_36] : memref<1x4x32x8xbf16, #tpu.memory_space<vmem>>, vector<1x4x32x8xbf16>
    %55 = vector.shape_cast %54 : vector<1x4x32x8xbf16> to vector<4x32x8xbf16>
    %c0_37 = arith.constant 0 : index
    %c0_38 = arith.constant 0 : index
    %c0_39 = arith.constant 0 : index
    %c0_40 = arith.constant 0 : index
    %56 = vector.load %arg10[%c0_37, %c0_38, %c0_39, %c0_40] : memref<1x4x1x8xf32, #tpu.memory_space<vmem>>, vector<1x4x1x8xf32>
    %57 = vector.shape_cast %56 : vector<1x4x1x8xf32> to vector<4x1x8xf32>
    %c0_41 = arith.constant 0 : index
    %c0_42 = arith.constant 0 : index
    %c0_43 = arith.constant 0 : index
    %c0_44 = arith.constant 0 : index
    %58 = vector.load %arg11[%c0_41, %c0_42, %c0_43, %c0_44] : memref<1x4x32x8xbf16, #tpu.memory_space<vmem>>, vector<1x4x32x8xbf16>
    %59 = vector.shape_cast %58 : vector<1x4x32x8xbf16> to vector<4x32x8xbf16>
    %c0_45 = arith.constant 0 : index
    %c0_46 = arith.constant 0 : index
    %c0_47 = arith.constant 0 : index
    %c0_48 = arith.constant 0 : index
    %60 = vector.load %arg12[%c0_45, %c0_46, %c0_47, %c0_48] : memref<1x4x1x8xf32, #tpu.memory_space<vmem>>, vector<1x4x1x8xf32>
    %61 = vector.shape_cast %60 : vector<1x4x1x8xf32> to vector<4x1x8xf32>
    %c0_49 = arith.constant 0 : index
    %c0_50 = arith.constant 0 : index
    %c0_51 = arith.constant 0 : index
    %62 = vector.load %arg13[%c0_49, %c0_50, %c0_51] : memref<1x32x32xbf16, #tpu.memory_space<vmem>>, vector<1x32x32xbf16>
    %63 = vector.shape_cast %62 : vector<1x32x32xbf16> to vector<32x32xbf16>
    %c0_52 = arith.constant 0 : index
    %c0_53 = arith.constant 0 : index
    %c0_54 = arith.constant 0 : index
    %64 = vector.load %arg14[%c0_52, %c0_53, %c0_54] : memref<1x1x32xf32, #tpu.memory_space<vmem>>, vector<1x1x32xf32>
    %65 = vector.shape_cast %64 : vector<1x1x32xf32> to vector<1x32xf32>
    %66 = vector.extract_strided_slice %51 {offsets = [0, 0, 0], sizes = [1, 32, 8], strides = [1, 1, 1]} : vector<4x32x8xbf16> to vector<1x32x8xbf16>
    %67 = vector.shape_cast %66 : vector<1x32x8xbf16> to vector<32x8xbf16>
    %68 = arith.truncf %26 : vector<8x32xf32> to vector<8x32xbf16>
    %cst_55 = arith.constant dense<0.000000e+00> : vector<8x8xf32>
    %69 = tpu.matmul %68, %67, %cst_55 {dimension_numbers = #tpu.dot_dimension_numbers<[1], [0], [0], [1], [0, 0, 1, 1], [], []>} : vector<8x32xbf16>, vector<32x8xbf16>, vector<8x8xf32> -> vector<8x8xf32>
    %70 = vector.extract_strided_slice %53 {offsets = [0, 0, 0], sizes = [1, 1, 8], strides = [1, 1, 1]} : vector<4x1x8xf32> to vector<1x1x8xf32>
    %71 = vector.shape_cast %70 : vector<1x1x8xf32> to vector<1x8xf32>
    %72 = vector.broadcast %71 : vector<1x8xf32> to vector<8x8xf32>
    %73 = arith.addf %69, %72 : vector<8x8xf32>
    %74 = vector.extract_strided_slice %55 {offsets = [0, 0, 0], sizes = [1, 32, 8], strides = [1, 1, 1]} : vector<4x32x8xbf16> to vector<1x32x8xbf16>
    %75 = vector.shape_cast %74 : vector<1x32x8xbf16> to vector<32x8xbf16>
    %76 = arith.truncf %26 : vector<8x32xf32> to vector<8x32xbf16>
    %cst_56 = arith.constant dense<0.000000e+00> : vector<8x8xf32>
    %77 = tpu.matmul %76, %75, %cst_56 {dimension_numbers = #tpu.dot_dimension_numbers<[1], [0], [0], [1], [0, 0, 1, 1], [], []>} : vector<8x32xbf16>, vector<32x8xbf16>, vector<8x8xf32> -> vector<8x8xf32>
    %78 = vector.extract_strided_slice %57 {offsets = [0, 0, 0], sizes = [1, 1, 8], strides = [1, 1, 1]} : vector<4x1x8xf32> to vector<1x1x8xf32>
    %79 = vector.shape_cast %78 : vector<1x1x8xf32> to vector<1x8xf32>
    %80 = vector.broadcast %79 : vector<1x8xf32> to vector<8x8xf32>
    %81 = arith.addf %77, %80 : vector<8x8xf32>
    %82 = vector.extract_strided_slice %59 {offsets = [0, 0, 0], sizes = [1, 32, 8], strides = [1, 1, 1]} : vector<4x32x8xbf16> to vector<1x32x8xbf16>
    %83 = vector.shape_cast %82 : vector<1x32x8xbf16> to vector<32x8xbf16>
    %84 = arith.truncf %26 : vector<8x32xf32> to vector<8x32xbf16>
    %cst_57 = arith.constant dense<0.000000e+00> : vector<8x8xf32>
    %85 = tpu.matmul %84, %83, %cst_57 {dimension_numbers = #tpu.dot_dimension_numbers<[1], [0], [0], [1], [0, 0, 1, 1], [], []>} : vector<8x32xbf16>, vector<32x8xbf16>, vector<8x8xf32> -> vector<8x8xf32>
    %86 = vector.extract_strided_slice %61 {offsets = [0, 0, 0], sizes = [1, 1, 8], strides = [1, 1, 1]} : vector<4x1x8xf32> to vector<1x1x8xf32>
    %87 = vector.shape_cast %86 : vector<1x1x8xf32> to vector<1x8xf32>
    %88 = vector.broadcast %87 : vector<1x8xf32> to vector<8x8xf32>
    %89 = arith.addf %85, %88 : vector<8x8xf32>
    %90 = arith.truncf %73 : vector<8x8xf32> to vector<8x8xbf16>
    %91 = arith.truncf %81 : vector<8x8xf32> to vector<8x8xbf16>
    %cst_58 = arith.constant dense<0.000000e+00> : vector<8x8xf32>
    %92 = tpu.matmul %90, %91, %cst_58 {dimension_numbers = #tpu.dot_dimension_numbers<[1], [1], [0], [0], [0, 0, 1, 0], [], []>} : vector<8x8xbf16>, vector<8x8xbf16>, vector<8x8xf32> -> vector<8x8xf32>
    %cst_59 = arith.constant 0.353553385 : f32
    %93 = vector.broadcast %cst_59 : f32 to vector<8x8xf32>
    %94 = arith.mulf %92, %93 : vector<8x8xf32>
    %95 = arith.addf %94, %40 : vector<8x8xf32>
    %cst_60 = arith.constant dense<0xFF800000> : vector<8xf32>
    %96 = vector.multi_reduction <maximumf>, %95, %cst_60 [1] : vector<8x8xf32> to vector<8xf32>
    %97 = vector.shape_cast %96 : vector<8xf32> to vector<8x1xf32>
    %98 = vector.broadcast %97 : vector<8x1xf32> to vector<8x8xf32>
    %99 = arith.subf %95, %98 : vector<8x8xf32>
    %100 = math.exp %99 : vector<8x8xf32>
    %cst_61 = arith.constant dense<0.000000e+00> : vector<8xf32>
    %101 = vector.multi_reduction <add>, %100, %cst_61 [1] : vector<8x8xf32> to vector<8xf32>
    %102 = vector.shape_cast %101 : vector<8xf32> to vector<8x1xf32>
    %103 = tpu.reciprocal %102 {approx = true} : vector<8x1xf32> -> vector<8x1xf32>
    %104 = vector.broadcast %103 : vector<8x1xf32> to vector<8x8xf32>
    %105 = arith.mulf %100, %104 : vector<8x8xf32>
    %106 = arith.truncf %105 : vector<8x8xf32> to vector<8x8xbf16>
    %107 = arith.truncf %89 : vector<8x8xf32> to vector<8x8xbf16>
    %cst_62 = arith.constant dense<0.000000e+00> : vector<8x8xf32>
    %108 = tpu.matmul %106, %107, %cst_62 {dimension_numbers = #tpu.dot_dimension_numbers<[1], [0], [0], [1], [0, 0, 1, 1], [], []>} : vector<8x8xbf16>, vector<8x8xbf16>, vector<8x8xf32> -> vector<8x8xf32>
    %c0_63 = arith.constant 0 : index
    %c0_64 = arith.constant 0 : index
    %109 = vector.load %arg34[%c0_63, %c0_64] : memref<8x32xf32, #tpu.memory_space<vmem>>, vector<8x8xf32>
    tpu.vector_store %arg34[%c0_63, %c0_64], %108 {strides = array<i32>} : memref<8x32xf32, #tpu.memory_space<vmem>>, vector<8x8xf32>,
    %110 = vector.extract_strided_slice %51 {offsets = [1, 0, 0], sizes = [1, 32, 8], strides = [1, 1, 1]} : vector<4x32x8xbf16> to vector<1x32x8xbf16>
    %111 = vector.shape_cast %110 : vector<1x32x8xbf16> to vector<32x8xbf16>
    %112 = arith.truncf %26 : vector<8x32xf32> to vector<8x32xbf16>
    %cst_65 = arith.constant dense<0.000000e+00> : vector<8x8xf32>
    %113 = tpu.matmul %112, %111, %cst_65 {dimension_numbers = #tpu.dot_dimension_numbers<[1], [0], [0], [1], [0, 0, 1, 1], [], []>} : vector<8x32xbf16>, vector<32x8xbf16>, vector<8x8xf32> -> vector<8x8xf32>
    %114 = vector.extract_strided_slice %53 {offsets = [1, 0, 0], sizes = [1, 1, 8], strides = [1, 1, 1]} : vector<4x1x8xf32> to vector<1x1x8xf32>
    %115 = vector.shape_cast %114 : vector<1x1x8xf32> to vector<1x8xf32>
    %116 = vector.broadcast %115 : vector<1x8xf32> to vector<8x8xf32>
    %117 = arith.addf %113, %116 : vector<8x8xf32>
    %118 = vector.extract_strided_slice %55 {offsets = [1, 0, 0], sizes = [1, 32, 8], strides = [1, 1, 1]} : vector<4x32x8xbf16> to vector<1x32x8xbf16>
    %119 = vector.shape_cast %118 : vector<1x32x8xbf16> to vector<32x8xbf16>
    %120 = arith.truncf %26 : vector<8x32xf32> to vector<8x32xbf16>
    %cst_66 = arith.constant dense<0.000000e+00> : vector<8x8xf32>
    %121 = tpu.matmul %120, %119, %cst_66 {dimension_numbers = #tpu.dot_dimension_numbers<[1], [0], [0], [1], [0, 0, 1, 1], [], []>} : vector<8x32xbf16>, vector<32x8xbf16>, vector<8x8xf32> -> vector<8x8xf32>
    %122 = vector.extract_strided_slice %57 {offsets = [1, 0, 0], sizes = [1, 1, 8], strides = [1, 1, 1]} : vector<4x1x8xf32> to vector<1x1x8xf32>
    %123 = vector.shape_cast %122 : vector<1x1x8xf32> to vector<1x8xf32>
    %124 = vector.broadcast %123 : vector<1x8xf32> to vector<8x8xf32>
    %125 = arith.addf %121, %124 : vector<8x8xf32>
    %126 = vector.extract_strided_slice %59 {offsets = [1, 0, 0], sizes = [1, 32, 8], strides = [1, 1, 1]} : vector<4x32x8xbf16> to vector<1x32x8xbf16>
    %127 = vector.shape_cast %126 : vector<1x32x8xbf16> to vector<32x8xbf16>
    %128 = arith.truncf %26 : vector<8x32xf32> to vector<8x32xbf16>
    %cst_67 = arith.constant dense<0.000000e+00> : vector<8x8xf32>
    %129 = tpu.matmul %128, %127, %cst_67 {dimension_numbers = #tpu.dot_dimension_numbers<[1], [0], [0], [1], [0, 0, 1, 1], [], []>} : vector<8x32xbf16>, vector<32x8xbf16>, vector<8x8xf32> -> vector<8x8xf32>
    %130 = vector.extract_strided_slice %61 {offsets = [1, 0, 0], sizes = [1, 1, 8], strides = [1, 1, 1]} : vector<4x1x8xf32> to vector<1x1x8xf32>
    %131 = vector.shape_cast %130 : vector<1x1x8xf32> to vector<1x8xf32>
    %132 = vector.broadcast %131 : vector<1x8xf32> to vector<8x8xf32>
    %133 = arith.addf %129, %132 : vector<8x8xf32>
    %134 = arith.truncf %117 : vector<8x8xf32> to vector<8x8xbf16>
    %135 = arith.truncf %125 : vector<8x8xf32> to vector<8x8xbf16>
    %cst_68 = arith.constant dense<0.000000e+00> : vector<8x8xf32>
    %136 = tpu.matmul %134, %135, %cst_68 {dimension_numbers = #tpu.dot_dimension_numbers<[1], [1], [0], [0], [0, 0, 1, 0], [], []>} : vector<8x8xbf16>, vector<8x8xbf16>, vector<8x8xf32> -> vector<8x8xf32>
    %cst_69 = arith.constant 0.353553385 : f32
    %137 = vector.broadcast %cst_69 : f32 to vector<8x8xf32>
    %138 = arith.mulf %136, %137 : vector<8x8xf32>
    %139 = arith.addf %138, %40 : vector<8x8xf32>
    %cst_70 = arith.constant dense<0xFF800000> : vector<8xf32>
    %140 = vector.multi_reduction <maximumf>, %139, %cst_70 [1] : vector<8x8xf32> to vector<8xf32>
    %141 = vector.shape_cast %140 : vector<8xf32> to vector<8x1xf32>
    %142 = vector.broadcast %141 : vector<8x1xf32> to vector<8x8xf32>
    %143 = arith.subf %139, %142 : vector<8x8xf32>
    %144 = math.exp %143 : vector<8x8xf32>
    %cst_71 = arith.constant dense<0.000000e+00> : vector<8xf32>
    %145 = vector.multi_reduction <add>, %144, %cst_71 [1] : vector<8x8xf32> to vector<8xf32>
    %146 = vector.shape_cast %145 : vector<8xf32> to vector<8x1xf32>
    %147 = tpu.reciprocal %146 {approx = true} : vector<8x1xf32> -> vector<8x1xf32>
    %148 = vector.broadcast %147 : vector<8x1xf32> to vector<8x8xf32>
    %149 = arith.mulf %144, %148 : vector<8x8xf32>
    %150 = arith.truncf %149 : vector<8x8xf32> to vector<8x8xbf16>
    %151 = arith.truncf %133 : vector<8x8xf32> to vector<8x8xbf16>
    %cst_72 = arith.constant dense<0.000000e+00> : vector<8x8xf32>
    %152 = tpu.matmul %150, %151, %cst_72 {dimension_numbers = #tpu.dot_dimension_numbers<[1], [0], [0], [1], [0, 0, 1, 1], [], []>} : vector<8x8xbf16>, vector<8x8xbf16>, vector<8x8xf32> -> vector<8x8xf32>
    %c0_73 = arith.constant 0 : index
    %c8 = arith.constant 8 : index
    %153 = vector.load %arg34[%c0_73, %c8] : memref<8x32xf32, #tpu.memory_space<vmem>>, vector<8x8xf32>
    tpu.vector_store %arg34[%c0_73, %c8], %152 {strides = array<i32>} : memref<8x32xf32, #tpu.memory_space<vmem>>, vector<8x8xf32>,
    %154 = vector.extract_strided_slice %51 {offsets = [2, 0, 0], sizes = [1, 32, 8], strides = [1, 1, 1]} : vector<4x32x8xbf16> to vector<1x32x8xbf16>
    %155 = vector.shape_cast %154 : vector<1x32x8xbf16> to vector<32x8xbf16>
    %156 = arith.truncf %26 : vector<8x32xf32> to vector<8x32xbf16>
    %cst_74 = arith.constant dense<0.000000e+00> : vector<8x8xf32>
    %157 = tpu.matmul %156, %155, %cst_74 {dimension_numbers = #tpu.dot_dimension_numbers<[1], [0], [0], [1], [0, 0, 1, 1], [], []>} : vector<8x32xbf16>, vector<32x8xbf16>, vector<8x8xf32> -> vector<8x8xf32>
    %158 = vector.extract_strided_slice %53 {offsets = [2, 0, 0], sizes = [1, 1, 8], strides = [1, 1, 1]} : vector<4x1x8xf32> to vector<1x1x8xf32>
    %159 = vector.shape_cast %158 : vector<1x1x8xf32> to vector<1x8xf32>
    %160 = vector.broadcast %159 : vector<1x8xf32> to vector<8x8xf32>
    %161 = arith.addf %157, %160 : vector<8x8xf32>
    %162 = vector.extract_strided_slice %55 {offsets = [2, 0, 0], sizes = [1, 32, 8], strides = [1, 1, 1]} : vector<4x32x8xbf16> to vector<1x32x8xbf16>
    %163 = vector.shape_cast %162 : vector<1x32x8xbf16> to vector<32x8xbf16>
    %164 = arith.truncf %26 : vector<8x32xf32> to vector<8x32xbf16>
    %cst_75 = arith.constant dense<0.000000e+00> : vector<8x8xf32>
    %165 = tpu.matmul %164, %163, %cst_75 {dimension_numbers = #tpu.dot_dimension_numbers<[1], [0], [0], [1], [0, 0, 1, 1], [], []>} : vector<8x32xbf16>, vector<32x8xbf16>, vector<8x8xf32> -> vector<8x8xf32>
    %166 = vector.extract_strided_slice %57 {offsets = [2, 0, 0], sizes = [1, 1, 8], strides = [1, 1, 1]} : vector<4x1x8xf32> to vector<1x1x8xf32>
    %167 = vector.shape_cast %166 : vector<1x1x8xf32> to vector<1x8xf32>
    %168 = vector.broadcast %167 : vector<1x8xf32> to vector<8x8xf32>
    %169 = arith.addf %165, %168 : vector<8x8xf32>
    %170 = vector.extract_strided_slice %59 {offsets = [2, 0, 0], sizes = [1, 32, 8], strides = [1, 1, 1]} : vector<4x32x8xbf16> to vector<1x32x8xbf16>
    %171 = vector.shape_cast %170 : vector<1x32x8xbf16> to vector<32x8xbf16>
    %172 = arith.truncf %26 : vector<8x32xf32> to vector<8x32xbf16>
    %cst_76 = arith.constant dense<0.000000e+00> : vector<8x8xf32>
    %173 = tpu.matmul %172, %171, %cst_76 {dimension_numbers = #tpu.dot_dimension_numbers<[1], [0], [0], [1], [0, 0, 1, 1], [], []>} : vector<8x32xbf16>, vector<32x8xbf16>, vector<8x8xf32> -> vector<8x8xf32>
    %174 = vector.extract_strided_slice %61 {offsets = [2, 0, 0], sizes = [1, 1, 8], strides = [1, 1, 1]} : vector<4x1x8xf32> to vector<1x1x8xf32>
    %175 = vector.shape_cast %174 : vector<1x1x8xf32> to vector<1x8xf32>
    %176 = vector.broadcast %175 : vector<1x8xf32> to vector<8x8xf32>
    %177 = arith.addf %173, %176 : vector<8x8xf32>
    %178 = arith.truncf %161 : vector<8x8xf32> to vector<8x8xbf16>
    %179 = arith.truncf %169 : vector<8x8xf32> to vector<8x8xbf16>
    %cst_77 = arith.constant dense<0.000000e+00> : vector<8x8xf32>
    %180 = tpu.matmul %178, %179, %cst_77 {dimension_numbers = #tpu.dot_dimension_numbers<[1], [1], [0], [0], [0, 0, 1, 0], [], []>} : vector<8x8xbf16>, vector<8x8xbf16>, vector<8x8xf32> -> vector<8x8xf32>
    %cst_78 = arith.constant 0.353553385 : f32
    %181 = vector.broadcast %cst_78 : f32 to vector<8x8xf32>
    %182 = arith.mulf %180, %181 : vector<8x8xf32>
    %183 = arith.addf %182, %40 : vector<8x8xf32>
    %cst_79 = arith.constant dense<0xFF800000> : vector<8xf32>
    %184 = vector.multi_reduction <maximumf>, %183, %cst_79 [1] : vector<8x8xf32> to vector<8xf32>
    %185 = vector.shape_cast %184 : vector<8xf32> to vector<8x1xf32>
    %186 = vector.broadcast %185 : vector<8x1xf32> to vector<8x8xf32>
    %187 = arith.subf %183, %186 : vector<8x8xf32>
    %188 = math.exp %187 : vector<8x8xf32>
    %cst_80 = arith.constant dense<0.000000e+00> : vector<8xf32>
    %189 = vector.multi_reduction <add>, %188, %cst_80 [1] : vector<8x8xf32> to vector<8xf32>
    %190 = vector.shape_cast %189 : vector<8xf32> to vector<8x1xf32>
    %191 = tpu.reciprocal %190 {approx = true} : vector<8x1xf32> -> vector<8x1xf32>
    %192 = vector.broadcast %191 : vector<8x1xf32> to vector<8x8xf32>
    %193 = arith.mulf %188, %192 : vector<8x8xf32>
    %194 = arith.truncf %193 : vector<8x8xf32> to vector<8x8xbf16>
    %195 = arith.truncf %177 : vector<8x8xf32> to vector<8x8xbf16>
    %cst_81 = arith.constant dense<0.000000e+00> : vector<8x8xf32>
    %196 = tpu.matmul %194, %195, %cst_81 {dimension_numbers = #tpu.dot_dimension_numbers<[1], [0], [0], [1], [0, 0, 1, 1], [], []>} : vector<8x8xbf16>, vector<8x8xbf16>, vector<8x8xf32> -> vector<8x8xf32>
    %c0_82 = arith.constant 0 : index
    %c16 = arith.constant 16 : index
    %197 = vector.load %arg34[%c0_82, %c16] : memref<8x32xf32, #tpu.memory_space<vmem>>, vector<8x8xf32>
    tpu.vector_store %arg34[%c0_82, %c16], %196 {strides = array<i32>} : memref<8x32xf32, #tpu.memory_space<vmem>>, vector<8x8xf32>,
    %198 = vector.extract_strided_slice %51 {offsets = [3, 0, 0], sizes = [1, 32, 8], strides = [1, 1, 1]} : vector<4x32x8xbf16> to vector<1x32x8xbf16>
    %199 = vector.shape_cast %198 : vector<1x32x8xbf16> to vector<32x8xbf16>
    %200 = arith.truncf %26 : vector<8x32xf32> to vector<8x32xbf16>
    %cst_83 = arith.constant dense<0.000000e+00> : vector<8x8xf32>
    %201 = tpu.matmul %200, %199, %cst_83 {dimension_numbers = #tpu.dot_dimension_numbers<[1], [0], [0], [1], [0, 0, 1, 1], [], []>} : vector<8x32xbf16>, vector<32x8xbf16>, vector<8x8xf32> -> vector<8x8xf32>
    %202 = vector.extract_strided_slice %53 {offsets = [3, 0, 0], sizes = [1, 1, 8], strides = [1, 1, 1]} : vector<4x1x8xf32> to vector<1x1x8xf32>
    %203 = vector.shape_cast %202 : vector<1x1x8xf32> to vector<1x8xf32>
    %204 = vector.broadcast %203 : vector<1x8xf32> to vector<8x8xf32>
    %205 = arith.addf %201, %204 : vector<8x8xf32>
    %206 = vector.extract_strided_slice %55 {offsets = [3, 0, 0], sizes = [1, 32, 8], strides = [1, 1, 1]} : vector<4x32x8xbf16> to vector<1x32x8xbf16>
    %207 = vector.shape_cast %206 : vector<1x32x8xbf16> to vector<32x8xbf16>
    %208 = arith.truncf %26 : vector<8x32xf32> to vector<8x32xbf16>
    %cst_84 = arith.constant dense<0.000000e+00> : vector<8x8xf32>
    %209 = tpu.matmul %208, %207, %cst_84 {dimension_numbers = #tpu.dot_dimension_numbers<[1], [0], [0], [1], [0, 0, 1, 1], [], []>} : vector<8x32xbf16>, vector<32x8xbf16>, vector<8x8xf32> -> vector<8x8xf32>
    %210 = vector.extract_strided_slice %57 {offsets = [3, 0, 0], sizes = [1, 1, 8], strides = [1, 1, 1]} : vector<4x1x8xf32> to vector<1x1x8xf32>
    %211 = vector.shape_cast %210 : vector<1x1x8xf32> to vector<1x8xf32>
    %212 = vector.broadcast %211 : vector<1x8xf32> to vector<8x8xf32>
    %213 = arith.addf %209, %212 : vector<8x8xf32>
    %214 = vector.extract_strided_slice %59 {offsets = [3, 0, 0], sizes = [1, 32, 8], strides = [1, 1, 1]} : vector<4x32x8xbf16> to vector<1x32x8xbf16>
    %215 = vector.shape_cast %214 : vector<1x32x8xbf16> to vector<32x8xbf16>
    %216 = arith.truncf %26 : vector<8x32xf32> to vector<8x32xbf16>
    %cst_85 = arith.constant dense<0.000000e+00> : vector<8x8xf32>
    %217 = tpu.matmul %216, %215, %cst_85 {dimension_numbers = #tpu.dot_dimension_numbers<[1], [0], [0], [1], [0, 0, 1, 1], [], []>} : vector<8x32xbf16>, vector<32x8xbf16>, vector<8x8xf32> -> vector<8x8xf32>
    %218 = vector.extract_strided_slice %61 {offsets = [3, 0, 0], sizes = [1, 1, 8], strides = [1, 1, 1]} : vector<4x1x8xf32> to vector<1x1x8xf32>
    %219 = vector.shape_cast %218 : vector<1x1x8xf32> to vector<1x8xf32>
    %220 = vector.broadcast %219 : vector<1x8xf32> to vector<8x8xf32>
    %221 = arith.addf %217, %220 : vector<8x8xf32>
    %222 = arith.truncf %205 : vector<8x8xf32> to vector<8x8xbf16>
    %223 = arith.truncf %213 : vector<8x8xf32> to vector<8x8xbf16>
    %cst_86 = arith.constant dense<0.000000e+00> : vector<8x8xf32>
    %224 = tpu.matmul %222, %223, %cst_86 {dimension_numbers = #tpu.dot_dimension_numbers<[1], [1], [0], [0], [0, 0, 1, 0], [], []>} : vector<8x8xbf16>, vector<8x8xbf16>, vector<8x8xf32> -> vector<8x8xf32>
    %cst_87 = arith.constant 0.353553385 : f32
    %225 = vector.broadcast %cst_87 : f32 to vector<8x8xf32>
    %226 = arith.mulf %224, %225 : vector<8x8xf32>
    %227 = arith.addf %226, %40 : vector<8x8xf32>
    %cst_88 = arith.constant dense<0xFF800000> : vector<8xf32>
    %228 = vector.multi_reduction <maximumf>, %227, %cst_88 [1] : vector<8x8xf32> to vector<8xf32>
    %229 = vector.shape_cast %228 : vector<8xf32> to vector<8x1xf32>
    %230 = vector.broadcast %229 : vector<8x1xf32> to vector<8x8xf32>
    %231 = arith.subf %227, %230 : vector<8x8xf32>
    %232 = math.exp %231 : vector<8x8xf32>
    %cst_89 = arith.constant dense<0.000000e+00> : vector<8xf32>
    %233 = vector.multi_reduction <add>, %232, %cst_89 [1] : vector<8x8xf32> to vector<8xf32>
    %234 = vector.shape_cast %233 : vector<8xf32> to vector<8x1xf32>
    %235 = tpu.reciprocal %234 {approx = true} : vector<8x1xf32> -> vector<8x1xf32>
    %236 = vector.broadcast %235 : vector<8x1xf32> to vector<8x8xf32>
    %237 = arith.mulf %232, %236 : vector<8x8xf32>
    %238 = arith.truncf %237 : vector<8x8xf32> to vector<8x8xbf16>
    %239 = arith.truncf %221 : vector<8x8xf32> to vector<8x8xbf16>
    %cst_90 = arith.constant dense<0.000000e+00> : vector<8x8xf32>
    %240 = tpu.matmul %238, %239, %cst_90 {dimension_numbers = #tpu.dot_dimension_numbers<[1], [0], [0], [1], [0, 0, 1, 1], [], []>} : vector<8x8xbf16>, vector<8x8xbf16>, vector<8x8xf32> -> vector<8x8xf32>
    %c0_91 = arith.constant 0 : index
    %c24 = arith.constant 24 : index
    %241 = vector.load %arg34[%c0_91, %c24] : memref<8x32xf32, #tpu.memory_space<vmem>>, vector<8x8xf32>
    tpu.vector_store %arg34[%c0_91, %c24], %240 {strides = array<i32>} : memref<8x32xf32, #tpu.memory_space<vmem>>, vector<8x8xf32>,
    %c0_92 = arith.constant 0 : index
    %c0_93 = arith.constant 0 : index
    %242 = vector.load %arg34[%c0_92, %c0_93] : memref<8x32xf32, #tpu.memory_space<vmem>>, vector<8x32xf32>
    %243 = arith.truncf %242 : vector<8x32xf32> to vector<8x32xbf16>
    %cst_94 = arith.constant dense<0.000000e+00> : vector<8x32xf32>
    %244 = tpu.matmul %243, %63, %cst_94 {dimension_numbers = #tpu.dot_dimension_numbers<[1], [0], [0], [1], [0, 0, 1, 1], [], []>} : vector<8x32xbf16>, vector<32x32xbf16>, vector<8x32xf32> -> vector<8x32xf32>
    %245 = vector.broadcast %65 : vector<1x32xf32> to vector<8x32xf32>
    %246 = arith.addf %244, %245 : vector<8x32xf32>
    %247 = arith.addf %26, %246 : vector<8x32xf32>
    %c0_95 = arith.constant 0 : index
    %c0_96 = arith.constant 0 : index
    %c0_97 = arith.constant 0 : index
    %248 = vector.load %arg15[%c0_95, %c0_96, %c0_97] : memref<1x1x32xf32, #tpu.memory_space<vmem>>, vector<1x1x32xf32>
    %249 = vector.shape_cast %248 : vector<1x1x32xf32> to vector<1x32xf32>
    %c0_98 = arith.constant 0 : index
    %c0_99 = arith.constant 0 : index
    %c0_100 = arith.constant 0 : index
    %250 = vector.load %arg16[%c0_98, %c0_99, %c0_100] : memref<1x1x32xf32, #tpu.memory_space<vmem>>, vector<1x1x32xf32>
    %251 = vector.shape_cast %250 : vector<1x1x32xf32> to vector<1x32xf32>
    %cst_101 = arith.constant dense<0.000000e+00> : vector<8xf32>
    %252 = vector.multi_reduction <add>, %247, %cst_101 [1] : vector<8x32xf32> to vector<8xf32>
    %253 = vector.shape_cast %252 : vector<8xf32> to vector<8x1xf32>
    %cst_102 = arith.constant 3.200000e+01 : f32
    %254 = vector.broadcast %cst_102 : f32 to vector<8x1xf32>
    %255 = arith.divf %253, %254 : vector<8x1xf32>
    %256 = vector.broadcast %255 : vector<8x1xf32> to vector<8x32xf32>
    %257 = arith.subf %247, %256 : vector<8x32xf32>
    %258 = arith.mulf %257, %257 : vector<8x32xf32>
    %cst_103 = arith.constant dense<0.000000e+00> : vector<8xf32>
    %259 = vector.multi_reduction <add>, %258, %cst_103 [1] : vector<8x32xf32> to vector<8xf32>
    %260 = vector.shape_cast %259 : vector<8xf32> to vector<8x1xf32>
    %cst_104 = arith.constant 3.200000e+01 : f32
    %261 = vector.broadcast %cst_104 : f32 to vector<8x1xf32>
    %262 = arith.divf %260, %261 : vector<8x1xf32>
    %263 = vector.broadcast %255 : vector<8x1xf32> to vector<8x32xf32>
    %264 = arith.subf %247, %263 : vector<8x32xf32>
    %cst_105 = arith.constant 9.99999996E-13 : f32
    %265 = vector.broadcast %cst_105 : f32 to vector<8x1xf32>
    %266 = arith.addf %262, %265 : vector<8x1xf32>
    %267 = math.rsqrt %266 : vector<8x1xf32>
    %268 = vector.broadcast %267 : vector<8x1xf32> to vector<8x32xf32>
    %269 = arith.mulf %264, %268 : vector<8x32xf32>
    %270 = vector.broadcast %249 : vector<1x32xf32> to vector<8x32xf32>
    %271 = arith.mulf %269, %270 : vector<8x32xf32>
    %272 = vector.broadcast %251 : vector<1x32xf32> to vector<8x32xf32>
    %273 = arith.addf %271, %272 : vector<8x32xf32>
    %c0_106 = arith.constant 0 : index
    %c0_107 = arith.constant 0 : index
    %c0_108 = arith.constant 0 : index
    %c0_109 = arith.constant 0 : index
    %274 = vector.load %arg17[%c0_106, %c0_107, %c0_108, %c0_109] : memref<1x4x32x8xbf16, #tpu.memory_space<vmem>>, vector<1x4x32x8xbf16>
    %275 = vector.shape_cast %274 : vector<1x4x32x8xbf16> to vector<4x32x8xbf16>
    %c0_110 = arith.constant 0 : index
    %c0_111 = arith.constant 0 : index
    %c0_112 = arith.constant 0 : index
    %c0_113 = arith.constant 0 : index
    %276 = vector.load %arg18[%c0_110, %c0_111, %c0_112, %c0_113] : memref<1x4x1x8xf32, #tpu.memory_space<vmem>>, vector<1x4x1x8xf32>
    %277 = vector.shape_cast %276 : vector<1x4x1x8xf32> to vector<4x1x8xf32>
    %c0_114 = arith.constant 0 : index
    %c0_115 = arith.constant 0 : index
    %c0_116 = arith.constant 0 : index
    %c0_117 = arith.constant 0 : index
    %278 = vector.load %arg19[%c0_114, %c0_115, %c0_116, %c0_117] : memref<1x4x32x8xbf16, #tpu.memory_space<vmem>>, vector<1x4x32x8xbf16>
    %279 = vector.shape_cast %278 : vector<1x4x32x8xbf16> to vector<4x32x8xbf16>
    %c0_118 = arith.constant 0 : index
    %c0_119 = arith.constant 0 : index
    %c0_120 = arith.constant 0 : index
    %c0_121 = arith.constant 0 : index
    %280 = vector.load %arg20[%c0_118, %c0_119, %c0_120, %c0_121] : memref<1x4x1x8xf32, #tpu.memory_space<vmem>>, vector<1x4x1x8xf32>
    %281 = vector.shape_cast %280 : vector<1x4x1x8xf32> to vector<4x1x8xf32>
    %c0_122 = arith.constant 0 : index
    %c0_123 = arith.constant 0 : index
    %c0_124 = arith.constant 0 : index
    %c0_125 = arith.constant 0 : index
    %282 = vector.load %arg21[%c0_122, %c0_123, %c0_124, %c0_125] : memref<1x4x32x8xbf16, #tpu.memory_space<vmem>>, vector<1x4x32x8xbf16>
    %283 = vector.shape_cast %282 : vector<1x4x32x8xbf16> to vector<4x32x8xbf16>
    %c0_126 = arith.constant 0 : index
    %c0_127 = arith.constant 0 : index
    %c0_128 = arith.constant 0 : index
    %c0_129 = arith.constant 0 : index
    %284 = vector.load %arg22[%c0_126, %c0_127, %c0_128, %c0_129] : memref<1x4x1x8xf32, #tpu.memory_space<vmem>>, vector<1x4x1x8xf32>
    %285 = vector.shape_cast %284 : vector<1x4x1x8xf32> to vector<4x1x8xf32>
    %c0_130 = arith.constant 0 : index
    %c0_131 = arith.constant 0 : index
    %c0_132 = arith.constant 0 : index
    %286 = vector.load %arg23[%c0_130, %c0_131, %c0_132] : memref<1x32x32xbf16, #tpu.memory_space<vmem>>, vector<1x32x32xbf16>
    %287 = vector.shape_cast %286 : vector<1x32x32xbf16> to vector<32x32xbf16>
    %c0_133 = arith.constant 0 : index
    %c0_134 = arith.constant 0 : index
    %c0_135 = arith.constant 0 : index
    %288 = vector.load %arg24[%c0_133, %c0_134, %c0_135] : memref<1x1x32xf32, #tpu.memory_space<vmem>>, vector<1x1x32xf32>
    %289 = vector.shape_cast %288 : vector<1x1x32xf32> to vector<1x32xf32>
    %290 = vector.extract_strided_slice %275 {offsets = [0, 0, 0], sizes = [1, 32, 8], strides = [1, 1, 1]} : vector<4x32x8xbf16> to vector<1x32x8xbf16>
    %291 = vector.shape_cast %290 : vector<1x32x8xbf16> to vector<32x8xbf16>
    %292 = arith.truncf %273 : vector<8x32xf32> to vector<8x32xbf16>
    %cst_136 = arith.constant dense<0.000000e+00> : vector<8x8xf32>
    %293 = tpu.matmul %292, %291, %cst_136 {dimension_numbers = #tpu.dot_dimension_numbers<[1], [0], [0], [1], [0, 0, 1, 1], [], []>} : vector<8x32xbf16>, vector<32x8xbf16>, vector<8x8xf32> -> vector<8x8xf32>
    %294 = vector.extract_strided_slice %277 {offsets = [0, 0, 0], sizes = [1, 1, 8], strides = [1, 1, 1]} : vector<4x1x8xf32> to vector<1x1x8xf32>
    %295 = vector.shape_cast %294 : vector<1x1x8xf32> to vector<1x8xf32>
    %296 = vector.broadcast %295 : vector<1x8xf32> to vector<8x8xf32>
    %297 = arith.addf %293, %296 : vector<8x8xf32>
    %298 = vector.extract_strided_slice %279 {offsets = [0, 0, 0], sizes = [1, 32, 8], strides = [1, 1, 1]} : vector<4x32x8xbf16> to vector<1x32x8xbf16>
    %299 = vector.shape_cast %298 : vector<1x32x8xbf16> to vector<32x8xbf16>
    %300 = arith.truncf %49 : vector<8x32xf32> to vector<8x32xbf16>
    %cst_137 = arith.constant dense<0.000000e+00> : vector<8x8xf32>
    %301 = tpu.matmul %300, %299, %cst_137 {dimension_numbers = #tpu.dot_dimension_numbers<[1], [0], [0], [1], [0, 0, 1, 1], [], []>} : vector<8x32xbf16>, vector<32x8xbf16>, vector<8x8xf32> -> vector<8x8xf32>
    %302 = vector.extract_strided_slice %281 {offsets = [0, 0, 0], sizes = [1, 1, 8], strides = [1, 1, 1]} : vector<4x1x8xf32> to vector<1x1x8xf32>
    %303 = vector.shape_cast %302 : vector<1x1x8xf32> to vector<1x8xf32>
    %304 = vector.broadcast %303 : vector<1x8xf32> to vector<8x8xf32>
    %305 = arith.addf %301, %304 : vector<8x8xf32>
    %306 = vector.extract_strided_slice %283 {offsets = [0, 0, 0], sizes = [1, 32, 8], strides = [1, 1, 1]} : vector<4x32x8xbf16> to vector<1x32x8xbf16>
    %307 = vector.shape_cast %306 : vector<1x32x8xbf16> to vector<32x8xbf16>
    %308 = arith.truncf %49 : vector<8x32xf32> to vector<8x32xbf16>
    %cst_138 = arith.constant dense<0.000000e+00> : vector<8x8xf32>
    %309 = tpu.matmul %308, %307, %cst_138 {dimension_numbers = #tpu.dot_dimension_numbers<[1], [0], [0], [1], [0, 0, 1, 1], [], []>} : vector<8x32xbf16>, vector<32x8xbf16>, vector<8x8xf32> -> vector<8x8xf32>
    %310 = vector.extract_strided_slice %285 {offsets = [0, 0, 0], sizes = [1, 1, 8], strides = [1, 1, 1]} : vector<4x1x8xf32> to vector<1x1x8xf32>
    %311 = vector.shape_cast %310 : vector<1x1x8xf32> to vector<1x8xf32>
    %312 = vector.broadcast %311 : vector<1x8xf32> to vector<8x8xf32>
    %313 = arith.addf %309, %312 : vector<8x8xf32>
    %314 = arith.truncf %297 : vector<8x8xf32> to vector<8x8xbf16>
    %315 = arith.truncf %305 : vector<8x8xf32> to vector<8x8xbf16>
    %cst_139 = arith.constant dense<0.000000e+00> : vector<8x8xf32>
    %316 = tpu.matmul %314, %315, %cst_139 {dimension_numbers = #tpu.dot_dimension_numbers<[1], [1], [0], [0], [0, 0, 1, 0], [], []>} : vector<8x8xbf16>, vector<8x8xbf16>, vector<8x8xf32> -> vector<8x8xf32>
    %cst_140 = arith.constant 0.353553385 : f32
    %317 = vector.broadcast %cst_140 : f32 to vector<8x8xf32>
    %318 = arith.mulf %316, %317 : vector<8x8xf32>
    %319 = vector.broadcast %46 : vector<1x8xf32> to vector<8x8xf32>
    %320 = arith.addf %318, %319 : vector<8x8xf32>
    %cst_141 = arith.constant dense<0xFF800000> : vector<8xf32>
    %321 = vector.multi_reduction <maximumf>, %320, %cst_141 [1] : vector<8x8xf32> to vector<8xf32>
    %322 = vector.shape_cast %321 : vector<8xf32> to vector<8x1xf32>
    %323 = vector.broadcast %322 : vector<8x1xf32> to vector<8x8xf32>
    %324 = arith.subf %320, %323 : vector<8x8xf32>
    %325 = math.exp %324 : vector<8x8xf32>
    %cst_142 = arith.constant dense<0.000000e+00> : vector<8xf32>
    %326 = vector.multi_reduction <add>, %325, %cst_142 [1] : vector<8x8xf32> to vector<8xf32>
    %327 = vector.shape_cast %326 : vector<8xf32> to vector<8x1xf32>
    %328 = tpu.reciprocal %327 {approx = true} : vector<8x1xf32> -> vector<8x1xf32>
    %329 = vector.broadcast %328 : vector<8x1xf32> to vector<8x8xf32>
    %330 = arith.mulf %325, %329 : vector<8x8xf32>
    %331 = arith.truncf %330 : vector<8x8xf32> to vector<8x8xbf16>
    %332 = arith.truncf %313 : vector<8x8xf32> to vector<8x8xbf16>
    %cst_143 = arith.constant dense<0.000000e+00> : vector<8x8xf32>
    %333 = tpu.matmul %331, %332, %cst_143 {dimension_numbers = #tpu.dot_dimension_numbers<[1], [0], [0], [1], [0, 0, 1, 1], [], []>} : vector<8x8xbf16>, vector<8x8xbf16>, vector<8x8xf32> -> vector<8x8xf32>
    %c0_144 = arith.constant 0 : index
    %c0_145 = arith.constant 0 : index
    %334 = vector.load %arg34[%c0_144, %c0_145] : memref<8x32xf32, #tpu.memory_space<vmem>>, vector<8x8xf32>
    tpu.vector_store %arg34[%c0_144, %c0_145], %333 {strides = array<i32>} : memref<8x32xf32, #tpu.memory_space<vmem>>, vector<8x8xf32>,
    %335 = vector.extract_strided_slice %275 {offsets = [1, 0, 0], sizes = [1, 32, 8], strides = [1, 1, 1]} : vector<4x32x8xbf16> to vector<1x32x8xbf16>
    %336 = vector.shape_cast %335 : vector<1x32x8xbf16> to vector<32x8xbf16>
    %337 = arith.truncf %273 : vector<8x32xf32> to vector<8x32xbf16>
    %cst_146 = arith.constant dense<0.000000e+00> : vector<8x8xf32>
    %338 = tpu.matmul %337, %336, %cst_146 {dimension_numbers = #tpu.dot_dimension_numbers<[1], [0], [0], [1], [0, 0, 1, 1], [], []>} : vector<8x32xbf16>, vector<32x8xbf16>, vector<8x8xf32> -> vector<8x8xf32>
    %339 = vector.extract_strided_slice %277 {offsets = [1, 0, 0], sizes = [1, 1, 8], strides = [1, 1, 1]} : vector<4x1x8xf32> to vector<1x1x8xf32>
    %340 = vector.shape_cast %339 : vector<1x1x8xf32> to vector<1x8xf32>
    %341 = vector.broadcast %340 : vector<1x8xf32> to vector<8x8xf32>
    %342 = arith.addf %338, %341 : vector<8x8xf32>
    %343 = vector.extract_strided_slice %279 {offsets = [1, 0, 0], sizes = [1, 32, 8], strides = [1, 1, 1]} : vector<4x32x8xbf16> to vector<1x32x8xbf16>
    %344 = vector.shape_cast %343 : vector<1x32x8xbf16> to vector<32x8xbf16>
    %345 = arith.truncf %49 : vector<8x32xf32> to vector<8x32xbf16>
    %cst_147 = arith.constant dense<0.000000e+00> : vector<8x8xf32>
    %346 = tpu.matmul %345, %344, %cst_147 {dimension_numbers = #tpu.dot_dimension_numbers<[1], [0], [0], [1], [0, 0, 1, 1], [], []>} : vector<8x32xbf16>, vector<32x8xbf16>, vector<8x8xf32> -> vector<8x8xf32>
    %347 = vector.extract_strided_slice %281 {offsets = [1, 0, 0], sizes = [1, 1, 8], strides = [1, 1, 1]} : vector<4x1x8xf32> to vector<1x1x8xf32>
    %348 = vector.shape_cast %347 : vector<1x1x8xf32> to vector<1x8xf32>
    %349 = vector.broadcast %348 : vector<1x8xf32> to vector<8x8xf32>
    %350 = arith.addf %346, %349 : vector<8x8xf32>
    %351 = vector.extract_strided_slice %283 {offsets = [1, 0, 0], sizes = [1, 32, 8], strides = [1, 1, 1]} : vector<4x32x8xbf16> to vector<1x32x8xbf16>
    %352 = vector.shape_cast %351 : vector<1x32x8xbf16> to vector<32x8xbf16>
    %353 = arith.truncf %49 : vector<8x32xf32> to vector<8x32xbf16>
    %cst_148 = arith.constant dense<0.000000e+00> : vector<8x8xf32>
    %354 = tpu.matmul %353, %352, %cst_148 {dimension_numbers = #tpu.dot_dimension_numbers<[1], [0], [0], [1], [0, 0, 1, 1], [], []>} : vector<8x32xbf16>, vector<32x8xbf16>, vector<8x8xf32> -> vector<8x8xf32>
    %355 = vector.extract_strided_slice %285 {offsets = [1, 0, 0], sizes = [1, 1, 8], strides = [1, 1, 1]} : vector<4x1x8xf32> to vector<1x1x8xf32>
    %356 = vector.shape_cast %355 : vector<1x1x8xf32> to vector<1x8xf32>
    %357 = vector.broadcast %356 : vector<1x8xf32> to vector<8x8xf32>
    %358 = arith.addf %354, %357 : vector<8x8xf32>
    %359 = arith.truncf %342 : vector<8x8xf32> to vector<8x8xbf16>
    %360 = arith.truncf %350 : vector<8x8xf32> to vector<8x8xbf16>
    %cst_149 = arith.constant dense<0.000000e+00> : vector<8x8xf32>
    %361 = tpu.matmul %359, %360, %cst_149 {dimension_numbers = #tpu.dot_dimension_numbers<[1], [1], [0], [0], [0, 0, 1, 0], [], []>} : vector<8x8xbf16>, vector<8x8xbf16>, vector<8x8xf32> -> vector<8x8xf32>
    %cst_150 = arith.constant 0.353553385 : f32
    %362 = vector.broadcast %cst_150 : f32 to vector<8x8xf32>
    %363 = arith.mulf %361, %362 : vector<8x8xf32>
    %364 = vector.broadcast %46 : vector<1x8xf32> to vector<8x8xf32>
    %365 = arith.addf %363, %364 : vector<8x8xf32>
    %cst_151 = arith.constant dense<0xFF800000> : vector<8xf32>
    %366 = vector.multi_reduction <maximumf>, %365, %cst_151 [1] : vector<8x8xf32> to vector<8xf32>
    %367 = vector.shape_cast %366 : vector<8xf32> to vector<8x1xf32>
    %368 = vector.broadcast %367 : vector<8x1xf32> to vector<8x8xf32>
    %369 = arith.subf %365, %368 : vector<8x8xf32>
    %370 = math.exp %369 : vector<8x8xf32>
    %cst_152 = arith.constant dense<0.000000e+00> : vector<8xf32>
    %371 = vector.multi_reduction <add>, %370, %cst_152 [1] : vector<8x8xf32> to vector<8xf32>
    %372 = vector.shape_cast %371 : vector<8xf32> to vector<8x1xf32>
    %373 = tpu.reciprocal %372 {approx = true} : vector<8x1xf32> -> vector<8x1xf32>
    %374 = vector.broadcast %373 : vector<8x1xf32> to vector<8x8xf32>
    %375 = arith.mulf %370, %374 : vector<8x8xf32>
    %376 = arith.truncf %375 : vector<8x8xf32> to vector<8x8xbf16>
    %377 = arith.truncf %358 : vector<8x8xf32> to vector<8x8xbf16>
    %cst_153 = arith.constant dense<0.000000e+00> : vector<8x8xf32>
    %378 = tpu.matmul %376, %377, %cst_153 {dimension_numbers = #tpu.dot_dimension_numbers<[1], [0], [0], [1], [0, 0, 1, 1], [], []>} : vector<8x8xbf16>, vector<8x8xbf16>, vector<8x8xf32> -> vector<8x8xf32>
    %c0_154 = arith.constant 0 : index
    %c8_155 = arith.constant 8 : index
    %379 = vector.load %arg34[%c0_154, %c8_155] : memref<8x32xf32, #tpu.memory_space<vmem>>, vector<8x8xf32>
    tpu.vector_store %arg34[%c0_154, %c8_155], %378 {strides = array<i32>} : memref<8x32xf32, #tpu.memory_space<vmem>>, vector<8x8xf32>,
    %380 = vector.extract_strided_slice %275 {offsets = [2, 0, 0], sizes = [1, 32, 8], strides = [1, 1, 1]} : vector<4x32x8xbf16> to vector<1x32x8xbf16>
    %381 = vector.shape_cast %380 : vector<1x32x8xbf16> to vector<32x8xbf16>
    %382 = arith.truncf %273 : vector<8x32xf32> to vector<8x32xbf16>
    %cst_156 = arith.constant dense<0.000000e+00> : vector<8x8xf32>
    %383 = tpu.matmul %382, %381, %cst_156 {dimension_numbers = #tpu.dot_dimension_numbers<[1], [0], [0], [1], [0, 0, 1, 1], [], []>} : vector<8x32xbf16>, vector<32x8xbf16>, vector<8x8xf32> -> vector<8x8xf32>
    %384 = vector.extract_strided_slice %277 {offsets = [2, 0, 0], sizes = [1, 1, 8], strides = [1, 1, 1]} : vector<4x1x8xf32> to vector<1x1x8xf32>
    %385 = vector.shape_cast %384 : vector<1x1x8xf32> to vector<1x8xf32>
    %386 = vector.broadcast %385 : vector<1x8xf32> to vector<8x8xf32>
    %387 = arith.addf %383, %386 : vector<8x8xf32>
    %388 = vector.extract_strided_slice %279 {offsets = [2, 0, 0], sizes = [1, 32, 8], strides = [1, 1, 1]} : vector<4x32x8xbf16> to vector<1x32x8xbf16>
    %389 = vector.shape_cast %388 : vector<1x32x8xbf16> to vector<32x8xbf16>
    %390 = arith.truncf %49 : vector<8x32xf32> to vector<8x32xbf16>
    %cst_157 = arith.constant dense<0.000000e+00> : vector<8x8xf32>
    %391 = tpu.matmul %390, %389, %cst_157 {dimension_numbers = #tpu.dot_dimension_numbers<[1], [0], [0], [1], [0, 0, 1, 1], [], []>} : vector<8x32xbf16>, vector<32x8xbf16>, vector<8x8xf32> -> vector<8x8xf32>
    %392 = vector.extract_strided_slice %281 {offsets = [2, 0, 0], sizes = [1, 1, 8], strides = [1, 1, 1]} : vector<4x1x8xf32> to vector<1x1x8xf32>
    %393 = vector.shape_cast %392 : vector<1x1x8xf32> to vector<1x8xf32>
    %394 = vector.broadcast %393 : vector<1x8xf32> to vector<8x8xf32>
    %395 = arith.addf %391, %394 : vector<8x8xf32>
    %396 = vector.extract_strided_slice %283 {offsets = [2, 0, 0], sizes = [1, 32, 8], strides = [1, 1, 1]} : vector<4x32x8xbf16> to vector<1x32x8xbf16>
    %397 = vector.shape_cast %396 : vector<1x32x8xbf16> to vector<32x8xbf16>
    %398 = arith.truncf %49 : vector<8x32xf32> to vector<8x32xbf16>
    %cst_158 = arith.constant dense<0.000000e+00> : vector<8x8xf32>
    %399 = tpu.matmul %398, %397, %cst_158 {dimension_numbers = #tpu.dot_dimension_numbers<[1], [0], [0], [1], [0, 0, 1, 1], [], []>} : vector<8x32xbf16>, vector<32x8xbf16>, vector<8x8xf32> -> vector<8x8xf32>
    %400 = vector.extract_strided_slice %285 {offsets = [2, 0, 0], sizes = [1, 1, 8], strides = [1, 1, 1]} : vector<4x1x8xf32> to vector<1x1x8xf32>
    %401 = vector.shape_cast %400 : vector<1x1x8xf32> to vector<1x8xf32>
    %402 = vector.broadcast %401 : vector<1x8xf32> to vector<8x8xf32>
    %403 = arith.addf %399, %402 : vector<8x8xf32>
    %404 = arith.truncf %387 : vector<8x8xf32> to vector<8x8xbf16>
    %405 = arith.truncf %395 : vector<8x8xf32> to vector<8x8xbf16>
    %cst_159 = arith.constant dense<0.000000e+00> : vector<8x8xf32>
    %406 = tpu.matmul %404, %405, %cst_159 {dimension_numbers = #tpu.dot_dimension_numbers<[1], [1], [0], [0], [0, 0, 1, 0], [], []>} : vector<8x8xbf16>, vector<8x8xbf16>, vector<8x8xf32> -> vector<8x8xf32>
    %cst_160 = arith.constant 0.353553385 : f32
    %407 = vector.broadcast %cst_160 : f32 to vector<8x8xf32>
    %408 = arith.mulf %406, %407 : vector<8x8xf32>
    %409 = vector.broadcast %46 : vector<1x8xf32> to vector<8x8xf32>
    %410 = arith.addf %408, %409 : vector<8x8xf32>
    %cst_161 = arith.constant dense<0xFF800000> : vector<8xf32>
    %411 = vector.multi_reduction <maximumf>, %410, %cst_161 [1] : vector<8x8xf32> to vector<8xf32>
    %412 = vector.shape_cast %411 : vector<8xf32> to vector<8x1xf32>
    %413 = vector.broadcast %412 : vector<8x1xf32> to vector<8x8xf32>
    %414 = arith.subf %410, %413 : vector<8x8xf32>
    %415 = math.exp %414 : vector<8x8xf32>
    %cst_162 = arith.constant dense<0.000000e+00> : vector<8xf32>
    %416 = vector.multi_reduction <add>, %415, %cst_162 [1] : vector<8x8xf32> to vector<8xf32>
    %417 = vector.shape_cast %416 : vector<8xf32> to vector<8x1xf32>
    %418 = tpu.reciprocal %417 {approx = true} : vector<8x1xf32> -> vector<8x1xf32>
    %419 = vector.broadcast %418 : vector<8x1xf32> to vector<8x8xf32>
    %420 = arith.mulf %415, %419 : vector<8x8xf32>
    %421 = arith.truncf %420 : vector<8x8xf32> to vector<8x8xbf16>
    %422 = arith.truncf %403 : vector<8x8xf32> to vector<8x8xbf16>
    %cst_163 = arith.constant dense<0.000000e+00> : vector<8x8xf32>
    %423 = tpu.matmul %421, %422, %cst_163 {dimension_numbers = #tpu.dot_dimension_numbers<[1], [0], [0], [1], [0, 0, 1, 1], [], []>} : vector<8x8xbf16>, vector<8x8xbf16>, vector<8x8xf32> -> vector<8x8xf32>
    %c0_164 = arith.constant 0 : index
    %c16_165 = arith.constant 16 : index
    %424 = vector.load %arg34[%c0_164, %c16_165] : memref<8x32xf32, #tpu.memory_space<vmem>>, vector<8x8xf32>
    tpu.vector_store %arg34[%c0_164, %c16_165], %423 {strides = array<i32>} : memref<8x32xf32, #tpu.memory_space<vmem>>, vector<8x8xf32>,
    %425 = vector.extract_strided_slice %275 {offsets = [3, 0, 0], sizes = [1, 32, 8], strides = [1, 1, 1]} : vector<4x32x8xbf16> to vector<1x32x8xbf16>
    %426 = vector.shape_cast %425 : vector<1x32x8xbf16> to vector<32x8xbf16>
    %427 = arith.truncf %273 : vector<8x32xf32> to vector<8x32xbf16>
    %cst_166 = arith.constant dense<0.000000e+00> : vector<8x8xf32>
    %428 = tpu.matmul %427, %426, %cst_166 {dimension_numbers = #tpu.dot_dimension_numbers<[1], [0], [0], [1], [0, 0, 1, 1], [], []>} : vector<8x32xbf16>, vector<32x8xbf16>, vector<8x8xf32> -> vector<8x8xf32>
    %429 = vector.extract_strided_slice %277 {offsets = [3, 0, 0], sizes = [1, 1, 8], strides = [1, 1, 1]} : vector<4x1x8xf32> to vector<1x1x8xf32>
    %430 = vector.shape_cast %429 : vector<1x1x8xf32> to vector<1x8xf32>
    %431 = vector.broadcast %430 : vector<1x8xf32> to vector<8x8xf32>
    %432 = arith.addf %428, %431 : vector<8x8xf32>
    %433 = vector.extract_strided_slice %279 {offsets = [3, 0, 0], sizes = [1, 32, 8], strides = [1, 1, 1]} : vector<4x32x8xbf16> to vector<1x32x8xbf16>
    %434 = vector.shape_cast %433 : vector<1x32x8xbf16> to vector<32x8xbf16>
    %435 = arith.truncf %49 : vector<8x32xf32> to vector<8x32xbf16>
    %cst_167 = arith.constant dense<0.000000e+00> : vector<8x8xf32>
    %436 = tpu.matmul %435, %434, %cst_167 {dimension_numbers = #tpu.dot_dimension_numbers<[1], [0], [0], [1], [0, 0, 1, 1], [], []>} : vector<8x32xbf16>, vector<32x8xbf16>, vector<8x8xf32> -> vector<8x8xf32>
    %437 = vector.extract_strided_slice %281 {offsets = [3, 0, 0], sizes = [1, 1, 8], strides = [1, 1, 1]} : vector<4x1x8xf32> to vector<1x1x8xf32>
    %438 = vector.shape_cast %437 : vector<1x1x8xf32> to vector<1x8xf32>
    %439 = vector.broadcast %438 : vector<1x8xf32> to vector<8x8xf32>
    %440 = arith.addf %436, %439 : vector<8x8xf32>
    %441 = vector.extract_strided_slice %283 {offsets = [3, 0, 0], sizes = [1, 32, 8], strides = [1, 1, 1]} : vector<4x32x8xbf16> to vector<1x32x8xbf16>
    %442 = vector.shape_cast %441 : vector<1x32x8xbf16> to vector<32x8xbf16>
    %443 = arith.truncf %49 : vector<8x32xf32> to vector<8x32xbf16>
    %cst_168 = arith.constant dense<0.000000e+00> : vector<8x8xf32>
    %444 = tpu.matmul %443, %442, %cst_168 {dimension_numbers = #tpu.dot_dimension_numbers<[1], [0], [0], [1], [0, 0, 1, 1], [], []>} : vector<8x32xbf16>, vector<32x8xbf16>, vector<8x8xf32> -> vector<8x8xf32>
    %445 = vector.extract_strided_slice %285 {offsets = [3, 0, 0], sizes = [1, 1, 8], strides = [1, 1, 1]} : vector<4x1x8xf32> to vector<1x1x8xf32>
    %446 = vector.shape_cast %445 : vector<1x1x8xf32> to vector<1x8xf32>
    %447 = vector.broadcast %446 : vector<1x8xf32> to vector<8x8xf32>
    %448 = arith.addf %444, %447 : vector<8x8xf32>
    %449 = arith.truncf %432 : vector<8x8xf32> to vector<8x8xbf16>
    %450 = arith.truncf %440 : vector<8x8xf32> to vector<8x8xbf16>
    %cst_169 = arith.constant dense<0.000000e+00> : vector<8x8xf32>
    %451 = tpu.matmul %449, %450, %cst_169 {dimension_numbers = #tpu.dot_dimension_numbers<[1], [1], [0], [0], [0, 0, 1, 0], [], []>} : vector<8x8xbf16>, vector<8x8xbf16>, vector<8x8xf32> -> vector<8x8xf32>
    %cst_170 = arith.constant 0.353553385 : f32
    %452 = vector.broadcast %cst_170 : f32 to vector<8x8xf32>
    %453 = arith.mulf %451, %452 : vector<8x8xf32>
    %454 = vector.broadcast %46 : vector<1x8xf32> to vector<8x8xf32>
    %455 = arith.addf %453, %454 : vector<8x8xf32>
    %cst_171 = arith.constant dense<0xFF800000> : vector<8xf32>
    %456 = vector.multi_reduction <maximumf>, %455, %cst_171 [1] : vector<8x8xf32> to vector<8xf32>
    %457 = vector.shape_cast %456 : vector<8xf32> to vector<8x1xf32>
    %458 = vector.broadcast %457 : vector<8x1xf32> to vector<8x8xf32>
    %459 = arith.subf %455, %458 : vector<8x8xf32>
    %460 = math.exp %459 : vector<8x8xf32>
    %cst_172 = arith.constant dense<0.000000e+00> : vector<8xf32>
    %461 = vector.multi_reduction <add>, %460, %cst_172 [1] : vector<8x8xf32> to vector<8xf32>
    %462 = vector.shape_cast %461 : vector<8xf32> to vector<8x1xf32>
    %463 = tpu.reciprocal %462 {approx = true} : vector<8x1xf32> -> vector<8x1xf32>
    %464 = vector.broadcast %463 : vector<8x1xf32> to vector<8x8xf32>
    %465 = arith.mulf %460, %464 : vector<8x8xf32>
    %466 = arith.truncf %465 : vector<8x8xf32> to vector<8x8xbf16>
    %467 = arith.truncf %448 : vector<8x8xf32> to vector<8x8xbf16>
    %cst_173 = arith.constant dense<0.000000e+00> : vector<8x8xf32>
    %468 = tpu.matmul %466, %467, %cst_173 {dimension_numbers = #tpu.dot_dimension_numbers<[1], [0], [0], [1], [0, 0, 1, 1], [], []>} : vector<8x8xbf16>, vector<8x8xbf16>, vector<8x8xf32> -> vector<8x8xf32>
    %c0_174 = arith.constant 0 : index
    %c24_175 = arith.constant 24 : index
    %469 = vector.load %arg34[%c0_174, %c24_175] : memref<8x32xf32, #tpu.memory_space<vmem>>, vector<8x8xf32>
    tpu.vector_store %arg34[%c0_174, %c24_175], %468 {strides = array<i32>} : memref<8x32xf32, #tpu.memory_space<vmem>>, vector<8x8xf32>,
    %c0_176 = arith.constant 0 : index
    %c0_177 = arith.constant 0 : index
    %470 = vector.load %arg34[%c0_176, %c0_177] : memref<8x32xf32, #tpu.memory_space<vmem>>, vector<8x32xf32>
    %471 = arith.truncf %470 : vector<8x32xf32> to vector<8x32xbf16>
    %cst_178 = arith.constant dense<0.000000e+00> : vector<8x32xf32>
    %472 = tpu.matmul %471, %287, %cst_178 {dimension_numbers = #tpu.dot_dimension_numbers<[1], [0], [0], [1], [0, 0, 1, 1], [], []>} : vector<8x32xbf16>, vector<32x32xbf16>, vector<8x32xf32> -> vector<8x32xf32>
    %473 = vector.broadcast %289 : vector<1x32xf32> to vector<8x32xf32>
    %474 = arith.addf %472, %473 : vector<8x32xf32>
    %475 = arith.addf %273, %474 : vector<8x32xf32>
    %c0_179 = arith.constant 0 : index
    %c0_180 = arith.constant 0 : index
    %c0_181 = arith.constant 0 : index
    %476 = vector.load %arg25[%c0_179, %c0_180, %c0_181] : memref<1x1x32xf32, #tpu.memory_space<vmem>>, vector<1x1x32xf32>
    %477 = vector.shape_cast %476 : vector<1x1x32xf32> to vector<1x32xf32>
    %c0_182 = arith.constant 0 : index
    %c0_183 = arith.constant 0 : index
    %c0_184 = arith.constant 0 : index
    %478 = vector.load %arg26[%c0_182, %c0_183, %c0_184] : memref<1x1x32xf32, #tpu.memory_space<vmem>>, vector<1x1x32xf32>
    %479 = vector.shape_cast %478 : vector<1x1x32xf32> to vector<1x32xf32>
    %cst_185 = arith.constant dense<0.000000e+00> : vector<8xf32>
    %480 = vector.multi_reduction <add>, %475, %cst_185 [1] : vector<8x32xf32> to vector<8xf32>
    %481 = vector.shape_cast %480 : vector<8xf32> to vector<8x1xf32>
    %cst_186 = arith.constant 3.200000e+01 : f32
    %482 = vector.broadcast %cst_186 : f32 to vector<8x1xf32>
    %483 = arith.divf %481, %482 : vector<8x1xf32>
    %484 = vector.broadcast %483 : vector<8x1xf32> to vector<8x32xf32>
    %485 = arith.subf %475, %484 : vector<8x32xf32>
    %486 = arith.mulf %485, %485 : vector<8x32xf32>
    %cst_187 = arith.constant dense<0.000000e+00> : vector<8xf32>
    %487 = vector.multi_reduction <add>, %486, %cst_187 [1] : vector<8x32xf32> to vector<8xf32>
    %488 = vector.shape_cast %487 : vector<8xf32> to vector<8x1xf32>
    %cst_188 = arith.constant 3.200000e+01 : f32
    %489 = vector.broadcast %cst_188 : f32 to vector<8x1xf32>
    %490 = arith.divf %488, %489 : vector<8x1xf32>
    %491 = vector.broadcast %483 : vector<8x1xf32> to vector<8x32xf32>
    %492 = arith.subf %475, %491 : vector<8x32xf32>
    %cst_189 = arith.constant 9.99999996E-13 : f32
    %493 = vector.broadcast %cst_189 : f32 to vector<8x1xf32>
    %494 = arith.addf %490, %493 : vector<8x1xf32>
    %495 = math.rsqrt %494 : vector<8x1xf32>
    %496 = vector.broadcast %495 : vector<8x1xf32> to vector<8x32xf32>
    %497 = arith.mulf %492, %496 : vector<8x32xf32>
    %498 = vector.broadcast %477 : vector<1x32xf32> to vector<8x32xf32>
    %499 = arith.mulf %497, %498 : vector<8x32xf32>
    %500 = vector.broadcast %479 : vector<1x32xf32> to vector<8x32xf32>
    %501 = arith.addf %499, %500 : vector<8x32xf32>
    %c0_190 = arith.constant 0 : index
    %c0_191 = arith.constant 0 : index
    %c0_192 = arith.constant 0 : index
    %502 = vector.load %arg27[%c0_190, %c0_191, %c0_192] : memref<1x32x64xbf16, #tpu.memory_space<vmem>>, vector<1x32x64xbf16>
    %503 = vector.shape_cast %502 : vector<1x32x64xbf16> to vector<32x64xbf16>
    %504 = arith.truncf %501 : vector<8x32xf32> to vector<8x32xbf16>
    %cst_193 = arith.constant dense<0.000000e+00> : vector<8x64xf32>
    %505 = tpu.matmul %504, %503, %cst_193 {dimension_numbers = #tpu.dot_dimension_numbers<[1], [0], [0], [1], [0, 0, 1, 1], [], []>} : vector<8x32xbf16>, vector<32x64xbf16>, vector<8x64xf32> -> vector<8x64xf32>
    %c0_194 = arith.constant 0 : index
    %c0_195 = arith.constant 0 : index
    %c0_196 = arith.constant 0 : index
    %506 = vector.load %arg28[%c0_194, %c0_195, %c0_196] : memref<1x1x64xf32, #tpu.memory_space<vmem>>, vector<1x1x64xf32>
    %507 = vector.shape_cast %506 : vector<1x1x64xf32> to vector<1x64xf32>
    %508 = vector.broadcast %507 : vector<1x64xf32> to vector<8x64xf32>
    %509 = arith.addf %505, %508 : vector<8x64xf32>
    %cst_197 = arith.constant 5.000000e-01 : f32
    %510 = vector.broadcast %cst_197 : f32 to vector<8x64xf32>
    %511 = arith.mulf %510, %509 : vector<8x64xf32>
    %cst_198 = arith.constant 4.471500e-02 : f32
    %512 = vector.broadcast %cst_198 : f32 to vector<8x64xf32>
    %513 = arith.mulf %512, %509 : vector<8x64xf32>
    %514 = arith.mulf %513, %509 : vector<8x64xf32>
    %515 = arith.mulf %514, %509 : vector<8x64xf32>
    %516 = arith.addf %509, %515 : vector<8x64xf32>
    %cst_199 = arith.constant 0.797884583 : f32
    %517 = vector.broadcast %cst_199 : f32 to vector<8x64xf32>
    %518 = arith.mulf %517, %516 : vector<8x64xf32>
    %519 = math.tanh %518 : vector<8x64xf32>
    %cst_200 = arith.constant 1.000000e+00 : f32
    %520 = vector.broadcast %cst_200 : f32 to vector<8x64xf32>
    %521 = arith.addf %520, %519 : vector<8x64xf32>
    %522 = arith.mulf %511, %521 : vector<8x64xf32>
    %c0_201 = arith.constant 0 : index
    %c0_202 = arith.constant 0 : index
    %c0_203 = arith.constant 0 : index
    %523 = vector.load %arg29[%c0_201, %c0_202, %c0_203] : memref<1x64x32xbf16, #tpu.memory_space<vmem>>, vector<1x64x32xbf16>
    %524 = vector.shape_cast %523 : vector<1x64x32xbf16> to vector<64x32xbf16>
    %525 = arith.truncf %522 : vector<8x64xf32> to vector<8x64xbf16>
    %cst_204 = arith.constant dense<0.000000e+00> : vector<8x32xf32>
    %526 = tpu.matmul %525, %524, %cst_204 {dimension_numbers = #tpu.dot_dimension_numbers<[1], [0], [0], [1], [0, 0, 1, 1], [], []>} : vector<8x64xbf16>, vector<64x32xbf16>, vector<8x32xf32> -> vector<8x32xf32>
    %c0_205 = arith.constant 0 : index
    %c0_206 = arith.constant 0 : index
    %c0_207 = arith.constant 0 : index
    %527 = vector.load %arg30[%c0_205, %c0_206, %c0_207] : memref<1x1x32xf32, #tpu.memory_space<vmem>>, vector<1x1x32xf32>
    %528 = vector.shape_cast %527 : vector<1x1x32xf32> to vector<1x32xf32>
    %529 = vector.broadcast %528 : vector<1x32xf32> to vector<8x32xf32>
    %530 = arith.addf %526, %529 : vector<8x32xf32>
    %531 = arith.addf %501, %530 : vector<8x32xf32>
    %c0_208 = arith.constant 0 : index
    %c0_209 = arith.constant 0 : index
    %c0_210 = arith.constant 0 : index
    %532 = vector.load %arg31[%c0_208, %c0_209, %c0_210] : memref<1x1x32xf32, #tpu.memory_space<vmem>>, vector<1x1x32xf32>
    %533 = vector.shape_cast %532 : vector<1x1x32xf32> to vector<1x32xf32>
    %c0_211 = arith.constant 0 : index
    %c0_212 = arith.constant 0 : index
    %c0_213 = arith.constant 0 : index
    %534 = vector.load %arg32[%c0_211, %c0_212, %c0_213] : memref<1x1x32xf32, #tpu.memory_space<vmem>>, vector<1x1x32xf32>
    %535 = vector.shape_cast %534 : vector<1x1x32xf32> to vector<1x32xf32>
    %cst_214 = arith.constant dense<0.000000e+00> : vector<8xf32>
    %536 = vector.multi_reduction <add>, %531, %cst_214 [1] : vector<8x32xf32> to vector<8xf32>
    %537 = vector.shape_cast %536 : vector<8xf32> to vector<8x1xf32>
    %cst_215 = arith.constant 3.200000e+01 : f32
    %538 = vector.broadcast %cst_215 : f32 to vector<8x1xf32>
    %539 = arith.divf %537, %538 : vector<8x1xf32>
    %540 = vector.broadcast %539 : vector<8x1xf32> to vector<8x32xf32>
    %541 = arith.subf %531, %540 : vector<8x32xf32>
    %542 = arith.mulf %541, %541 : vector<8x32xf32>
    %cst_216 = arith.constant dense<0.000000e+00> : vector<8xf32>
    %543 = vector.multi_reduction <add>, %542, %cst_216 [1] : vector<8x32xf32> to vector<8xf32>
    %544 = vector.shape_cast %543 : vector<8xf32> to vector<8x1xf32>
    %cst_217 = arith.constant 3.200000e+01 : f32
    %545 = vector.broadcast %cst_217 : f32 to vector<8x1xf32>
    %546 = arith.divf %544, %545 : vector<8x1xf32>
    %547 = vector.broadcast %539 : vector<8x1xf32> to vector<8x32xf32>
    %548 = arith.subf %531, %547 : vector<8x32xf32>
    %cst_218 = arith.constant 9.99999996E-13 : f32
    %549 = vector.broadcast %cst_218 : f32 to vector<8x1xf32>
    %550 = arith.addf %546, %549 : vector<8x1xf32>
    %551 = math.rsqrt %550 : vector<8x1xf32>
    %552 = vector.broadcast %551 : vector<8x1xf32> to vector<8x32xf32>
    %553 = arith.mulf %548, %552 : vector<8x32xf32>
    %554 = vector.broadcast %533 : vector<1x32xf32> to vector<8x32xf32>
    %555 = arith.mulf %553, %554 : vector<8x32xf32>
    %556 = vector.broadcast %535 : vector<1x32xf32> to vector<8x32xf32>
    %557 = arith.addf %555, %556 : vector<8x32xf32>
    %558 = arith.truncf %557 : vector<8x32xf32> to vector<8x32xbf16>
    %c0_219 = arith.constant 0 : index
    %c0_220 = arith.constant 0 : index
    %c0_221 = arith.constant 0 : index
    %559 = vector.load %arg33[%c0_219, %c0_220, %c0_221] : memref<1x8x32xbf16, #tpu.memory_space<vmem>>, vector<1x8x32xbf16>
    %560 = vector.shape_cast %559 : vector<1x8x32xbf16> to vector<8x32xbf16>
    %561 = vector.shape_cast %558 : vector<8x32xbf16> to vector<1x8x32xbf16>
    tpu.vector_store %arg33[%c0_219, %c0_220, %c0_221], %561 {strides = array<i32>} : memref<1x8x32xbf16, #tpu.memory_space<vmem>>, vector<1x8x32xbf16>,
    return
  }
  func.func @transform_0(%arg0: i32) -> (i32, i32, i32) {
    %c0_i32 = arith.constant 0 : i32
    %c0_i32_0 = arith.constant 0 : i32
    %c0_i32_1 = arith.constant 0 : i32
    return %arg0, %c0_i32, %c0_i32_0 : i32, i32, i32
  }
  func.func @transform_1(%arg0: i32) -> (i32, i32, i32) {
    %c0_i32 = arith.constant 0 : i32
    %c0_i32_0 = arith.constant 0 : i32
    %c0_i32_1 = arith.constant 0 : i32
    return %arg0, %c0_i32, %c0_i32_0 : i32, i32, i32
  }
  func.func @transform_2(%arg0: i32) -> (i32, i32, i32) {
    %c0_i32 = arith.constant 0 : i32
    %c0_i32_0 = arith.constant 0 : i32
    %c0_i32_1 = arith.constant 0 : i32
    return %arg0, %c0_i32, %c0_i32_0 : i32, i32, i32
  }
  func.func @transform_3(%arg0: i32) -> (i32, i32, i32) {
    %c0_i32 = arith.constant 0 : i32
    %c0_i32_0 = arith.constant 0 : i32
    %c0_i32_1 = arith.constant 0 : i32
    return %arg0, %c0_i32, %c0_i32_0 : i32, i32, i32
  }
  func.func @transform_4(%arg0: i32) -> (i32, i32) {
    %c0_i32 = arith.constant 0 : i32
    %c0_i32_0 = arith.constant 0 : i32
    %c0_i32_1 = arith.constant 0 : i32
    return %c0_i32, %c0_i32_0 : i32, i32
  }
  func.func @transform_5(%arg0: i32) -> (i32, i32) {
    %c0_i32 = arith.constant 0 : i32
    %c0_i32_0 = arith.constant 0 : i32
    %c0_i32_1 = arith.constant 0 : i32
    return %c0_i32, %c0_i32_0 : i32, i32
  }
  func.func @transform_6(%arg0: i32) -> (i32, i32, i32, i32) {
    %c0_i32 = arith.constant 0 : i32
    %c0_i32_0 = arith.constant 0 : i32
    %c0_i32_1 = arith.constant 0 : i32
    %c0_i32_2 = arith.constant 0 : i32
    %c0_i32_3 = arith.constant 0 : i32
    return %c0_i32, %c0_i32_0, %c0_i32_1, %c0_i32_2 : i32, i32, i32, i32
  }
  func.func @transform_7(%arg0: i32) -> (i32, i32, i32, i32) {
    %c0_i32 = arith.constant 0 : i32
    %c0_i32_0 = arith.constant 0 : i32
    %c0_i32_1 = arith.constant 0 : i32
    %c0_i32_2 = arith.constant 0 : i32
    %c0_i32_3 = arith.constant 0 : i32
    return %c0_i32, %c0_i32_0, %c0_i32_1, %c0_i32_2 : i32, i32, i32, i32
  }
  func.func @transform_8(%arg0: i32) -> (i32, i32, i32, i32) {
    %c0_i32 = arith.constant 0 : i32
    %c0_i32_0 = arith.constant 0 : i32
    %c0_i32_1 = arith.constant 0 : i32
    %c0_i32_2 = arith.constant 0 : i32
    %c0_i32_3 = arith.constant 0 : i32
    return %c0_i32, %c0_i32_0, %c0_i32_1, %c0_i32_2 : i32, i32, i32, i32
  }
  func.func @transform_9(%arg0: i32) -> (i32, i32, i32, i32) {
    %c0_i32 = arith.constant 0 : i32
    %c0_i32_0 = arith.constant 0 : i32
    %c0_i32_1 = arith.constant 0 : i32
    %c0_i32_2 = arith.constant 0 : i32
    %c0_i32_3 = arith.constant 0 : i32
    return %c0_i32, %c0_i32_0, %c0_i32_1, %c0_i32_2 : i32, i32, i32, i32
  }
  func.func @transform_10(%arg0: i32) -> (i32, i32, i32, i32) {
    %c0_i32 = arith.constant 0 : i32
    %c0_i32_0 = arith.constant 0 : i32
    %c0_i32_1 = arith.constant 0 : i32
    %c0_i32_2 = arith.constant 0 : i32
    %c0_i32_3 = arith.constant 0 : i32
    return %c0_i32, %c0_i32_0, %c0_i32_1, %c0_i32_2 : i32, i32, i32, i32
  }
  func.func @transform_11(%arg0: i32) -> (i32, i32, i32, i32) {
    %c0_i32 = arith.constant 0 : i32
    %c0_i32_0 = arith.constant 0 : i32
    %c0_i32_1 = arith.constant 0 : i32
    %c0_i32_2 = arith.constant 0 : i32
    %c0_i32_3 = arith.constant 0 : i32
    return %c0_i32, %c0_i32_0, %c0_i32_1, %c0_i32_2 : i32, i32, i32, i32
  }
  func.func @transform_12(%arg0: i32) -> (i32, i32, i32) {
    %c0_i32 = arith.constant 0 : i32
    %c0_i32_0 = arith.constant 0 : i32
    %c0_i32_1 = arith.constant 0 : i32
    %c0_i32_2 = arith.constant 0 : i32
    return %c0_i32, %c0_i32_0, %c0_i32_1 : i32, i32, i32
  }
  func.func @transform_13(%arg0: i32) -> (i32, i32, i32) {
    %c0_i32 = arith.constant 0 : i32
    %c0_i32_0 = arith.constant 0 : i32
    %c0_i32_1 = arith.constant 0 : i32
    %c0_i32_2 = arith.constant 0 : i32
    return %c0_i32, %c0_i32_0, %c0_i32_1 : i32, i32, i32
  }
  func.func @transform_14(%arg0: i32) -> (i32, i32, i32) {
    %c0_i32 = arith.constant 0 : i32
    %c0_i32_0 = arith.constant 0 : i32
    %c0_i32_1 = arith.constant 0 : i32
    %c0_i32_2 = arith.constant 0 : i32
    return %c0_i32, %c0_i32_0, %c0_i32_1 : i32, i32, i32
  }
  func.func @transform_15(%arg0: i32) -> (i32, i32, i32) {
    %c0_i32 = arith.constant 0 : i32
    %c0_i32_0 = arith.constant 0 : i32
    %c0_i32_1 = arith.constant 0 : i32
    %c0_i32_2 = arith.constant 0 : i32
    return %c0_i32, %c0_i32_0, %c0_i32_1 : i32, i32, i32
  }
  func.func @transform_16(%arg0: i32) -> (i32, i32, i32, i32) {
    %c0_i32 = arith.constant 0 : i32
    %c0_i32_0 = arith.constant 0 : i32
    %c0_i32_1 = arith.constant 0 : i32
    %c0_i32_2 = arith.constant 0 : i32
    %c0_i32_3 = arith.constant 0 : i32
    return %c0_i32, %c0_i32_0, %c0_i32_1, %c0_i32_2 : i32, i32, i32, i32
  }
  func.func @transform_17(%arg0: i32) -> (i32, i32, i32, i32) {
    %c0_i32 = arith.constant 0 : i32
    %c0_i32_0 = arith.constant 0 : i32
    %c0_i32_1 = arith.constant 0 : i32
    %c0_i32_2 = arith.constant 0 : i32
    %c0_i32_3 = arith.constant 0 : i32
    return %c0_i32, %c0_i32_0, %c0_i32_1, %c0_i32_2 : i32, i32, i32, i32
  }
  func.func @transform_18(%arg0: i32) -> (i32, i32, i32, i32) {
    %c0_i32 = arith.constant 0 : i32
    %c0_i32_0 = arith.constant 0 : i32
    %c0_i32_1 = arith.constant 0 : i32
    %c0_i32_2 = arith.constant 0 : i32
    %c0_i32_3 = arith.constant 0 : i32
    return %c0_i32, %c0_i32_0, %c0_i32_1, %c0_i32_2 : i32, i32, i32, i32
  }
  func.func @transform_19(%arg0: i32) -> (i32, i32, i32, i32) {
    %c0_i32 = arith.constant 0 : i32
    %c0_i32_0 = arith.constant 0 : i32
    %c0_i32_1 = arith.constant 0 : i32
    %c0_i32_2 = arith.constant 0 : i32
    %c0_i32_3 = arith.constant 0 : i32
    return %c0_i32, %c0_i32_0, %c0_i32_1, %c0_i32_2 : i32, i32, i32, i32
  }
  func.func @transform_20(%arg0: i32) -> (i32, i32, i32, i32) {
    %c0_i32 = arith.constant 0 : i32
    %c0_i32_0 = arith.constant 0 : i32
    %c0_i32_1 = arith.constant 0 : i32
    %c0_i32_2 = arith.constant 0 : i32
    %c0_i32_3 = arith.constant 0 : i32
    return %c0_i32, %c0_i32_0, %c0_i32_1, %c0_i32_2 : i32, i32, i32, i32
  }
  func.func @transform_21(%arg0: i32) -> (i32, i32, i32, i32) {
    %c0_i32 = arith.constant 0 : i32
    %c0_i32_0 = arith.constant 0 : i32
    %c0_i32_1 = arith.constant 0 : i32
    %c0_i32_2 = arith.constant 0 : i32
    %c0_i32_3 = arith.constant 0 : i32
    return %c0_i32, %c0_i32_0, %c0_i32_1, %c0_i32_2 : i32, i32, i32, i32
  }
  func.func @transform_22(%arg0: i32) -> (i32, i32, i32) {
    %c0_i32 = arith.constant 0 : i32
    %c0_i32_0 = arith.constant 0 : i32
    %c0_i32_1 = arith.constant 0 : i32
    %c0_i32_2 = arith.constant 0 : i32
    return %c0_i32, %c0_i32_0, %c0_i32_1 : i32, i32, i32
  }
  func.func @transform_23(%arg0: i32) -> (i32, i32, i32) {
    %c0_i32 = arith.constant 0 : i32
    %c0_i32_0 = arith.constant 0 : i32
    %c0_i32_1 = arith.constant 0 : i32
    %c0_i32_2 = arith.constant 0 : i32
    return %c0_i32, %c0_i32_0, %c0_i32_1 : i32, i32, i32
  }
  func.func @transform_24(%arg0: i32) -> (i32, i32, i32) {
    %c0_i32 = arith.constant 0 : i32
    %c0_i32_0 = arith.constant 0 : i32
    %c0_i32_1 = arith.constant 0 : i32
    %c0_i32_2 = arith.constant 0 : i32
    return %c0_i32, %c0_i32_0, %c0_i32_1 : i32, i32, i32
  }
  func.func @transform_25(%arg0: i32) -> (i32, i32, i32) {
    %c0_i32 = arith.constant 0 : i32
    %c0_i32_0 = arith.constant 0 : i32
    %c0_i32_1 = arith.constant 0 : i32
    %c0_i32_2 = arith.constant 0 : i32
    return %c0_i32, %c0_i32_0, %c0_i32_1 : i32, i32, i32
  }
  func.func @transform_26(%arg0: i32) -> (i32, i32, i32) {
    %c0_i32 = arith.constant 0 : i32
    %c0_i32_0 = arith.constant 0 : i32
    %c0_i32_1 = arith.constant 0 : i32
    %c0_i32_2 = arith.constant 0 : i32
    return %c0_i32, %c0_i32_0, %c0_i32_1 : i32, i32, i32
  }
  func.func @transform_27(%arg0: i32) -> (i32, i32, i32) {
    %c0_i32 = arith.constant 0 : i32
    %c0_i32_0 = arith.constant 0 : i32
    %c0_i32_1 = arith.constant 0 : i32
    %c0_i32_2 = arith.constant 0 : i32
    return %c0_i32, %c0_i32_0, %c0_i32_1 : i32, i32, i32
  }
  func.func @transform_28(%arg0: i32) -> (i32, i32, i32) {
    %c0_i32 = arith.constant 0 : i32
    %c0_i32_0 = arith.constant 0 : i32
    %c0_i32_1 = arith.constant 0 : i32
    %c0_i32_2 = arith.constant 0 : i32
    return %c0_i32, %c0_i32_0, %c0_i32_1 : i32, i32, i32
  }
  func.func @transform_29(%arg0: i32) -> (i32, i32, i32) {
    %c0_i32 = arith.constant 0 : i32
    %c0_i32_0 = arith.constant 0 : i32
    %c0_i32_1 = arith.constant 0 : i32
    %c0_i32_2 = arith.constant 0 : i32
    return %c0_i32, %c0_i32_0, %c0_i32_1 : i32, i32, i32
  }
  func.func @transform_30(%arg0: i32) -> (i32, i32, i32) {
    %c0_i32 = arith.constant 0 : i32
    %c0_i32_0 = arith.constant 0 : i32
    %c0_i32_1 = arith.constant 0 : i32
    %c0_i32_2 = arith.constant 0 : i32
    return %c0_i32, %c0_i32_0, %c0_i32_1 : i32, i32, i32
  }
  func.func @transform_31(%arg0: i32) -> (i32, i32, i32) {
    %c0_i32 = arith.constant 0 : i32
    %c0_i32_0 = arith.constant 0 : i32
    %c0_i32_1 = arith.constant 0 : i32
    %c0_i32_2 = arith.constant 0 : i32
    return %c0_i32, %c0_i32_0, %c0_i32_1 : i32, i32, i32
  }
  func.func @transform_32(%arg0: i32) -> (i32, i32, i32) {
    %c0_i32 = arith.constant 0 : i32
    %c0_i32_0 = arith.constant 0 : i32
    %c0_i32_1 = arith.constant 0 : i32
    return %arg0, %c0_i32, %c0_i32_0 : i32, i32, i32
  }
}

module attributes {stable_mosaic.version = 11 : i64} {
  func.func @_head_ce_kernel(%arg0: i32, %arg1: memref<1x8x32xbf16, #tpu.memory_space<vmem>>, %arg2: memref<1x8x1xi32, #tpu.memory_space<vmem>>, %arg3: memref<32x32xbf16, #tpu.memory_space<vmem>>, %arg4: memref<1x32xf32, #tpu.memory_space<vmem>>, %arg5: memref<1x32xf32, #tpu.memory_space<vmem>>, %arg6: memref<1x32xf32, #tpu.memory_space<vmem>>, %arg7: memref<32x64xbf16, #tpu.memory_space<vmem>>, %arg8: memref<1x64xf32, #tpu.memory_space<vmem>>, %arg9: memref<1x1xf32, #tpu.memory_space<vmem>>) attributes {dimension_semantics = [#tpu.dimension_semantics<arbitrary>], iteration_bounds = array<i64: 2>, scalar_prefetch = 0 : i64, scratch_operands = 0 : i64, tpu.core_type = #tpu.core_type<tc>, window_params = [{transform_indices = @transform_0, window_bounds = array<i64: 1, 8, 32>}, {transform_indices = @transform_1, window_bounds = array<i64: 1, 8, 1>}, {pipeline_mode = #tpu.pipeline_mode<synchronous>, transform_indices = @transform_2, window_bounds = array<i64: 32, 32>}, {pipeline_mode = #tpu.pipeline_mode<synchronous>, transform_indices = @transform_3, window_bounds = array<i64: 1, 32>}, {pipeline_mode = #tpu.pipeline_mode<synchronous>, transform_indices = @transform_4, window_bounds = array<i64: 1, 32>}, {pipeline_mode = #tpu.pipeline_mode<synchronous>, transform_indices = @transform_5, window_bounds = array<i64: 1, 32>}, {pipeline_mode = #tpu.pipeline_mode<synchronous>, transform_indices = @transform_6, window_bounds = array<i64: 32, 64>}, {pipeline_mode = #tpu.pipeline_mode<synchronous>, transform_indices = @transform_7, window_bounds = array<i64: 1, 64>}, {pipeline_mode = #tpu.pipeline_mode<synchronous>, transform_indices = @transform_8, window_bounds = array<i64: 1, 1>}]} {
    %c0_i32 = arith.constant 0 : i32
    %0 = arith.cmpi eq, %arg0, %c0_i32 : i32
    %1 = arith.extui %0 : i1 to i32
    %c0_i32_0 = arith.constant 0 : i32
    %2 = arith.cmpi ne, %1, %c0_i32_0 : i32
    scf.if %2 {
      %cst_43 = arith.constant 0.000000e+00 : f32
      %101 = vector.broadcast %cst_43 : f32 to vector<1x1xf32>
      %c0_44 = arith.constant 0 : index
      %c0_45 = arith.constant 0 : index
      %102 = vector.load %arg9[%c0_44, %c0_45] : memref<1x1xf32, #tpu.memory_space<vmem>>, vector<1x1xf32>
      tpu.vector_store %arg9[%c0_44, %c0_45], %101 {strides = array<i32>} : memref<1x1xf32, #tpu.memory_space<vmem>>, vector<1x1xf32>,
    } else {
    }
    %c0 = arith.constant 0 : index
    %c0_1 = arith.constant 0 : index
    %c0_2 = arith.constant 0 : index
    %3 = vector.load %arg1[%c0, %c0_1, %c0_2] : memref<1x8x32xbf16, #tpu.memory_space<vmem>>, vector<1x8x32xbf16>
    %4 = vector.shape_cast %3 : vector<1x8x32xbf16> to vector<8x32xbf16>
    %5 = arith.extf %4 : vector<8x32xbf16> to vector<8x32xf32>
    %c0_3 = arith.constant 0 : index
    %c0_4 = arith.constant 0 : index
    %6 = vector.load %arg3[%c0_3, %c0_4] : memref<32x32xbf16, #tpu.memory_space<vmem>>, vector<32x32xbf16>
    %7 = arith.truncf %5 : vector<8x32xf32> to vector<8x32xbf16>
    %cst = arith.constant dense<0.000000e+00> : vector<8x32xf32>
    %8 = tpu.matmul %7, %6, %cst {dimension_numbers = #tpu.dot_dimension_numbers<[1], [0], [0], [1], [0, 0, 1, 1], [], []>} : vector<8x32xbf16>, vector<32x32xbf16>, vector<8x32xf32> -> vector<8x32xf32>
    %c0_5 = arith.constant 0 : index
    %c0_6 = arith.constant 0 : index
    %9 = vector.load %arg4[%c0_5, %c0_6] : memref<1x32xf32, #tpu.memory_space<vmem>>, vector<1x32xf32>
    %10 = vector.broadcast %9 : vector<1x32xf32> to vector<8x32xf32>
    %11 = arith.addf %8, %10 : vector<8x32xf32>
    %cst_7 = arith.constant 5.000000e-01 : f32
    %12 = vector.broadcast %cst_7 : f32 to vector<8x32xf32>
    %13 = arith.mulf %12, %11 : vector<8x32xf32>
    %cst_8 = arith.constant 4.471500e-02 : f32
    %14 = vector.broadcast %cst_8 : f32 to vector<8x32xf32>
    %15 = arith.mulf %14, %11 : vector<8x32xf32>
    %16 = arith.mulf %15, %11 : vector<8x32xf32>
    %17 = arith.mulf %16, %11 : vector<8x32xf32>
    %18 = arith.addf %11, %17 : vector<8x32xf32>
    %cst_9 = arith.constant 0.797884583 : f32
    %19 = vector.broadcast %cst_9 : f32 to vector<8x32xf32>
    %20 = arith.mulf %19, %18 : vector<8x32xf32>
    %21 = math.tanh %20 : vector<8x32xf32>
    %cst_10 = arith.constant 1.000000e+00 : f32
    %22 = vector.broadcast %cst_10 : f32 to vector<8x32xf32>
    %23 = arith.addf %22, %21 : vector<8x32xf32>
    %24 = arith.mulf %13, %23 : vector<8x32xf32>
    %c0_11 = arith.constant 0 : index
    %c0_12 = arith.constant 0 : index
    %25 = vector.load %arg5[%c0_11, %c0_12] : memref<1x32xf32, #tpu.memory_space<vmem>>, vector<1x32xf32>
    %c0_13 = arith.constant 0 : index
    %c0_14 = arith.constant 0 : index
    %26 = vector.load %arg6[%c0_13, %c0_14] : memref<1x32xf32, #tpu.memory_space<vmem>>, vector<1x32xf32>
    %cst_15 = arith.constant dense<0.000000e+00> : vector<8xf32>
    %27 = vector.multi_reduction <add>, %24, %cst_15 [1] : vector<8x32xf32> to vector<8xf32>
    %28 = vector.shape_cast %27 : vector<8xf32> to vector<8x1xf32>
    %cst_16 = arith.constant 3.200000e+01 : f32
    %29 = vector.broadcast %cst_16 : f32 to vector<8x1xf32>
    %30 = arith.divf %28, %29 : vector<8x1xf32>
    %31 = vector.broadcast %30 : vector<8x1xf32> to vector<8x32xf32>
    %32 = arith.subf %24, %31 : vector<8x32xf32>
    %33 = arith.mulf %32, %32 : vector<8x32xf32>
    %cst_17 = arith.constant dense<0.000000e+00> : vector<8xf32>
    %34 = vector.multi_reduction <add>, %33, %cst_17 [1] : vector<8x32xf32> to vector<8xf32>
    %35 = vector.shape_cast %34 : vector<8xf32> to vector<8x1xf32>
    %cst_18 = arith.constant 3.200000e+01 : f32
    %36 = vector.broadcast %cst_18 : f32 to vector<8x1xf32>
    %37 = arith.divf %35, %36 : vector<8x1xf32>
    %38 = vector.broadcast %30 : vector<8x1xf32> to vector<8x32xf32>
    %39 = arith.subf %24, %38 : vector<8x32xf32>
    %cst_19 = arith.constant 9.99999996E-13 : f32
    %40 = vector.broadcast %cst_19 : f32 to vector<8x1xf32>
    %41 = arith.addf %37, %40 : vector<8x1xf32>
    %42 = math.rsqrt %41 : vector<8x1xf32>
    %43 = vector.broadcast %42 : vector<8x1xf32> to vector<8x32xf32>
    %44 = arith.mulf %39, %43 : vector<8x32xf32>
    %45 = vector.broadcast %25 : vector<1x32xf32> to vector<8x32xf32>
    %46 = arith.mulf %44, %45 : vector<8x32xf32>
    %47 = vector.broadcast %26 : vector<1x32xf32> to vector<8x32xf32>
    %48 = arith.addf %46, %47 : vector<8x32xf32>
    %c0_20 = arith.constant 0 : index
    %c0_21 = arith.constant 0 : index
    %49 = vector.load %arg7[%c0_20, %c0_21] : memref<32x64xbf16, #tpu.memory_space<vmem>>, vector<32x64xbf16>
    %50 = arith.truncf %48 : vector<8x32xf32> to vector<8x32xbf16>
    %cst_22 = arith.constant dense<0.000000e+00> : vector<8x64xf32>
    %51 = tpu.matmul %50, %49, %cst_22 {dimension_numbers = #tpu.dot_dimension_numbers<[1], [0], [0], [1], [0, 0, 1, 1], [], []>} : vector<8x32xbf16>, vector<32x64xbf16>, vector<8x64xf32> -> vector<8x64xf32>
    %c0_23 = arith.constant 0 : index
    %c0_24 = arith.constant 0 : index
    %52 = vector.load %arg8[%c0_23, %c0_24] : memref<1x64xf32, #tpu.memory_space<vmem>>, vector<1x64xf32>
    %53 = vector.broadcast %52 : vector<1x64xf32> to vector<8x64xf32>
    %54 = arith.addf %51, %53 : vector<8x64xf32>
    %c0_25 = arith.constant 0 : index
    %c0_26 = arith.constant 0 : index
    %c0_27 = arith.constant 0 : index
    %55 = vector.load %arg2[%c0_25, %c0_26, %c0_27] : memref<1x8x1xi32, #tpu.memory_space<vmem>>, vector<1x8x1xi32>
    %56 = vector.shape_cast %55 : vector<1x8x1xi32> to vector<8x1xi32>
    %cst_28 = arith.constant dense<0xFF800000> : vector<8xf32>
    %57 = vector.multi_reduction <maximumf>, %54, %cst_28 [1] : vector<8x64xf32> to vector<8xf32>
    %58 = vector.shape_cast %57 : vector<8xf32> to vector<8x1xf32>
    %59 = vector.broadcast %58 : vector<8x1xf32> to vector<8x64xf32>
    %60 = arith.subf %54, %59 : vector<8x64xf32>
    %61 = math.exp %60 : vector<8x64xf32>
    %cst_29 = arith.constant dense<0.000000e+00> : vector<8xf32>
    %62 = vector.multi_reduction <add>, %61, %cst_29 [1] : vector<8x64xf32> to vector<8xf32>
    %63 = vector.shape_cast %62 : vector<8xf32> to vector<8x1xf32>
    %64 = math.log %63 : vector<8x1xf32>
    %65 = arith.addf %64, %58 : vector<8x1xf32>
    %66 = vector.broadcast %65 : vector<8x1xf32> to vector<8x64xf32>
    %67 = arith.subf %54, %66 : vector<8x64xf32>
    %68 = tpu.iota {dimensions = array<i32: 1>} : vector<8x64xi32>
    %69 = vector.broadcast %56 : vector<8x1xi32> to vector<8x64xi32>
    %70 = arith.cmpi eq, %68, %69 : vector<8x64xi32>
    %71 = arith.extui %70 : vector<8x64xi1> to vector<8x64xi32>
    %72 = arith.sitofp %71 : vector<8x64xi32> to vector<8x64xf32>
    %73 = arith.mulf %72, %67 : vector<8x64xf32>
    %cst_30 = arith.constant dense<0.000000e+00> : vector<8xf32>
    %74 = vector.multi_reduction <add>, %73, %cst_30 [1] : vector<8x64xf32> to vector<8xf32>
    %75 = vector.shape_cast %74 : vector<8xf32> to vector<8x1xf32>
    %cst_31 = arith.constant 0.000000e+00 : f32
    %76 = vector.broadcast %cst_31 : f32 to vector<8x1xf32>
    %77 = arith.subf %76, %75 : vector<8x1xf32>
    %cst_32 = arith.constant dense<0.000000e+00> : vector<8xf32>
    %78 = vector.multi_reduction <add>, %67, %cst_32 [1] : vector<8x64xf32> to vector<8xf32>
    %79 = vector.shape_cast %78 : vector<8xf32> to vector<8x1xf32>
    %cst_33 = arith.constant 6.400000e+01 : f32
    %80 = vector.broadcast %cst_33 : f32 to vector<8x1xf32>
    %81 = arith.divf %79, %80 : vector<8x1xf32>
    %cst_34 = arith.constant 0.000000e+00 : f32
    %82 = vector.broadcast %cst_34 : f32 to vector<8x1xf32>
    %83 = arith.subf %82, %81 : vector<8x1xf32>
    %c-100_i32 = arith.constant -100 : i32
    %84 = vector.broadcast %c-100_i32 : i32 to vector<8x1xi32>
    %85 = arith.cmpi ne, %56, %84 : vector<8x1xi32>
    %86 = arith.extui %85 : vector<8x1xi1> to vector<8x1xi32>
    %87 = arith.sitofp %86 : vector<8x1xi32> to vector<8x1xf32>
    %cst_35 = arith.constant 0.899999976 : f32
    %88 = vector.broadcast %cst_35 : f32 to vector<8x1xf32>
    %89 = arith.mulf %88, %77 : vector<8x1xf32>
    %cst_36 = arith.constant 1.000000e-01 : f32
    %90 = vector.broadcast %cst_36 : f32 to vector<8x1xf32>
    %91 = arith.mulf %90, %83 : vector<8x1xf32>
    %92 = arith.addf %89, %91 : vector<8x1xf32>
    %93 = arith.mulf %92, %87 : vector<8x1xf32>
    %c0_37 = arith.constant 0 : index
    %c0_38 = arith.constant 0 : index
    %94 = vector.load %arg9[%c0_37, %c0_38] : memref<1x1xf32, #tpu.memory_space<vmem>>, vector<1x1xf32>
    %cst_39 = arith.constant dense<0.000000e+00> : vector<1xf32>
    %95 = vector.multi_reduction <add>, %93, %cst_39 [0] : vector<8x1xf32> to vector<1xf32>
    %96 = vector.shape_cast %95 : vector<1xf32> to vector<1x1xf32>
    %cst_40 = arith.constant 5.000000e-01 : f32
    %97 = vector.broadcast %cst_40 : f32 to vector<1x1xf32>
    %98 = arith.mulf %96, %97 : vector<1x1xf32>
    %99 = arith.addf %94, %98 : vector<1x1xf32>
    %c0_41 = arith.constant 0 : index
    %c0_42 = arith.constant 0 : index
    %100 = vector.load %arg9[%c0_41, %c0_42] : memref<1x1xf32, #tpu.memory_space<vmem>>, vector<1x1xf32>
    tpu.vector_store %arg9[%c0_41, %c0_42], %99 {strides = array<i32>} : memref<1x1xf32, #tpu.memory_space<vmem>>, vector<1x1xf32>,
    return
  }
  func.func @transform_0(%arg0: i32) -> (i32, i32, i32) {
    %c0_i32 = arith.constant 0 : i32
    %c0_i32_0 = arith.constant 0 : i32
    %c0_i32_1 = arith.constant 0 : i32
    return %arg0, %c0_i32, %c0_i32_0 : i32, i32, i32
  }
  func.func @transform_1(%arg0: i32) -> (i32, i32, i32) {
    %c0_i32 = arith.constant 0 : i32
    %c0_i32_0 = arith.constant 0 : i32
    %c0_i32_1 = arith.constant 0 : i32
    return %arg0, %c0_i32, %c0_i32_0 : i32, i32, i32
  }
  func.func @transform_2(%arg0: i32) -> (i32, i32) {
    %c0_i32 = arith.constant 0 : i32
    %c0_i32_0 = arith.constant 0 : i32
    %c0_i32_1 = arith.constant 0 : i32
    return %c0_i32, %c0_i32_0 : i32, i32
  }
  func.func @transform_3(%arg0: i32) -> (i32, i32) {
    %c0_i32 = arith.constant 0 : i32
    %c0_i32_0 = arith.constant 0 : i32
    %c0_i32_1 = arith.constant 0 : i32
    return %c0_i32, %c0_i32_0 : i32, i32
  }
  func.func @transform_4(%arg0: i32) -> (i32, i32) {
    %c0_i32 = arith.constant 0 : i32
    %c0_i32_0 = arith.constant 0 : i32
    %c0_i32_1 = arith.constant 0 : i32
    return %c0_i32, %c0_i32_0 : i32, i32
  }
  func.func @transform_5(%arg0: i32) -> (i32, i32) {
    %c0_i32 = arith.constant 0 : i32
    %c0_i32_0 = arith.constant 0 : i32
    %c0_i32_1 = arith.constant 0 : i32
    return %c0_i32, %c0_i32_0 : i32, i32
  }
  func.func @transform_6(%arg0: i32) -> (i32, i32) {
    %c0_i32 = arith.constant 0 : i32
    %c0_i32_0 = arith.constant 0 : i32
    %c0_i32_1 = arith.constant 0 : i32
    return %c0_i32, %c0_i32_0 : i32, i32
  }
  func.func @transform_7(%arg0: i32) -> (i32, i32) {
    %c0_i32 = arith.constant 0 : i32
    %c0_i32_0 = arith.constant 0 : i32
    %c0_i32_1 = arith.constant 0 : i32
    return %c0_i32, %c0_i32_0 : i32, i32
  }
  func.func @transform_8(%arg0: i32) -> (i32, i32) {
    %c0_i32 = arith.constant 0 : i32
    %c0_i32_0 = arith.constant 0 : i32
    %c0_i32_1 = arith.constant 0 : i32
    return %c0_i32, %c0_i32_0 : i32, i32
  }
}

</mosaic_0001>

<bundles_post_ra>
// kernel: blip_comet_forward.6
= control target key start
LH: loop header
LB: loop body
LE: loop exit
PB: predicated region body
PF: predicated region fallthrough
CT: control target
= control target key end

     0   :  { %s476_s15 = smov 0   ;;  %s512_s0 = inlined_call_operand.vmem [shape: bf16[2,2,5,32], index: 0, kind: input, shape index: {}]   ;;  %s513_s1 = inlined_call_operand.vmem [shape: f32[2,1,2], index: 1, kind: input, shape index: {}]   ;;  %s514_s2 = inlined_call_operand.vmem [shape: f32[1,32], index: 2, kind: input, shape index: {}]   ;;  %s515_s3 = inlined_call_operand.vmem [shape: f32[1,32], index: 3, kind: input, shape index: {}]   ;;  %s516_s4 = inlined_call_operand.vmem [shape: bf16[2,5,32], index: 4, kind: output, shape index: {}]  }
   0x1 LB: > { %s402_s16 = sadd.s32 4294967295, %s446_s15   ;;  %p406_p0 = scmp.ge.s32.totalorder %s446_s15, 1  ;;  %s446_s15 = sphi %s476_s15, %s14_s15  }
   0x2   : > { %p170_p1 = scmp.lt.s32.totalorder %s446_s15, 3 }
   0x4   : > { %p171_p2 = pnand %p406_p0, %p170_p1 }
   0x5   : > { %p198_p3 = scmp.lt.s32.totalorder (!%p171_p2), %s402_s16, 1 }
   0x6   : > { %174 = sbr.rel (%p171_p2) target bundleno = 477 (0x1dd), region = 36 }
   0xb   : > { %s518_s16 = smov (!%p198_p3, %s402_s16), 1  ;;  %vm216_vm0 = vcmask 258048   ;;  %v448_v6 = vmov 32.0   ;;  %v449_v10 = vmov 0   ;;  %v450_v11 = vmov 1  }
   0xc   : > { %s412_s17 = sshll.u32 %s518_s16, 3  ;;  %s205_s23 = scalar_lea.vmem %s513_s1, %s518_s16  ;;  %430 = vrcp.f32 %v448_v6  ;;  %424 = vset.pattern.permute.xlu2 %v449_v10  ;;  %426 = vset.pattern.permute.xlu0 %v450_v11  ;;  %v428_v44 = vld [vmem:[%s514_s2] ss:$0 sm:$0xff]  ;;  %vm297_vm8 = vcmask 1044480   ;;  %vm334_vm14 = vcmask 256000  }
   0xd   : > { %s202_s20 = scalar_lea.vmem %s512_s0, %s412_s17  ;;  %v427_v9 = vld [vmem:[%s205_s23] ss:$0 sm:$0xff]  ;;  %s409_s28 = sshll.u32 %s518_s16, 2  ;;  %vm335_vm15 = vsmask.f32 2304 }
   0xe   : > { %v210_v0 = vld [vmem:[%s202_s20] sm:$0x7]  ;;  %v211_v2 = vld [vmem:[%s202_s20 + $0x4] sm:$0x7]  ;;  %257 = vperm.xlu2 %424, %v427_v9   ;;  %s209_s5 = scalar_lea.vmem %s516_s4, %s409_s28 }
   0xf   : > { %v215_v1 = vunpack.c.l.bf16 %v210_v0  ;;  %v261_v4 = vunpack.c.l.bf16 %v211_v2  ;;  %v429_v48 = vld [vmem:[%s515_s3] ss:$0 sm:$0xff] }
  0x11   : > { %v217_v3 = vsel %vm216_vm0, %v215_v1, 0.0  ;;  %v262_v5 = vsel %vm216_vm0, %v261_v4, 0.0 }
  0x12   : > { %218 = vadd.xlane.f32.xlu0 %v217_v3  ;;  %v431_v7 = vpop.eup %430 }
  0x13   : > { %v221_v8 = vmul.f32 32.0, %v431_v7  ;;  %vm225_vm1 = vweird.f32 %v431_v7 }
  0x15   : > { %v222_v12 = vsub.f32 1.0, %v221_v8 }
  0x16   : > { %425 = vset.pattern.permute.xlu2 %v450_v11 }
  0x17   : > { %v223_v13 = vmul.f32 %v431_v7, %v222_v12  ;;  %287 = vperm.xlu2 %425, %v427_v9  }
  0x19   : > { %v224_v14 = vadd.f32 %v431_v7, %v223_v13 }
  0x1a   : > { %263 = vadd.xlane.f32.xlu0 %v262_v5 }
  0x1b   : > { %v226_v15 = vsel %vm225_vm1, %v431_v7, %v224_v14  ;;  %vm336_vm1 = vmand %vm334_vm14, %vm335_vm15 }
  0x68   : > { %v258_v43 = vpop.permute.xlu2 %257 }
  0x71   : > { %v288_v54 = vpop.permute.xlu2 %287 }
  0x85   : > { %v219_v16 = vpop.xlane.xlu0 %218 }
  0x86   : > { %v227_v17 = vmul.f32 %v226_v15, %v219_v16 }
  0x88   : > { %v228_v18 = vsub.f32 %v215_v1, %v227_v17 }
  0x8a   : > { %v229_v19 = vmul.f32 %v228_v18, %v228_v18 }
  0x8c   : > { %v230_v20 = vsel %vm216_vm0, %v229_v19, 0.0 }
  0x8d   : > { %231 = vadd.xlane.f32.xlu1 %v230_v20  ;;  %v264_v21 = vpop.xlane.xlu0 %263 }
  0x8e   : > { %v265_v22 = vmul.f32 %v264_v21, %v226_v15 }
  0x90   : > { %v266_v23 = vsub.f32 %v261_v4, %v265_v22 }
  0x92   : > { %v267_v24 = vmul.f32 %v266_v23, %v266_v23 }
  0x94   : > { %v268_v25 = vsel %vm216_vm0, %v267_v24, 0.0 }
  0x95   : > { %269 = vadd.xlane.f32.xlu1 %v268_v25 }
 0x100   : > { %v232_v26 = vpop.xlane.xlu1 %231 }
 0x101   : > { %v233_v27 = vmul.f32 %v232_v26, %v226_v15 }
 0x103   : > { %v234_v28 = vadd.f32 1e-06, %v233_v27 }
 0x105   : > { %432 = vrsqrt.f32 %v234_v28  ;;  %vm241_vm3 = vweird.f32 %v234_v28 }
 0x108   : > { %v270_v29 = vpop.xlane.xlu1 %269 }
 0x109   : > { %v271_v30 = vmul.f32 %v270_v29, %v226_v15 }
 0x10b   : > { %v433_v31 = vpop.eup %432  ;;  %v272_v32 = vadd.f32 1e-06, %v271_v30 }
 0x10c   : > { %v236_v33 = vmul.f32 %v433_v31, %v234_v28  ;;  %vm242_vm2 = vweird.f32 %v433_v31  ;;  %v337_v28 = vld [vmem:[%s209_s5] sm:$0x7] }
 0x10d   : > { %434 = vrsqrt.f32 %v272_v32  ;;  %vm243_vm4 = vmor %vm241_vm3, %vm242_vm2  ;;  %vm279_vm6 = vweird.f32 %v272_v32 }
 0x10e   : > { %v237_v34 = vmul.f32 %v433_v31, %v236_v33 }
 0x110   : > { %v238_v35 = vmul.f32 0.5, %v237_v34 }
 0x112   : > { %v239_v36 = vsub.f32 1.5, %v238_v35 }
 0x113   : > { %v435_v37 = vpop.eup %434 }
 0x114   : > { %v240_v38 = vmul.f32 %v433_v31, %v239_v36  ;;  %v274_v39 = vmul.f32 %v435_v37, %v272_v32  ;;  %vm280_vm5 = vweird.f32 %v435_v37 }
 0x115   : > { %vm281_vm7 = vmor %vm279_vm6, %vm280_vm5 }
 0x116   : > { %v275_v40 = vmul.f32 %v435_v37, %v274_v39  ;;  %v244_v41 = vsel %vm243_vm4, %v433_v31, %v240_v38 }
 0x117   : > { %v245_v45 = vmul.f32 %v244_v41, %v228_v18 }
 0x118   : > { %v276_v42 = vmul.f32 0.5, %v275_v40 }
 0x119   : > { %v249_v49 = vmul.f32 %v428_v44, %v245_v45 }
 0x11a   : > { %v277_v46 = vsub.f32 1.5, %v276_v42 }
 0x11b   : > { %v253_v52 = vadd.f32 %v429_v48, %v249_v49 }
 0x11c   : > { %v278_v47 = vmul.f32 %v435_v37, %v277_v46 }
 0x11d   : > { %v260_v56 = vmul.f32 %v258_v43, %v253_v52 }
 0x11e   : > { %v282_v50 = vsel %vm281_vm7, %v435_v37, %v278_v47 }
 0x11f   : > { %v283_v51 = vmul.f32 %v282_v50, %v266_v23 }
 0x121   : > { %v284_v53 = vmul.f32 %v428_v44, %v283_v51 }
 0x123   : > { %v285_v55 = vadd.f32 %v429_v48, %v284_v53 }
 0x125   : > { %v290_v57 = vmul.f32 %v288_v54, %v285_v55 }
 0x127   : > { %v291_v58 = vadd.f32 %v290_v57, %v260_v56 }
 0x129   : > { %v292_v59 = vmul.f32 0.5, %v291_v58 }
 0x12b   : > { %v293_v60 = vmul.f32 %v292_v59, %v292_v59 }
 0x12d   : > { %v294_v61 = vsel %vm216_vm0, %v293_v60, 0.0 }
 0x12e   : > { %295 = vadd.xlane.f32.xlu0 %v294_v61 }
 0x1a1   : > { %v296_v62 = vpop.xlane.xlu0 %295 }
 0x1a2   : > { %v298_v63 = vsel %vm297_vm8, %v296_v62, 0.0 }
 0x1a3   : > { %v299_v0 = vrot.slane %v298_v63, 4 }
 0x1a5   : > { %v300_v1 = vadd.f32 %v299_v0, %v298_v63 }
 0x1a7   : > { %v301_v2 = vrot.slane %v300_v1, 2 }
 0x1a9   : > { %v302_v3 = vadd.f32 %v301_v2, %v300_v1 }
 0x1ab   : > { %v303_v4 = vrot.slane %v302_v3, 1 }
 0x1ad   : > { %v304_v5 = vadd.f32 %v303_v4, %v302_v3 }
 0x1af   : > { %436 = vrsqrt.f32 %v304_v5  ;;  %vm312_vm9 = vcmp.eq.f32.partialorder %v304_v5, inf  ;;  %v315_v13 = vand.u32 2147483648, %v304_v5  ;;  %vm314_vm10 = vcmp.eq.f32.partialorder %v304_v5, 0.0 }
 0x1b5   : > { %v437_v6 = vpop.eup %436 }
 0x1b6   : > { %v306_v7 = vmul.f32 %v437_v6, %v304_v5 }
 0x1b8   : > { %v307_v8 = vmul.f32 %v437_v6, %v306_v7 }
 0x1ba   : > { %v308_v9 = vmul.f32 0.5, %v307_v8 }
 0x1bc   : > { %v309_v10 = vsub.f32 1.5, %v308_v9 }
 0x1be   : > { %v310_v11 = vmul.f32 %v437_v6, %v309_v10 }
 0x1c0   : > { %v311_v12 = vmul.f32 %v310_v11, %v304_v5 }
 0x1c2   : > { %v313_v14 = vsel %vm312_vm9, %v304_v5, %v311_v12 }
 0x1c3   : > { %v316_v15 = vsel %vm314_vm10, %v315_v13, %v313_v14 }
 0x1c4   : > { %v317_v16 = vmax.f32 %v316_v15, 1e-12 }
 0x1c6   : > { %438 = vrcp.f32 %v317_v16  ;;  %v329_v20 = vand.u32 2147483648, %v317_v16  ;;  %v327_v22 = vand.u32 2147483647, %v317_v16  ;;  %vm323_vm12 = vweird.f32 %v317_v16 }
 0x1c8   : > { %v330_v24 = vor.u32 1.1754944e-38, %v329_v20  ;;  %vm328_vm0 = vcmp.eq.f32.partialorder %v327_v22, 8.507059e+37 }
 0x1cc   : > { %v439_v17 = vpop.eup %438 }
 0x1cd   : > { %v319_v18 = vmul.f32 %v439_v17, %v317_v16  ;;  %vm324_vm11 = vweird.f32 %v439_v17 }
 0x1ce   : > { %vm325_vm13 = vmor %vm323_vm12, %vm324_vm11 }
 0x1cf   : > { %v320_v19 = vsub.f32 1.0, %v319_v18 }
 0x1d1   : > { %v321_v21 = vmul.f32 %v439_v17, %v320_v19 }
 0x1d3   : > { %v322_v23 = vadd.f32 %v439_v17, %v321_v21 }
 0x1d5   : > { %v326_v25 = vsel %vm325_vm13, %v439_v17, %v322_v23 }
 0x1d6   : > { %v331_v26 = vsel %vm328_vm0, %v330_v24, %v326_v25 }
 0x1d7   : > { %v332_v27 = vmul.f32 %v331_v26, %v292_v59 }
 0x1d9   : > { %v333_v29 = vpack.c.bf16 %v332_v27, %v332_v27 }
 0x1db   : > { %v338_v30 = vsel %vm336_vm1, %v333_v29, %v337_v28 }
 0x1dc   : > { %339 = vst [vmem:[%s209_s5] sm:$0x7] %v338_v30 }
 0x1dd PF: > { %s14_s15 = sadd.s32 1, %s446_s15  }
 0x1de   : > { %p11_p4 = scmp.ge.s32.totalorder %s14_s15, 4  }
 0x1e0   :  { %13 = sbr.rel (!%p11_p4) target bundleno = 1 (0x1), region = 69 }

// kernel: blip_comet_forward.5
= control target key start
LH: loop header
LB: loop body
LE: loop exit
PB: predicated region body
PF: predicated region fallthrough
CT: control target
= control target key end

     0   :  { %s2459_s0 = inlined_call_operand.vmem [shape: f32[4,4,192], index: 0, kind: input, shape index: {}]   ;;  %s2460_s1 = inlined_call_operand.vmem [shape: bf16[192,32], index: 1, kind: input, shape index: {}]   ;;  %s2461_s2 = inlined_call_operand.vmem [shape: f32[1,32], index: 2, kind: input, shape index: {}]   ;;  %s2462_s3 = inlined_call_operand.vmem [shape: f32[1,32], index: 3, kind: input, shape index: {}]   ;;  %s2463_s4 = inlined_call_operand.vmem [shape: f32[5,32], index: 4, kind: input, shape index: {}]   ;;  %s2464_s5 = inlined_call_operand.vmem [shape: f32[1,1,32], index: 5, kind: input, shape index: {}, may-alias: {5,15}]   ;;  %s2465_s6 = inlined_call_operand.vmem [shape: f32[1,1,32], index: 6, kind: input, shape index: {}, may-alias: {6,14,16,20}]   ;;  %s2466_s7 = inlined_call_operand.vmem [shape: bf16[1,4,32,8], index: 7, kind: input, shape index: {}]   ;;  %s2467_s8 = inlined_call_operand.vmem [shape: f32[1,4,1,8], index: 8, kind: input, shape index: {}, may-alias: {8,10,12}]   ;;  %s2468_s9 = inlined_call_operand.vmem [shape: bf16[1,4,32,8], index: 9, kind: input, shape index: {}]   ;;  %s2469_s10 = inlined_call_operand.vmem [shape: f32[1,4,1,8], index: 10, kind: input, shape index: {}, may-alias: {8,10,12}]   ;;  %s2470_s11 = inlined_call_operand.vmem [shape: bf16[1,4,32,8], index: 11, kind: input, shape index: {}]   ;;  %s2471_s12 = inlined_call_operand.vmem [shape: f32[1,4,1,8], index: 12, kind: input, shape index: {}, may-alias: {8,10,12}]   ;;  %s2472_s13 = inlined_call_operand.vmem [shape: bf16[1,32,32], index: 13, kind: input, shape index: {}]   ;;  %s2473_s14 = inlined_call_operand.vmem [shape: f32[1,1,32], index: 14, kind: input, shape index: {}, may-alias: {6,14,16,20}]   ;;  %s2474_s15 = inlined_call_operand.vmem [shape: f32[1,1,32], index: 15, kind: input, shape index: {}, may-alias: {5,15}]   ;;  %s2475_s16 = inlined_call_operand.vmem [shape: f32[1,1,32], index: 16, kind: input, shape index: {}, may-alias: {6,14,16,20}]   ;;  %s2476_s17 = inlined_call_operand.vmem [shape: bf16[1,32,64], index: 17, kind: input, shape index: {}]   ;;  %s2477_s18 = inlined_call_operand.vmem [shape: f32[1,1,64], index: 18, kind: input, shape index: {}]   ;;  %s2478_s19 = inlined_call_operand.vmem [shape: bf16[1,64,32], index: 19, kind: input, shape index: {}]   ;;  %s2479_s20 = inlined_call_operand.vmem [shape: f32[1,1,32], index: 20, kind: input, shape index: {}, may-alias: {6,14,16,20}]   ;;  %s2480_s21 = inlined_call_operand.vmem [shape: bf16[4,5,32], index: 21, kind: output, shape index: {}]  }
   0x1   :  { %2482 = sst [smem:[#allocation4_spill]] %s2459_s0 }
   0x2   :  { %2483 = sst [smem:[#allocation5_spill]] %s2460_s1 }
   0x3   :  { %2484 = sst [smem:[#allocation6_spill]] %s2461_s2  ;;  %s2158_s2 = smov 0  }
   0x4   :  { %2485 = sst [smem:[#allocation7_spill]] %s2462_s3 }
   0x5   :  { %2486 = sst [smem:[#allocation8_spill]] %s2463_s4 }
   0x6   :  { %2487 = sst [smem:[#allocation9_spill]] %s2464_s5 }
   0x7 LB: > { %s1723_s25 = sadd.s32 4294967295, %s2041_s2   ;;  %p1727_p0 = scmp.ge.s32.totalorder %s2041_s2, 1  ;;  %s2041_s2 = sphi %s2158_s2, %s31_s2  }
   0x8   : > { %p587_p1 = scmp.lt.s32.totalorder %s2041_s2, 5 }
   0xa   : > { %p588_p2 = pnand %p1727_p0, %p587_p1 }
   0xb   : > { %s2488_s3 = sld [smem:[#allocation5_spill]] (!%p588_p2)  ;;  %p646_p3 = scmp.lt.s32.totalorder (!%p588_p2), %s1723_s25, 3 }
   0xc   : > { %591 = sbr.rel (%p588_p2) target bundleno = 3153 (0xc51), region = 104  ;;  %s2489_s29 = sld [smem:[#allocation4_spill]] (!%p588_p2) }
   0xd   : > { %s2490_s5 = sld [smem:[#allocation8_spill]] (!%p588_p2)  ;;  %s2045_s4 = smov (!%p588_p2), 8  }
   0xe   : > { %s2491_s24 = sld [smem:[#allocation7_spill]] (!%p588_p2)  ;;  %s2046_s22 = smov (!%p588_p2), 16  }
   0xf   : > { %s2492_s27 = sld [smem:[#allocation6_spill]] (!%p588_p2)  ;;  %s2047_s23 = smov (!%p588_p2), 24  }
  0x10   : > { %s2493_s26 = sld [smem:[#allocation9_spill]] (!%p588_p2) }
  0x11   : > { %v1941_v0 = vld [vmem:[%s2488_s3 + $0x38] sm:$0xff]  ;;  %v1940_v2 = vld [vmem:[%s2488_s3 + $0x30] sm:$0xff]  ;;  %s2495_s25 = smov (!%p646_p3, %s1723_s25), 3  ;;  %v1939_v4 = vld [vmem:[%s2488_s3 + $0x28] sm:$0xff]  ;;  %vm765_vm0 = vcmask 523264   ;;  %vm798_vm1 = vcmask 253952  }
  0x12   : > { %v1945_v1 = vld [vmem:[%s2488_s3 + $0x58] sm:$0xff]  ;;  %769 = vmatpush.bf16.msra.mxu0 %v1941_v0  ;;  %v1944_v3 = vld [vmem:[%s2488_s3 + $0x50] sm:$0xff]  ;;  %s1933_s1 = sshll.u32 %s2495_s25, 3  ;;  %v1943_v5 = vld [vmem:[%s2488_s3 + $0x48] sm:$0xff]  ;;  %vm804_vm2 = vcmask 257024   ;;  %vm809_vm3 = vcmask 258048  }
  0x13   : > { %786 = vmatpush.bf16.msra.mxu1 %v1945_v1  ;;  %s650_s0 = scalar_lea.vmem %s2489_s29, %s1933_s1  ;;  %v1938_v7 = vld [vmem:[%s2488_s3 + $0x20] sm:$0xff]  ;;  %v1937_v9 = vld [vmem:[%s2488_s3 + $0x18] sm:$0xff]  ;;  %v1936_v12 = vld [vmem:[%s2488_s3 + $0x10] sm:$0xff]  ;;  %v2043_v31 = vmov 32.0   ;;  %vm928_vm8 = vcmask 261120   ;;  %vm1042_vm9 = vcmask 1041408  }
  0x14   : > { %v656_v6 = vld [vmem:[%s650_s0] sm:$0xff]  ;;  %v1935_v13 = vld [vmem:[%s2488_s3 + $0x8] sm:$0xff]  ;;  %2011 = vrcp.f32 %v2043_v31  ;;  %v1965_v45 = vld [vmem:[%s2470_s11 + $0x18] sm:$0xff]  ;;  %vm1043_vm10 = vcmask 1042432   ;;  %vm1003_vm11 = vcmask 64512   ;;  %vm1024_vm12 = vcmask 36864  }
  0x15   : > { %682 = vst [vmem:[#allocation1] ss:$2 sm:$0xff] %v656_v6  ;;  %v1942_v8 = vld [vmem:[%s2488_s3 + $0x40] sm:$0xff]  ;;  %v1947_v43 = vld [vmem:[%s2466_s7 + $0x8] sm:$0xff]  ;;  %v1964_v48 = vld [vmem:[%s2470_s11 + $0x10] sm:$0xff]  ;;  %vm1038_vm13 = vcmask 39936  }
  0x16   : > { %770 = vmatpush.bf16.msra.mxu0 %v1940_v2  ;;  %v1934_v14 = vld [vmem:[%s2488_s3] sm:$0xff]  ;;  %v1955_v44 = vld [vmem:[%s2468_s9 + $0x8] sm:$0xff]  ;;  %938 = vmatpush.bf16.msra.mxu2 %v1947_v43  ;;  %v1953_v6 = vld [vmem:[%s2466_s7 + $0x38] sm:$0xff]  ;;  %vm1062_vm14 = vcmask 61440   ;;  %vm1206_vm15 = vcmask 127040  }
  0x17   : > { %787 = vmatpush.bf16.msra.mxu1 %v1944_v3  ;;  %v795_v17 = vld [vmem:[%s2490_s5] sm:$0x1f]  ;;  %966 = vmatpush.bf16.msra.mxu3 %v1955_v44  ;;  %v1963_v50 = vld [vmem:[%s2470_s11 + $0x8] sm:$0xff] }
  0x18   : > { %v796_v18 = vld [vmem:[%s2491_s24] sm:$0x1]  ;;  %v801_v25 = vrot.slane %v795_v17, 1  ;;  %v1959_v51 = vld [vmem:[%s2468_s9 + $0x28] sm:$0xff]  ;;  %v1997_v31 = vld [vmem:[%s2469_s10 + $0x2] ss:$0 sm:$0xff] }
  0x19   : > { %v797_v19 = vadd.f32 %v796_v18, %v795_v17  ;;  %v1991_v22 = vld [vmem:[%s2492_s27] ss:$0 sm:$0xff]  ;;  %s1730_s24 = sshll.u32 %s2495_s25, 2 }
  0x1a   : > { %771 = vmatpush.bf16.msra.mxu0 %v1939_v4  ;;  %v2012_v32 = vpop.eup %2011  ;;  %v1946_v46 = vld [vmem:[%s2466_s7] sm:$0xff]  ;;  %v1949_v4 = vld [vmem:[%s2466_s7 + $0x18] sm:$0xff]  ;;  %s654_s29 = scalar_lea.vmem %s2480_s21, %s1730_s24 }
  0x1b   : > { %788 = vmatpush.bf16.msra.mxu1 %v1943_v5  ;;  %799 = vst.msk [vmem:[#allocation2] sm:$0x1] %vm798_vm1, %v797_v19  ;;  %v814_v33 = vmul.f32 32.0, %v2012_v32  ;;  %vm818_vm4 = vweird.f32 %v2012_v32  ;;  %v1954_v47 = vld [vmem:[%s2468_s9] sm:$0xff]  ;;  %939 = vmatpush.bf16.msra.mxu2 %v1946_v46  ;;  %vm1350_vm1 = vcmask 192640  }
  0x1c   : > { %v684_v10 = vld.sshfl [vmem:[#allocation1 + $0x8] sm:$0xff pattern:$0x75316420]  ;;  %v683_v15 = vld.sshfl [vmem:[#allocation1] sm:$0xff pattern:$0x75316420]  ;;  %967 = vmatpush.bf16.msra.mxu3 %v1954_v47 }
  0x1d   : > { %v688_v11 = vpack.c.bf16 %v684_v10, %v684_v10  ;;  %v687_v16 = vpack.c.bf16 %v683_v15, %v683_v15  ;;  %v815_v34 = vsub.f32 1.0, %v814_v33  ;;  %v1962_v53 = vld [vmem:[%s2470_s11] sm:$0xff]  ;;  %v2044_v10 = vmov 65535  }
  0x1e   : > { %772 = vmatpush.bf16.msra.mxu0 %v1938_v7  ;;  %v1958_v54 = vld [vmem:[%s2468_s9 + $0x20] sm:$0xff]  ;;  %v1948_v7 = vld [vmem:[%s2466_s7 + $0x10] sm:$0xff] }
  0x1f   : > { %789 = vmatpush.bf16.msra.mxu1 %v1942_v8  ;;  %v816_v35 = vmul.f32 %v2012_v32, %v815_v34  ;;  %994 = vmatpush.bf16.msrb.mxu2 %v1963_v50  ;;  %v1992_v62 = vld [vmem:[%s2493_s26] ss:$0 sm:$0xff]  ;;  %v1952_v8 = vld [vmem:[%s2466_s7 + $0x30] sm:$0xff] }
  0x20   : > { %v1993_v0 = vld [vmem:[%s2465_s6] ss:$0 sm:$0xff] }
  0x21   : > { %v817_v36 = vadd.f32 %v2012_v32, %v816_v35  ;;  %v1996_v15 = vld [vmem:[%s2469_s10] ss:$0 sm:$0xff] }
  0x22   : > { %773 = vmatpush.bf16.msra.mxu0 %v1937_v9  ;;  %1779 = vmatmul.msk.bf16.vlgmr.msra.gmra.mxu1 %vm765_vm0, %v688_v11  ;;  %v1994_v9 = vld [vmem:[%s2471_s12 + $0x1] ss:$0 sm:$0xff]  ;;  %v1044_v11 = vsel %vm1042_vm9, 4294967295, %v2044_v10 }
  0x23   : > { %v2222_v37 = vsel %vm818_vm4, %v2012_v32, %v817_v36  ;;  %995 = vmatpush.bf16.msrb.mxu2 %v1962_v53  ;;  %v1951_v32 = vld [vmem:[%s2466_s7 + $0x28] sm:$0xff]  ;;  %v1998_v36 = vld [vmem:[%s2471_s12] ss:$0 sm:$0xff] }
  0x24   : > { %v1966_v10 = vld [vmem:[%s2470_s11 + $0x20] sm:$0xff] }
  0x26   : > { %774 = vmatpush.bf16.msra.mxu0 %v1936_v12 }
  0x2a   : > { %775 = vmatpush.bf16.msra.mxu0 %v1935_v13 }
  0x2e   : > { %776 = vmatpush.bf16.msra.mxu0 %v1934_v14  ;;  %v2295_v14 = vsel %vm1043_vm10, %v1044_v11, 0  ;;  %v2000_v11 = vld [vmem:[%s2467_s8 + $0x1] ss:$0 sm:$0xff] }
  0x31   : > { %777 = vmatmul.bf16.vlgmr.msra.gmra.mxu0 %v687_v16 }
  0x32   : > { %1141 = vmatpush.bf16.msrb.mxu0 %v1965_v45 }
  0x36   : > { %1142 = vmatpush.bf16.msrb.mxu0 %v1964_v48 }
  0x3a   : > { %1257 = vmatpush.bf16.msra.mxu0 %v1959_v51 }
  0x3e   : > { %1258 = vmatpush.bf16.msra.mxu0 %v1958_v54 }
  0x9f   : > { %v791_v20 = vpop.f32.mrf.mxu1 }
  0xa7   : > { %v793_v21 = vpop.f32.mrf.mxu1 }
  0xa8   : > { %v1995_v21 = vld [vmem:[%s2467_s8] ss:$0 sm:$0xff] }
  0xae   : > { %v778_v23 = vpop.f32.mrf.mxu0 }
  0xaf   : > { %v779_v24 = vadd.f32 %v1991_v22, %v778_v23 }
  0xb1   : > { %v792_v26 = vadd.f32 %v791_v20, %v779_v24  ;;  %v1957_v24 = vld [vmem:[%s2468_s9 + $0x18] sm:$0xff] }
  0xb3   : > { %v803_v27 = vadd.f32 %v801_v25, %v792_v26 }
  0xb5   : > { %805 = vst.msk [vmem:[#allocation2 + $0x1] sm:$0xf] %vm804_vm2, %v803_v27  ;;  %v1956_v27 = vld [vmem:[%s2468_s9 + $0x10] sm:$0xff]  ;;  %vm1494_vm2 = vcmask 258240  }
  0xb6   : > { %v780_v28 = vpop.f32.mrf.mxu0 }
  0xbc   : > { %v2218_v29 = vld [vmem:[#allocation2] sm:$0x1f] }
  0xbd   : > { %v810_v30 = vsel %vm809_vm3, %v2218_v29, 0.0 }
  0xbe   : > { %811 = vadd.xlane.f32.xlu0 %v810_v30 }
 0x131   : > { %v812_v38 = vpop.xlane.xlu0 %811 }
 0x132   : > { %v820_v39 = vmul.f32 %v2222_v37, %v812_v38 }
 0x134   : > { %v821_v40 = vsub.f32 %v2218_v29, %v820_v39  ;;  %v1950_v39 = vld [vmem:[%s2466_s7 + $0x20] sm:$0xff] }
 0x136   : > { %v822_v41 = vmul.f32 %v821_v40, %v821_v40 }
 0x138   : > { %v823_v42 = vsel %vm809_vm3, %v822_v41, 0.0 }
 0x139   : > { %824 = vadd.xlane.f32.xlu0 %v823_v42 }
 0x1ac   : > { %v825_v49 = vpop.xlane.xlu0 %824 }
 0x1ad   : > { %v826_v52 = vmul.f32 %v825_v49, %v2222_v37 }
 0x1af   : > { %v827_v55 = vadd.f32 1e-06, %v826_v52 }
 0x1b1   : > { %2013 = vrsqrt.f32 %v827_v55  ;;  %vm834_vm6 = vweird.f32 %v827_v55 }
 0x1b7   : > { %v2014_v56 = vpop.eup %2013 }
 0x1b8   : > { %v829_v57 = vmul.f32 %v2014_v56, %v827_v55  ;;  %vm835_vm5 = vweird.f32 %v2014_v56  ;;  %v2001_v55 = vld [vmem:[%s2469_s10 + $0x1] ss:$0 sm:$0xff] }
 0x1b9   : > { %vm836_vm7 = vmor %vm834_vm6, %vm835_vm5  ;;  %vm1664_vm6 = vcmask 256000  }
 0x1ba   : > { %v830_v58 = vmul.f32 %v2014_v56, %v829_v57 }
 0x1bc   : > { %v831_v59 = vmul.f32 0.5, %v830_v58 }
 0x1be   : > { %v832_v60 = vsub.f32 1.5, %v831_v59 }
 0x1c0   : > { %v833_v61 = vmul.f32 %v2014_v56, %v832_v60 }
 0x1c2   : > { %v837_v63 = vsel %vm836_vm7, %v2014_v56, %v833_v61  ;;  %vm1665_vm7 = vsmask.f32 2304 }
 0x1c3   : > { %v838_v1 = vmul.f32 %v837_v63, %v821_v40 }
 0x1c5   : > { %v842_v2 = vmul.f32 %v1992_v62, %v838_v1 }
 0x1c7   : > { %v846_v3 = vadd.f32 %v1993_v0, %v842_v2 }
 0x1c9   : > { %v2267_v5 = vpack.c.bf16 %v846_v3, %v846_v3 }
 0x1cb   : > { %1788 = vmatmul.msk.bf16.vlgmr.msra.gmra.mxu2 %vm928_vm8, %v2267_v5  ;;  %1797 = vmatmul.msk.bf16.vlgmr.msra.gmra.mxu3 %vm928_vm8, %v2267_v5 }
 0x1cc   : > { %1835 = vmatmul.msk.bf16.vlgmr.msrb.gmra.mxu0 %vm928_vm8, %v2267_v5  ;;  %1085 = vmatpush.bf16.msra.mxu2 %v1949_v4 }
 0x1cd   : > { %1373 = vmatpush.bf16.msrb.mxu0 %v1953_v6 }
 0x1d0   : > { %1086 = vmatpush.bf16.msra.mxu2 %v1948_v7 }
 0x1d1   : > { %1374 = vmatpush.bf16.msrb.mxu0 %v1952_v8  ;;  %v1967_v8 = vld [vmem:[%s2470_s11 + $0x28] sm:$0xff] }
 0x1db   : > { %1806 = vmatmul.msk.bf16.vlgmr.msrb.gmra.mxu2 %vm928_vm8, %v2267_v5 }
 0x1dc   : > { %1855 = vmatmul.msk.bf16.vlgmr.msra.gmra.mxu0 %vm928_vm8, %v2267_v5 }
 0x1eb   : > { %1817 = vmatmul.msk.bf16.vlgmr.msra.gmra.mxu2 %vm928_vm8, %v2267_v5 }
 0x1ec   : > { %1875 = vmatmul.msk.bf16.vlgmr.msrb.gmra.mxu0 %vm928_vm8, %v2267_v5 }
 0x249   : > { %v1144_v12 = vpop.f32.mrf.mxu0 }
 0x24a   : > { %v1145_v13 = vadd.f32 %v1994_v9, %v1144_v12 }
 0x24c   : > { %v1182_v16 = vpack.c.bf16 %v1145_v13, %v1145_v13  ;;  %v1961_v13 = vld [vmem:[%s2468_s9 + $0x38] sm:$0xff] }
 0x24e   : > { %v1187_v17 = vand.u32 %v1182_v16, %v2295_v14  ;;  %v941_v18 = vpop.f32.mrf.mxu2  ;;  %v969_v19 = vpop.f32.mrf.mxu3  ;;  %v1960_v16 = vld [vmem:[%s2468_s9 + $0x30] sm:$0xff] }
 0x24f   : > { %v970_v20 = vadd.f32 %v1996_v15, %v969_v19  ;;  %v942_v26 = vadd.f32 %v1995_v21, %v941_v18 }
 0x250   : > { %1196 = vmatpush.bf16.msrb.mxu2 %v1187_v17 }
 0x251   : > { %v1002_v22 = vpack.c.bf16 %v970_v20, %v970_v20  ;;  %v1146_v23 = vpop.f32.mrf.mxu0  ;;  %v1001_v33 = vpack.c.bf16 %v942_v26, %v942_v26 }
 0x252   : > { %v2003_v23 = vld [vmem:[%s2471_s12 + $0x2] ss:$0 sm:$0xff] }
 0x253   : > { %v1008_v25 = vsel %vm1003_vm11, %v1002_v22, 0 }
 0x254   : > { %1017 = vmatpush.bf16.xpose.msrb.mxu3 %v1008_v25 }
 0x256   : > { %v943_v28 = vpop.f32.mrf.mxu2  ;;  %v971_v30 = vpop.f32.mrf.mxu3 }
 0x257   : > { %v2004_v30 = vld [vmem:[%s2469_s10 + $0x3] ss:$0 sm:$0xff] }
 0x259   : > { %v1260_v34 = vpop.f32.mrf.mxu0 }
 0x25a   : > { %v1261_v35 = vadd.f32 %v1997_v31, %v1260_v34 }
 0x25b   : > { %1807 = vmatmul.msk.bf16.vlgmr.msrb.gmra.mxu3 %vm1003_vm11, %v1001_v33 }
 0x25c   : > { %1113 = vmatpush.bf16.msra.mxu3 %v1957_v24  ;;  %v1293_v38 = vpack.c.bf16 %v1261_v35, %v1261_v35 }
 0x25e   : > { %v1298_v40 = vsel %vm1003_vm11, %v1293_v38, 0  ;;  %v997_v41 = vpop.f32.mrf.mxu2 }
 0x25f   : > { %v998_v42 = vadd.f32 %v1998_v36, %v997_v41  ;;  %1307 = vmatpush.bf16.xpose.msra.mxu2 %v1298_v40 }
 0x260   : > { %1114 = vmatpush.bf16.msra.mxu3 %v1956_v27 }
 0x261   : > { %v1037_v43 = vpack.c.bf16 %v998_v42, %v998_v42  ;;  %v1262_v44 = vpop.f32.mrf.mxu0 }
 0x263   : > { %v1047_v45 = vand.u32 %v2295_v14, %v1037_v43 }
 0x264   : > { %1229 = vmatpush.bf16.msrb.mxu3 %v1951_v32 }
 0x265   : > { %1056 = vmatpush.bf16.msrb.mxu1 %v1047_v45  ;;  %v1969_v45 = vld [vmem:[%s2470_s11 + $0x38] sm:$0xff] }
 0x266   : > { %v999_v46 = vpop.f32.mrf.mxu2 }
 0x268   : > { %1230 = vmatpush.bf16.msrb.mxu3 %v1950_v39 }
 0x269   : > { %v2326_v47 = vpop.f32.mrf.mxu0 }
 0x26b   : > { %1826 = vmatmul.msk.bf16.vlgmr.msra.gmra.mxu3 %vm928_vm8, %v2267_v5 }
 0x26e   : > { %v1088_v48 = vpop.f32.mrf.mxu2 }
 0x26f   : > { %v1089_v12 = vadd.f32 %v2000_v11, %v1088_v48  ;;  %v1968_v48 = vld [vmem:[%s2470_s11 + $0x30] sm:$0xff] }
 0x271   : > { %v1378_v49 = vpop.f32.mrf.mxu0  ;;  %v1148_v15 = vpack.c.bf16 %v1089_v12, %v1089_v12 }
 0x272   : > { %v2002_v49 = vld [vmem:[%s2467_s8 + $0x2] ss:$0 sm:$0xff] }
 0x276   : > { %v1090_v50 = vpop.f32.mrf.mxu2 }
 0x27b   : > { %1846 = vmatmul.msk.bf16.vlgmr.msrb.gmra.mxu3 %vm928_vm8, %v2267_v5 }
 0x2de   : > { %v1019_v51 = vpop.f32.mrf.mxu3 }
 0x2df   : > { %v1023_v52 = vmul.f32 0.35355338, %v1019_v51 }
 0x2e1   : > { %v1025_v53 = vsel %vm1024_vm12, %v1023_v52, -inf }
 0x2e2   : > { %1026 = vmax.xlane.f32.xlu1 %v1025_v53 }
 0x2e6   : > { %v1021_v54 = vpop.f32.mrf.mxu3 }
 0x2ee   : > { %v1116_v56 = vpop.f32.mrf.mxu3 }
 0x2ef   : > { %v1117_v57 = vadd.f32 %v2001_v55, %v1116_v56 }
 0x2f1   : > { %v1149_v58 = vpack.c.bf16 %v1117_v57, %v1117_v57 }
 0x2f3   : > { %v1154_v59 = vsel %vm1003_vm11, %v1149_v58, 0  ;;  %v2005_v58 = vld [vmem:[%s2471_s12 + $0x3] ss:$0 sm:$0xff] }
 0x2f4   : > { %1163 = vmatpush.bf16.xpose.msra.mxu1 %v1154_v59 }
 0x2f6   : > { %v1118_v60 = vpop.f32.mrf.mxu3 }
 0x2fe   : > { %v2337_v61 = vpop.f32.mrf.mxu3 }
 0x2ff   : > { %v1233_v50 = vadd.f32 %v2002_v49, %v2337_v61  ;;  %v1973_v49 = vld [vmem:[%s2476_s17 + $0x8] sm:$0xff] }
 0x301   : > { %v1292_v51 = vpack.c.bf16 %v1233_v50, %v1233_v50 }
 0x306   : > { %v1234_v62 = vpop.f32.mrf.mxu3 }
 0x355   : > { %v1027_v63 = vpop.xlane.xlu1 %1026 }
 0x356   : > { %v1028_v0 = vsub.f32 %v1023_v52, %v1027_v63 }
 0x358   : > { %v1029_v1 = vmul.f32 1.442695, %v1028_v0 }
 0x35a   : > { %2015 = vpow2.f32 %v1029_v1 }
 0x360   : > { %v2016_v2 = vpop.eup %2015 }
 0x361   : > { %v1031_v3 = vsel %vm1024_vm12, %v2016_v2, 0.0 }
 0x362   : > { %1032 = vadd.xlane.f32.xlu1 %v1031_v3 }
 0x3d5   : > { %v1033_v4 = vpop.xlane.xlu1 %1032 }
 0x3d6   : > { %2017 = vrcp.f32 %v1033_v4 }
 0x3dc   : > { %v2018_v6 = vpop.eup %2017 }
 0x3dd   : > { %v1035_v7 = vmul.f32 %v2018_v6, %v2016_v2 }
 0x3df   : > { %v1036_v9 = vpack.c.bf16 %v1035_v7, %v1035_v7 }
 0x3e1   : > { %1808 = vmatmul.msk.bf16.vlgmr.msrb.gmra.mxu1 %vm1038_vm13, %v1036_v9 }
 0x3e2   : > { %1285 = vmatpush.bf16.msrb.mxu1 %v1967_v8 }
 0x3e6   : > { %1286 = vmatpush.bf16.msrb.mxu1 %v1966_v10 }
 0x3f1   : > { %1836 = vmatmul.msk.bf16.vlgmr.msra.gmra.mxu1 %vm1003_vm11, %v1148_v15 }
 0x3f2   : > { %1401 = vmatpush.bf16.msra.mxu1 %v1961_v13 }
 0x3f6   : > { %1402 = vmatpush.bf16.msra.mxu1 %v1960_v16 }
 0x401   : > { %1864 = vmatmul.msk.bf16.vlgmr.msrb.gmra.mxu1 %vm928_vm8, %v2267_v5 }
 0x411   : > { %1884 = vmatmul.msk.bf16.vlgmr.msra.gmra.mxu1 %vm928_vm8, %v2267_v5 }
 0x45e   : > { %v1058_v17 = vpop.f32.mrf.mxu1 }
 0x45f   : > { %1063 = vst.msk [vmem:[#allocation3] sm:$0x1f] %vm1062_vm14, %v1058_v17 }
 0x466   : > { %v1060_v18 = vpop.f32.mrf.mxu1 }
 0x46e   : > { %v1165_v19 = vpop.f32.mrf.mxu1 }
 0x46f   : > { %v1169_v20 = vmul.f32 0.35355338, %v1165_v19 }
 0x471   : > { %v1170_v21 = vsel %vm1024_vm12, %v1169_v20, -inf }
 0x472   : > { %1171 = vmax.xlane.f32.xlu2 %v1170_v21 }
 0x476   : > { %v1167_v22 = vpop.f32.mrf.mxu1 }
 0x47e   : > { %v1288_v24 = vpop.f32.mrf.mxu1 }
 0x47f   : > { %v1289_v25 = vadd.f32 %v2003_v23, %v1288_v24 }
 0x481   : > { %v1326_v26 = vpack.c.bf16 %v1289_v25, %v1289_v25 }
 0x483   : > { %v1331_v27 = vand.u32 %v1326_v26, %v2295_v14 }
 0x485   : > { %1340 = vmatpush.bf16.msra.mxu3 %v1331_v27 }
 0x486   : > { %v1290_v28 = vpop.f32.mrf.mxu1 }
 0x48e   : > { %v1404_v31 = vpop.f32.mrf.mxu1 }
 0x48f   : > { %v1405_v32 = vadd.f32 %v2004_v30, %v1404_v31  ;;  %v1971_v31 = vld [vmem:[%s2472_s13 + $0x8] sm:$0xff] }
 0x490   : > { %1522 = vmatpush.bf16.msrb.mxu1 %v1971_v31 }
 0x491   : > { %v1437_v33 = vpack.c.bf16 %v1405_v32, %v1405_v32  ;;  %v1970_v32 = vld [vmem:[%s2472_s13] sm:$0xff] }
 0x493   : > { %v1442_v34 = vsel %vm1003_vm11, %v1437_v33, 0 }
 0x494   : > { %1451 = vmatpush.bf16.xpose.msrb.mxu3 %v1442_v34  ;;  %1523 = vmatpush.bf16.msrb.mxu1 %v1970_v32 }
 0x496   : > { %v1406_v35 = vpop.f32.mrf.mxu1 }
 0x4e5   : > { %v1172_v36 = vpop.xlane.xlu2 %1171 }
 0x4e6   : > { %v1173_v38 = vsub.f32 %v1169_v20, %v1172_v36  ;;  %v2006_v36 = vld [vmem:[%s2473_s14] ss:$0 sm:$0xff] }
 0x4e8   : > { %v1174_v39 = vmul.f32 1.442695, %v1173_v38 }
 0x4ea   : > { %2019 = vpow2.f32 %v1174_v39 }
 0x4f0   : > { %v2020_v40 = vpop.eup %2019 }
 0x4f1   : > { %v1176_v41 = vsel %vm1024_vm12, %v2020_v40, 0.0 }
 0x4f2   : > { %1177 = vadd.xlane.f32.xlu2 %v1176_v41 }
 0x565   : > { %v1178_v42 = vpop.xlane.xlu2 %1177 }
 0x566   : > { %2021 = vrcp.f32 %v1178_v42 }
 0x56c   : > { %v2022_v43 = vpop.eup %2021 }
 0x56d   : > { %v1180_v44 = vmul.f32 %v2022_v43, %v2020_v40 }
 0x56f   : > { %v1181_v46 = vpack.c.bf16 %v1180_v44, %v1180_v44 }
 0x571   : > { %1837 = vmatmul.msk.bf16.vlgmr.msrb.gmra.mxu2 %vm1038_vm13, %v1181_v46 }
 0x572   : > { %1429 = vmatpush.bf16.msrb.mxu2 %v1969_v45 }
 0x576   : > { %1430 = vmatpush.bf16.msrb.mxu2 %v1968_v48 }
 0x581   : > { %1865 = vmatmul.msk.bf16.vlgmr.msra.gmra.mxu2 %vm1003_vm11, %v1292_v51 }
 0x582   : > { %1592 = vmatpush.bf16.msra.mxu2 %v1973_v49 }
 0x591   : > { %1893 = vmatmul.msk.bf16.vlgmr.msrb.gmra.mxu2 %vm928_vm8, %v2267_v5 }
 0x5f4   : > { %v1198_v52 = vpop.f32.mrf.mxu2 }
 0x5fc   : > { %v1200_v53 = vpop.f32.mrf.mxu2 }
 0x604   : > { %v1309_v54 = vpop.f32.mrf.mxu2 }
 0x605   : > { %v1313_v55 = vmul.f32 0.35355338, %v1309_v54 }
 0x607   : > { %v1314_v56 = vsel %vm1024_vm12, %v1313_v55, -inf }
 0x608   : > { %1315 = vmax.xlane.f32.xlu0 %v1314_v56 }
 0x60c   : > { %v1311_v57 = vpop.f32.mrf.mxu2 }
 0x614   : > { %v1432_v59 = vpop.f32.mrf.mxu2 }
 0x615   : > { %v1433_v60 = vadd.f32 %v2005_v58, %v1432_v59  ;;  %v2007_v59 = vld [vmem:[%s2474_s15] ss:$0 sm:$0xff] }
 0x617   : > { %v1470_v61 = vpack.c.bf16 %v1433_v60, %v1433_v60 }
 0x619   : > { %v1475_v62 = vand.u32 %v1470_v61, %v2295_v14  ;;  %v1999_v14 = vld [vmem:[%s2467_s8 + $0x3] ss:$0 sm:$0xff] }
 0x61a   : > { %v1377_v9 = vadd.f32 %v1999_v14, %v2326_v47 }
 0x61b   : > { %1484 = vmatpush.bf16.msra.mxu0 %v1475_v62 }
 0x61c   : > { %v1434_v63 = vpop.f32.mrf.mxu2  ;;  %v1436_v11 = vpack.c.bf16 %v1377_v9, %v1377_v9 }
 0x67b   : > { %v1316_v5 = vpop.xlane.xlu0 %1315 }
 0x67c   : > { %v1317_v0 = vsub.f32 %v1313_v55, %v1316_v5 }
 0x67e   : > { %v1318_v1 = vmul.f32 1.442695, %v1317_v0  ;;  %v1977_v0 = vld [vmem:[%s2478_s19 + $0x18] sm:$0xff] }
 0x680   : > { %2023 = vpow2.f32 %v1318_v1  ;;  %v1976_v1 = vld [vmem:[%s2478_s19 + $0x10] sm:$0xff] }
 0x686   : > { %v2024_v2 = vpop.eup %2023 }
 0x687   : > { %v1320_v3 = vsel %vm1024_vm12, %v2024_v2, 0.0 }
 0x688   : > { %1321 = vadd.xlane.f32.xlu1 %v1320_v3  ;;  %v1974_v3 = vld [vmem:[%s2478_s19] sm:$0xff] }
 0x6a1   : > { %1203 = vrot.lane.b32.xlu1 %v1198_v52, %s2045_s4 }
 0x6fb   : > { %v1322_v4 = vpop.xlane.xlu1 %1321 }
 0x6fc   : > { %2025 = vrcp.f32 %v1322_v4  ;;  %v2009_v4 = vld [vmem:[%s2477_s18] ss:$0 sm:$0xff] }
 0x702   : > { %v2026_v6 = vpop.eup %2025 }
 0x703   : > { %v1324_v7 = vmul.f32 %v2026_v6, %v2024_v2  ;;  %v1975_v2 = vld [vmem:[%s2478_s19 + $0x8] sm:$0xff] }
 0x705   : > { %v1325_v8 = vpack.c.bf16 %v1324_v7, %v1324_v7 }
 0x707   : > { %1866 = vmatmul.msk.bf16.vlgmr.msra.gmra.mxu3 %vm1038_vm13, %v1325_v8 }
 0x708   : > { %1648 = vmatpush.bf16.msra.mxu3 %v1977_v0 }
 0x70c   : > { %1649 = vmatpush.bf16.msra.mxu3 %v1976_v1 }
 0x710   : > { %1650 = vmatpush.bf16.msra.mxu3 %v1975_v2 }
 0x713   : > { %v1204_v10 = vpop.permute.xlu1 %1203 }
 0x714   : > { %1207 = vst.msk [vmem:[#allocation3] sm:$0x1f] %vm1206_vm15, %v1204_v10  ;;  %1651 = vmatpush.bf16.msra.mxu3 %v1974_v3 }
 0x717   : > { %1894 = vmatmul.msk.bf16.vlgmr.msrb.gmra.mxu3 %vm1003_vm11, %v1436_v11 }
 0x78a   : > { %v1342_v12 = vpop.f32.mrf.mxu3 }
 0x792   : > { %v1344_v13 = vpop.f32.mrf.mxu3 }
 0x79a   : > { %v1453_v15 = vpop.f32.mrf.mxu3 }
 0x79b   : > { %v1457_v16 = vmul.f32 0.35355338, %v1453_v15 }
 0x79d   : > { %v1458_v17 = vsel %vm1024_vm12, %v1457_v16, -inf }
 0x79e   : > { %1459 = vmax.xlane.f32.xlu2 %v1458_v17 }
 0x7a2   : > { %v1455_v18 = vpop.f32.mrf.mxu3 }
 0x7b6   : > { %1347 = vrot.lane.b32.xlu2 %v1342_v12, %s2046_s22 }
 0x811   : > { %v1460_v19 = vpop.xlane.xlu2 %1459 }
 0x812   : > { %v1461_v20 = vsub.f32 %v1457_v16, %v1460_v19  ;;  %v2010_v19 = vld [vmem:[%s2479_s20] ss:$0 sm:$0xff] }
 0x814   : > { %v1462_v21 = vmul.f32 1.442695, %v1461_v20 }
 0x816   : > { %2027 = vpow2.f32 %v1462_v21 }
 0x819   : > { %v1348_v47 = vpop.permute.xlu2 %1347 }
 0x81a   : > { %1351 = vst.msk [vmem:[#allocation3] sm:$0x1f] %vm1350_vm1, %v1348_v47 }
 0x81c   : > { %v2028_v22 = vpop.eup %2027 }
 0x81d   : > { %v1464_v23 = vsel %vm1024_vm12, %v2028_v22, 0.0 }
 0x81e   : > { %1465 = vadd.xlane.f32.xlu0 %v1464_v23 }
 0x891   : > { %v1466_v24 = vpop.xlane.xlu0 %1465 }
 0x892   : > { %2029 = vrcp.f32 %v1466_v24 }
 0x898   : > { %v2030_v25 = vpop.eup %2029 }
 0x899   : > { %v1468_v26 = vmul.f32 %v2030_v25, %v2028_v22  ;;  %v1667_v22 = vld [vmem:[%s654_s29] sm:$0x7] }
 0x89b   : > { %v1469_v27 = vpack.c.bf16 %v1468_v26, %v1468_v26 }
 0x89d   : > { %1895 = vmatmul.msk.bf16.vlgmr.msra.gmra.mxu0 %vm1038_vm13, %v1469_v27 }
 0x91a   : > { %v1486_v28 = vpop.f32.mrf.mxu0 }
 0x91b   : > { %1491 = vrot.lane.b32.xlu0 %v1486_v28, %s2047_s23 }
 0x922   : > { %v1488_v30 = vpop.f32.mrf.mxu0 }
 0x98d   : > { %v1492_v33 = vpop.permute.xlu0 %1491 }
 0x98e   : > { %1495 = vst.msk [vmem:[#allocation3] sm:$0x1f] %vm1494_vm2, %v1492_v33 }
 0x995   : > { %v1496_v34 = vld [vmem:[#allocation3] sm:$0x1f] }
 0x996   : > { %v1497_v35 = vpack.c.bf16 %v1496_v34, %v1496_v34 }
 0x998   : > { %1904 = vmatmul.msk.bf16.vlgmr.msrb.gmra.mxu1 %vm928_vm8, %v1497_v35 }
 0xa15   : > { %v1525_v38 = vpop.f32.mrf.mxu1 }
 0xa16   : > { %v1526_v39 = vadd.f32 %v2006_v36, %v1525_v38 }
 0xa18   : > { %v2411_v40 = vadd.f32 %v1526_v39, %v2218_v29  ;;  %v1972_v29 = vld [vmem:[%s2476_s17] sm:$0xff] }
 0xa19   : > { %1593 = vmatpush.bf16.msra.mxu2 %v1972_v29 }
 0xa1a   : > { %v1532_v41 = vsel %vm809_vm3, %v2411_v40, 0.0 }
 0xa1b   : > { %1533 = vadd.xlane.f32.xlu2 %v1532_v41 }
 0xa1d   : > { %v1527_v42 = vpop.f32.mrf.mxu1 }
 0xa8e   : > { %v1534_v43 = vpop.xlane.xlu2 %1533 }
 0xa8f   : > { %v1535_v44 = vmul.f32 %v1534_v43, %v2222_v37 }
 0xa91   : > { %v1536_v45 = vsub.f32 %v2411_v40, %v1535_v44 }
 0xa93   : > { %v1537_v46 = vmul.f32 %v1536_v45, %v1536_v45 }
 0xa95   : > { %v1538_v48 = vsel %vm809_vm3, %v1537_v46, 0.0 }
 0xa96   : > { %1539 = vadd.xlane.f32.xlu1 %v1538_v48 }
 0xb09   : > { %v1540_v50 = vpop.xlane.xlu1 %1539 }
 0xb0a   : > { %v1541_v51 = vmul.f32 %v1540_v50, %v2222_v37  ;;  %v2008_v37 = vld [vmem:[%s2475_s16] ss:$0 sm:$0xff] }
 0xb0c   : > { %v1542_v52 = vadd.f32 1e-06, %v1541_v51 }
 0xb0e   : > { %2031 = vrsqrt.f32 %v1542_v52  ;;  %vm1549_vm4 = vweird.f32 %v1542_v52 }
 0xb14   : > { %v2032_v53 = vpop.eup %2031 }
 0xb15   : > { %v1544_v54 = vmul.f32 %v2032_v53, %v1542_v52  ;;  %vm1550_vm3 = vweird.f32 %v2032_v53 }
 0xb16   : > { %vm1551_vm5 = vmor %vm1549_vm4, %vm1550_vm3 }
 0xb17   : > { %v1545_v55 = vmul.f32 %v2032_v53, %v1544_v54 }
 0xb19   : > { %v1546_v56 = vmul.f32 0.5, %v1545_v55 }
 0xb1b   : > { %v1547_v57 = vsub.f32 1.5, %v1546_v56 }
 0xb1d   : > { %v1548_v58 = vmul.f32 %v2032_v53, %v1547_v57 }
 0xb1f   : > { %v1552_v60 = vsel %vm1551_vm5, %v2032_v53, %v1548_v58 }
 0xb20   : > { %v1553_v61 = vmul.f32 %v1552_v60, %v1536_v45 }
 0xb22   : > { %v1557_v62 = vmul.f32 %v2007_v59, %v1553_v61 }
 0xb24   : > { %v1561_v63 = vadd.f32 %v2008_v37, %v1557_v62 }
 0xb26   : > { %v1566_v5 = vpack.c.bf16 %v1561_v63, %v1561_v63 }
 0xb28   : > { %1913 = vmatmul.msk.bf16.vlgmr.msra.gmra.mxu2 %vm928_vm8, %v1566_v5  ;;  %vm1666_vm8 = vmand %vm1664_vm6, %vm1665_vm7 }
 0xbab   : > { %v1595_v6 = vpop.f32.mrf.mxu2 }
 0xbac   : > { %v1596_v7 = vadd.f32 %v2009_v4, %v1595_v6 }
 0xbae   : > { %v1600_v8 = vmul.f32 0.044715, %v1596_v7  ;;  %v1599_v15 = vmul.f32 0.5, %v1596_v7 }
 0xbb0   : > { %v1601_v14 = vmul.f32 %v1600_v8, %v1596_v7 }
 0xbb2   : > { %v1602_v9 = vmul.f32 %v1601_v14, %v1596_v7 }
 0xbb3   : > { %v1597_v10 = vpop.f32.mrf.mxu2 }
 0xbb4   : > { %v1603_v11 = vadd.f32 %v1602_v9, %v1596_v7 }
 0xbb6   : > { %v1604_v12 = vmul.f32 0.7978846, %v1603_v11 }
 0xbb8   : > { %2033 = vtanh.f32 %v1604_v12 }
 0xbbe   : > { %v2034_v13 = vpop.eup %2033 }
 0xbbf   : > { %v1606_v16 = vadd.f32 1.0, %v2034_v13 }
 0xbc1   : > { %v1607_v17 = vmul.f32 %v1606_v16, %v1599_v15 }
 0xbc3   : > { %v1616_v18 = vpack.c.bf16 %v1607_v17, %v1607_v17 }
 0xbc5   : > { %1930 = vmatmul.msk.bf16.vlgmr.msra.gmra.mxu3 %vm765_vm0, %v1616_v18 }
 0xc48   : > { %v1653_v20 = vpop.f32.mrf.mxu3 }
 0xc49   : > { %v1657_v21 = vadd.f32 %v1653_v20, %v2411_v40 }
 0xc4b   : > { %v1662_v47 = vadd.f32 %v2010_v19, %v1657_v21 }
 0xc4d   : > { %v1663_v23 = vpack.c.bf16 %v1662_v47, %v1662_v47 }
 0xc4f   : > { %v1668_v24 = vsel %vm1666_vm8, %v1663_v23, %v1667_v22 }
 0xc50   : > { %1669 = vst [vmem:[%s654_s29] sm:$0x7] %v1668_v24  ;;  %v1655_v25 = vpop.f32.mrf.mxu3 }
 0xc51 PF: > { %s31_s2 = sadd.s32 1, %s2041_s2  }
 0xc52   : > { %p28_p4 = scmp.ge.s32.totalorder %s31_s2, 6  }
 0xc54   :  { %30 = sbr.rel (!%p28_p4) target bundleno = 7 (0x7), region = 134 }

// kernel: blip_comet_forward.9
= control target key start
LH: loop header
LB: loop body
LE: loop exit
PB: predicated region body
PF: predicated region fallthrough
CT: control target
= control target key end

     0   :  { %13 = vsyncpa [#allocation3], 0  ;;  %s720_s27 = smov 0   ;;  %s781_s0 = inlined_call_operand.vmem [shape: bf16[2,8,32], index: 0, kind: input, shape index: {}]   ;;  %s782_s1 = inlined_call_operand.vmem [shape: s32[2,8,1], index: 1, kind: input, shape index: {}]   ;;  %s783_s2 = inlined_call_operand.vmem [shape: bf16[32,32], index: 2, kind: input, shape index: {}]   ;;  %s784_s3 = inlined_call_operand.vmem [shape: f32[1,32], index: 3, kind: input, shape index: {}, may-alias: {3,5}]   ;;  %s785_s4 = inlined_call_operand.vmem [shape: f32[1,32], index: 4, kind: input, shape index: {}]   ;;  %s786_s5 = inlined_call_operand.vmem [shape: f32[1,32], index: 5, kind: input, shape index: {}, may-alias: {3,5}]   ;;  %s787_s6 = inlined_call_operand.vmem [shape: bf16[32,64], index: 6, kind: input, shape index: {}]   ;;  %s788_s7 = inlined_call_operand.vmem [shape: f32[1,64], index: 7, kind: input, shape index: {}]   ;;  %s789_s8 = inlined_call_operand.hbm [shape: f32[1,1], index: 8, kind: output, shape index: {}]  }
   0x1 LB: > { %s726_s28 = sadd.s32 4294967295, %s667_s27   ;;  %p559_p0 = scmp.ge.s32.totalorder %s667_s27, 1  ;;  %s667_s27 = sphi %s720_s27, %s19_s27  }
   0x2   : > { %p266_p1 = scmp.lt.s32.totalorder %s667_s27, 3 }
   0x4   : > { %p267_p2 = pnand %p559_p0, %p266_p1 }
   0x5   : > { %p298_p3 = scmp.lt.s32.totalorder (!%p267_p2), %s726_s28, 1  ;;  %p562_p4 = scmp.ne.s32.totalorder (!%p267_p2), %s726_s28, 0 }
   0x6   : > { %270 = sbr.rel (%p267_p2) target bundleno = 980 (0x3d4), region = 52 }
   0xb   : > { %s299_s29 = scalar_select %p298_p3, %s726_s28, 1 }
   0xc   : > { %310 = sbr.rel (%p562_p4) target bundleno = 19 (0x13), region = 56 }
   0xd   : > { %s560_s30 = sshll.u32 %s299_s29, 2  ;;  %s561_s9 = sshll.u32 %s299_s29, 3 }
   0xe   : > { %s301_s12 = scalar_lea.vmem %s781_s0, %s560_s30  ;;  %s738_s15 = scalar_lea.vmem %s782_s1, %s561_s9 }
  0x11   : > { %vm311_vm0 = vcmask 0   ;;  %v669_v0 = vmov 0.0  }
  0x12   : > { %312 = vst.msk [vmem:[#allocation2] sm:$0x1] %vm311_vm0, %v669_v0 }
  0x13 PF: > { %v588_v1 = vld [vmem:[%s783_s2 + $0x8] sm:$0xff]  ;;  %v587_v2 = vld [vmem:[%s783_s2] sm:$0xff]  ;;  %vm334_vm1 = vcmask 261120   ;;  %v670_v18 = vmov 32.0   ;;  %vm437_vm6 = vcmask 523264   ;;  %v671_v54 = vmov 0  }
  0x14   : > { %344 = vmatpush.bf16.msra.mxu0 %v588_v1  ;;  %v313_v3 = vld [vmem:[%s301_s12] sm:$0xf]  ;;  %v590_v30 = vld [vmem:[%s787_s6 + $0x8] sm:$0xff]  ;;  %611 = vset.pattern.permute.xlu2 %v671_v54  ;;  %v451_v61 = vlaneseq  ;;  %vm484_vm10 = vcmask 7168   ;;  %s674_s12 = smov [#allocation2]   ;;  %s504_s16 = sshll.u32 %s789_s8, 4  ;;  %s505_s16 = int_to_ptr.hbm [resolvable:$true] %s504_s16 }
  0x15   : > { %v613_v4 = vld [vmem:[%s784_s3] ss:$0 sm:$0xff]  ;;  %429 = vmatpush.bf16.msra.mxu1 %v590_v30  ;;  %612 = vset.pattern.permute.xlu0 %v671_v54  ;;  %s502_s13 = sshll.u32 %s674_s12, 4  ;;  %vm494_vm11 = vcmask 0   ;;  %p595_p5 = scmp.eq.s32.totalorder %s726_s28, 1  ;;  %s503_s13 = int_to_ptr.vmem [resolvable:$true] %s502_s13 }
  0x16   : > { %v589_v31 = vld [vmem:[%s787_s6] sm:$0xff]  ;;  %v452_v62 = vand.u32 127, %v451_v61 }
  0x17   : > { %v614_v41 = vld [vmem:[%s785_s4] ss:$0 sm:$0xff] }
  0x18   : > { %345 = vmatpush.bf16.msra.mxu0 %v587_v2  ;;  %v615_v44 = vld [vmem:[%s786_s5] ss:$0 sm:$0xff] }
  0x19   : > { %430 = vmatpush.bf16.msra.mxu1 %v589_v31  ;;  %v616_v48 = vld [vmem:[%s788_s7] ss:$0 sm:$0xff] }
  0x1a   : > { %v436_v53 = vld [vmem:[%s738_s15] sm:$0xff] }
  0x1b   : > { %571 = vmatmul.msk.bf16.vlgmr.msra.gmra.mxu0 %vm334_vm1, %v313_v3  ;;  %454 = vperm.xlu2 %611, %v436_v53   ;;  %v672_v3 = vmov 0.0   ;;  %vm476_vm9 = vcmp.ne.s32.totalorder %v436_v53, 4294967196 }
  0x75   : > { %v455_v63 = vpop.permute.xlu2 %454 }
  0x76   : > { %vm456_vm7 = vcmp.eq.s32.totalorder %v452_v62, %v455_v63 }
  0x98   : > { %v347_v5 = vpop.f32.mrf.mxu0 }
  0x99   : > { %v348_v6 = vadd.f32 %v613_v4, %v347_v5  ;;  %v581_v4 = vsel %vm456_vm7, 1.0, %v672_v3 }
  0x9b   : > { %v352_v7 = vmul.f32 0.044715, %v348_v6  ;;  %v351_v14 = vmul.f32 0.5, %v348_v6 }
  0x9d   : > { %v353_v8 = vmul.f32 %v352_v7, %v348_v6 }
  0x9f   : > { %v354_v9 = vmul.f32 %v353_v8, %v348_v6 }
  0xa0   : > { %v349_v10 = vpop.f32.mrf.mxu0 }
  0xa1   : > { %v355_v11 = vadd.f32 %v354_v9, %v348_v6  ;;  %v673_v9 = vmov 64.0  }
  0xa3   : > { %v356_v12 = vmul.f32 0.7978846, %v355_v11 }
  0xa5   : > { %617 = vtanh.f32 %v356_v12 }
  0xa6   : > { %619 = vrcp.f32 %v670_v18 }
  0xab   : > { %v618_v13 = vpop.eup %617 }
  0xac   : > { %v358_v15 = vadd.f32 1.0, %v618_v13  ;;  %v620_v19 = vpop.eup %619 }
  0xad   : > { %v366_v20 = vmul.f32 32.0, %v620_v19  ;;  %vm370_vm2 = vweird.f32 %v620_v19 }
  0xae   : > { %v359_v16 = vmul.f32 %v358_v15, %v351_v14 }
  0xaf   : > { %v367_v21 = vsub.f32 1.0, %v366_v20 }
  0xb0   : > { %v362_v17 = vsel %vm334_vm1, %v359_v16, 0.0 }
  0xb1   : > { %363 = vadd.xlane.f32.xlu0 %v362_v17  ;;  %v368_v22 = vmul.f32 %v620_v19, %v367_v21 }
  0xb3   : > { %v369_v23 = vadd.f32 %v620_v19, %v368_v22 }
  0xb5   : > { %v371_v24 = vsel %vm370_vm2, %v620_v19, %v369_v23  ;;  %v582_v23 = vsel %vm476_vm9, 1.0, %v672_v3 }
 0x124   : > { %v364_v25 = vpop.xlane.xlu0 %363 }
 0x125   : > { %v372_v26 = vmul.f32 %v371_v24, %v364_v25 }
 0x127   : > { %v373_v27 = vsub.f32 %v359_v16, %v372_v26 }
 0x129   : > { %v374_v28 = vmul.f32 %v373_v27, %v373_v27 }
 0x12b   : > { %v375_v29 = vsel %vm334_vm1, %v374_v28, 0.0 }
 0x12c   : > { %376 = vadd.xlane.f32.xlu0 %v375_v29 }
 0x19f   : > { %v377_v32 = vpop.xlane.xlu0 %376 }
 0x1a0   : > { %v378_v33 = vmul.f32 %v377_v32, %v371_v24 }
 0x1a2   : > { %v379_v34 = vadd.f32 1e-12, %v378_v33  ;;  %v483_v33 = vld [vmem:[#allocation2] sm:$0x1] }
 0x1a4   : > { %621 = vrsqrt.f32 %v379_v34  ;;  %vm386_vm4 = vweird.f32 %v379_v34 }
 0x1aa   : > { %v622_v35 = vpop.eup %621 }
 0x1ab   : > { %v381_v36 = vmul.f32 %v622_v35, %v379_v34  ;;  %vm387_vm3 = vweird.f32 %v622_v35 }
 0x1ac   : > { %vm388_vm5 = vmor %vm386_vm4, %vm387_vm3 }
 0x1ad   : > { %v382_v37 = vmul.f32 %v622_v35, %v381_v36 }
 0x1af   : > { %v383_v38 = vmul.f32 0.5, %v382_v37 }
 0x1b1   : > { %v384_v39 = vsub.f32 1.5, %v383_v38 }
 0x1b3   : > { %v385_v40 = vmul.f32 %v622_v35, %v384_v39 }
 0x1b5   : > { %v389_v42 = vsel %vm388_vm5, %v622_v35, %v385_v40 }
 0x1b6   : > { %v390_v43 = vmul.f32 %v389_v42, %v373_v27 }
 0x1b8   : > { %v394_v45 = vmul.f32 %v614_v41, %v390_v43 }
 0x1ba   : > { %v398_v46 = vadd.f32 %v615_v44, %v394_v45 }
 0x1bc   : > { %v403_v47 = vpack.c.bf16 %v398_v46, %v398_v46 }
 0x1be   : > { %580 = vmatmul.msk.bf16.vlgmr.msra.gmra.mxu1 %vm334_vm1, %v403_v47 }
 0x23b   : > { %v432_v49 = vpop.f32.mrf.mxu1 }
 0x23c   : > { %v433_v50 = vadd.f32 %v616_v48, %v432_v49 }
 0x23e   : > { %v438_v51 = vsel %vm437_vm6, %v433_v50, -inf }
 0x23f   : > { %439 = vmax.xlane.f32.xlu1 %v438_v51 }
 0x243   : > { %v434_v52 = vpop.f32.mrf.mxu1 }
 0x2b2   : > { %v440_v55 = vpop.xlane.xlu1 %439 }
 0x2b3   : > { %v441_v56 = vsub.f32 %v433_v50, %v440_v55 }
 0x2b5   : > { %v442_v57 = vmul.f32 1.442695, %v441_v56 }
 0x2b7   : > { %623 = vpow2.f32 %v442_v57 }
 0x2bd   : > { %v624_v58 = vpop.eup %623 }
 0x2be   : > { %v444_v59 = vsel %vm437_vm6, %v624_v58, 0.0 }
 0x2bf   : > { %445 = vadd.xlane.f32.xlu1 %v444_v59 }
 0x332   : > { %v446_v60 = vpop.xlane.xlu1 %445 }
 0x333   : > { %625 = vlog2.f32 %v446_v60 }
 0x334   : > { %627 = vrcp.f32 %v673_v9 }
 0x339   : > { %v626_v0 = vpop.eup %625 }
 0x33a   : > { %v448_v1 = vmul.f32 0.6931472, %v626_v0  ;;  %v628_v10 = vpop.eup %627 }
 0x33b   : > { %v468_v11 = vmul.f32 64.0, %v628_v10  ;;  %vm472_vm8 = vweird.f32 %v628_v10 }
 0x33c   : > { %v449_v2 = vadd.f32 %v448_v1, %v440_v55 }
 0x33d   : > { %v469_v12 = vsub.f32 1.0, %v468_v11 }
 0x33e   : > { %v450_v5 = vsub.f32 %v433_v50, %v449_v2 }
 0x33f   : > { %v470_v13 = vmul.f32 %v628_v10, %v469_v12 }
 0x340   : > { %v464_v6 = vsel %vm437_vm6, %v450_v5, 0.0  ;;  %v459_v7 = vmul.f32 %v581_v4, %v450_v5 }
 0x341   : > { %465 = vadd.xlane.f32.xlu2 %v464_v6  ;;  %v471_v14 = vadd.f32 %v628_v10, %v470_v13 }
 0x342   : > { %v460_v8 = vsel %vm437_vm6, %v459_v7, 0.0 }
 0x343   : > { %461 = vadd.xlane.f32.xlu0 %v460_v8  ;;  %v473_v15 = vsel %vm472_vm8, %v628_v10, %v471_v14 }
 0x3b4   : > { %v466_v16 = vpop.xlane.xlu2 %465 }
 0x3b5   : > { %v474_v17 = vmul.f32 %v473_v15, %v466_v16 }
 0x3b6   : > { %v462_v18 = vpop.xlane.xlu0 %461 }
 0x3b7   : > { %v475_v19 = vsub.f32 0.0, %v474_v17  ;;  %v463_v20 = vsub.f32 0.0, %v462_v18 }
 0x3b9   : > { %v480_v21 = vmul.f32 0.1, %v475_v19  ;;  %v479_v22 = vmul.f32 0.9, %v463_v20 }
 0x3bb   : > { %v481_v24 = vadd.f32 %v480_v21, %v479_v22 }
 0x3bd   : > { %v482_v25 = vmul.f32 %v582_v23, %v481_v24 }
 0x3bf   : > { %v485_v26 = vsel %vm484_vm10, %v482_v25, 0.0 }
 0x3c0   : > { %v486_v27 = vrot.slane %v485_v26, 4 }
 0x3c2   : > { %v487_v28 = vadd.f32 %v486_v27, %v485_v26 }
 0x3c4   : > { %v488_v29 = vrot.slane %v487_v28, 2 }
 0x3c6   : > { %v489_v30 = vadd.f32 %v488_v29, %v487_v28 }
 0x3c8   : > { %v490_v31 = vrot.slane %v489_v30, 1 }
 0x3ca   : > { %v491_v32 = vadd.f32 %v490_v31, %v489_v30 }
 0x3cc   : > { %v492_v34 = vmul.f32 0.5, %v491_v32 }
 0x3ce   : > { %v493_v35 = vadd.f32 %v492_v34, %v483_v33 }
 0x3d0   : > { %495 = vst.msk [vmem:[#allocation2] sm:$0x1] %vm494_vm11, %v493_v35 }
 0x3d1   : > { %592 = dma.vmem_to_hbm [thread:$0]  (%p595_p5), %s503_s13, 16, %s505_s16, [#allocation3]  }
 0x3d2   : > { %662 = dma.done.wait (%p595_p5), [#allocation3], 16  }
 0x3d3   : > { %664 = vsyncadd (%p595_p5), [#allocation3], 4294967280 }
 0x3d4 PF: > { %s19_s27 = sadd.s32 1, %s667_s27  }
 0x3d5   : > { %p16_p6 = scmp.ge.s32.totalorder %s19_s27, 4  }
 0x3d7   :  { %18 = sbr.rel (!%p16_p6) target bundleno = 1 (0x1), region = 86 }
 0x3dc   :  { %518 = vsyncpa [#allocation3], 1 }
 0x3dd   :  { %520 = vsyncpa [#allocation3 + $0x1], 1 }

// kernel: blip_comet_forward.8
= control target key start
LH: loop header
LB: loop body
LE: loop exit
PB: predicated region body
PF: predicated region fallthrough
CT: control target
= control target key end

     0   :  { %s3240_s6 = smov 1   ;;  %s3241_s10 = smov 2   ;;  %s3735_s0 = inlined_call_operand.smem [shape: u32[33], index: -1, kind: input, shape index: {}] }
   0x1   :  { %s3285_s5 = sld [smem:[%s3735_s0]]   ;;  %s3242_s14 = smov 3  }
   0x2   :  { %s3290_s9 = sld [smem:[%s3735_s0 + %s3240_s6]]   ;;  %s3243_s18 = smov 4  }
   0x3   :  { %s3295_s13 = sld [smem:[%s3735_s0 + %s3241_s10]]   ;;  %s3244_s22 = smov 5  }
   0x4   :  { %s3300_s17 = sld [smem:[%s3735_s0 + %s3242_s14]]   ;;  %s3245_s26 = smov 6  }
   0x5   :  { %s3305_s21 = sld [smem:[%s3735_s0 + %s3243_s18]]   ;;  %s3246_s30 = smov 7  }
   0x6   :  { %s3310_s25 = sld [smem:[%s3735_s0 + %s3244_s22]]   ;;  %s3247_s4 = smov 8  }
   0x7   :  { %s3315_s29 = sld [smem:[%s3735_s0 + %s3245_s26]]   ;;  %s3248_s10 = smov 9  }
   0x8   :  { %s3320_s3 = sld [smem:[%s3735_s0 + %s3246_s30]]   ;;  %s3249_s15 = smov 10  }
   0x9   :  { %3743 = sst [smem:[#allocation3_spill]] %s3295_s13  ;;  %s3250_s20 = smov 11  }
   0xa   :  { %3744 = sst [smem:[#allocation4_spill]] %s3300_s17  ;;  %s3251_s26 = smov 12  }
   0xb   :  { %s3325_s8 = sld [smem:[%s3735_s0 + %s3247_s4]]   ;;  %s3252_s1 = smov 13  }
   0xc   :  { %s3330_s14 = sld [smem:[%s3735_s0 + %s3248_s10]]   ;;  %s3253_s7 = smov 14  }
   0xd   :  { %s3335_s19 = sld [smem:[%s3735_s0 + %s3249_s15]]   ;;  %s3254_s15 = smov 15  }
   0xe   :  { %s3340_s24 = sld [smem:[%s3735_s0 + %s3250_s20]]   ;;  %s3255_s22 = smov 16  }
   0xf   :  { %s3345_s30 = sld [smem:[%s3735_s0 + %s3251_s26]]   ;;  %s3256_s28 = smov 17  }
  0x10   :  { %s3350_s6 = sld [smem:[%s3735_s0 + %s3252_s1]]  }
  0x11   :  { %s3355_s12 = sld [smem:[%s3735_s0 + %s3253_s7]]   ;;  %s3257_s7 = smov 18  }
  0x12   :  { %s3360_s20 = sld [smem:[%s3735_s0 + %s3254_s15]]   ;;  %s3258_s15 = smov 19  }
  0x13   :  { %s3365_s27 = sld [smem:[%s3735_s0 + %s3255_s22]]   ;;  %s3259_s22 = smov 20  }
  0x14   :  { %s3370_s4 = sld [smem:[%s3735_s0 + %s3256_s28]]   ;;  %s3260_s28 = smov 21  }
  0x15   :  { %s3375_s17 = sld [smem:[%s3735_s0 + %s3257_s7]]   ;;  %s3261_s7 = smov 22  }
  0x17   :  { %3745 = sst [smem:[#allocation5_spill]] %s3355_s12 }
  0x18   :  { %3746 = sst [smem:[#allocation6_spill]] %s3360_s20 }
  0x19   :  { %3747 = sst [smem:[#allocation7_spill]] %s3365_s27 }
  0x1a   :  { %3748 = sst [smem:[#allocation8_spill]] %s3370_s4 }
  0x1b   :  { %s3380_s20 = sld [smem:[%s3735_s0 + %s3258_s15]]   ;;  %s3262_s15 = smov 23  }
  0x1c   :  { %s3385_s12 = sld [smem:[%s3735_s0 + %s3259_s22]]   ;;  %s3263_s22 = smov 24  }
  0x1d   :  { %s3390_s4 = sld [smem:[%s3735_s0 + %s3260_s28]]   ;;  %s3264_s28 = smov 25  }
  0x1e   :  { %s3395_s27 = sld [smem:[%s3735_s0 + %s3261_s7]]   ;;  %s3265_s7 = smov 26  }
  0x1f   :  { %s3405_s13 = sld [smem:[%s3735_s0 + %s3263_s22]]   ;;  %s3267_s22 = smov 28  }
  0x21   :  { %3749 = sst [smem:[#allocation9_spill]] %s3380_s20 }
  0x22   :  { %s3400_s20 = sld [smem:[%s3735_s0 + %s3262_s15]]   ;;  %s3266_s15 = smov 27  }
  0x23   :  { %3750 = sst [smem:[#allocation10_spill]] %s3390_s4 }
  0x24   :  { %3751 = sst [smem:[#allocation11_spill]] %s3395_s27 }
  0x25   :  { %3753 = sst [smem:[#allocation13_spill]] %s3405_s13 }
  0x26   :  { %s3410_s4 = sld [smem:[%s3735_s0 + %s3264_s28]]   ;;  %s3268_s28 = smov 29  }
  0x27   :  { %s3415_s27 = sld [smem:[%s3735_s0 + %s3265_s7]]   ;;  %s3269_s7 = smov 30  }
  0x28   :  { %3752 = sst [smem:[#allocation12_spill]] %s3400_s20 }
  0x29   :  { %s3420_s20 = sld [smem:[%s3735_s0 + %s3266_s15]]   ;;  %s3270_s15 = smov 31  }
  0x2a   :  { %s3425_s13 = sld [smem:[%s3735_s0 + %s3267_s22]]   ;;  %s3271_s22 = smov 32  }
  0x2c   :  { %3754 = sst [smem:[#allocation14_spill]] %s3410_s4 }
  0x2d   :  { %3755 = sst [smem:[#allocation15_spill]] %s3415_s27 }
  0x2e   :  { %s3430_s4 = sld [smem:[%s3735_s0 + %s3268_s28]]   ;;  %s3447_s28 = smov 0  }
  0x2f   :  { %3756 = sst [smem:[#allocation16_spill]] %s3420_s20 }
  0x30   :  { %3757 = sst [smem:[#allocation17_spill]] %s3425_s13 }
  0x31   :  { %s3435_s27 = sld [smem:[%s3735_s0 + %s3269_s7]]  }
  0x32   :  { %s3440_s20 = sld [smem:[%s3735_s0 + %s3270_s15]]  }
  0x33   :  { %s3445_s13 = sld [smem:[%s3735_s0 + %s3271_s22]]  }
  0x34 LB: > { %s2763_s1 = sadd.s32 4294967295, %s3238_s28   ;;  %p2767_p0 = scmp.ge.s32.totalorder %s3238_s28, 1  ;;  %s3238_s28 = sphi %s3447_s28, %s75_s28  }
  0x35   : > { %p919_p1 = scmp.lt.s32.totalorder %s3238_s28, 3 }
  0x37   : > { %p920_p2 = pnand %p2767_p0, %p919_p1 }
  0x38   : > { %p1009_p3 = scmp.lt.s32.totalorder (!%p920_p2), %s2763_s1, 1  ;;  %s3274_s10 = smov (!%p920_p2), 8  }
  0x39   : > { %923 = sbr.rel (%p920_p2) target bundleno = 5662 (0x161e), region = 148  ;;  %s3275_s11 = smov (!%p920_p2), 16  }
  0x3a   : > { %s3276_s15 = smov (!%p920_p2), 24   ;;  %s3758_s16 = sld [smem:[#allocation3_spill]] (!%p920_p2) }
  0x3b   : > { %s3759_s22 = sld [smem:[#allocation7_spill]] (!%p920_p2) }
  0x3c   : > { %s3760_s23 = sld [smem:[#allocation10_spill]] (!%p920_p2) }
  0x3d   : > { %s3761_s26 = sld [smem:[#allocation9_spill]] (!%p920_p2) }
  0x3e   : > { %s3774_s1 = smov (!%p1009_p3, %s2763_s1), 1  ;;  %vm1032_vm0 = vcmask 261120   ;;  %v3272_v3 = vmov 32.0   ;;  %v3050_v15 = vld [vmem:[%s3315_s29 + $0x8] sm:$0xff]  ;;  %v3049_v18 = vld [vmem:[%s3315_s29] sm:$0xff]  ;;  %v3052_v22 = vld [vmem:[%s3315_s29 + $0x18] sm:$0xff] }
  0x3f   : > { %s3458_s0 = sshll.u32 %s3774_s1, 2  ;;  %3188 = vrcp.f32 %v3272_v3  ;;  %v3058_v16 = vld [vmem:[%s3325_s8 + $0x8] sm:$0xff]  ;;  %1177 = vmatpush.bf16.msra.mxu0 %v3050_v15  ;;  %v3057_v19 = vld [vmem:[%s3325_s8] sm:$0xff]  ;;  %v3060_v23 = vld [vmem:[%s3325_s8 + $0x18] sm:$0xff]  ;;  %vm1242_vm5 = vcmask 64512   ;;  %vm1280_vm6 = vcmask 1043456   ;;  %s1015_s7 = scalar_lea.vmem %s3290_s9, %s3774_s1 }
  0x40   : > { %s1012_s2 = scalar_lea.vmem %s3285_s5, %s3458_s0  ;;  %v3066_v17 = vld [vmem:[%s3335_s19 + $0x8] sm:$0xff]  ;;  %1205 = vmatpush.bf16.msra.mxu1 %v3058_v16  ;;  %v3065_v20 = vld [vmem:[%s3335_s19] sm:$0xff]  ;;  %v3051_v25 = vld [vmem:[%s3315_s29 + $0x10] sm:$0xff]  ;;  %vm1441_vm8 = vcmask 130112   ;;  %vm1586_vm9 = vcmask 195712   ;;  %vm1731_vm10 = vcmask 261312   ;;  %s1019_s18 = scalar_lea.vmem %s3758_s16, %s3458_s0 }
  0x41   : > { %v1028_v0 = vld [vmem:[%s1012_s2] sm:$0xf]  ;;  %1233 = vmatpush.bf16.msra.mxu2 %v3066_v17  ;;  %v3059_v26 = vld [vmem:[%s3325_s8 + $0x10] sm:$0xff]  ;;  %v3054_v41 = vld [vmem:[%s3315_s29 + $0x28] sm:$0xff]  ;;  %s3762_s2 = sld [smem:[#allocation5_spill]] }
  0x42   : > { %v1029_v1 = vunpack.c.l.bf16 %v1028_v0  ;;  %v3152_v34 = vld [vmem:[%s3305_s21] ss:$0 sm:$0xff]  ;;  %v3068_v49 = vld [vmem:[%s3335_s19 + $0x18] sm:$0xff]  ;;  %v3067_v54 = vld [vmem:[%s3335_s19 + $0x10] sm:$0xff]  ;;  %s3764_s16 = sld [smem:[#allocation8_spill]] }
  0x43   : > { %1178 = vmatpush.bf16.msra.mxu0 %v3049_v18  ;;  %v3153_v36 = vld [vmem:[%s3310_s25] ss:$0 sm:$0xff]  ;;  %v3062_v59 = vld [vmem:[%s3325_s8 + $0x28] sm:$0xff] }
  0x44   : > { %v1033_v2 = vsel %vm1032_vm0, %v1029_v1, 0.0  ;;  %1206 = vmatpush.bf16.msra.mxu1 %v3057_v19  ;;  %v3053_v42 = vld [vmem:[%s3315_s29 + $0x20] sm:$0xff] }
  0x45   : > { %1034 = vadd.xlane.f32.xlu0 %v1033_v2  ;;  %v3189_v4 = vpop.eup %3188  ;;  %1234 = vmatpush.bf16.msra.mxu2 %v3065_v20  ;;  %v3155_v43 = vld [vmem:[%s3330_s14] ss:$0 sm:$0xff]  ;;  %v3273_v20 = vmov -10000.0  }
  0x46   : > { %v1037_v5 = vmul.f32 32.0, %v3189_v4  ;;  %vm1041_vm1 = vweird.f32 %v3189_v4  ;;  %v3154_v47 = vld [vmem:[%s3320_s3] ss:$0 sm:$0xff] }
  0x47   : > { %v3156_v50 = vld [vmem:[%s3340_s24] ss:$0 sm:$0xff] }
  0x48   : > { %v1038_v6 = vsub.f32 1.0, %v1037_v5  ;;  %1319 = vmatpush.bf16.msrb.mxu1 %v3052_v22  ;;  %v3061_v62 = vld [vmem:[%s3325_s8 + $0x20] sm:$0xff] }
  0x49   : > { %1347 = vmatpush.bf16.msrb.mxu2 %v3060_v23 }
  0x4a   : > { %v1039_v7 = vmul.f32 %v3189_v4, %v1038_v6  ;;  %v3056_v6 = vld [vmem:[%s3315_s29 + $0x38] sm:$0xff] }
  0x4c   : > { %v1040_v8 = vadd.f32 %v3189_v4, %v1039_v7  ;;  %1320 = vmatpush.bf16.msrb.mxu1 %v3051_v25 }
  0x4d   : > { %1348 = vmatpush.bf16.msrb.mxu2 %v3059_v26 }
  0x4e   : > { %v3463_v9 = vsel %vm1041_vm1, %v3189_v4, %v1040_v8  ;;  %v3055_v8 = vld [vmem:[%s3315_s29 + $0x30] sm:$0xff] }
  0xb8   : > { %v1035_v10 = vpop.xlane.xlu0 %1034 }
  0xb9   : > { %v1043_v11 = vmul.f32 %v3463_v9, %v1035_v10 }
  0xbb   : > { %v1044_v12 = vsub.f32 %v1029_v1, %v1043_v11  ;;  %v3158_v1 = vld [vmem:[%s3330_s14 + $0x1] ss:$0 sm:$0xff] }
  0xbd   : > { %v1045_v13 = vmul.f32 %v1044_v12, %v1044_v12 }
  0xbf   : > { %v1046_v14 = vsel %vm1032_vm0, %v1045_v13, 0.0  ;;  %v1070_v13 = vld [vmem:[%s1015_s7] sm:$0x1]  ;;  %s3763_s7 = sld [smem:[#allocation6_spill]] }
  0xc0   : > { %1047 = vadd.xlane.f32.xlu0 %v1046_v14  ;;  %v1073_v14 = vlaneseq  ;;  %v1071_v15 = vsub.f32 1.0, %v1070_v13 }
  0xc2   : > { %v1074_v16 = vshrl.u32 %v1073_v14, 7  ;;  %v1076_v17 = vand.u32 127, %v1073_v14  ;;  %v1072_v18 = vmul.f32 -10000.0, %v1071_v15 }
  0xc4   : > { %vm1077_vm7 = vcmp.le.s32.totalorder %v1076_v17, %v1074_v16  ;;  %v1080_v19 = vperm.slane %v1072_v18, 0 }
 0x133   : > { %v1048_v21 = vpop.xlane.xlu0 %1047 }
 0x134   : > { %v1049_v24 = vmul.f32 %v1048_v21, %v3463_v9  ;;  %v1078_v21 = vsel %vm1077_vm7, 0.0, %v3273_v20 }
 0x135   : > { %v3526_v22 = vadd.f32 %v1080_v19, %v1078_v21 }
 0x136   : > { %v1050_v27 = vadd.f32 1e-12, %v1049_v24 }
 0x138   : > { %3190 = vrsqrt.f32 %v1050_v27  ;;  %vm1057_vm3 = vweird.f32 %v1050_v27 }
 0x13e   : > { %v3191_v28 = vpop.eup %3190 }
 0x13f   : > { %v1052_v29 = vmul.f32 %v3191_v28, %v1050_v27  ;;  %vm1058_vm2 = vweird.f32 %v3191_v28 }
 0x140   : > { %vm1059_vm4 = vmor %vm1057_vm3, %vm1058_vm2  ;;  %vm2595_vm2 = vcmask 523264  }
 0x141   : > { %v1053_v30 = vmul.f32 %v3191_v28, %v1052_v29 }
 0x143   : > { %v1054_v31 = vmul.f32 0.5, %v1053_v30 }
 0x145   : > { %v1055_v32 = vsub.f32 1.5, %v1054_v31 }
 0x147   : > { %v1056_v33 = vmul.f32 %v3191_v28, %v1055_v32 }
 0x149   : > { %v1060_v35 = vsel %vm1059_vm4, %v3191_v28, %v1056_v33  ;;  %v3160_v28 = vld [vmem:[%s3340_s24 + $0x1] ss:$0 sm:$0xff] }
 0x14a   : > { %v1061_v37 = vmul.f32 %v1060_v35, %v1044_v12 }
 0x14c   : > { %v1065_v38 = vmul.f32 %v3152_v34, %v1061_v37  ;;  %v3161_v34 = vld [vmem:[%s3330_s14 + $0x2] ss:$0 sm:$0xff] }
 0x14e   : > { %v3480_v39 = vadd.f32 %v3153_v36, %v1065_v38 }
 0x150   : > { %v3484_v40 = vpack.c.bf16 %v3480_v39, %v3480_v39 }
 0x152   : > { %2779 = vmatmul.msk.bf16.vlgmr.msra.gmra.mxu0 %vm1032_vm0, %v3484_v40  ;;  %2788 = vmatmul.msk.bf16.vlgmr.msra.gmra.mxu1 %vm1032_vm0, %v3484_v40 }
 0x153   : > { %2797 = vmatmul.msk.bf16.vlgmr.msra.gmra.mxu2 %vm1032_vm0, %v3484_v40 }
 0x154   : > { %1464 = vmatpush.bf16.msra.mxu2 %v3054_v41 }
 0x158   : > { %1465 = vmatpush.bf16.msra.mxu2 %v3053_v42 }
 0x162   : > { %2808 = vmatmul.msk.bf16.vlgmr.msrb.gmra.mxu1 %vm1032_vm0, %v3484_v40 }
 0x163   : > { %2817 = vmatmul.msk.bf16.vlgmr.msrb.gmra.mxu2 %vm1032_vm0, %v3484_v40 }
 0x173   : > { %2837 = vmatmul.msk.bf16.vlgmr.msra.gmra.mxu2 %vm1032_vm0, %v3484_v40 }
 0x1cf   : > { %v1180_v44 = vpop.f32.mrf.mxu0  ;;  %v1208_v45 = vpop.f32.mrf.mxu1 }
 0x1d0   : > { %v1209_v46 = vadd.f32 %v3155_v43, %v1208_v45  ;;  %v1181_v52 = vadd.f32 %v3154_v47, %v1180_v44 }
 0x1d2   : > { %v1241_v48 = vpack.c.bf16 %v1209_v46, %v1209_v46  ;;  %v1240_v60 = vpack.c.bf16 %v1181_v52, %v1181_v52  ;;  %v3070_v52 = vld [vmem:[%s3335_s19 + $0x28] sm:$0xff] }
 0x1d4   : > { %v1247_v51 = vsel %vm1242_vm5, %v1241_v48, 0 }
 0x1d5   : > { %1256 = vmatpush.bf16.xpose.msra.mxu3 %v1247_v51 }
 0x1d6   : > { %v1236_v53 = vpop.f32.mrf.mxu2 }
 0x1d7   : > { %v1237_v55 = vadd.f32 %v3156_v50, %v1236_v53  ;;  %v1182_v56 = vpop.f32.mrf.mxu0  ;;  %v1210_v57 = vpop.f32.mrf.mxu1 }
 0x1d8   : > { %v3064_v57 = vld [vmem:[%s3325_s8 + $0x38] sm:$0xff] }
 0x1d9   : > { %v1276_v58 = vpack.c.bf16 %v1237_v55, %v1237_v55  ;;  %v3157_v55 = vld [vmem:[%s3320_s3 + $0x1] ss:$0 sm:$0xff] }
 0x1db   : > { %v1282_v61 = vsel %vm1280_vm6, %v1276_v58, 0 }
 0x1dc   : > { %1291 = vmatpush.bf16.msrb.mxu0 %v1282_v61  ;;  %2798 = vmatmul.msk.bf16.vlgmr.msra.gmra.mxu3 %vm1242_vm5, %v1240_v60 }
 0x1dd   : > { %1375 = vmatpush.bf16.msrb.mxu3 %v3068_v49 }
 0x1de   : > { %v1238_v63 = vpop.f32.mrf.mxu2 }
 0x1df   : > { %v3510_v0 = vpop.f32.mrf.mxu1 }
 0x1e0   : > { %v1323_v56 = vadd.f32 %v3157_v55, %v3510_v0  ;;  %v3162_v55 = vld [vmem:[%s3320_s3 + $0x3] ss:$0 sm:$0xff] }
 0x1e1   : > { %1376 = vmatpush.bf16.msrb.mxu3 %v3067_v54  ;;  %v3069_v54 = vld [vmem:[%s3335_s19 + $0x20] sm:$0xff] }
 0x1e2   : > { %v1382_v58 = vpack.c.bf16 %v1323_v56, %v1323_v56 }
 0x1e5   : > { %1492 = vmatpush.bf16.msra.mxu3 %v3062_v59  ;;  %v3063_v59 = vld [vmem:[%s3325_s8 + $0x30] sm:$0xff] }
 0x1e6   : > { %v1350_v2 = vpop.f32.mrf.mxu2 }
 0x1e7   : > { %v1351_v3 = vadd.f32 %v3158_v1, %v1350_v2  ;;  %v1324_v4 = vpop.f32.mrf.mxu1 }
 0x1e9   : > { %1493 = vmatpush.bf16.msra.mxu3 %v3061_v62  ;;  %v1383_v5 = vpack.c.bf16 %v1351_v3, %v1351_v3  ;;  %v3163_v3 = vld [vmem:[%s3340_s24 + $0x2] ss:$0 sm:$0xff] }
 0x1eb   : > { %v1388_v7 = vsel %vm1242_vm5, %v1383_v5, 0 }
 0x1ec   : > { %1397 = vmatpush.bf16.xpose.msra.mxu0 %v1388_v7  ;;  %2826 = vmatmul.msk.bf16.vlgmr.msrb.gmra.mxu3 %vm1032_vm0, %v3484_v40 }
 0x1ed   : > { %1609 = vmatpush.bf16.msrb.mxu3 %v3056_v6 }
 0x1ee   : > { %v1352_v10 = vpop.f32.mrf.mxu2 }
 0x1ef   : > { %v3164_v10 = vld [vmem:[%s3330_s14 + $0x3] ss:$0 sm:$0xff] }
 0x1f1   : > { %1610 = vmatpush.bf16.msrb.mxu3 %v3055_v8 }
 0x1f6   : > { %v3518_v11 = vpop.f32.mrf.mxu2 }
 0x1fc   : > { %2846 = vmatmul.msk.bf16.vlgmr.msra.gmra.mxu3 %vm1032_vm0, %v3484_v40 }
 0x1fe   : > { %v1469_v12 = vpop.f32.mrf.mxu2 }
 0x20c   : > { %2866 = vmatmul.msk.bf16.vlgmr.msrb.gmra.mxu3 %vm1032_vm0, %v3484_v40 }
 0x25f   : > { %v1258_v23 = vpop.f32.mrf.mxu3 }
 0x260   : > { %v1262_v24 = vmul.f32 0.35355338, %v1258_v23 }
 0x262   : > { %v1263_v25 = vadd.f32 %v1262_v24, %v3526_v22 }
 0x264   : > { %v1264_v26 = vsel %vm1242_vm5, %v1263_v25, -inf }
 0x265   : > { %1265 = vmax.xlane.f32.xlu1 %v1264_v26  ;;  %v3072_v26 = vld [vmem:[%s3335_s19 + $0x38] sm:$0xff] }
 0x267   : > { %v1260_v27 = vpop.f32.mrf.mxu3 }
 0x26f   : > { %v1378_v29 = vpop.f32.mrf.mxu3 }
 0x270   : > { %v1379_v30 = vadd.f32 %v3160_v28, %v1378_v29  ;;  %v3071_v28 = vld [vmem:[%s3335_s19 + $0x30] sm:$0xff]  ;;  %v3159_v29 = vld [vmem:[%s3320_s3 + $0x2] ss:$0 sm:$0xff] }
 0x272   : > { %v1417_v31 = vpack.c.bf16 %v1379_v30, %v1379_v30  ;;  %v1468_v30 = vadd.f32 %v3159_v29, %v3518_v11  ;;  %v3083_v29 = vld [vmem:[%s3375_s17] sm:$0xff] }
 0x274   : > { %v1422_v32 = vsel %vm1280_vm6, %v1417_v31, 0  ;;  %v1527_v31 = vpack.c.bf16 %v1468_v30, %v1468_v30  ;;  %v3596_v30 = vld [vmem:[%s1019_s18] sm:$0xf]  ;;  %s3765_s18 = sld [smem:[#allocation4_spill]] }
 0x275   : > { %1431 = vmatpush.bf16.msra.mxu1 %v1422_v32 }
 0x277   : > { %v1380_v33 = vpop.f32.mrf.mxu3 }
 0x27f   : > { %v1495_v35 = vpop.f32.mrf.mxu3 }
 0x280   : > { %v1496_v36 = vadd.f32 %v3161_v34, %v1495_v35 }
 0x282   : > { %v1528_v37 = vpack.c.bf16 %v1496_v36, %v1496_v36 }
 0x284   : > { %v1533_v38 = vsel %vm1242_vm5, %v1528_v37, 0 }
 0x285   : > { %1542 = vmatpush.bf16.xpose.msrb.mxu1 %v1533_v38 }
 0x287   : > { %v1497_v41 = vpop.f32.mrf.mxu3 }
 0x288   : > { %v3165_v41 = vld [vmem:[%s3340_s24 + $0x3] ss:$0 sm:$0xff] }
 0x28f   : > { %v3534_v42 = vpop.f32.mrf.mxu3 }
 0x290   : > { %v1613_v56 = vadd.f32 %v3162_v55, %v3534_v42 }
 0x297   : > { %v1614_v43 = vpop.f32.mrf.mxu3 }
 0x2d8   : > { %v1266_v44 = vpop.xlane.xlu1 %1265 }
 0x2d9   : > { %v1267_v45 = vsub.f32 %v1263_v25, %v1266_v44 }
 0x2db   : > { %v1268_v46 = vmul.f32 1.442695, %v1267_v45 }
 0x2dd   : > { %3192 = vpow2.f32 %v1268_v46 }
 0x2e3   : > { %v3193_v47 = vpop.eup %3192 }
 0x2e4   : > { %v1270_v48 = vsel %vm1242_vm5, %v3193_v47, 0.0 }
 0x2e5   : > { %1271 = vadd.xlane.f32.xlu1 %v1270_v48 }
 0x358   : > { %v1272_v49 = vpop.xlane.xlu1 %1271 }
 0x359   : > { %3194 = vrcp.f32 %v1272_v49 }
 0x35f   : > { %v3195_v50 = vpop.eup %3194 }
 0x360   : > { %v1274_v51 = vmul.f32 %v3195_v50, %v3193_v47 }
 0x362   : > { %v1275_v53 = vpack.c.bf16 %v1274_v51, %v1274_v51 }
 0x364   : > { %2799 = vmatmul.msk.bf16.vlgmr.msrb.gmra.mxu0 %vm1242_vm5, %v1275_v53 }
 0x365   : > { %1520 = vmatpush.bf16.msrb.mxu0 %v3070_v52 }
 0x369   : > { %1521 = vmatpush.bf16.msrb.mxu0 %v3069_v54 }
 0x374   : > { %2827 = vmatmul.msk.bf16.vlgmr.msra.gmra.mxu0 %vm1242_vm5, %v1382_v58  ;;  %v1672_v58 = vpack.c.bf16 %v1613_v56, %v1613_v56 }
 0x375   : > { %1637 = vmatpush.bf16.msra.mxu0 %v3064_v57 }
 0x379   : > { %1638 = vmatpush.bf16.msra.mxu0 %v3063_v59 }
 0x384   : > { %2855 = vmatmul.msk.bf16.vlgmr.msrb.gmra.mxu0 %vm1032_vm0, %v3484_v40 }
 0x394   : > { %2875 = vmatmul.msk.bf16.vlgmr.msra.gmra.mxu0 %vm1032_vm0, %v3484_v40 }
 0x3e1   : > { %v1293_v60 = vpop.f32.mrf.mxu0 }
 0x3e2   : > { %1297 = vst.msk [vmem:[#allocation2] sm:$0xff] %vm1242_vm5, %v1293_v60 }
 0x3e9   : > { %v1295_v61 = vpop.f32.mrf.mxu0 }
 0x3f1   : > { %v1399_v62 = vpop.f32.mrf.mxu0 }
 0x3f2   : > { %v1403_v63 = vmul.f32 0.35355338, %v1399_v62 }
 0x3f4   : > { %v1404_v0 = vadd.f32 %v1403_v63, %v3526_v22 }
 0x3f6   : > { %v1405_v1 = vsel %vm1242_vm5, %v1404_v0, -inf }
 0x3f7   : > { %1406 = vmax.xlane.f32.xlu2 %v1405_v1 }
 0x3f9   : > { %v1401_v2 = vpop.f32.mrf.mxu0 }
 0x401   : > { %v1523_v4 = vpop.f32.mrf.mxu0 }
 0x402   : > { %v1524_v5 = vadd.f32 %v3163_v3, %v1523_v4 }
 0x404   : > { %v1562_v6 = vpack.c.bf16 %v1524_v5, %v1524_v5 }
 0x406   : > { %v1567_v7 = vsel %vm1280_vm6, %v1562_v6, 0 }
 0x407   : > { %1576 = vmatpush.bf16.msrb.mxu2 %v1567_v7 }
 0x409   : > { %v1525_v8 = vpop.f32.mrf.mxu0 }
 0x411   : > { %v1640_v12 = vpop.f32.mrf.mxu0 }
 0x412   : > { %v1641_v13 = vadd.f32 %v3164_v10, %v1640_v12  ;;  %v3074_v12 = vld [vmem:[%s3345_s30 + $0x8] sm:$0xff] }
 0x413   : > { %1759 = vmatpush.bf16.msrb.mxu0 %v3074_v12 }
 0x414   : > { %v1673_v14 = vpack.c.bf16 %v1641_v13, %v1641_v13 }
 0x416   : > { %v1678_v15 = vsel %vm1242_vm5, %v1673_v14, 0 }
 0x417   : > { %1687 = vmatpush.bf16.xpose.msra.mxu2 %v1678_v15  ;;  %v3073_v15 = vld [vmem:[%s3345_s30] sm:$0xff] }
 0x418   : > { %1760 = vmatpush.bf16.msrb.mxu0 %v3073_v15  ;;  %v3093_v15 = vld [vmem:[%s3385_s12 + $0x10] sm:$0xff] }
 0x419   : > { %v1642_v16 = vpop.f32.mrf.mxu0 }
 0x46a   : > { %v1407_v17 = vpop.xlane.xlu2 %1406 }
 0x46b   : > { %v1408_v18 = vsub.f32 %v1404_v0, %v1407_v17 }
 0x46d   : > { %v1409_v19 = vmul.f32 1.442695, %v1408_v18 }
 0x46f   : > { %3196 = vpow2.f32 %v1409_v19  ;;  %v3166_v19 = vld [vmem:[%s3350_s6] ss:$0 sm:$0xff] }
 0x475   : > { %v3197_v20 = vpop.eup %3196 }
 0x476   : > { %v1411_v21 = vsel %vm1242_vm5, %v3197_v20, 0.0 }
 0x477   : > { %1412 = vadd.xlane.f32.xlu2 %v1411_v21 }
 0x4ea   : > { %v1413_v23 = vpop.xlane.xlu2 %1412 }
 0x4eb   : > { %3198 = vrcp.f32 %v1413_v23 }
 0x4f1   : > { %v3199_v24 = vpop.eup %3198 }
 0x4f2   : > { %v1415_v25 = vmul.f32 %v3199_v24, %v3197_v20 }
 0x4f4   : > { %v1416_v27 = vpack.c.bf16 %v1415_v25, %v1415_v25 }
 0x4f6   : > { %2828 = vmatmul.msk.bf16.vlgmr.msra.gmra.mxu1 %vm1242_vm5, %v1416_v27  ;;  %v3084_v27 = vld [vmem:[%s3375_s17 + $0x8] sm:$0xff] }
 0x4f7   : > { %1665 = vmatpush.bf16.msra.mxu1 %v3072_v26  ;;  %v3092_v26 = vld [vmem:[%s3385_s12 + $0x8] sm:$0xff] }
 0x4fb   : > { %1666 = vmatpush.bf16.msra.mxu1 %v3071_v28  ;;  %v3091_v28 = vld [vmem:[%s3385_s12] sm:$0xff] }
 0x506   : > { %2856 = vmatmul.msk.bf16.vlgmr.msrb.gmra.mxu1 %vm1242_vm5, %v1527_v31 }
 0x516   : > { %2884 = vmatmul.msk.bf16.vlgmr.msra.gmra.mxu1 %vm1032_vm0, %v3484_v40 }
 0x573   : > { %v1433_v32 = vpop.f32.mrf.mxu1 }
 0x57b   : > { %v1435_v33 = vpop.f32.mrf.mxu1 }
 0x583   : > { %v1544_v34 = vpop.f32.mrf.mxu1 }
 0x584   : > { %v1548_v35 = vmul.f32 0.35355338, %v1544_v34 }
 0x586   : > { %v1549_v36 = vadd.f32 %v1548_v35, %v3526_v22  ;;  %v3086_v35 = vld [vmem:[%s3375_s17 + $0x18] sm:$0xff] }
 0x588   : > { %v1550_v37 = vsel %vm1242_vm5, %v1549_v36, -inf }
 0x589   : > { %1551 = vmax.xlane.f32.xlu0 %v1550_v37  ;;  %v3076_v37 = vld [vmem:[%s3759_s22 + $0x8] sm:$0xff] }
 0x58a   : > { %1889 = vmatpush.bf16.msrb.mxu1 %v3076_v37 }
 0x58b   : > { %v1546_v38 = vpop.f32.mrf.mxu1 }
 0x58c   : > { %v3078_v38 = vld [vmem:[%s3759_s22 + $0x18] sm:$0xff] }
 0x593   : > { %v1668_v43 = vpop.f32.mrf.mxu1 }
 0x594   : > { %v1669_v44 = vadd.f32 %v3165_v41, %v1668_v43  ;;  %v3080_v41 = vld [vmem:[%s3759_s22 + $0x28] sm:$0xff]  ;;  %v3075_v43 = vld [vmem:[%s3759_s22] sm:$0xff] }
 0x595   : > { %1890 = vmatpush.bf16.msrb.mxu1 %v3075_v43 }
 0x596   : > { %v1707_v11 = vpack.c.bf16 %v1669_v44, %v1669_v44  ;;  %v3077_v44 = vld [vmem:[%s3759_s22 + $0x10] sm:$0xff] }
 0x598   : > { %v1712_v45 = vsel %vm1280_vm6, %v1707_v11, 0  ;;  %v3079_v11 = vld [vmem:[%s3759_s22 + $0x20] sm:$0xff] }
 0x599   : > { %1721 = vmatpush.bf16.msra.mxu3 %v1712_v45 }
 0x59b   : > { %v1670_v46 = vpop.f32.mrf.mxu1 }
 0x59c   : > { %v3169_v46 = vld [vmem:[%s3760_s23] ss:$0 sm:$0xff] }
 0x59d   : > { %1948 = vmatpush.bf16.msrb.mxu3 %v3092_v26 }
 0x5a1   : > { %1949 = vmatpush.bf16.msrb.mxu3 %v3091_v28  ;;  %v3082_v28 = vld [vmem:[%s3759_s22 + $0x38] sm:$0xff] }
 0x5fc   : > { %v1552_v40 = vpop.xlane.xlu0 %1551 }
 0x5fd   : > { %v1553_v47 = vsub.f32 %v1549_v36, %v1552_v40  ;;  %v3085_v36 = vld [vmem:[%s3375_s17 + $0x10] sm:$0xff] }
 0x5ff   : > { %v1554_v48 = vmul.f32 1.442695, %v1553_v47  ;;  %v3170_v47 = vld [vmem:[%s3761_s26] ss:$0 sm:$0xff] }
 0x601   : > { %3200 = vpow2.f32 %v1554_v48 }
 0x607   : > { %v3201_v49 = vpop.eup %3200 }
 0x608   : > { %v1556_v50 = vsel %vm1242_vm5, %v3201_v49, 0.0 }
 0x609   : > { %1557 = vadd.xlane.f32.xlu1 %v1556_v50 }
 0x622   : > { %1438 = vrot.lane.b32.xlu1 %v1433_v32, %s3274_s10 }
 0x67c   : > { %v1558_v51 = vpop.xlane.xlu1 %1557 }
 0x67d   : > { %3202 = vrcp.f32 %v1558_v51 }
 0x683   : > { %v3203_v52 = vpop.eup %3202 }
 0x684   : > { %v1560_v53 = vmul.f32 %v3203_v52, %v3201_v49 }
 0x686   : > { %v1561_v54 = vpack.c.bf16 %v1560_v53, %v1560_v53 }
 0x688   : > { %2857 = vmatmul.msk.bf16.vlgmr.msrb.gmra.mxu2 %vm1242_vm5, %v1561_v54 }
 0x689   : > { %1920 = vmatpush.bf16.msrb.mxu2 %v3084_v27 }
 0x68d   : > { %1921 = vmatpush.bf16.msrb.mxu2 %v3083_v29  ;;  %v3081_v29 = vld [vmem:[%s3759_s22 + $0x30] sm:$0xff] }
 0x694   : > { %v1439_v57 = vpop.permute.xlu1 %1438 }
 0x695   : > { %1442 = vst.msk [vmem:[#allocation2] sm:$0xff] %vm1441_vm8, %v1439_v57 }
 0x698   : > { %2885 = vmatmul.msk.bf16.vlgmr.msra.gmra.mxu2 %vm1242_vm5, %v1672_v58 }
 0x699   : > { %2035 = vmatpush.bf16.msra.mxu2 %v3078_v38 }
 0x69d   : > { %2036 = vmatpush.bf16.msra.mxu2 %v3077_v44 }
 0x6a8   : > { %2913 = vmatmul.msk.bf16.vlgmr.msrb.gmra.mxu2 %vm1032_vm0, %v3596_v30 }
 0x70b   : > { %v1578_v59 = vpop.f32.mrf.mxu2 }
 0x713   : > { %v1580_v60 = vpop.f32.mrf.mxu2 }
 0x71b   : > { %v1689_v61 = vpop.f32.mrf.mxu2 }
 0x71c   : > { %v1693_v62 = vmul.f32 0.35355338, %v1689_v61 }
 0x71e   : > { %v1694_v63 = vadd.f32 %v1693_v62, %v3526_v22 }
 0x720   : > { %v1695_v0 = vsel %vm1242_vm5, %v1694_v63, -inf }
 0x721   : > { %1696 = vmax.xlane.f32.xlu2 %v1695_v0 }
 0x723   : > { %v1691_v1 = vpop.f32.mrf.mxu2 }
 0x724   : > { %v3167_v1 = vld [vmem:[%s3762_s2] ss:$0 sm:$0xff]  ;;  %s1022_s2 = scalar_lea.vmem %s3765_s18, %s3774_s1  ;;  %s3766_s1 = sld [smem:[#allocation11_spill]] }
 0x725   : > { %s3771_s18 = sld [smem:[#allocation17_spill]] }
 0x72b   : > { %v1923_v49 = vpop.f32.mrf.mxu2 }
 0x72c   : > { %v1924_v51 = vadd.f32 %v3170_v47, %v1923_v49 }
 0x72e   : > { %v1956_v54 = vpack.c.bf16 %v1924_v51, %v1924_v51 }
 0x730   : > { %v1961_v56 = vsel %vm1242_vm5, %v1956_v54, 0 }
 0x731   : > { %1970 = vmatpush.bf16.xpose.msra.mxu0 %v1961_v56 }
 0x733   : > { %v1925_v58 = vpop.f32.mrf.mxu2 }
 0x739   : > { %1583 = vrot.lane.b32.xlu2 %v1578_v59, %s3275_s11 }
 0x794   : > { %v1697_v42 = vpop.xlane.xlu2 %1696 }
 0x795   : > { %v1698_v2 = vsub.f32 %v1694_v63, %v1697_v42 }
 0x797   : > { %v1699_v3 = vmul.f32 1.442695, %v1698_v2  ;;  %v3168_v2 = vld [vmem:[%s3763_s7] ss:$0 sm:$0xff]  ;;  %s3770_s7 = sld [smem:[#allocation14_spill]] }
 0x799   : > { %3204 = vpow2.f32 %v1699_v3 }
 0x79c   : > { %v1584_v4 = vpop.permute.xlu2 %1583 }
 0x79d   : > { %1587 = vst.msk [vmem:[#allocation2] sm:$0xff] %vm1586_vm9, %v1584_v4 }
 0x79f   : > { %v3205_v5 = vpop.eup %3204 }
 0x7a0   : > { %v1701_v22 = vsel %vm1242_vm5, %v3205_v5, 0.0 }
 0x7a1   : > { %1702 = vadd.xlane.f32.xlu0 %v1701_v22 }
 0x814   : > { %v1703_v6 = vpop.xlane.xlu0 %1702 }
 0x815   : > { %3206 = vrcp.f32 %v1703_v6  ;;  %v3171_v6 = vld [vmem:[%s3761_s26 + $0x1] ss:$0 sm:$0xff] }
 0x81b   : > { %v3207_v7 = vpop.eup %3206 }
 0x81c   : > { %v1705_v8 = vmul.f32 %v3207_v7, %v3205_v5 }
 0x81e   : > { %v1706_v10 = vpack.c.bf16 %v1705_v8, %v1705_v8 }
 0x820   : > { %2886 = vmatmul.msk.bf16.vlgmr.msra.gmra.mxu3 %vm1242_vm5, %v1706_v10 }
 0x821   : > { %2063 = vmatpush.bf16.msra.mxu3 %v3086_v35 }
 0x825   : > { %2064 = vmatpush.bf16.msra.mxu3 %v3085_v36 }
 0x830   : > { %2922 = vmatmul.msk.bf16.vlgmr.msrb.gmra.mxu3 %vm1032_vm0, %v3596_v30 }
 0x831   : > { %2179 = vmatpush.bf16.msrb.mxu3 %v3080_v41  ;;  %v3175_v41 = vld [vmem:[%s3760_s23 + $0x1] ss:$0 sm:$0xff] }
 0x835   : > { %2180 = vmatpush.bf16.msrb.mxu3 %v3079_v11 }
 0x840   : > { %2942 = vmatmul.msk.bf16.vlgmr.msra.gmra.mxu3 %vm1032_vm0, %v3596_v30 }
 0x8a3   : > { %v1723_v13 = vpop.f32.mrf.mxu3 }
 0x8a4   : > { %1728 = vrot.lane.b32.xlu0 %v1723_v13, %s3276_s15 }
 0x8ab   : > { %v1725_v14 = vpop.f32.mrf.mxu3 }
 0x8ac   : > { %v3094_v14 = vld [vmem:[%s3385_s12 + $0x18] sm:$0xff] }
 0x8b3   : > { %v1951_v40 = vpop.f32.mrf.mxu3 }
 0x8b4   : > { %v1952_v50 = vadd.f32 %v3169_v46, %v1951_v40  ;;  %v3176_v40 = vld [vmem:[%s3761_s26 + $0x2] ss:$0 sm:$0xff] }
 0x8b6   : > { %v1993_v53 = vpack.c.bf16 %v1952_v50, %v1952_v50 }
 0x8b8   : > { %v1998_v55 = vsel %vm1280_vm6, %v1993_v53, 0 }
 0x8b9   : > { %2007 = vmatpush.bf16.msra.mxu1 %v1998_v55 }
 0x8bb   : > { %v1953_v57 = vpop.f32.mrf.mxu3 }
 0x8c3   : > { %v2066_v7 = vpop.f32.mrf.mxu3 }
 0x8c4   : > { %v2067_v8 = vadd.f32 %v3171_v6, %v2066_v7 }
 0x8c6   : > { %v2099_v10 = vpack.c.bf16 %v2067_v8, %v2067_v8 }
 0x8c8   : > { %v2104_v12 = vsel %vm1242_vm5, %v2099_v10, 0 }
 0x8cb   : > { %v2068_v13 = vpop.f32.mrf.mxu3 }
 0x916   : > { %v1729_v16 = vpop.permute.xlu0 %1728 }
 0x917   : > { %1732 = vst.msk [vmem:[#allocation2] sm:$0xff] %vm1731_vm10, %v1729_v16  ;;  %v3172_v16 = vld [vmem:[%s3764_s16] ss:$0 sm:$0xff] }
 0x91e   : > { %v1733_v17 = vld [vmem:[#allocation2] sm:$0xff] }
 0x91f   : > { %v1734_v18 = vpack.c.bf16 %v1733_v17, %v1733_v17 }
 0x921   : > { %2895 = vmatmul.msk.bf16.vlgmr.msrb.gmra.mxu0 %vm1032_vm0, %v1734_v18 }
 0x922   : > { %2091 = vmatpush.bf16.msrb.mxu0 %v3094_v14 }
 0x926   : > { %2092 = vmatpush.bf16.msrb.mxu0 %v3093_v15 }
 0x99e   : > { %v1762_v20 = vpop.f32.mrf.mxu0 }
 0x99f   : > { %v1763_v21 = vadd.f32 %v3166_v19, %v1762_v20  ;;  %v3088_v19 = vld [vmem:[%s3375_s17 + $0x28] sm:$0xff] }
 0x9a1   : > { %v1766_v23 = vadd.f32 %v1763_v21, %v3480_v39 }
 0x9a3   : > { %v1769_v24 = vsel %vm1032_vm0, %v1766_v23, 0.0 }
 0x9a4   : > { %1770 = vadd.xlane.f32.xlu2 %v1769_v24 }
 0x9a6   : > { %v1764_v25 = vpop.f32.mrf.mxu0 }
 0xa17   : > { %v1771_v39 = vpop.xlane.xlu2 %1770 }
 0xa18   : > { %v1772_v31 = vmul.f32 %v1771_v39, %v3463_v9  ;;  %v1083_v39 = vld [vmem:[%s1022_s2] sm:$0x1]  ;;  %s3772_s2 = sld [smem:[#allocation16_spill]] }
 0xa1a   : > { %v1773_v32 = vsub.f32 %v1766_v23, %v1772_v31  ;;  %v3087_v23 = vld [vmem:[%s3375_s17 + $0x20] sm:$0xff]  ;;  %v1084_v31 = vsub.f32 1.0, %v1083_v39 }
 0xa1c   : > { %v1774_v33 = vmul.f32 %v1773_v32, %v1773_v32 }
 0xa1e   : > { %v1775_v34 = vsel %vm1032_vm0, %v1774_v33, 0.0 }
 0xa1f   : > { %1776 = vadd.xlane.f32.xlu1 %v1775_v34 }
 0xa92   : > { %v1777_v45 = vpop.xlane.xlu1 %1776 }
 0xa93   : > { %v1778_v48 = vmul.f32 %v1777_v45, %v3463_v9 }
 0xa95   : > { %v1779_v52 = vadd.f32 1e-12, %v1778_v48 }
 0xa97   : > { %3208 = vrsqrt.f32 %v1779_v52  ;;  %vm1786_vm12 = vweird.f32 %v1779_v52 }
 0xa9d   : > { %v3209_v59 = vpop.eup %3208 }
 0xa9e   : > { %v1781_v60 = vmul.f32 %v3209_v59, %v1779_v52  ;;  %vm1787_vm11 = vweird.f32 %v3209_v59 }
 0xa9f   : > { %vm1788_vm13 = vmor %vm1786_vm12, %vm1787_vm11 }
 0xaa0   : > { %v1782_v61 = vmul.f32 %v3209_v59, %v1781_v60 }
 0xaa2   : > { %v1783_v62 = vmul.f32 0.5, %v1782_v61 }
 0xaa4   : > { %v1784_v63 = vsub.f32 1.5, %v1783_v62 }
 0xaa6   : > { %v1785_v0 = vmul.f32 %v3209_v59, %v1784_v63  ;;  %v3173_v63 = vld [vmem:[%s3764_s16 + $0x1] ss:$0 sm:$0xff] }
 0xaa8   : > { %v1789_v42 = vsel %vm1788_vm13, %v3209_v59, %v1785_v0 }
 0xaa9   : > { %v1790_v3 = vmul.f32 %v1789_v42, %v1773_v32  ;;  %v1085_v32 = vmul.f32 -10000.0, %v1084_v31 }
 0xaab   : > { %v1794_v4 = vmul.f32 %v3167_v1, %v1790_v3  ;;  %v3647_v33 = vperm.slane %v1085_v32, 0 }
 0xaad   : > { %v3621_v5 = vadd.f32 %v3168_v2, %v1794_v4 }
 0xaaf   : > { %v1864_v22 = vpack.c.bf16 %v3621_v5, %v3621_v5 }
 0xab1   : > { %2904 = vmatmul.msk.bf16.vlgmr.msrb.gmra.mxu1 %vm1032_vm0, %v1864_v22  ;;  %2933 = vmatmul.msk.bf16.vlgmr.msra.gmra.mxu2 %vm1032_vm0, %v1864_v22 }
 0xab2   : > { %2962 = vmatmul.msk.bf16.vlgmr.msrb.gmra.mxu3 %vm1032_vm0, %v1864_v22  ;;  %2113 = vmatpush.bf16.xpose.msrb.mxu1 %v2104_v12 }
 0xb2e   : > { %v1892_v17 = vpop.f32.mrf.mxu1 }
 0xb2f   : > { %v1893_v18 = vadd.f32 %v3172_v16, %v1892_v17 }
 0xb31   : > { %v1955_v20 = vpack.c.bf16 %v1893_v18, %v1893_v18 }
 0xb33   : > { %2923 = vmatmul.msk.bf16.vlgmr.msra.gmra.mxu0 %vm1242_vm5, %v1955_v20 }
 0xb34   : > { %v2038_v21 = vpop.f32.mrf.mxu2  ;;  %2207 = vmatpush.bf16.msra.mxu0 %v3088_v19  ;;  %v3174_v19 = vld [vmem:[%s3764_s16 + $0x2] ss:$0 sm:$0xff] }
 0xb35   : > { %v3636_v24 = vpop.f32.mrf.mxu3  ;;  %v2039_v0 = vadd.f32 %v3173_v63, %v2038_v21 }
 0xb36   : > { %v1894_v25 = vpop.f32.mrf.mxu1  ;;  %v2183_v20 = vadd.f32 %v3174_v19, %v3636_v24 }
 0xb37   : > { %v2098_v1 = vpack.c.bf16 %v2039_v0, %v2039_v0  ;;  %v3095_v25 = vld [vmem:[%s3385_s12 + $0x20] sm:$0xff]  ;;  %v3098_v0 = vld [vmem:[%s3385_s12 + $0x38] sm:$0xff] }
 0xb38   : > { %2208 = vmatpush.bf16.msra.mxu0 %v3087_v23  ;;  %v2242_v21 = vpack.c.bf16 %v2183_v20, %v2183_v20  ;;  %v3096_v23 = vld [vmem:[%s3385_s12 + $0x28] sm:$0xff] }
 0xb3c   : > { %v2040_v26 = vpop.f32.mrf.mxu2 }
 0xb3d   : > { %v2184_v27 = vpop.f32.mrf.mxu3  ;;  %v3090_v26 = vld [vmem:[%s3375_s17 + $0x38] sm:$0xff] }
 0xb3e   : > { %v3089_v27 = vld [vmem:[%s3375_s17 + $0x30] sm:$0xff] }
 0xb43   : > { %2951 = vmatmul.msk.bf16.vlgmr.msrb.gmra.mxu0 %vm1032_vm0, %v3596_v30 }
 0xb44   : > { %2323 = vmatpush.bf16.msrb.mxu0 %v3082_v28 }
 0xb48   : > { %2324 = vmatpush.bf16.msrb.mxu0 %v3081_v29 }
 0xb53   : > { %2971 = vmatmul.msk.bf16.vlgmr.msra.gmra.mxu0 %vm1032_vm0, %v3596_v30 }
 0xb63   : > { %2991 = vmatmul.msk.bf16.vlgmr.msrb.gmra.mxu0 %vm1032_vm0, %v1864_v22 }
 0xbb0   : > { %v1972_v34 = vpop.f32.mrf.mxu0 }
 0xbb1   : > { %v1976_v35 = vmul.f32 0.35355338, %v1972_v34 }
 0xbb3   : > { %v1980_v36 = vadd.f32 %v3647_v33, %v1976_v35 }
 0xbb5   : > { %v1981_v37 = vsel %vm1242_vm5, %v1980_v36, -inf }
 0xbb6   : > { %1982 = vmax.xlane.f32.xlu0 %v1981_v37 }
 0xbb8   : > { %v1974_v38 = vpop.f32.mrf.mxu0 }
 0xbb9   : > { %v3178_v38 = vld [vmem:[%s3760_s23 + $0x2] ss:$0 sm:$0xff] }
 0xbc0   : > { %v2094_v43 = vpop.f32.mrf.mxu0 }
 0xbc1   : > { %v2095_v44 = vadd.f32 %v3175_v41, %v2094_v43 }
 0xbc3   : > { %v2133_v11 = vpack.c.bf16 %v2095_v44, %v2095_v44 }
 0xbc5   : > { %v2138_v45 = vsel %vm1280_vm6, %v2133_v11, 0 }
 0xbc6   : > { %2147 = vmatpush.bf16.msrb.mxu2 %v2138_v45 }
 0xbc8   : > { %v2096_v46 = vpop.f32.mrf.mxu0 }
 0xbd0   : > { %v2210_v47 = vpop.f32.mrf.mxu0 }
 0xbd1   : > { %v2211_v48 = vadd.f32 %v3176_v40, %v2210_v47  ;;  %v3179_v47 = vld [vmem:[%s3761_s26 + $0x3] ss:$0 sm:$0xff] }
 0xbd3   : > { %v2243_v49 = vpack.c.bf16 %v2211_v48, %v2211_v48 }
 0xbd5   : > { %v2248_v50 = vsel %vm1242_vm5, %v2243_v49, 0 }
 0xbd6   : > { %2257 = vmatpush.bf16.xpose.msra.mxu2 %v2248_v50 }
 0xbd8   : > { %v2212_v51 = vpop.f32.mrf.mxu0 }
 0xbe0   : > { %v3655_v52 = vpop.f32.mrf.mxu0 }
 0xbe8   : > { %v2328_v53 = vpop.f32.mrf.mxu0 }
 0xc29   : > { %v1983_v54 = vpop.xlane.xlu0 %1982 }
 0xc2a   : > { %v1984_v55 = vsub.f32 %v1980_v36, %v1983_v54 }
 0xc2c   : > { %v1985_v56 = vmul.f32 1.442695, %v1984_v55 }
 0xc2e   : > { %3210 = vpow2.f32 %v1985_v56 }
 0xc34   : > { %v3211_v57 = vpop.eup %3210 }
 0xc35   : > { %v1987_v58 = vsel %vm1242_vm5, %v3211_v57, 0.0 }
 0xc36   : > { %1988 = vadd.xlane.f32.xlu2 %v1987_v58  ;;  %v3177_v58 = vld [vmem:[%s3764_s16 + $0x3] ss:$0 sm:$0xff] }
 0xca9   : > { %v1989_v59 = vpop.xlane.xlu2 %1988 }
 0xcaa   : > { %3212 = vrcp.f32 %v1989_v59  ;;  %v2327_v59 = vadd.f32 %v3177_v58, %v3655_v52 }
 0xcb0   : > { %v3213_v60 = vpop.eup %3212 }
 0xcb1   : > { %v1991_v61 = vmul.f32 %v3213_v60, %v3211_v57 }
 0xcb3   : > { %v1992_v62 = vpack.c.bf16 %v1991_v61, %v1991_v61  ;;  %v2386_v61 = vpack.c.bf16 %v2327_v59, %v2327_v59 }
 0xcb5   : > { %2924 = vmatmul.msk.bf16.vlgmr.msra.gmra.mxu1 %vm1242_vm5, %v1992_v62 }
 0xcb6   : > { %2235 = vmatpush.bf16.msra.mxu1 %v3096_v23 }
 0xcba   : > { %2236 = vmatpush.bf16.msra.mxu1 %v3095_v25 }
 0xcc5   : > { %2952 = vmatmul.msk.bf16.vlgmr.msrb.gmra.mxu1 %vm1242_vm5, %v2098_v1  ;;  %v3097_v1 = vld [vmem:[%s3385_s12 + $0x30] sm:$0xff] }
 0xcc6   : > { %2351 = vmatpush.bf16.msrb.mxu1 %v3090_v26  ;;  %v3099_v26 = vld [vmem:[%s3766_s1] sm:$0xff] }
 0xcca   : > { %2352 = vmatpush.bf16.msrb.mxu1 %v3089_v27 }
 0xcd5   : > { %2980 = vmatmul.msk.bf16.vlgmr.msra.gmra.mxu1 %vm1032_vm0, %v3596_v30 }
 0xce5   : > { %3000 = vmatmul.msk.bf16.vlgmr.msrb.gmra.mxu1 %vm1032_vm0, %v3596_v30 }
 0xd32   : > { %v2009_v42 = vpop.f32.mrf.mxu1 }
 0xd33   : > { %2013 = vst.msk [vmem:[#allocation2] sm:$0xff] %vm1242_vm5, %v2009_v42 }
 0xd3a   : > { %v2011_v2 = vpop.f32.mrf.mxu1 }
 0xd42   : > { %v2115_v3 = vpop.f32.mrf.mxu1 }
 0xd43   : > { %v2119_v4 = vmul.f32 0.35355338, %v2115_v3 }
 0xd45   : > { %v2120_v22 = vadd.f32 %v2119_v4, %v3647_v33 }
 0xd47   : > { %v2121_v6 = vsel %vm1242_vm5, %v2120_v22, -inf }
 0xd48   : > { %2122 = vmax.xlane.f32.xlu1 %v2121_v6 }
 0xd4a   : > { %v2117_v7 = vpop.f32.mrf.mxu1 }
 0xd52   : > { %v2238_v41 = vpop.f32.mrf.mxu1 }
 0xd53   : > { %v2239_v43 = vadd.f32 %v3178_v38, %v2238_v41 }
 0xd55   : > { %v2277_v44 = vpack.c.bf16 %v2239_v43, %v2239_v43 }
 0xd57   : > { %v2282_v46 = vsel %vm1280_vm6, %v2277_v44, 0 }
 0xd58   : > { %2291 = vmatpush.bf16.msra.mxu3 %v2282_v46 }
 0xd5a   : > { %v2240_v40 = vpop.f32.mrf.mxu1 }
 0xd62   : > { %v2354_v48 = vpop.f32.mrf.mxu1 }
 0xd63   : > { %v2355_v49 = vadd.f32 %v3179_v47, %v2354_v48 }
 0xd65   : > { %v2387_v50 = vpack.c.bf16 %v2355_v49, %v2355_v49 }
 0xd67   : > { %v2392_v51 = vsel %vm1242_vm5, %v2387_v50, 0 }
 0xd68   : > { %2401 = vmatpush.bf16.xpose.msrb.mxu3 %v2392_v51 }
 0xd6a   : > { %v2356_v53 = vpop.f32.mrf.mxu1 }
 0xdbb   : > { %v2123_v8 = vpop.xlane.xlu1 %2122 }
 0xdbc   : > { %v2124_v10 = vsub.f32 %v2120_v22, %v2123_v8  ;;  %v3180_v8 = vld [vmem:[%s3760_s23 + $0x3] ss:$0 sm:$0xff] }
 0xdbe   : > { %v2125_v12 = vmul.f32 1.442695, %v2124_v10 }
 0xdc0   : > { %3214 = vpow2.f32 %v2125_v12 }
 0xdc6   : > { %v3215_v13 = vpop.eup %3214 }
 0xdc7   : > { %v2127_v14 = vsel %vm1242_vm5, %v3215_v13, 0.0 }
 0xdc8   : > { %2128 = vadd.xlane.f32.xlu0 %v2127_v14 }
 0xe3b   : > { %v2129_v15 = vpop.xlane.xlu0 %2128 }
 0xe3c   : > { %3216 = vrcp.f32 %v2129_v15 }
 0xe42   : > { %v3217_v16 = vpop.eup %3216 }
 0xe43   : > { %v2131_v17 = vmul.f32 %v3217_v16, %v3215_v13 }
 0xe45   : > { %v2132_v18 = vpack.c.bf16 %v2131_v17, %v2131_v17 }
 0xe47   : > { %2953 = vmatmul.msk.bf16.vlgmr.msrb.gmra.mxu2 %vm1242_vm5, %v2132_v18 }
 0xe48   : > { %2379 = vmatpush.bf16.msrb.mxu2 %v3098_v0  ;;  %v3184_v0 = vld [vmem:[%s3772_s2] ss:$0 sm:$0xff] }
 0xe4c   : > { %2380 = vmatpush.bf16.msrb.mxu2 %v3097_v1 }
 0xe57   : > { %2981 = vmatmul.msk.bf16.vlgmr.msra.gmra.mxu2 %vm1242_vm5, %v2242_v21  ;;  %v3100_v21 = vld [vmem:[%s3766_s1 + $0x8] sm:$0xff] }
 0xe58   : > { %2472 = vmatpush.bf16.msra.mxu1 %v3100_v21 }
 0xe5c   : > { %2473 = vmatpush.bf16.msra.mxu1 %v3099_v26 }
 0xe67   : > { %3009 = vmatmul.msk.bf16.vlgmr.msrb.gmra.mxu2 %vm1032_vm0, %v3596_v30 }
 0xeca   : > { %v2149_v28 = vpop.f32.mrf.mxu2 }
 0xed2   : > { %v2151_v29 = vpop.f32.mrf.mxu2 }
 0xeda   : > { %v2259_v39 = vpop.f32.mrf.mxu2 }
 0xedb   : > { %v2263_v31 = vmul.f32 0.35355338, %v2259_v39 }
 0xedd   : > { %v2264_v24 = vadd.f32 %v2263_v31, %v3647_v33 }
 0xedf   : > { %v2265_v32 = vsel %vm1242_vm5, %v2264_v24, -inf }
 0xee0   : > { %2266 = vmax.xlane.f32.xlu2 %v2265_v32 }
 0xee2   : > { %v2261_v34 = vpop.f32.mrf.mxu2 }
 0xf53   : > { %v2267_v35 = vpop.xlane.xlu2 %2266 }
 0xf54   : > { %v2268_v36 = vsub.f32 %v2264_v24, %v2267_v35 }
 0xf56   : > { %v2269_v37 = vmul.f32 1.442695, %v2268_v36 }
 0xf58   : > { %3218 = vpow2.f32 %v2269_v37 }
 0xf5e   : > { %v3219_v11 = vpop.eup %3218 }
 0xf5f   : > { %v2271_v45 = vsel %vm1242_vm5, %v3219_v11, 0.0 }
 0xf60   : > { %2272 = vadd.xlane.f32.xlu1 %v2271_v45 }
 0xf79   : > { %2154 = vrot.lane.b32.xlu1 %v2149_v28, %s3274_s10  ;;  %s3767_s10 = sld [smem:[#allocation12_spill]] }
 0xf7f   : > { %v3181_v39 = vld [vmem:[%s3767_s10] ss:$0 sm:$0xff]  ;;  %s1026_s10 = scalar_lea.vmem %s3445_s13, %s3458_s0 }
 0xfd3   : > { %v2273_v54 = vpop.xlane.xlu1 %2272 }
 0xfd4   : > { %3220 = vrcp.f32 %v2273_v54 }
 0xfda   : > { %v3221_v55 = vpop.eup %3220 }
 0xfdb   : > { %v2275_v56 = vmul.f32 %v3221_v55, %v3219_v11  ;;  %v3183_v55 = vld [vmem:[%s3770_s7] ss:$0 sm:$0xff] }
 0xfdd   : > { %v2276_v57 = vpack.c.bf16 %v2275_v56, %v2275_v56 }
 0xfdf   : > { %2982 = vmatmul.msk.bf16.vlgmr.msra.gmra.mxu3 %vm1242_vm5, %v2276_v57 }
 0xfeb   : > { %v2155_v60 = vpop.permute.xlu1 %2154 }
 0xfec   : > { %2157 = vst.msk [vmem:[#allocation2] sm:$0xff] %vm1441_vm8, %v2155_v60  ;;  %v3106_v60 = vld [vmem:[%s3771_s18 + $0x18] sm:$0xff] }
 0xfed   : > { %2603 = vmatpush.bf16.msra.mxu3 %v3106_v60 }
 0xfef   : > { %3010 = vmatmul.msk.bf16.vlgmr.msrb.gmra.mxu3 %vm1242_vm5, %v2386_v61  ;;  %v3105_v61 = vld [vmem:[%s3771_s18 + $0x10] sm:$0xff] }
 0xff1   : > { %2604 = vmatpush.bf16.msra.mxu3 %v3105_v61 }
0x1062   : > { %v2293_v62 = vpop.f32.mrf.mxu3 }
0x106a   : > { %v2295_v63 = vpop.f32.mrf.mxu3 }
0x106b   : > { %v3103_v63 = vld [vmem:[%s3771_s18] sm:$0xff] }
0x1072   : > { %v2403_v42 = vpop.f32.mrf.mxu3 }
0x1073   : > { %v2407_v2 = vmul.f32 0.35355338, %v2403_v42 }
0x1075   : > { %v2408_v3 = vadd.f32 %v2407_v2, %v3647_v33  ;;  %v2382_v33 = vpop.f32.mrf.mxu2 }
0x1076   : > { %v2383_v13 = vadd.f32 %v3180_v8, %v2382_v33 }
0x1077   : > { %v2409_v52 = vsel %vm1242_vm5, %v2408_v3, -inf }
0x1078   : > { %2410 = vmax.xlane.f32.xlu0 %v2409_v52  ;;  %v2421_v14 = vpack.c.bf16 %v2383_v13, %v2383_v13  ;;  %v3185_v13 = vld [vmem:[%s3430_s4] ss:$0 sm:$0xff] }
0x107a   : > { %v2405_v4 = vpop.f32.mrf.mxu3  ;;  %v2426_v30 = vsel %vm1280_vm6, %v2421_v14, 0 }
0x107b   : > { %2435 = vmatpush.bf16.msra.mxu0 %v2426_v30 }
0x107d   : > { %v2384_v16 = vpop.f32.mrf.mxu2 }
0x108c   : > { %2298 = vrot.lane.b32.xlu0 %v2293_v62, %s3275_s11  ;;  %s3768_s11 = sld [smem:[#allocation15_spill]]  ;;  %v3104_v62 = vld [vmem:[%s3771_s18 + $0x8] sm:$0xff] }
0x108d   : > { %2605 = vmatpush.bf16.msra.mxu3 %v3104_v62 }
0x1091   : > { %2606 = vmatpush.bf16.msra.mxu3 %v3103_v63 }
0x1092   : > { %v3102_v44 = vld [vmem:[%s3768_s11 + $0x8] sm:$0xff]  ;;  %v3101_v11 = vld [vmem:[%s3768_s11] sm:$0xff] }
0x1093   : > { %2542 = vmatpush.bf16.msra.mxu2 %v3102_v44 }
0x1097   : > { %2543 = vmatpush.bf16.msra.mxu2 %v3101_v11 }
0x10eb   : > { %v2411_v22 = vpop.xlane.xlu0 %2410 }
0x10ec   : > { %v2412_v6 = vsub.f32 %v2408_v3, %v2411_v22 }
0x10ee   : > { %v2413_v7 = vmul.f32 1.442695, %v2412_v6 }
0x10f0   : > { %3222 = vpow2.f32 %v2413_v7 }
0x10f6   : > { %v3223_v10 = vpop.eup %3222 }
0x10f7   : > { %v2415_v12 = vsel %vm1242_vm5, %v3223_v10, 0.0 }
0x10f8   : > { %2416 = vadd.xlane.f32.xlu2 %v2415_v12 }
0x10fe   : > { %v2299_v15 = vpop.permute.xlu0 %2298 }
0x10ff   : > { %2301 = vst.msk [vmem:[#allocation2] sm:$0xff] %vm1586_vm9, %v2299_v15 }
0x116b   : > { %v2417_v17 = vpop.xlane.xlu2 %2416 }
0x116c   : > { %3224 = vrcp.f32 %v2417_v17 }
0x1172   : > { %v3225_v18 = vpop.eup %3224 }
0x1173   : > { %v2419_v19 = vmul.f32 %v3225_v18, %v3223_v10 }
0x1175   : > { %v2420_v20 = vpack.c.bf16 %v2419_v19, %v2419_v19 }
0x1177   : > { %3011 = vmatmul.msk.bf16.vlgmr.msra.gmra.mxu0 %vm1242_vm5, %v2420_v20 }
0x11f4   : > { %v2437_v23 = vpop.f32.mrf.mxu0 }
0x11f5   : > { %2442 = vrot.lane.b32.xlu2 %v2437_v23, %s3276_s15  ;;  %s3769_s15 = sld [smem:[#allocation13_spill]] }
0x11fb   : > { %v3182_v53 = vld [vmem:[%s3769_s15] ss:$0 sm:$0xff] }
0x11fc   : > { %v2439_v25 = vpop.f32.mrf.mxu0 }
0x124f   : > { %v2443_v27 = vpop.permute.xlu2 %2442 }
0x1250   : > { %2445 = vst.msk [vmem:[#allocation2] sm:$0xff] %vm1731_vm10, %v2443_v27 }
0x1257   : > { %v2446_v28 = vld [vmem:[#allocation2] sm:$0xff] }
0x1258   : > { %v2447_v29 = vpack.c.bf16 %v2446_v28, %v2446_v28 }
0x125a   : > { %3020 = vmatmul.msk.bf16.vlgmr.msra.gmra.mxu1 %vm1032_vm0, %v2447_v29 }
0x12d7   : > { %v2475_v31 = vpop.f32.mrf.mxu1 }
0x12d8   : > { %v2476_v24 = vadd.f32 %v3181_v39, %v2475_v31 }
0x12da   : > { %v2479_v32 = vadd.f32 %v2476_v24, %v3621_v5 }
0x12dc   : > { %v2482_v34 = vsel %vm1032_vm0, %v2479_v32, 0.0 }
0x12dd   : > { %2483 = vadd.xlane.f32.xlu0 %v2482_v34  ;;  %v3186_v34 = vld [vmem:[%s3435_s27] ss:$0 sm:$0xff] }
0x12df   : > { %v2477_v35 = vpop.f32.mrf.mxu1 }
0x1350   : > { %v2484_v36 = vpop.xlane.xlu0 %2483 }
0x1351   : > { %v2485_v37 = vmul.f32 %v2484_v36, %v3463_v9  ;;  %v3187_v36 = vld [vmem:[%s3440_s20] ss:$0 sm:$0xff] }
0x1353   : > { %v2486_v38 = vsub.f32 %v2479_v32, %v2485_v37 }
0x1355   : > { %v2487_v41 = vmul.f32 %v2486_v38, %v2486_v38 }
0x1357   : > { %v2488_v43 = vsel %vm1032_vm0, %v2487_v41, 0.0 }
0x1358   : > { %2489 = vadd.xlane.f32.xlu1 %v2488_v43 }
0x13cb   : > { %v2490_v45 = vpop.xlane.xlu1 %2489 }
0x13cc   : > { %v2491_v5 = vmul.f32 %v2490_v45, %v3463_v9 }
0x13ce   : > { %v2492_v46 = vadd.f32 1e-12, %v2491_v5 }
0x13d0   : > { %3226 = vrsqrt.f32 %v2492_v46  ;;  %vm2499_vm15 = vweird.f32 %v2492_v46 }
0x13d6   : > { %v3227_v40 = vpop.eup %3226 }
0x13d7   : > { %v2494_v47 = vmul.f32 %v3227_v40, %v2492_v46  ;;  %vm2500_vm14 = vweird.f32 %v3227_v40 }
0x13d8   : > { %vm2501_vm1 = vmor %vm2499_vm15, %vm2500_vm14 }
0x13d9   : > { %v2495_v48 = vmul.f32 %v3227_v40, %v2494_v47 }
0x13db   : > { %v2496_v49 = vmul.f32 0.5, %v2495_v48 }
0x13dd   : > { %v2497_v50 = vsub.f32 1.5, %v2496_v49 }
0x13df   : > { %v2498_v51 = vmul.f32 %v3227_v40, %v2497_v50 }
0x13e1   : > { %v2502_v54 = vsel %vm2501_vm1, %v3227_v40, %v2498_v51 }
0x13e2   : > { %v2503_v56 = vmul.f32 %v2502_v54, %v2486_v38 }
0x13e4   : > { %v2507_v57 = vmul.f32 %v3182_v53, %v2503_v56 }
0x13e6   : > { %v2511_v58 = vadd.f32 %v3183_v55, %v2507_v57 }
0x13e8   : > { %v2516_v59 = vpack.c.bf16 %v2511_v58, %v2511_v58 }
0x13ea   : > { %3029 = vmatmul.msk.bf16.vlgmr.msra.gmra.mxu2 %vm1032_vm0, %v2516_v59 }
0x146d   : > { %v2545_v1 = vpop.f32.mrf.mxu2 }
0x146e   : > { %v2546_v42 = vadd.f32 %v3184_v0, %v2545_v1 }
0x1470   : > { %v2550_v2 = vmul.f32 0.044715, %v2546_v42  ;;  %v2549_v8 = vmul.f32 0.5, %v2546_v42 }
0x1472   : > { %v2551_v3 = vmul.f32 %v2550_v2, %v2546_v42 }
0x1474   : > { %v2552_v52 = vmul.f32 %v2551_v3, %v2546_v42 }
0x1475   : > { %v2547_v4 = vpop.f32.mrf.mxu2 }
0x1476   : > { %v2553_v22 = vadd.f32 %v2552_v52, %v2546_v42 }
0x1478   : > { %v2554_v6 = vmul.f32 0.7978846, %v2553_v22 }
0x147a   : > { %3228 = vtanh.f32 %v2554_v6 }
0x1480   : > { %v3229_v7 = vpop.eup %3228 }
0x1481   : > { %v2556_v10 = vadd.f32 1.0, %v3229_v7 }
0x1483   : > { %v2557_v12 = vmul.f32 %v2556_v10, %v2549_v8 }
0x1485   : > { %v2566_v33 = vpack.c.bf16 %v2557_v12, %v2557_v12 }
0x1487   : > { %3046 = vmatmul.msk.bf16.vlgmr.msra.gmra.mxu3 %vm2595_vm2, %v2566_v33 }
0x150a   : > { %v2608_v14 = vpop.f32.mrf.mxu3 }
0x150b   : > { %v2609_v30 = vadd.f32 %v3185_v13, %v2608_v14 }
0x150d   : > { %v2612_v15 = vadd.f32 %v2609_v30, %v2511_v58 }
0x150f   : > { %v2615_v16 = vsel %vm1032_vm0, %v2612_v15, 0.0 }
0x1510   : > { %2616 = vadd.xlane.f32.xlu2 %v2615_v16 }
0x1512   : > { %v2610_v17 = vpop.f32.mrf.mxu3 }
0x1583   : > { %v2617_v18 = vpop.xlane.xlu2 %2616 }
0x1584   : > { %v2618_v19 = vmul.f32 %v2617_v18, %v3463_v9 }
0x1586   : > { %v2619_v20 = vsub.f32 %v2612_v15, %v2618_v19 }
0x1588   : > { %v2620_v21 = vmul.f32 %v2619_v20, %v2619_v20 }
0x158a   : > { %v2621_v23 = vsel %vm1032_vm0, %v2620_v21, 0.0  ;;  %vm2646_vm0 = vcmask 257024  }
0x158b   : > { %2622 = vadd.xlane.f32.xlu0 %v2621_v23 }
0x15fe   : > { %v2623_v25 = vpop.xlane.xlu0 %2622 }
0x15ff   : > { %v2624_v26 = vmul.f32 %v2623_v25, %v3463_v9 }
0x1601   : > { %v2625_v27 = vadd.f32 1e-12, %v2624_v26 }
0x1603   : > { %3230 = vrsqrt.f32 %v2625_v27  ;;  %vm2632_vm4 = vweird.f32 %v2625_v27 }
0x1609   : > { %v3231_v28 = vpop.eup %3230 }
0x160a   : > { %v2627_v29 = vmul.f32 %v3231_v28, %v2625_v27  ;;  %vm2633_vm3 = vweird.f32 %v3231_v28 }
0x160b   : > { %vm2634_vm5 = vmor %vm2632_vm4, %vm2633_vm3 }
0x160c   : > { %v2628_v39 = vmul.f32 %v3231_v28, %v2627_v29 }
0x160e   : > { %v2629_v31 = vmul.f32 0.5, %v2628_v39 }
0x1610   : > { %v2630_v24 = vsub.f32 1.5, %v2629_v31 }
0x1612   : > { %v2631_v32 = vmul.f32 %v3231_v28, %v2630_v24 }
0x1614   : > { %v2635_v35 = vsel %vm2634_vm5, %v3231_v28, %v2631_v32 }
0x1615   : > { %v2636_v37 = vmul.f32 %v2635_v35, %v2619_v20 }
0x1617   : > { %v2640_v38 = vmul.f32 %v3186_v34, %v2636_v37 }
0x1619   : > { %v2644_v41 = vadd.f32 %v3187_v36, %v2640_v38 }
0x161b   : > { %v2645_v9 = vpack.c.bf16 %v2644_v41, %v2644_v41 }
0x161d   : > { %2647 = vst.msk [vmem:[%s1026_s10] sm:$0xf] %vm2646_vm0, %v2645_v9 }
0x161e PF: > { %s75_s28 = sadd.s32 1, %s3238_s28  }
0x161f   : > { %p72_p4 = scmp.ge.s32.totalorder %s75_s28, 4  }
0x1621   :  { %74 = sbr.rel (!%p72_p4) target bundleno = 52 (0x34), region = 219 }

// kernel: blip_comet_forward.7
= control target key start
LH: loop header
LB: loop body
LE: loop exit
PB: predicated region body
PF: predicated region fallthrough
CT: control target
= control target key end

     0   :  { %s3226_s6 = smov 1   ;;  %s3227_s10 = smov 2   ;;  %s3709_s0 = inlined_call_operand.smem [shape: u32[33], index: -1, kind: input, shape index: {}] }
   0x1   :  { %s3270_s5 = sld [smem:[%s3709_s0]]   ;;  %s3228_s14 = smov 4  }
   0x2   :  { %s3275_s9 = sld [smem:[%s3709_s0 + %s3226_s6]]   ;;  %s3229_s18 = smov 5  }
   0x3   :  { %s3280_s13 = sld [smem:[%s3709_s0 + %s3227_s10]]   ;;  %s3230_s22 = smov 6  }
   0x4   :  { %s3285_s17 = sld [smem:[%s3709_s0 + %s3228_s14]]   ;;  %s3231_s26 = smov 7  }
   0x5   :  { %s3290_s21 = sld [smem:[%s3709_s0 + %s3229_s18]]   ;;  %s3232_s30 = smov 8  }
   0x6   :  { %s3295_s25 = sld [smem:[%s3709_s0 + %s3230_s22]]   ;;  %s3233_s4 = smov 9  }
   0x7   :  { %s3300_s29 = sld [smem:[%s3709_s0 + %s3231_s26]]   ;;  %s3234_s10 = smov 10  }
   0x8   :  { %s3305_s3 = sld [smem:[%s3709_s0 + %s3232_s30]]   ;;  %s3235_s15 = smov 11  }
   0x9   :  { %3717 = sst [smem:[#allocation3_spill]] %s3280_s13  ;;  %s3236_s20 = smov 12  }
   0xa   :  { %s3310_s8 = sld [smem:[%s3709_s0 + %s3233_s4]]   ;;  %s3237_s26 = smov 13  }
   0xb   :  { %s3315_s14 = sld [smem:[%s3709_s0 + %s3234_s10]]   ;;  %s3238_s1 = smov 14  }
   0xc   :  { %s3320_s19 = sld [smem:[%s3709_s0 + %s3235_s15]]   ;;  %s3239_s7 = smov 15  }
   0xd   :  { %s3325_s24 = sld [smem:[%s3709_s0 + %s3236_s20]]   ;;  %s3240_s15 = smov 16  }
   0xe   :  { %s3330_s30 = sld [smem:[%s3709_s0 + %s3237_s26]]   ;;  %s3241_s22 = smov 17  }
   0xf   :  { %s3335_s6 = sld [smem:[%s3709_s0 + %s3238_s1]]   ;;  %s3242_s28 = smov 18  }
  0x10   :  { %s3340_s12 = sld [smem:[%s3709_s0 + %s3239_s7]]   ;;  %s3243_s7 = smov 19  }
  0x11   :  { %s3345_s20 = sld [smem:[%s3709_s0 + %s3240_s15]]   ;;  %s3244_s15 = smov 20  }
  0x12   :  { %s3350_s27 = sld [smem:[%s3709_s0 + %s3241_s22]]   ;;  %s3245_s22 = smov 21  }
  0x13   :  { %s3355_s4 = sld [smem:[%s3709_s0 + %s3242_s28]]   ;;  %s3246_s28 = smov 22  }
  0x15   :  { %3718 = sst [smem:[#allocation4_spill]] %s3335_s6 }
  0x16   :  { %3719 = sst [smem:[#allocation5_spill]] %s3340_s12 }
  0x17   :  { %3720 = sst [smem:[#allocation6_spill]] %s3345_s20 }
  0x18   :  { %3721 = sst [smem:[#allocation7_spill]] %s3350_s27 }
  0x19   :  { %s3360_s12 = sld [smem:[%s3709_s0 + %s3243_s7]]   ;;  %s3247_s7 = smov 23  }
  0x1a   :  { %s3365_s6 = sld [smem:[%s3709_s0 + %s3244_s15]]   ;;  %s3248_s15 = smov 24  }
  0x1b   :  { %s3370_s27 = sld [smem:[%s3709_s0 + %s3245_s22]]   ;;  %s3249_s22 = smov 25  }
  0x1c   :  { %s3375_s20 = sld [smem:[%s3709_s0 + %s3246_s28]]   ;;  %s3250_s28 = smov 26  }
  0x1d   :  { %s3385_s13 = sld [smem:[%s3709_s0 + %s3248_s15]]   ;;  %s3252_s15 = smov 28  }
  0x1f   :  { %3722 = sst [smem:[#allocation8_spill]] %s3360_s12 }
  0x20   :  { %s3380_s12 = sld [smem:[%s3709_s0 + %s3247_s7]]   ;;  %s3251_s7 = smov 27  }
  0x21   :  { %3723 = sst [smem:[#allocation9_spill]] %s3370_s27 }
  0x22   :  { %3724 = sst [smem:[#allocation10_spill]] %s3375_s20 }
  0x23   :  { %3726 = sst [smem:[#allocation12_spill]] %s3385_s13 }
  0x24   :  { %s3390_s27 = sld [smem:[%s3709_s0 + %s3249_s22]]   ;;  %s3253_s22 = smov 29  }
  0x25   :  { %s3395_s20 = sld [smem:[%s3709_s0 + %s3250_s28]]   ;;  %s3254_s28 = smov 30  }
  0x26   :  { %3725 = sst [smem:[#allocation11_spill]] %s3380_s12 }
  0x27   :  { %s3400_s12 = sld [smem:[%s3709_s0 + %s3251_s7]]   ;;  %s3255_s7 = smov 31  }
  0x28   :  { %s3405_s13 = sld [smem:[%s3709_s0 + %s3252_s15]]   ;;  %s3256_s15 = smov 32  }
  0x2a   :  { %3727 = sst [smem:[#allocation13_spill]] %s3390_s27 }
  0x2b   :  { %3728 = sst [smem:[#allocation14_spill]] %s3395_s20 }
  0x2c   :  { %s3410_s27 = sld [smem:[%s3709_s0 + %s3253_s22]]   ;;  %s3427_s22 = smov 0  }
  0x2d   :  { %3729 = sst [smem:[#allocation15_spill]] %s3400_s12 }
  0x2e   :  { %3730 = sst [smem:[#allocation16_spill]] %s3405_s13 }
  0x2f   :  { %s3415_s20 = sld [smem:[%s3709_s0 + %s3254_s28]]  }
  0x30   :  { %s3420_s12 = sld [smem:[%s3709_s0 + %s3255_s7]]  }
  0x31   :  { %s3425_s13 = sld [smem:[%s3709_s0 + %s3256_s15]]  }
  0x32 LB: > { %s2750_s23 = sadd.s32 4294967295, %s3224_s22   ;;  %p2754_p0 = scmp.ge.s32.totalorder %s3224_s22, 1  ;;  %s3224_s22 = sphi %s3427_s22, %s75_s22  }
  0x33   : > { %p919_p1 = scmp.lt.s32.totalorder %s3224_s22, 3 }
  0x35   : > { %p920_p2 = pnand %p2754_p0, %p919_p1 }
  0x36   : > { %p1009_p3 = scmp.lt.s32.totalorder (!%p920_p2), %s2750_s23, 1  ;;  %s3258_s1 = smov (!%p920_p2), 8  }
  0x37   : > { %923 = sbr.rel (%p920_p2) target bundleno = 5652 (0x1614), region = 148  ;;  %s3259_s2 = smov (!%p920_p2), 16  }
  0x38   : > { %s3260_s7 = smov (!%p920_p2), 24   ;;  %s3731_s10 = sld [smem:[#allocation3_spill]] (!%p920_p2) }
  0x39   : > { %s3732_s15 = sld [smem:[#allocation6_spill]] (!%p920_p2) }
  0x3a   : > { %s3733_s16 = sld [smem:[#allocation9_spill]] (!%p920_p2) }
  0x3b   : > { %s3734_s18 = sld [smem:[#allocation8_spill]] (!%p920_p2) }
  0x3c   : > { %s3746_s23 = smov (!%p1009_p3, %s2750_s23), 1  ;;  %vm1032_vm0 = vcmask 261120   ;;  %v3257_v3 = vmov 32.0   ;;  %v3037_v15 = vld [vmem:[%s3295_s25 + $0x8] sm:$0xff]  ;;  %v3036_v18 = vld [vmem:[%s3295_s25] sm:$0xff]  ;;  %v3039_v22 = vld [vmem:[%s3295_s25 + $0x18] sm:$0xff] }
  0x3d   : > { %s3438_s0 = sshll.u32 %s3746_s23, 2  ;;  %3174 = vrcp.f32 %v3257_v3  ;;  %v3045_v16 = vld [vmem:[%s3305_s3 + $0x8] sm:$0xff]  ;;  %1164 = vmatpush.bf16.msra.mxu0 %v3037_v15  ;;  %v3044_v19 = vld [vmem:[%s3305_s3] sm:$0xff]  ;;  %v3047_v23 = vld [vmem:[%s3305_s3 + $0x18] sm:$0xff]  ;;  %vm1229_vm5 = vcmask 64512   ;;  %vm1270_vm6 = vcmask 1043456   ;;  %s1015_s28 = scalar_lea.vmem %s3275_s9, %s3746_s23 }
  0x3e   : > { %s1012_s26 = scalar_lea.vmem %s3270_s5, %s3438_s0  ;;  %v3053_v17 = vld [vmem:[%s3315_s14 + $0x8] sm:$0xff]  ;;  %1192 = vmatpush.bf16.msra.mxu1 %v3045_v16  ;;  %v3052_v20 = vld [vmem:[%s3315_s14] sm:$0xff]  ;;  %v3038_v25 = vld [vmem:[%s3295_s25 + $0x10] sm:$0xff]  ;;  %vm1431_vm7 = vcmask 130112   ;;  %vm1576_vm8 = vcmask 195712   ;;  %vm1721_vm9 = vcmask 261312   ;;  %s1019_s11 = scalar_lea.vmem %s3731_s10, %s3438_s0 }
  0x3f   : > { %v1028_v0 = vld [vmem:[%s1012_s26] sm:$0xf]  ;;  %1220 = vmatpush.bf16.msra.mxu2 %v3053_v17  ;;  %v3046_v26 = vld [vmem:[%s3305_s3 + $0x10] sm:$0xff]  ;;  %v3041_v41 = vld [vmem:[%s3295_s25 + $0x28] sm:$0xff]  ;;  %vm1984_vm10 = vcmask 1041408   ;;  %vm1985_vm11 = vcmask 1042432  }
  0x40   : > { %v1029_v1 = vunpack.c.l.bf16 %v1028_v0  ;;  %v3138_v34 = vld [vmem:[%s3285_s17] ss:$0 sm:$0xff]  ;;  %v3055_v49 = vld [vmem:[%s3315_s14 + $0x18] sm:$0xff]  ;;  %v3054_v54 = vld [vmem:[%s3315_s14 + $0x10] sm:$0xff]  ;;  %s3735_s23 = sld [smem:[#allocation4_spill]]  ;;  %vm1967_vm15 = vcmask 39936  }
  0x41   : > { %1165 = vmatpush.bf16.msra.mxu0 %v3036_v18  ;;  %v3139_v36 = vld [vmem:[%s3290_s21] ss:$0 sm:$0xff]  ;;  %v3049_v59 = vld [vmem:[%s3305_s3 + $0x28] sm:$0xff]  ;;  %s3736_s26 = sld [smem:[#allocation5_spill]] }
  0x42   : > { %v1033_v2 = vsel %vm1032_vm0, %v1029_v1, 0.0  ;;  %1193 = vmatpush.bf16.msra.mxu1 %v3044_v19  ;;  %v3040_v42 = vld [vmem:[%s3295_s25 + $0x20] sm:$0xff]  ;;  %s3740_s10 = sld [smem:[#allocation14_spill]] }
  0x43   : > { %1034 = vadd.xlane.f32.xlu0 %v1033_v2  ;;  %v3175_v4 = vpop.eup %3174  ;;  %1221 = vmatpush.bf16.msra.mxu2 %v3052_v20  ;;  %v3141_v43 = vld [vmem:[%s3310_s8] ss:$0 sm:$0xff] }
  0x44   : > { %v1037_v5 = vmul.f32 32.0, %v3175_v4  ;;  %vm1041_vm1 = vweird.f32 %v3175_v4  ;;  %v3140_v47 = vld [vmem:[%s3300_s29] ss:$0 sm:$0xff] }
  0x45   : > { %v3142_v50 = vld [vmem:[%s3320_s19] ss:$0 sm:$0xff] }
  0x46   : > { %v1038_v6 = vsub.f32 1.0, %v1037_v5  ;;  %1309 = vmatpush.bf16.msrb.mxu1 %v3039_v22  ;;  %v3048_v62 = vld [vmem:[%s3305_s3 + $0x20] sm:$0xff] }
  0x47   : > { %1337 = vmatpush.bf16.msrb.mxu2 %v3047_v23  ;;  %v3146_v22 = vld [vmem:[%s3320_s19 + $0x1] ss:$0 sm:$0xff] }
  0x48   : > { %v1039_v7 = vmul.f32 %v3175_v4, %v1038_v6  ;;  %v3043_v6 = vld [vmem:[%s3295_s25 + $0x38] sm:$0xff] }
  0x4a   : > { %v1040_v8 = vadd.f32 %v3175_v4, %v1039_v7  ;;  %1310 = vmatpush.bf16.msrb.mxu1 %v3038_v25 }
  0x4b   : > { %1338 = vmatpush.bf16.msrb.mxu2 %v3046_v26 }
  0x4c   : > { %v3443_v9 = vsel %vm1041_vm1, %v3175_v4, %v1040_v8  ;;  %v3042_v8 = vld [vmem:[%s3295_s25 + $0x30] sm:$0xff] }
  0xb6   : > { %v1035_v10 = vpop.xlane.xlu0 %1034 }
  0xb7   : > { %v1043_v11 = vmul.f32 %v3443_v9, %v1035_v10 }
  0xb9   : > { %v1044_v12 = vsub.f32 %v1029_v1, %v1043_v11  ;;  %v3144_v1 = vld [vmem:[%s3310_s8 + $0x1] ss:$0 sm:$0xff] }
  0xbb   : > { %v1045_v13 = vmul.f32 %v1044_v12, %v1044_v12 }
  0xbd   : > { %v1046_v14 = vsel %vm1032_vm0, %v1045_v13, 0.0  ;;  %v1070_v13 = vld [vmem:[%s1015_s28] sm:$0x1]  ;;  %s3737_s28 = sld [smem:[#allocation7_spill]] }
  0xbe   : > { %1047 = vadd.xlane.f32.xlu0 %v1046_v14  ;;  %v1071_v14 = vsub.f32 1.0, %v1070_v13 }
  0xc0   : > { %v1072_v15 = vmul.f32 -10000.0, %v1071_v14 }
  0xc2   : > { %v3506_v16 = vperm.slane %v1072_v15, 0 }
 0x131   : > { %v1048_v21 = vpop.xlane.xlu0 %1047 }
 0x132   : > { %v1049_v24 = vmul.f32 %v1048_v21, %v3443_v9 }
 0x134   : > { %v1050_v27 = vadd.f32 1e-12, %v1049_v24 }
 0x136   : > { %3176 = vrsqrt.f32 %v1050_v27  ;;  %vm1057_vm3 = vweird.f32 %v1050_v27 }
 0x13c   : > { %v3177_v28 = vpop.eup %3176 }
 0x13d   : > { %v1052_v29 = vmul.f32 %v3177_v28, %v1050_v27  ;;  %vm1058_vm2 = vweird.f32 %v3177_v28 }
 0x13e   : > { %vm1059_vm4 = vmor %vm1057_vm3, %vm1058_vm2 }
 0x13f   : > { %v1053_v30 = vmul.f32 %v3177_v28, %v1052_v29 }
 0x141   : > { %v1054_v31 = vmul.f32 0.5, %v1053_v30 }
 0x143   : > { %v1055_v32 = vsub.f32 1.5, %v1054_v31 }
 0x145   : > { %v1056_v33 = vmul.f32 %v3177_v28, %v1055_v32 }
 0x147   : > { %v1060_v35 = vsel %vm1059_vm4, %v3177_v28, %v1056_v33  ;;  %v3147_v28 = vld [vmem:[%s3310_s8 + $0x2] ss:$0 sm:$0xff]  ;;  %vm2583_vm4 = vcmask 523264  }
 0x148   : > { %v1061_v37 = vmul.f32 %v1060_v35, %v1044_v12 }
 0x14a   : > { %v1065_v38 = vmul.f32 %v3138_v34, %v1061_v37 }
 0x14c   : > { %v3460_v39 = vadd.f32 %v3139_v36, %v1065_v38 }
 0x14e   : > { %v3464_v40 = vpack.c.bf16 %v3460_v39, %v3460_v39 }
 0x150   : > { %2766 = vmatmul.msk.bf16.vlgmr.msra.gmra.mxu0 %vm1032_vm0, %v3464_v40  ;;  %2775 = vmatmul.msk.bf16.vlgmr.msra.gmra.mxu1 %vm1032_vm0, %v3464_v40 }
 0x151   : > { %2784 = vmatmul.msk.bf16.vlgmr.msra.gmra.mxu2 %vm1032_vm0, %v3464_v40 }
 0x152   : > { %1454 = vmatpush.bf16.msra.mxu2 %v3041_v41 }
 0x156   : > { %1455 = vmatpush.bf16.msra.mxu2 %v3040_v42 }
 0x160   : > { %2795 = vmatmul.msk.bf16.vlgmr.msrb.gmra.mxu1 %vm1032_vm0, %v3464_v40 }
 0x161   : > { %2804 = vmatmul.msk.bf16.vlgmr.msrb.gmra.mxu2 %vm1032_vm0, %v3464_v40 }
 0x171   : > { %2824 = vmatmul.msk.bf16.vlgmr.msra.gmra.mxu2 %vm1032_vm0, %v3464_v40 }
 0x1cd   : > { %v1167_v44 = vpop.f32.mrf.mxu0  ;;  %v1195_v45 = vpop.f32.mrf.mxu1 }
 0x1ce   : > { %v1196_v46 = vadd.f32 %v3141_v43, %v1195_v45  ;;  %v1168_v52 = vadd.f32 %v3140_v47, %v1167_v44 }
 0x1d0   : > { %v1228_v48 = vpack.c.bf16 %v1196_v46, %v1196_v46  ;;  %v1227_v60 = vpack.c.bf16 %v1168_v52, %v1168_v52  ;;  %v3057_v46 = vld [vmem:[%s3315_s14 + $0x28] sm:$0xff] }
 0x1d2   : > { %v1234_v51 = vsel %vm1229_vm5, %v1228_v48, 0  ;;  %v3056_v48 = vld [vmem:[%s3315_s14 + $0x20] sm:$0xff] }
 0x1d3   : > { %1243 = vmatpush.bf16.xpose.msra.mxu3 %v1234_v51  ;;  %v3051_v51 = vld [vmem:[%s3305_s3 + $0x38] sm:$0xff] }
 0x1d4   : > { %v1223_v53 = vpop.f32.mrf.mxu2 }
 0x1d5   : > { %v1224_v55 = vadd.f32 %v3142_v50, %v1223_v53  ;;  %v1169_v56 = vpop.f32.mrf.mxu0  ;;  %v1197_v57 = vpop.f32.mrf.mxu1  ;;  %v3050_v53 = vld [vmem:[%s3305_s3 + $0x30] sm:$0xff] }
 0x1d7   : > { %v1266_v58 = vpack.c.bf16 %v1224_v55, %v1224_v55 }
 0x1d9   : > { %v1272_v61 = vsel %vm1270_vm6, %v1266_v58, 0 }
 0x1da   : > { %1281 = vmatpush.bf16.msrb.mxu0 %v1272_v61  ;;  %2785 = vmatmul.msk.bf16.vlgmr.msra.gmra.mxu3 %vm1229_vm5, %v1227_v60  ;;  %v3149_v61 = vld [vmem:[%s3320_s19 + $0x2] ss:$0 sm:$0xff] }
 0x1db   : > { %1365 = vmatpush.bf16.msrb.mxu3 %v3055_v49  ;;  %v3143_v49 = vld [vmem:[%s3300_s29 + $0x1] ss:$0 sm:$0xff] }
 0x1dc   : > { %v1225_v63 = vpop.f32.mrf.mxu2 }
 0x1dd   : > { %v3490_v0 = vpop.f32.mrf.mxu1 }
 0x1de   : > { %v1313_v50 = vadd.f32 %v3143_v49, %v3490_v0  ;;  %v3148_v49 = vld [vmem:[%s3300_s29 + $0x3] ss:$0 sm:$0xff] }
 0x1df   : > { %1366 = vmatpush.bf16.msrb.mxu3 %v3054_v54 }
 0x1e0   : > { %v1372_v52 = vpack.c.bf16 %v1313_v50, %v1313_v50 }
 0x1e3   : > { %1482 = vmatpush.bf16.msra.mxu3 %v3049_v59 }
 0x1e4   : > { %v1340_v2 = vpop.f32.mrf.mxu2 }
 0x1e5   : > { %v1341_v3 = vadd.f32 %v3144_v1, %v1340_v2  ;;  %v1314_v4 = vpop.f32.mrf.mxu1 }
 0x1e7   : > { %1483 = vmatpush.bf16.msra.mxu3 %v3048_v62  ;;  %v1373_v5 = vpack.c.bf16 %v1341_v3, %v1341_v3  ;;  %v3150_v3 = vld [vmem:[%s3310_s8 + $0x3] ss:$0 sm:$0xff] }
 0x1e9   : > { %v1378_v7 = vsel %vm1229_vm5, %v1373_v5, 0 }
 0x1ea   : > { %1387 = vmatpush.bf16.xpose.msra.mxu0 %v1378_v7  ;;  %2813 = vmatmul.msk.bf16.vlgmr.msrb.gmra.mxu3 %vm1032_vm0, %v3464_v40 }
 0x1eb   : > { %1599 = vmatpush.bf16.msrb.mxu3 %v3043_v6 }
 0x1ec   : > { %v1342_v10 = vpop.f32.mrf.mxu2 }
 0x1ef   : > { %1600 = vmatpush.bf16.msrb.mxu3 %v3042_v8 }
 0x1f4   : > { %v3498_v11 = vpop.f32.mrf.mxu2 }
 0x1fa   : > { %2833 = vmatmul.msk.bf16.vlgmr.msra.gmra.mxu3 %vm1032_vm0, %v3464_v40 }
 0x1fc   : > { %v1459_v12 = vpop.f32.mrf.mxu2 }
 0x20a   : > { %2853 = vmatmul.msk.bf16.vlgmr.msrb.gmra.mxu3 %vm1032_vm0, %v3464_v40 }
 0x25d   : > { %v1245_v17 = vpop.f32.mrf.mxu3 }
 0x25e   : > { %v1249_v18 = vmul.f32 0.35355338, %v1245_v17 }
 0x260   : > { %v1253_v19 = vadd.f32 %v3506_v16, %v1249_v18 }
 0x262   : > { %v1254_v20 = vsel %vm1229_vm5, %v1253_v19, -inf }
 0x263   : > { %1255 = vmax.xlane.f32.xlu1 %v1254_v20  ;;  %v3059_v20 = vld [vmem:[%s3315_s14 + $0x38] sm:$0xff] }
 0x265   : > { %v1247_v21 = vpop.f32.mrf.mxu3 }
 0x26d   : > { %v1368_v23 = vpop.f32.mrf.mxu3 }
 0x26e   : > { %v1369_v24 = vadd.f32 %v3146_v22, %v1368_v23  ;;  %v3058_v22 = vld [vmem:[%s3315_s14 + $0x30] sm:$0xff]  ;;  %v3145_v23 = vld [vmem:[%s3300_s29 + $0x2] ss:$0 sm:$0xff] }
 0x270   : > { %v1407_v25 = vpack.c.bf16 %v1369_v24, %v1369_v24  ;;  %v1458_v24 = vadd.f32 %v3145_v23, %v3498_v11  ;;  %v3070_v23 = vld [vmem:[%s3355_s4] sm:$0xff] }
 0x272   : > { %v1412_v26 = vsel %vm1270_vm6, %v1407_v25, 0  ;;  %v1517_v25 = vpack.c.bf16 %v1458_v24, %v1458_v24  ;;  %v3576_v24 = vld [vmem:[%s1019_s11] sm:$0x7]  ;;  %s3742_s11 = sld [smem:[#allocation13_spill]] }
 0x273   : > { %1421 = vmatpush.bf16.msra.mxu1 %v1412_v26 }
 0x275   : > { %v1370_v27 = vpop.f32.mrf.mxu3 }
 0x27d   : > { %v1485_v29 = vpop.f32.mrf.mxu3 }
 0x27e   : > { %v1486_v30 = vadd.f32 %v3147_v28, %v1485_v29 }
 0x280   : > { %v1518_v31 = vpack.c.bf16 %v1486_v30, %v1486_v30 }
 0x282   : > { %v1523_v32 = vsel %vm1229_vm5, %v1518_v31, 0 }
 0x283   : > { %1532 = vmatpush.bf16.xpose.msrb.mxu1 %v1523_v32 }
 0x285   : > { %v1487_v33 = vpop.f32.mrf.mxu3 }
 0x286   : > { %v3151_v33 = vld [vmem:[%s3320_s19 + $0x3] ss:$0 sm:$0xff] }
 0x28d   : > { %v3514_v34 = vpop.f32.mrf.mxu3 }
 0x28e   : > { %v1603_v50 = vadd.f32 %v3148_v49, %v3514_v34 }
 0x295   : > { %v1604_v35 = vpop.f32.mrf.mxu3 }
 0x2d6   : > { %v1256_v36 = vpop.xlane.xlu1 %1255 }
 0x2d7   : > { %v1257_v37 = vsub.f32 %v1253_v19, %v1256_v36 }
 0x2d9   : > { %v1258_v38 = vmul.f32 1.442695, %v1257_v37 }
 0x2db   : > { %3178 = vpow2.f32 %v1258_v38 }
 0x2e1   : > { %v3179_v41 = vpop.eup %3178 }
 0x2e2   : > { %v1260_v42 = vsel %vm1229_vm5, %v3179_v41, 0.0 }
 0x2e3   : > { %1261 = vadd.xlane.f32.xlu1 %v1260_v42 }
 0x356   : > { %v1262_v43 = vpop.xlane.xlu1 %1261 }
 0x357   : > { %3180 = vrcp.f32 %v1262_v43 }
 0x35d   : > { %v3181_v44 = vpop.eup %3180 }
 0x35e   : > { %v1264_v45 = vmul.f32 %v3181_v44, %v3179_v41 }
 0x360   : > { %v1265_v47 = vpack.c.bf16 %v1264_v45, %v1264_v45 }
 0x362   : > { %2786 = vmatmul.msk.bf16.vlgmr.msrb.gmra.mxu0 %vm1229_vm5, %v1265_v47 }
 0x363   : > { %1510 = vmatpush.bf16.msrb.mxu0 %v3057_v46 }
 0x367   : > { %1511 = vmatpush.bf16.msrb.mxu0 %v3056_v48 }
 0x372   : > { %2814 = vmatmul.msk.bf16.vlgmr.msra.gmra.mxu0 %vm1229_vm5, %v1372_v52  ;;  %v1662_v52 = vpack.c.bf16 %v1603_v50, %v1603_v50 }
 0x373   : > { %1627 = vmatpush.bf16.msra.mxu0 %v3051_v51 }
 0x377   : > { %1628 = vmatpush.bf16.msra.mxu0 %v3050_v53 }
 0x382   : > { %2842 = vmatmul.msk.bf16.vlgmr.msrb.gmra.mxu0 %vm1032_vm0, %v3464_v40 }
 0x392   : > { %2862 = vmatmul.msk.bf16.vlgmr.msra.gmra.mxu0 %vm1032_vm0, %v3464_v40 }
 0x3df   : > { %v1283_v54 = vpop.f32.mrf.mxu0 }
 0x3e0   : > { %1287 = vst.msk [vmem:[#allocation2] sm:$0xff] %vm1229_vm5, %v1283_v54 }
 0x3e7   : > { %v1285_v55 = vpop.f32.mrf.mxu0 }
 0x3ef   : > { %v1389_v56 = vpop.f32.mrf.mxu0 }
 0x3f0   : > { %v1393_v57 = vmul.f32 0.35355338, %v1389_v56 }
 0x3f2   : > { %v1394_v58 = vadd.f32 %v1393_v57, %v3506_v16 }
 0x3f4   : > { %v1395_v59 = vsel %vm1229_vm5, %v1394_v58, -inf }
 0x3f5   : > { %1396 = vmax.xlane.f32.xlu2 %v1395_v59 }
 0x3f7   : > { %v1391_v60 = vpop.f32.mrf.mxu0 }
 0x3ff   : > { %v1513_v62 = vpop.f32.mrf.mxu0 }
 0x400   : > { %v1514_v63 = vadd.f32 %v3149_v61, %v1513_v62 }
 0x402   : > { %v1552_v0 = vpack.c.bf16 %v1514_v63, %v1514_v63 }
 0x404   : > { %v1557_v1 = vsel %vm1270_vm6, %v1552_v0, 0 }
 0x405   : > { %1566 = vmatpush.bf16.msrb.mxu2 %v1557_v1 }
 0x407   : > { %v1515_v2 = vpop.f32.mrf.mxu0 }
 0x40f   : > { %v1630_v4 = vpop.f32.mrf.mxu0 }
 0x410   : > { %v1631_v5 = vadd.f32 %v3150_v3, %v1630_v4  ;;  %v3061_v4 = vld [vmem:[%s3325_s24 + $0x8] sm:$0xff] }
 0x411   : > { %1749 = vmatpush.bf16.msrb.mxu0 %v3061_v4 }
 0x412   : > { %v1663_v6 = vpack.c.bf16 %v1631_v5, %v1631_v5 }
 0x414   : > { %v1668_v7 = vsel %vm1229_vm5, %v1663_v6, 0 }
 0x415   : > { %1677 = vmatpush.bf16.xpose.msra.mxu2 %v1668_v7  ;;  %v3060_v7 = vld [vmem:[%s3325_s24] sm:$0xff] }
 0x416   : > { %1750 = vmatpush.bf16.msrb.mxu0 %v3060_v7 }
 0x417   : > { %v1632_v8 = vpop.f32.mrf.mxu0 }
 0x468   : > { %v1397_v10 = vpop.xlane.xlu2 %1396 }
 0x469   : > { %v1398_v12 = vsub.f32 %v1394_v58, %v1397_v10 }
 0x46b   : > { %v1399_v13 = vmul.f32 1.442695, %v1398_v12 }
 0x46d   : > { %3182 = vpow2.f32 %v1399_v13  ;;  %v3152_v13 = vld [vmem:[%s3330_s30] ss:$0 sm:$0xff] }
 0x473   : > { %v3183_v14 = vpop.eup %3182 }
 0x474   : > { %v1401_v15 = vsel %vm1229_vm5, %v3183_v14, 0.0 }
 0x475   : > { %1402 = vadd.xlane.f32.xlu2 %v1401_v15 }
 0x4e8   : > { %v1403_v17 = vpop.xlane.xlu2 %1402 }
 0x4e9   : > { %3184 = vrcp.f32 %v1403_v17 }
 0x4ef   : > { %v3185_v18 = vpop.eup %3184 }
 0x4f0   : > { %v1405_v19 = vmul.f32 %v3185_v18, %v3183_v14 }
 0x4f2   : > { %v1406_v21 = vpack.c.bf16 %v1405_v19, %v1405_v19 }
 0x4f4   : > { %2815 = vmatmul.msk.bf16.vlgmr.msra.gmra.mxu1 %vm1229_vm5, %v1406_v21  ;;  %v3071_v21 = vld [vmem:[%s3355_s4 + $0x8] sm:$0xff] }
 0x4f5   : > { %1655 = vmatpush.bf16.msra.mxu1 %v3059_v20  ;;  %v3079_v20 = vld [vmem:[%s3365_s6 + $0x8] sm:$0xff] }
 0x4f9   : > { %1656 = vmatpush.bf16.msra.mxu1 %v3058_v22  ;;  %v3078_v22 = vld [vmem:[%s3365_s6] sm:$0xff] }
 0x504   : > { %2843 = vmatmul.msk.bf16.vlgmr.msrb.gmra.mxu1 %vm1229_vm5, %v1517_v25 }
 0x514   : > { %2871 = vmatmul.msk.bf16.vlgmr.msra.gmra.mxu1 %vm1032_vm0, %v3464_v40 }
 0x571   : > { %v1423_v26 = vpop.f32.mrf.mxu1 }
 0x579   : > { %v1425_v27 = vpop.f32.mrf.mxu1 }
 0x581   : > { %v1534_v28 = vpop.f32.mrf.mxu1 }
 0x582   : > { %v1538_v29 = vmul.f32 0.35355338, %v1534_v28 }
 0x584   : > { %v1539_v30 = vadd.f32 %v1538_v29, %v3506_v16  ;;  %v3073_v29 = vld [vmem:[%s3355_s4 + $0x18] sm:$0xff] }
 0x586   : > { %v1540_v31 = vsel %vm1229_vm5, %v1539_v30, -inf }
 0x587   : > { %1541 = vmax.xlane.f32.xlu0 %v1540_v31  ;;  %v3063_v31 = vld [vmem:[%s3732_s15 + $0x8] sm:$0xff] }
 0x588   : > { %1879 = vmatpush.bf16.msrb.mxu1 %v3063_v31  ;;  %v3161_v31 = vld [vmem:[%s3733_s16 + $0x1] ss:$0 sm:$0xff] }
 0x589   : > { %v1536_v32 = vpop.f32.mrf.mxu1 }
 0x58a   : > { %v3065_v32 = vld [vmem:[%s3732_s15 + $0x18] sm:$0xff] }
 0x591   : > { %v1658_v35 = vpop.f32.mrf.mxu1 }
 0x592   : > { %v1659_v36 = vadd.f32 %v3151_v33, %v1658_v35  ;;  %v3067_v33 = vld [vmem:[%s3732_s15 + $0x28] sm:$0xff]  ;;  %v3062_v35 = vld [vmem:[%s3732_s15] sm:$0xff] }
 0x593   : > { %1880 = vmatpush.bf16.msrb.mxu1 %v3062_v35 }
 0x594   : > { %v1697_v11 = vpack.c.bf16 %v1659_v36, %v1659_v36  ;;  %v3064_v36 = vld [vmem:[%s3732_s15 + $0x10] sm:$0xff] }
 0x596   : > { %v1702_v37 = vsel %vm1270_vm6, %v1697_v11, 0  ;;  %v3066_v11 = vld [vmem:[%s3732_s15 + $0x20] sm:$0xff] }
 0x597   : > { %1711 = vmatpush.bf16.msra.mxu3 %v1702_v37 }
 0x599   : > { %v1660_v38 = vpop.f32.mrf.mxu1 }
 0x59a   : > { %v3155_v38 = vld [vmem:[%s3733_s16] ss:$0 sm:$0xff] }
 0x59b   : > { %1938 = vmatpush.bf16.msrb.mxu3 %v3079_v20  ;;  %v3074_v20 = vld [vmem:[%s3355_s4 + $0x20] sm:$0xff] }
 0x59f   : > { %1939 = vmatpush.bf16.msrb.mxu3 %v3078_v22 }
 0x5fa   : > { %v1542_v40 = vpop.xlane.xlu0 %1541 }
 0x5fb   : > { %v1543_v41 = vsub.f32 %v1539_v30, %v1542_v40  ;;  %v3072_v30 = vld [vmem:[%s3355_s4 + $0x10] sm:$0xff] }
 0x5fd   : > { %v1544_v42 = vmul.f32 1.442695, %v1543_v41 }
 0x5ff   : > { %3186 = vpow2.f32 %v1544_v42  ;;  %v3261_v42 = vmov 65535  }
 0x605   : > { %v3187_v43 = vpop.eup %3186 }
 0x606   : > { %v1546_v44 = vsel %vm1229_vm5, %v3187_v43, 0.0 }
 0x607   : > { %1547 = vadd.xlane.f32.xlu1 %v1546_v44  ;;  %v3156_v44 = vld [vmem:[%s3734_s18] ss:$0 sm:$0xff] }
 0x620   : > { %1428 = vrot.lane.b32.xlu1 %v1423_v26, %s3258_s1 }
 0x67a   : > { %v1548_v45 = vpop.xlane.xlu1 %1547 }
 0x67b   : > { %3188 = vrcp.f32 %v1548_v45 }
 0x681   : > { %v3189_v46 = vpop.eup %3188 }
 0x682   : > { %v1550_v47 = vmul.f32 %v3189_v46, %v3187_v43  ;;  %v1986_v43 = vsel %vm1984_vm10, 4294967295, %v3261_v42 }
 0x684   : > { %v1551_v48 = vpack.c.bf16 %v1550_v47, %v1550_v47 }
 0x686   : > { %2844 = vmatmul.msk.bf16.vlgmr.msrb.gmra.mxu2 %vm1229_vm5, %v1551_v48  ;;  %v3597_v48 = vsel %vm1985_vm11, %v1986_v43, 0 }
 0x687   : > { %1910 = vmatpush.bf16.msrb.mxu2 %v3071_v21 }
 0x68b   : > { %1911 = vmatpush.bf16.msrb.mxu2 %v3070_v23 }
 0x692   : > { %v1429_v51 = vpop.permute.xlu1 %1428 }
 0x693   : > { %1432 = vst.msk [vmem:[#allocation2] sm:$0xff] %vm1431_vm7, %v1429_v51 }
 0x696   : > { %2872 = vmatmul.msk.bf16.vlgmr.msra.gmra.mxu2 %vm1229_vm5, %v1662_v52 }
 0x697   : > { %2026 = vmatpush.bf16.msra.mxu2 %v3065_v32 }
 0x69b   : > { %2027 = vmatpush.bf16.msra.mxu2 %v3064_v36 }
 0x6a6   : > { %2900 = vmatmul.msk.bf16.vlgmr.msrb.gmra.mxu2 %vm1032_vm0, %v3576_v24 }
 0x709   : > { %v1568_v53 = vpop.f32.mrf.mxu2 }
 0x711   : > { %v1570_v54 = vpop.f32.mrf.mxu2 }
 0x719   : > { %v1679_v55 = vpop.f32.mrf.mxu2 }
 0x71a   : > { %v1683_v56 = vmul.f32 0.35355338, %v1679_v55 }
 0x71c   : > { %v1684_v57 = vadd.f32 %v1683_v56, %v3506_v16 }
 0x71e   : > { %v1685_v58 = vsel %vm1229_vm5, %v1684_v57, -inf }
 0x71f   : > { %1686 = vmax.xlane.f32.xlu2 %v1685_v58 }
 0x721   : > { %v1681_v59 = vpop.f32.mrf.mxu2 }
 0x729   : > { %v1913_v45 = vpop.f32.mrf.mxu2 }
 0x72a   : > { %v1914_v49 = vadd.f32 %v3156_v44, %v1913_v45 }
 0x72c   : > { %v1946_v51 = vpack.c.bf16 %v1914_v49, %v1914_v49 }
 0x731   : > { %v1915_v55 = vpop.f32.mrf.mxu2 }
 0x737   : > { %1573 = vrot.lane.b32.xlu2 %v1568_v53, %s3259_s2  ;;  %v1951_v53 = vsel %vm1229_vm5, %v1946_v51, 0 }
 0x738   : > { %1960 = vmatpush.bf16.xpose.msra.mxu0 %v1951_v53 }
 0x792   : > { %v1687_v34 = vpop.xlane.xlu2 %1686 }
 0x793   : > { %v1688_v60 = vsub.f32 %v1684_v57, %v1687_v34 }
 0x795   : > { %v1689_v61 = vmul.f32 1.442695, %v1688_v60 }
 0x797   : > { %3190 = vpow2.f32 %v1689_v61  ;;  %v3153_v61 = vld [vmem:[%s3735_s23] ss:$0 sm:$0xff]  ;;  %s3743_s23 = sld [smem:[#allocation16_spill]] }
 0x79a   : > { %v1574_v62 = vpop.permute.xlu2 %1573 }
 0x79b   : > { %1577 = vst.msk [vmem:[#allocation2] sm:$0xff] %vm1576_vm8, %v1574_v62 }
 0x79d   : > { %v3191_v63 = vpop.eup %3190 }
 0x79e   : > { %v1691_v16 = vsel %vm1229_vm5, %v3191_v63, 0.0 }
 0x79f   : > { %1692 = vadd.xlane.f32.xlu0 %v1691_v16 }
 0x812   : > { %v1693_v0 = vpop.xlane.xlu0 %1692 }
 0x813   : > { %3192 = vrcp.f32 %v1693_v0 }
 0x819   : > { %v3193_v1 = vpop.eup %3192 }
 0x81a   : > { %v1695_v2 = vmul.f32 %v3193_v1, %v3191_v63  ;;  %v3154_v63 = vld [vmem:[%s3736_s26] ss:$0 sm:$0xff]  ;;  %s3744_s26 = sld [smem:[#allocation15_spill]] }
 0x81c   : > { %v1696_v3 = vpack.c.bf16 %v1695_v2, %v1695_v2 }
 0x81e   : > { %2873 = vmatmul.msk.bf16.vlgmr.msra.gmra.mxu3 %vm1229_vm5, %v1696_v3  ;;  %v3157_v3 = vld [vmem:[%s3734_s18 + $0x1] ss:$0 sm:$0xff] }
 0x81f   : > { %2054 = vmatpush.bf16.msra.mxu3 %v3073_v29 }
 0x823   : > { %2055 = vmatpush.bf16.msra.mxu3 %v3072_v30 }
 0x82e   : > { %2909 = vmatmul.msk.bf16.vlgmr.msrb.gmra.mxu3 %vm1032_vm0, %v3576_v24 }
 0x82f   : > { %2169 = vmatpush.bf16.msrb.mxu3 %v3067_v33 }
 0x833   : > { %2170 = vmatpush.bf16.msrb.mxu3 %v3066_v11 }
 0x83e   : > { %2929 = vmatmul.msk.bf16.vlgmr.msra.gmra.mxu3 %vm1032_vm0, %v3576_v24 }
 0x8a1   : > { %v1713_v5 = vpop.f32.mrf.mxu3 }
 0x8a2   : > { %1718 = vrot.lane.b32.xlu0 %v1713_v5, %s3260_s7 }
 0x8a9   : > { %v1715_v6 = vpop.f32.mrf.mxu3 }
 0x8b1   : > { %v1941_v40 = vpop.f32.mrf.mxu3 }
 0x8b2   : > { %v1942_v46 = vadd.f32 %v3155_v38, %v1941_v40 }
 0x8b4   : > { %v1980_v50 = vpack.c.bf16 %v1942_v46, %v1942_v46 }
 0x8b6   : > { %v1989_v52 = vand.u32 %v3597_v48, %v1980_v50 }
 0x8b8   : > { %1998 = vmatpush.bf16.msra.mxu1 %v1989_v52 }
 0x8b9   : > { %v1943_v54 = vpop.f32.mrf.mxu3 }
 0x8c1   : > { %v2057_v4 = vpop.f32.mrf.mxu3 }
 0x8c2   : > { %v2058_v5 = vadd.f32 %v3157_v3, %v2057_v4 }
 0x8c4   : > { %v2090_v6 = vpack.c.bf16 %v2058_v5, %v2058_v5 }
 0x8c6   : > { %v2095_v7 = vsel %vm1229_vm5, %v2090_v6, 0 }
 0x914   : > { %v1719_v8 = vpop.permute.xlu0 %1718 }
 0x915   : > { %1722 = vst.msk [vmem:[#allocation2] sm:$0xff] %vm1721_vm9, %v1719_v8  ;;  %v2059_v8 = vpop.f32.mrf.mxu3 }
 0x91c   : > { %v1723_v10 = vld [vmem:[#allocation2] sm:$0xff] }
 0x91d   : > { %v1724_v12 = vpack.c.bf16 %v1723_v10, %v1723_v10  ;;  %v3081_v10 = vld [vmem:[%s3365_s6 + $0x18] sm:$0xff] }
 0x91f   : > { %2882 = vmatmul.msk.bf16.vlgmr.msrb.gmra.mxu0 %vm1032_vm0, %v1724_v12  ;;  %v3080_v12 = vld [vmem:[%s3365_s6 + $0x10] sm:$0xff] }
 0x920   : > { %2082 = vmatpush.bf16.msrb.mxu0 %v3081_v10  ;;  %v3160_v10 = vld [vmem:[%s3737_s28 + $0x2] ss:$0 sm:$0xff] }
 0x924   : > { %2083 = vmatpush.bf16.msrb.mxu0 %v3080_v12 }
 0x99c   : > { %v1752_v14 = vpop.f32.mrf.mxu0 }
 0x99d   : > { %v1753_v15 = vadd.f32 %v3152_v13, %v1752_v14  ;;  %v3158_v13 = vld [vmem:[%s3737_s28] ss:$0 sm:$0xff] }
 0x99f   : > { %v1756_v17 = vadd.f32 %v1753_v15, %v3460_v39 }
 0x9a1   : > { %v1759_v18 = vsel %vm1032_vm0, %v1756_v17, 0.0 }
 0x9a2   : > { %1760 = vadd.xlane.f32.xlu2 %v1759_v18 }
 0x9a4   : > { %v1754_v19 = vpop.f32.mrf.mxu0 }
 0xa15   : > { %v1761_v39 = vpop.xlane.xlu2 %1760 }
 0xa16   : > { %v1762_v25 = vmul.f32 %v1761_v39, %v3443_v9 }
 0xa18   : > { %v1763_v26 = vsub.f32 %v1756_v17, %v1762_v25  ;;  %v3075_v17 = vld [vmem:[%s3355_s4 + $0x28] sm:$0xff]  ;;  %v3069_v25 = vld [vmem:[%s3732_s15 + $0x38] sm:$0xff] }
 0xa1a   : > { %v1764_v27 = vmul.f32 %v1763_v26, %v1763_v26 }
 0xa1c   : > { %v1765_v28 = vsel %vm1032_vm0, %v1764_v27, 0.0 }
 0xa1d   : > { %1766 = vadd.xlane.f32.xlu1 %v1765_v28 }
 0xa90   : > { %v1767_v37 = vpop.xlane.xlu1 %1766 }
 0xa91   : > { %v1768_v41 = vmul.f32 %v1767_v37, %v3443_v9  ;;  %v3162_v37 = vld [vmem:[%s3734_s18 + $0x2] ss:$0 sm:$0xff] }
 0xa93   : > { %v1769_v47 = vadd.f32 1e-12, %v1768_v41 }
 0xa95   : > { %3194 = vrsqrt.f32 %v1769_v47  ;;  %vm1776_vm13 = vweird.f32 %v1769_v47 }
 0xa9b   : > { %v3195_v56 = vpop.eup %3194 }
 0xa9c   : > { %v1771_v57 = vmul.f32 %v3195_v56, %v1769_v47  ;;  %vm1777_vm12 = vweird.f32 %v3195_v56 }
 0xa9d   : > { %vm1778_vm14 = vmor %vm1776_vm13, %vm1777_vm12 }
 0xa9e   : > { %v1772_v58 = vmul.f32 %v3195_v56, %v1771_v57 }
 0xaa0   : > { %v1773_v59 = vmul.f32 0.5, %v1772_v58 }
 0xaa2   : > { %v1774_v34 = vsub.f32 1.5, %v1773_v59 }
 0xaa4   : > { %v1775_v60 = vmul.f32 %v3195_v56, %v1774_v34 }
 0xaa6   : > { %v1779_v62 = vsel %vm1778_vm14, %v3195_v56, %v1775_v60  ;;  %v3159_v56 = vld [vmem:[%s3737_s28 + $0x1] ss:$0 sm:$0xff] }
 0xaa7   : > { %v1780_v16 = vmul.f32 %v1779_v62, %v1763_v26  ;;  %v3068_v26 = vld [vmem:[%s3732_s15 + $0x30] sm:$0xff] }
 0xaa9   : > { %v1784_v0 = vmul.f32 %v3153_v61, %v1780_v16 }
 0xaab   : > { %v3603_v1 = vadd.f32 %v3154_v63, %v1784_v0 }
 0xaad   : > { %v1854_v2 = vpack.c.bf16 %v3603_v1, %v3603_v1 }
 0xaaf   : > { %2891 = vmatmul.msk.bf16.vlgmr.msrb.gmra.mxu1 %vm1032_vm0, %v1854_v2  ;;  %2920 = vmatmul.msk.bf16.vlgmr.msra.gmra.mxu2 %vm1032_vm0, %v1854_v2 }
 0xab0   : > { %2949 = vmatmul.msk.bf16.vlgmr.msrb.gmra.mxu3 %vm1032_vm0, %v1854_v2  ;;  %2104 = vmatpush.bf16.xpose.msrb.mxu1 %v2095_v7 }
 0xb2c   : > { %v1882_v14 = vpop.f32.mrf.mxu1 }
 0xb2d   : > { %v1883_v15 = vadd.f32 %v3158_v13, %v1882_v14  ;;  %v3083_v14 = vld [vmem:[%s3365_s6 + $0x28] sm:$0xff] }
 0xb2f   : > { %v1945_v18 = vpack.c.bf16 %v1883_v15, %v1883_v15  ;;  %v3082_v15 = vld [vmem:[%s3365_s6 + $0x20] sm:$0xff] }
 0xb31   : > { %2910 = vmatmul.msk.bf16.vlgmr.msra.gmra.mxu0 %vm1229_vm5, %v1945_v18  ;;  %v3076_v18 = vld [vmem:[%s3355_s4 + $0x30] sm:$0xff] }
 0xb32   : > { %v2029_v19 = vpop.f32.mrf.mxu2  ;;  %2197 = vmatpush.bf16.msra.mxu0 %v3075_v17  ;;  %v3077_v17 = vld [vmem:[%s3355_s4 + $0x38] sm:$0xff] }
 0xb33   : > { %v3618_v21 = vpop.f32.mrf.mxu3  ;;  %v2030_v57 = vadd.f32 %v3159_v56, %v2029_v19  ;;  %v3084_v56 = vld [vmem:[%s3365_s6 + $0x30] sm:$0xff] }
 0xb34   : > { %v1884_v22 = vpop.f32.mrf.mxu1  ;;  %v2173_v12 = vadd.f32 %v3160_v10, %v3618_v21 }
 0xb35   : > { %v2089_v58 = vpack.c.bf16 %v2030_v57, %v2030_v57 }
 0xb36   : > { %2198 = vmatpush.bf16.msra.mxu0 %v3074_v20  ;;  %v2232_v13 = vpack.c.bf16 %v2173_v12, %v2173_v12 }
 0xb3a   : > { %v2031_v23 = vpop.f32.mrf.mxu2 }
 0xb3b   : > { %v2174_v39 = vpop.f32.mrf.mxu3 }
 0xb41   : > { %2938 = vmatmul.msk.bf16.vlgmr.msrb.gmra.mxu0 %vm1032_vm0, %v3576_v24 }
 0xb42   : > { %2312 = vmatpush.bf16.msrb.mxu0 %v3069_v25 }
 0xb46   : > { %2313 = vmatpush.bf16.msrb.mxu0 %v3068_v26 }
 0xb51   : > { %2958 = vmatmul.msk.bf16.vlgmr.msra.gmra.mxu0 %vm1032_vm0, %v3576_v24 }
 0xb61   : > { %2978 = vmatmul.msk.bf16.vlgmr.msrb.gmra.mxu0 %vm1032_vm0, %v1854_v2 }
 0xbae   : > { %v1962_v27 = vpop.f32.mrf.mxu0 }
 0xbaf   : > { %v1966_v28 = vmul.f32 0.35355338, %v1962_v27 }
 0xbb1   : > { %v1968_v29 = vsel %vm1967_vm15, %v1966_v28, -inf }
 0xbb2   : > { %1969 = vmax.xlane.f32.xlu0 %v1968_v29 }
 0xbb6   : > { %v1964_v30 = vpop.f32.mrf.mxu0 }
 0xbbe   : > { %v2085_v32 = vpop.f32.mrf.mxu0 }
 0xbbf   : > { %v2086_v33 = vadd.f32 %v3161_v31, %v2085_v32 }
 0xbc1   : > { %v2123_v35 = vpack.c.bf16 %v2086_v33, %v2086_v33 }
 0xbc3   : > { %v2128_v36 = vand.u32 %v2123_v35, %v3597_v48 }
 0xbc5   : > { %2137 = vmatpush.bf16.msrb.mxu2 %v2128_v36 }
 0xbc6   : > { %v2087_v11 = vpop.f32.mrf.mxu0 }
 0xbc7   : > { %v3165_v11 = vld [vmem:[%s3734_s18 + $0x3] ss:$0 sm:$0xff] }
 0xbce   : > { %v2200_v38 = vpop.f32.mrf.mxu0 }
 0xbcf   : > { %v2201_v40 = vadd.f32 %v3162_v37, %v2200_v38 }
 0xbd1   : > { %v2233_v41 = vpack.c.bf16 %v2201_v40, %v2201_v40 }
 0xbd3   : > { %v2238_v42 = vsel %vm1229_vm5, %v2233_v41, 0 }
 0xbd4   : > { %2247 = vmatpush.bf16.xpose.msra.mxu2 %v2238_v42 }
 0xbd6   : > { %v2202_v43 = vpop.f32.mrf.mxu0 }
 0xbde   : > { %v3632_v44 = vpop.f32.mrf.mxu0 }
 0xbe6   : > { %v2317_v45 = vpop.f32.mrf.mxu0 }
 0xc25   : > { %v1970_v46 = vpop.xlane.xlu0 %1969 }
 0xc26   : > { %v1971_v47 = vsub.f32 %v1966_v28, %v1970_v46  ;;  %v3164_v28 = vld [vmem:[%s3733_s16 + $0x2] ss:$0 sm:$0xff] }
 0xc28   : > { %v1972_v49 = vmul.f32 1.442695, %v1971_v47 }
 0xc2a   : > { %3196 = vpow2.f32 %v1972_v49  ;;  %v3163_v49 = vld [vmem:[%s3737_s28 + $0x3] ss:$0 sm:$0xff] }
 0xc30   : > { %v3197_v50 = vpop.eup %3196 }
 0xc31   : > { %v1974_v51 = vsel %vm1967_vm15, %v3197_v50, 0.0 }
 0xc32   : > { %1975 = vadd.xlane.f32.xlu2 %v1974_v51 }
 0xca5   : > { %v1976_v52 = vpop.xlane.xlu2 %1975 }
 0xca6   : > { %3198 = vrcp.f32 %v1976_v52 }
 0xcac   : > { %v3199_v53 = vpop.eup %3198 }
 0xcad   : > { %v1978_v54 = vmul.f32 %v3199_v53, %v3197_v50  ;;  %v2316_v50 = vadd.f32 %v3163_v49, %v3632_v44 }
 0xcaf   : > { %v1979_v55 = vpack.c.bf16 %v1978_v54, %v1978_v54  ;;  %v2375_v52 = vpack.c.bf16 %v2316_v50, %v2316_v50  ;;  %v3093_v50 = vld [vmem:[%s3743_s23 + $0x18] sm:$0xff] }
 0xcb1   : > { %2911 = vmatmul.msk.bf16.vlgmr.msra.gmra.mxu1 %vm1967_vm15, %v1979_v55  ;;  %v3085_v55 = vld [vmem:[%s3365_s6 + $0x38] sm:$0xff] }
 0xcb2   : > { %2225 = vmatpush.bf16.msra.mxu1 %v3083_v14 }
 0xcb6   : > { %2226 = vmatpush.bf16.msra.mxu1 %v3082_v15 }
 0xcc1   : > { %2939 = vmatmul.msk.bf16.vlgmr.msrb.gmra.mxu1 %vm1229_vm5, %v2089_v58 }
 0xcc2   : > { %2340 = vmatpush.bf16.msrb.mxu1 %v3077_v17 }
 0xcc6   : > { %2341 = vmatpush.bf16.msrb.mxu1 %v3076_v18 }
 0xcd1   : > { %2967 = vmatmul.msk.bf16.vlgmr.msra.gmra.mxu1 %vm1032_vm0, %v3576_v24 }
 0xce1   : > { %2987 = vmatmul.msk.bf16.vlgmr.msrb.gmra.mxu1 %vm1032_vm0, %v3576_v24 }
 0xd2e   : > { %v2000_v59 = vpop.f32.mrf.mxu1 }
 0xd2f   : > { %2004 = vst.msk [vmem:[#allocation2] sm:$0xff] %vm1229_vm5, %v2000_v59 }
 0xd36   : > { %v2002_v34 = vpop.f32.mrf.mxu1 }
 0xd3e   : > { %v2106_v60 = vpop.f32.mrf.mxu1 }
 0xd3f   : > { %v2110_v61 = vmul.f32 0.35355338, %v2106_v60 }
 0xd41   : > { %v2111_v62 = vsel %vm1967_vm15, %v2110_v61, -inf }
 0xd42   : > { %2112 = vmax.xlane.f32.xlu1 %v2111_v62  ;;  %v3166_v62 = vld [vmem:[%s3733_s16 + $0x3] ss:$0 sm:$0xff] }
 0xd46   : > { %v2108_v63 = vpop.f32.mrf.mxu1 }
 0xd4e   : > { %v2228_v29 = vpop.f32.mrf.mxu1 }
 0xd4f   : > { %v2229_v30 = vadd.f32 %v3164_v28, %v2228_v29 }
 0xd51   : > { %v2266_v31 = vpack.c.bf16 %v2229_v30, %v2229_v30  ;;  %v3089_v30 = vld [vmem:[%s3740_s10 + $0x8] sm:$0xff] }
 0xd53   : > { %v2271_v35 = vand.u32 %v2266_v31, %v3597_v48  ;;  %v3088_v31 = vld [vmem:[%s3740_s10] sm:$0xff] }
 0xd55   : > { %2280 = vmatpush.bf16.msra.mxu3 %v2271_v35 }
 0xd56   : > { %v2230_v36 = vpop.f32.mrf.mxu1 }
 0xd5e   : > { %v2343_v37 = vpop.f32.mrf.mxu1 }
 0xd5f   : > { %v2344_v38 = vadd.f32 %v3165_v11, %v2343_v37 }
 0xd61   : > { %v2376_v40 = vpack.c.bf16 %v2344_v38, %v2344_v38 }
 0xd63   : > { %v2381_v41 = vsel %vm1229_vm5, %v2376_v40, 0 }
 0xd64   : > { %2390 = vmatpush.bf16.xpose.msrb.mxu3 %v2381_v41 }
 0xd66   : > { %v2345_v42 = vpop.f32.mrf.mxu1 }
 0xdb5   : > { %v2113_v16 = vpop.xlane.xlu1 %2112 }
 0xdb6   : > { %v2114_v0 = vsub.f32 %v2110_v61, %v2113_v16 }
 0xdb8   : > { %v2115_v2 = vmul.f32 1.442695, %v2114_v0 }
 0xdba   : > { %3200 = vpow2.f32 %v2115_v2 }
 0xdc0   : > { %v3201_v3 = vpop.eup %3200 }
 0xdc1   : > { %v2117_v4 = vsel %vm1967_vm15, %v3201_v3, 0.0 }
 0xdc2   : > { %2118 = vadd.xlane.f32.xlu0 %v2117_v4 }
 0xe35   : > { %v2119_v5 = vpop.xlane.xlu0 %2118 }
 0xe36   : > { %3202 = vrcp.f32 %v2119_v5 }
 0xe3c   : > { %v3203_v6 = vpop.eup %3202 }
 0xe3d   : > { %v2121_v7 = vmul.f32 %v3203_v6, %v3201_v3 }
 0xe3f   : > { %v2122_v8 = vpack.c.bf16 %v2121_v7, %v2121_v7 }
 0xe41   : > { %2940 = vmatmul.msk.bf16.vlgmr.msrb.gmra.mxu2 %vm1967_vm15, %v2122_v8 }
 0xe42   : > { %2368 = vmatpush.bf16.msrb.mxu2 %v3085_v55 }
 0xe46   : > { %2369 = vmatpush.bf16.msrb.mxu2 %v3084_v56 }
 0xe51   : > { %2968 = vmatmul.msk.bf16.vlgmr.msra.gmra.mxu2 %vm1229_vm5, %v2232_v13 }
 0xe52   : > { %2530 = vmatpush.bf16.msra.mxu2 %v3089_v30 }
 0xe56   : > { %2531 = vmatpush.bf16.msra.mxu2 %v3088_v31 }
 0xe61   : > { %2996 = vmatmul.msk.bf16.vlgmr.msrb.gmra.mxu2 %vm1032_vm0, %v3576_v24 }
 0xec4   : > { %v2139_v19 = vpop.f32.mrf.mxu2 }
 0xecc   : > { %v2141_v20 = vpop.f32.mrf.mxu2 }
 0xed4   : > { %v2249_v22 = vpop.f32.mrf.mxu2 }
 0xed5   : > { %v2253_v23 = vmul.f32 0.35355338, %v2249_v22 }
 0xed7   : > { %v2254_v21 = vsel %vm1967_vm15, %v2253_v23, -inf }
 0xed8   : > { %2255 = vmax.xlane.f32.xlu2 %v2254_v21 }
 0xedc   : > { %v2251_v39 = vpop.f32.mrf.mxu2 }
 0xee4   : > { %v2371_v0 = vpop.f32.mrf.mxu2 }
 0xee5   : > { %v2372_v2 = vadd.f32 %v3166_v62, %v2371_v0 }
 0xee7   : > { %v2409_v3 = vpack.c.bf16 %v2372_v2, %v2372_v2  ;;  %v3171_v2 = vld [vmem:[%s3410_s27] ss:$0 sm:$0xff] }
 0xee9   : > { %v2414_v24 = vand.u32 %v2409_v3, %v3597_v48 }
 0xeeb   : > { %2423 = vmatpush.bf16.msra.mxu0 %v2414_v24 }
 0xeec   : > { %v2373_v5 = vpop.f32.mrf.mxu2 }
 0xf4b   : > { %v2256_v25 = vpop.xlane.xlu2 %2255 }
 0xf4c   : > { %v2257_v26 = vsub.f32 %v2253_v23, %v2256_v25 }
 0xf4e   : > { %v2258_v27 = vmul.f32 1.442695, %v2257_v26 }
 0xf50   : > { %3204 = vpow2.f32 %v2258_v27 }
 0xf56   : > { %v3205_v32 = vpop.eup %3204 }
 0xf57   : > { %v2260_v33 = vsel %vm1967_vm15, %v3205_v32, 0.0 }
 0xf58   : > { %2261 = vadd.xlane.f32.xlu1 %v2260_v33 }
 0xf71   : > { %2144 = vrot.lane.b32.xlu1 %v2139_v19, %s3258_s1  ;;  %s3738_s1 = sld [smem:[#allocation10_spill]] }
 0xf77   : > { %v3087_v12 = vld [vmem:[%s3738_s1 + $0x8] sm:$0xff]  ;;  %v3086_v14 = vld [vmem:[%s3738_s1] sm:$0xff] }
 0xf78   : > { %2460 = vmatpush.bf16.msra.mxu1 %v3087_v12 }
 0xf7c   : > { %2461 = vmatpush.bf16.msra.mxu1 %v3086_v14 }
 0xfcb   : > { %v2262_v43 = vpop.xlane.xlu1 %2261 }
 0xfcc   : > { %3206 = vrcp.f32 %v2262_v43  ;;  %v3169_v43 = vld [vmem:[%s3742_s11] ss:$0 sm:$0xff] }
 0xfd2   : > { %v3207_v45 = vpop.eup %3206 }
 0xfd3   : > { %v2264_v46 = vmul.f32 %v3207_v45, %v3205_v32 }
 0xfd5   : > { %v2265_v47 = vpack.c.bf16 %v2264_v46, %v2264_v46 }
 0xfd7   : > { %2969 = vmatmul.msk.bf16.vlgmr.msra.gmra.mxu3 %vm1967_vm15, %v2265_v47 }
 0xfd8   : > { %2591 = vmatpush.bf16.msra.mxu3 %v3093_v50 }
 0xfe3   : > { %v2145_v51 = vpop.permute.xlu1 %2144 }
 0xfe4   : > { %2147 = vst.msk [vmem:[#allocation2] sm:$0xff] %vm1431_vm7, %v2145_v51  ;;  %v3092_v51 = vld [vmem:[%s3743_s23 + $0x10] sm:$0xff] }
 0xfe5   : > { %2592 = vmatpush.bf16.msra.mxu3 %v3092_v51 }
 0xfe7   : > { %2997 = vmatmul.msk.bf16.vlgmr.msrb.gmra.mxu3 %vm1229_vm5, %v2375_v52  ;;  %v3091_v52 = vld [vmem:[%s3743_s23 + $0x8] sm:$0xff] }
 0xfe9   : > { %2593 = vmatpush.bf16.msra.mxu3 %v3091_v52 }
0x105a   : > { %v2282_v53 = vpop.f32.mrf.mxu3 }
0x1062   : > { %v2284_v54 = vpop.f32.mrf.mxu3 }
0x1063   : > { %v3170_v54 = vld [vmem:[%s3744_s26] ss:$0 sm:$0xff] }
0x106a   : > { %v2392_v57 = vpop.f32.mrf.mxu3 }
0x106b   : > { %v2396_v58 = vmul.f32 0.35355338, %v2392_v57 }
0x106d   : > { %v2397_v44 = vsel %vm1967_vm15, %v2396_v58, -inf }
0x106e   : > { %2398 = vmax.xlane.f32.xlu0 %v2397_v44 }
0x1072   : > { %v2394_v59 = vpop.f32.mrf.mxu3 }
0x1082   : > { %2287 = vrot.lane.b32.xlu0 %v2282_v53, %s3259_s2  ;;  %s3739_s2 = sld [smem:[#allocation11_spill]]  ;;  %v3090_v53 = vld [vmem:[%s3743_s23] sm:$0xff] }
0x1083   : > { %2594 = vmatpush.bf16.msra.mxu3 %v3090_v53 }
0x1088   : > { %v3167_v19 = vld [vmem:[%s3739_s2] ss:$0 sm:$0xff]  ;;  %s1026_s2 = scalar_lea.vmem %s3425_s13, %s3438_s0 }
0x10e1   : > { %v2399_v34 = vpop.xlane.xlu0 %2398 }
0x10e2   : > { %v2400_v60 = vsub.f32 %v2396_v58, %v2399_v34 }
0x10e4   : > { %v2401_v61 = vmul.f32 1.442695, %v2400_v60 }
0x10e6   : > { %3208 = vpow2.f32 %v2401_v61 }
0x10ec   : > { %v3209_v63 = vpop.eup %3208 }
0x10ed   : > { %v2403_v16 = vsel %vm1967_vm15, %v3209_v63, 0.0 }
0x10ee   : > { %2404 = vadd.xlane.f32.xlu2 %v2403_v16 }
0x10f4   : > { %v2288_v4 = vpop.permute.xlu0 %2287 }
0x10f5   : > { %2290 = vst.msk [vmem:[#allocation2] sm:$0xff] %vm1576_vm8, %v2288_v4 }
0x1161   : > { %v2405_v6 = vpop.xlane.xlu2 %2404 }
0x1162   : > { %3210 = vrcp.f32 %v2405_v6 }
0x1168   : > { %v3211_v7 = vpop.eup %3210 }
0x1169   : > { %v2407_v8 = vmul.f32 %v3211_v7, %v3209_v63 }
0x116b   : > { %v2408_v10 = vpack.c.bf16 %v2407_v8, %v2407_v8 }
0x116d   : > { %2998 = vmatmul.msk.bf16.vlgmr.msra.gmra.mxu0 %vm1967_vm15, %v2408_v10 }
0x11ea   : > { %v2425_v13 = vpop.f32.mrf.mxu0 }
0x11eb   : > { %2430 = vrot.lane.b32.xlu2 %v2425_v13, %s3260_s7  ;;  %s3741_s7 = sld [smem:[#allocation12_spill]] }
0x11f1   : > { %v3168_v41 = vld [vmem:[%s3741_s7] ss:$0 sm:$0xff] }
0x11f2   : > { %v2427_v48 = vpop.f32.mrf.mxu0 }
0x1245   : > { %v2431_v15 = vpop.permute.xlu2 %2430 }
0x1246   : > { %2433 = vst.msk [vmem:[#allocation2] sm:$0xff] %vm1721_vm9, %v2431_v15 }
0x124d   : > { %v2434_v17 = vld [vmem:[#allocation2] sm:$0xff] }
0x124e   : > { %v2435_v18 = vpack.c.bf16 %v2434_v17, %v2434_v17 }
0x1250   : > { %3007 = vmatmul.msk.bf16.vlgmr.msra.gmra.mxu1 %vm1032_vm0, %v2435_v18 }
0x12cd   : > { %v2463_v20 = vpop.f32.mrf.mxu1 }
0x12ce   : > { %v2464_v22 = vadd.f32 %v3167_v19, %v2463_v20 }
0x12d0   : > { %v2467_v23 = vadd.f32 %v2464_v22, %v3603_v1 }
0x12d2   : > { %v2470_v21 = vsel %vm1032_vm0, %v2467_v23, 0.0 }
0x12d3   : > { %2471 = vadd.xlane.f32.xlu0 %v2470_v21  ;;  %v3172_v21 = vld [vmem:[%s3415_s20] ss:$0 sm:$0xff] }
0x12d5   : > { %v2465_v39 = vpop.f32.mrf.mxu1 }
0x1346   : > { %v2472_v25 = vpop.xlane.xlu0 %2471 }
0x1347   : > { %v2473_v26 = vmul.f32 %v2472_v25, %v3443_v9  ;;  %v3173_v25 = vld [vmem:[%s3420_s12] ss:$0 sm:$0xff] }
0x1349   : > { %v2474_v27 = vsub.f32 %v2467_v23, %v2473_v26 }
0x134b   : > { %v2475_v28 = vmul.f32 %v2474_v27, %v2474_v27 }
0x134d   : > { %v2476_v29 = vsel %vm1032_vm0, %v2475_v28, 0.0 }
0x134e   : > { %2477 = vadd.xlane.f32.xlu1 %v2476_v29 }
0x13c1   : > { %v2478_v32 = vpop.xlane.xlu1 %2477 }
0x13c2   : > { %v2479_v1 = vmul.f32 %v2478_v32, %v3443_v9 }
0x13c4   : > { %v2480_v33 = vadd.f32 1e-12, %v2479_v1 }
0x13c6   : > { %3212 = vrsqrt.f32 %v2480_v33  ;;  %vm2487_vm2 = vweird.f32 %v2480_v33 }
0x13cc   : > { %v3213_v35 = vpop.eup %3212 }
0x13cd   : > { %v2482_v36 = vmul.f32 %v3213_v35, %v2480_v33  ;;  %vm2488_vm1 = vweird.f32 %v3213_v35 }
0x13ce   : > { %vm2489_vm3 = vmor %vm2487_vm2, %vm2488_vm1 }
0x13cf   : > { %v2483_v11 = vmul.f32 %v3213_v35, %v2482_v36 }
0x13d1   : > { %v2484_v37 = vmul.f32 0.5, %v2483_v11 }
0x13d3   : > { %v2485_v38 = vsub.f32 1.5, %v2484_v37 }
0x13d5   : > { %v2486_v40 = vmul.f32 %v3213_v35, %v2485_v38 }
0x13d7   : > { %v2490_v42 = vsel %vm2489_vm3, %v3213_v35, %v2486_v40 }
0x13d8   : > { %v2491_v45 = vmul.f32 %v2490_v42, %v2474_v27 }
0x13da   : > { %v2495_v46 = vmul.f32 %v3168_v41, %v2491_v45 }
0x13dc   : > { %v2499_v47 = vadd.f32 %v3169_v43, %v2495_v46 }
0x13de   : > { %v2504_v49 = vpack.c.bf16 %v2499_v47, %v2499_v47 }
0x13e0   : > { %3016 = vmatmul.msk.bf16.vlgmr.msra.gmra.mxu2 %vm1032_vm0, %v2504_v49 }
0x1463   : > { %v2533_v55 = vpop.f32.mrf.mxu2 }
0x1464   : > { %v2534_v56 = vadd.f32 %v3170_v54, %v2533_v55 }
0x1466   : > { %v2538_v57 = vmul.f32 0.044715, %v2534_v56  ;;  %v2537_v62 = vmul.f32 0.5, %v2534_v56 }
0x1468   : > { %v2539_v58 = vmul.f32 %v2538_v57, %v2534_v56 }
0x146a   : > { %v2540_v44 = vmul.f32 %v2539_v58, %v2534_v56 }
0x146b   : > { %v2535_v59 = vpop.f32.mrf.mxu2 }
0x146c   : > { %v2541_v34 = vadd.f32 %v2540_v44, %v2534_v56 }
0x146e   : > { %v2542_v60 = vmul.f32 0.7978846, %v2541_v34 }
0x1470   : > { %3214 = vtanh.f32 %v2542_v60 }
0x1476   : > { %v3215_v61 = vpop.eup %3214 }
0x1477   : > { %v2544_v63 = vadd.f32 1.0, %v3215_v61 }
0x1479   : > { %v2545_v16 = vmul.f32 %v2544_v63, %v2537_v62 }
0x147b   : > { %v2554_v0 = vpack.c.bf16 %v2545_v16, %v2545_v16 }
0x147d   : > { %3033 = vmatmul.msk.bf16.vlgmr.msra.gmra.mxu3 %vm2583_vm4, %v2554_v0 }
0x1500   : > { %v2596_v3 = vpop.f32.mrf.mxu3 }
0x1501   : > { %v2597_v24 = vadd.f32 %v3171_v2, %v2596_v3 }
0x1503   : > { %v2600_v4 = vadd.f32 %v2597_v24, %v2499_v47 }
0x1505   : > { %v2603_v5 = vsel %vm1032_vm0, %v2600_v4, 0.0 }
0x1506   : > { %2604 = vadd.xlane.f32.xlu2 %v2603_v5 }
0x1508   : > { %v2598_v6 = vpop.f32.mrf.mxu3 }
0x1579   : > { %v2605_v7 = vpop.xlane.xlu2 %2604 }
0x157a   : > { %v2606_v8 = vmul.f32 %v2605_v7, %v3443_v9 }
0x157c   : > { %v2607_v10 = vsub.f32 %v2600_v4, %v2606_v8 }
0x157e   : > { %v2608_v12 = vmul.f32 %v2607_v10, %v2607_v10 }
0x1580   : > { %v2609_v13 = vsel %vm1032_vm0, %v2608_v12, 0.0  ;;  %vm2634_vm0 = vcmask 257024  }
0x1581   : > { %2610 = vadd.xlane.f32.xlu0 %v2609_v13 }
0x15f4   : > { %v2611_v48 = vpop.xlane.xlu0 %2610 }
0x15f5   : > { %v2612_v14 = vmul.f32 %v2611_v48, %v3443_v9 }
0x15f7   : > { %v2613_v15 = vadd.f32 1e-12, %v2612_v14 }
0x15f9   : > { %3216 = vrsqrt.f32 %v2613_v15  ;;  %vm2620_vm6 = vweird.f32 %v2613_v15 }
0x15ff   : > { %v3217_v17 = vpop.eup %3216 }
0x1600   : > { %v2615_v18 = vmul.f32 %v3217_v17, %v2613_v15  ;;  %vm2621_vm5 = vweird.f32 %v3217_v17 }
0x1601   : > { %vm2622_vm7 = vmor %vm2620_vm6, %vm2621_vm5 }
0x1602   : > { %v2616_v19 = vmul.f32 %v3217_v17, %v2615_v18 }
0x1604   : > { %v2617_v20 = vmul.f32 0.5, %v2616_v19 }
0x1606   : > { %v2618_v22 = vsub.f32 1.5, %v2617_v20 }
0x1608   : > { %v2619_v23 = vmul.f32 %v3217_v17, %v2618_v22 }
0x160a   : > { %v2623_v39 = vsel %vm2622_vm7, %v3217_v17, %v2619_v23 }
0x160b   : > { %v2624_v26 = vmul.f32 %v2623_v39, %v2607_v10 }
0x160d   : > { %v2628_v27 = vmul.f32 %v3172_v21, %v2624_v26 }
0x160f   : > { %v2632_v28 = vadd.f32 %v3173_v25, %v2628_v27 }
0x1611   : > { %v2633_v9 = vpack.c.bf16 %v2632_v28, %v2632_v28 }
0x1613   : > { %2635 = vst.msk [vmem:[%s1026_s2] sm:$0xf] %vm2634_vm0, %v2633_v9 }
0x1614 PF: > { %s75_s22 = sadd.s32 1, %s3224_s22  }
0x1615   : > { %p72_p4 = scmp.ge.s32.totalorder %s75_s22, 4  }
0x1617   :  { %74 = sbr.rel (!%p72_p4) target bundleno = 50 (0x32), region = 219 }

</bundles_post_ra>
